<compile_context>
chip_gen: v7x
topology: tpu7x:2x2x1
jax: 0.10.0
libtpu: 0.0.40
codegen_flags: <defaults>
</compile_context>

<pallas_src>
import functools
import math

import jax
import jax.numpy as jnp
from jax.experimental import pallas as pl
from jax.experimental.pallas import tpu as pltpu

ENC = 256          # GaussianEncoding encoded_size
D_IN = 2 * ENC     # 512 (cat(cos, sin))
D_H = 1024
D_OUT = 512
TN_MAX = 256       # N-tile size for large batches


def _capsule_kernel(sincos_ref, b_ref, w1_ref, b1_ref, w2_ref, b2_ref,
                    w3_ref, b3_ref, w4_ref, b4_ref, out_ref):
    x = sincos_ref[...]          # (TN, 2) f32: x[:, 0]=sin, x[:, 1]=cos
    b = b_ref[0]                 # (2, ENC) f32 random Fourier proj (incl. sigma)

    # RFF projection: contraction dim is only 2 -> do it on the VPU
    # (elementwise f32), avoiding an MXU matmul with a degenerate K dim.
    vp = 2.0 * jnp.pi * (x[:, 0:1] * b[0:1, :] + x[:, 1:2] * b[1:2, :])  # (TN, ENC)
    cos_vp = jnp.cos(vp).astype(jnp.bfloat16)   # EUP transcendental, f32 math
    sin_vp = jnp.sin(vp).astype(jnp.bfloat16)

    # Linear(512 -> 1024) on cat(cos, sin) == cos @ W[:256] + sin @ W[256:].
    # Static, sublane-aligned slices of the bf16 weight tile (no VMEM copy).
    w1 = w1_ref[0]               # (512, 1024) bf16
    h = (jnp.dot(cos_vp, w1[:ENC, :], preferred_element_type=jnp.float32)
         + jnp.dot(sin_vp, w1[ENC:, :], preferred_element_type=jnp.float32)
         + b1_ref[0])
    h = jnp.maximum(h, 0.0)
    h = jnp.maximum(
        jnp.dot(h.astype(jnp.bfloat16), w2_ref[0],
                preferred_element_type=jnp.float32) + b2_ref[0], 0.0)
    h = jnp.maximum(
        jnp.dot(h.astype(jnp.bfloat16), w3_ref[0],
                preferred_element_type=jnp.float32) + b3_ref[0], 0.0)
    h = jnp.maximum(
        jnp.dot(h.astype(jnp.bfloat16), w4_ref[0],
                preferred_element_type=jnp.float32) + b4_ref[0], 0.0)

    out_ref[0] = h               # per-capsule output (summed outside the kernel)


def init_params(sigmas, key):
    """Deterministic synthetic parameters (shapes match the PyTorch module).

    Dense weights stored in bfloat16 (HBM-bandwidth-bound kernel); RFF
    projections and biases stay f32.
    """
    n = len(sigmas)
    ks = jax.random.split(key, 9)
    sig = jnp.asarray(sigmas, jnp.float32)[:, None, None]
    # GaussianEncoding: b ~ N(0, sigma^2), shape (input_size=2, encoded_size=256)
    b = jax.random.normal(ks[0], (n, 2, ENC), jnp.float32) * sig

    def lin(kw, kb, fan_in, fan_out):
        bound = 1.0 / math.sqrt(fan_in)
        w = jax.random.uniform(kw, (n, fan_in, fan_out), jnp.float32, -bound, bound)
        bi = jax.random.uniform(kb, (n, 1, fan_out), jnp.float32, -bound, bound)
        return w.astype(jnp.bfloat16), bi

    w1, b1 = lin(ks[1], ks[2], D_IN, D_H)    # capsule Linear(512, 1024)
    w2, b2 = lin(ks[3], ks[4], D_H, D_H)     # capsule Linear(1024, 1024)
    w3, b3 = lin(ks[5], ks[6], D_H, D_H)     # head    Linear(1024, 1024)
    w4, b4 = lin(ks[7], ks[8], D_H, D_OUT)   # head    Linear(1024, 512)
    return (b, w1, b1, w2, b2, w3, b3, w4, b4)


@functools.partial(jax.jit, static_argnames=())
def rotate_encoder(rotation_deg, params):
    (b, w1, b1, w2, b2, w3, b3, w4, b4) = params
    n = b.shape[0]

    # Glue (matches torch forward): deg2rad, cat(sin, cos).
    rot = jnp.deg2rad(rotation_deg.reshape(-1).astype(jnp.float32))
    sincos = jnp.stack([jnp.sin(rot), jnp.cos(rot)], axis=1)   # (N, 2)
    N = sincos.shape[0]

    # Pad batch to a sublane / tile multiple so output stores are unmasked.
    if N <= TN_MAX:
        tn = ((N + 7) // 8) * 8
        n_pad = tn
    else:
        tn = TN_MAX
        n_pad = ((N + tn - 1) // tn) * tn
    if n_pad != N:
        sincos = jnp.pad(sincos, ((0, n_pad - N), (0, 0)))
    n_tiles = n_pad // tn

    per_capsule = lambda i, j: (i, 0, 0)

    out_caps = pl.pallas_call(
        _capsule_kernel,
        out_shape=jax.ShapeDtypeStruct((n, n_pad, D_OUT), jnp.float32),
        grid_spec=pltpu.PrefetchScalarGridSpec(
            num_scalar_prefetch=0,
            grid=(n, n_tiles),
            in_specs=[
                pl.BlockSpec((tn, 2), lambda i, j: (j, 0)),    # sin/cos tile (f32)
                pl.BlockSpec((1, 2, ENC), per_capsule),        # RFF projection (f32)
                pl.BlockSpec((1, D_IN, D_H), per_capsule),     # w1 (bf16, sliced in-kernel)
                pl.BlockSpec((1, 1, D_H), per_capsule),        # b1 (f32)
                pl.BlockSpec((1, D_H, D_H), per_capsule),      # w2 (bf16)
                pl.BlockSpec((1, 1, D_H), per_capsule),        # b2
                pl.BlockSpec((1, D_H, D_H), per_capsule),      # w3 (bf16)
                pl.BlockSpec((1, 1, D_H), per_capsule),        # b3
                pl.BlockSpec((1, D_H, D_OUT), per_capsule),    # w4 (bf16)
                pl.BlockSpec((1, 1, D_OUT), per_capsule),      # b4
            ],
            out_specs=pl.BlockSpec((1, tn, D_OUT), lambda i, j: (i, j, 0)),
        ),
        compiler_params=pltpu.CompilerParams(
            # Capsules and N-tiles are independent -> both parallel (capsules
            # shard across the two TensorCores on v7x; no-op on v5e/v6e).
            dimension_semantics=("parallel", "parallel"),
            vmem_limit_bytes=32 * 1024 * 1024,
        ),
    )(sincos, b, w1, b1, w2, b2, w3, b3, w4, b4)

    # Tiny (n, N, 512) f32 reduction over capsules, done outside the kernel.
    return jnp.sum(out_caps, axis=0)[:N]


def reference(rotation_deg, params):
    """Pure-JAX reference of the PyTorch forward (f32 math, same stored weights)."""
    (b, w1, b1, w2, b2, w3, b3, w4, b4) = params
    rot = jnp.deg2rad(rotation_deg.reshape(-1, 1).astype(jnp.float32))
    sincos = jnp.concatenate([jnp.sin(rot), jnp.cos(rot)], axis=1)   # (N, 2)
    out = jnp.zeros((sincos.shape[0], D_OUT), jnp.float32)
    for i in range(b.shape[0]):
        vp = 2.0 * jnp.pi * (sincos[:, 0:1] * b[i, 0:1, :]
                             + sincos[:, 1:2] * b[i, 1:2, :])
        enc = jnp.concatenate([jnp.cos(vp), jnp.sin(vp)], axis=1)    # (N, 512)
        h = jax.nn.relu(enc @ w1[i].astype(jnp.float32) + b1[i])
        h = jax.nn.relu(h @ w2[i].astype(jnp.float32) + b2[i])
        h = jax.nn.relu(h @ w3[i].astype(jnp.float32) + b3[i])
        h = jax.nn.relu(h @ w4[i].astype(jnp.float32) + b4[i])
        out = out + h
    return out


if __name__ == "__main__":
    key = jax.random.PRNGKey(0)
    kp, kx = jax.random.split(key)

    sigmas = [2 ** 0, 2 ** 4, 2 ** 8]
    params = init_params(sigmas, kp)

    # Small batch of rotation angles in degrees.
    rotation = jax.random.uniform(kx, (8,), jnp.float32, 0.0, 360.0)

    out = jax.block_until_ready(rotate_encoder(rotation, params))
    ref = reference(rotation, params)

    assert out.shape == (8, D_OUT), out.shape
    assert bool(jnp.all(jnp.isfinite(out)))
    assert jnp.allclose(out, ref, rtol=5e-2, atol=5e-2), float(
        jnp.max(jnp.abs(out - ref)))
    print("KERNEL_OK")
</pallas_src>

<mosaic_0001>
module attributes {stable_mosaic.version = 11 : i64} {
  func.func @_capsule_kernel(%arg0: i32, %arg1: i32, %arg2: memref<8x2xf32, #tpu.memory_space<vmem>>, %arg3: memref<1x2x256xf32, #tpu.memory_space<vmem>>, %arg4: memref<1x512x1024xbf16, #tpu.memory_space<vmem>>, %arg5: memref<1x1x1024xf32, #tpu.memory_space<vmem>>, %arg6: memref<1x1024x1024xbf16, #tpu.memory_space<vmem>>, %arg7: memref<1x1x1024xf32, #tpu.memory_space<vmem>>, %arg8: memref<1x1024x1024xbf16, #tpu.memory_space<vmem>>, %arg9: memref<1x1x1024xf32, #tpu.memory_space<vmem>>, %arg10: memref<1x1024x512xbf16, #tpu.memory_space<vmem>>, %arg11: memref<1x1x512xf32, #tpu.memory_space<vmem>>, %arg12: memref<1x8x512xf32, #tpu.memory_space<vmem>>) attributes {dimension_semantics = [#tpu.dimension_semantics<parallel>, #tpu.dimension_semantics<parallel>], iteration_bounds = array<i64: 3, 1>, scalar_prefetch = 0 : i64, scratch_operands = 0 : i64, tpu.core_type = #tpu.core_type<tc>, window_params = [{transform_indices = @transform_0, window_bounds = array<i64: 8, 2>}, {transform_indices = @transform_1, window_bounds = array<i64: 1, 2, 256>}, {transform_indices = @transform_2, window_bounds = array<i64: 1, 512, 1024>}, {transform_indices = @transform_3, window_bounds = array<i64: 1, 1, 1024>}, {transform_indices = @transform_4, window_bounds = array<i64: 1, 1024, 1024>}, {transform_indices = @transform_5, window_bounds = array<i64: 1, 1, 1024>}, {transform_indices = @transform_6, window_bounds = array<i64: 1, 1024, 1024>}, {transform_indices = @transform_7, window_bounds = array<i64: 1, 1, 1024>}, {transform_indices = @transform_8, window_bounds = array<i64: 1, 1024, 512>}, {transform_indices = @transform_9, window_bounds = array<i64: 1, 1, 512>}, {transform_indices = @transform_10, window_bounds = array<i64: 1, 8, 512>}]} {
    %c0 = arith.constant 0 : index
    %c0_0 = arith.constant 0 : index
    %0 = vector.load %arg2[%c0, %c0_0] : memref<8x2xf32, #tpu.memory_space<vmem>>, vector<8x2xf32>
    %c0_1 = arith.constant 0 : index
    %c0_2 = arith.constant 0 : index
    %c0_3 = arith.constant 0 : index
    %1 = vector.load %arg3[%c0_1, %c0_2, %c0_3] : memref<1x2x256xf32, #tpu.memory_space<vmem>>, vector<1x2x256xf32>
    %2 = vector.shape_cast %1 : vector<1x2x256xf32> to vector<2x256xf32>
    %3 = vector.extract_strided_slice %0 {offsets = [0, 0], sizes = [8, 1], strides = [1, 1]} : vector<8x2xf32> to vector<8x1xf32>
    %4 = vector.extract_strided_slice %2 {offsets = [0, 0], sizes = [1, 256], strides = [1, 1]} : vector<2x256xf32> to vector<1x256xf32>
    %5 = vector.broadcast %3 : vector<8x1xf32> to vector<8x256xf32>
    %6 = vector.broadcast %4 : vector<1x256xf32> to vector<8x256xf32>
    %7 = arith.mulf %5, %6 : vector<8x256xf32>
    %8 = vector.extract_strided_slice %0 {offsets = [0, 1], sizes = [8, 1], strides = [1, 1]} : vector<8x2xf32> to vector<8x1xf32>
    %9 = vector.extract_strided_slice %2 {offsets = [1, 0], sizes = [1, 256], strides = [1, 1]} : vector<2x256xf32> to vector<1x256xf32>
    %10 = vector.broadcast %8 : vector<8x1xf32> to vector<8x256xf32>
    %11 = vector.broadcast %9 : vector<1x256xf32> to vector<8x256xf32>
    %12 = arith.mulf %10, %11 : vector<8x256xf32>
    %13 = arith.addf %7, %12 : vector<8x256xf32>
    %cst = arith.constant 6.28318548 : f32
    %14 = vector.broadcast %cst : f32 to vector<8x256xf32>
    %15 = arith.mulf %14, %13 : vector<8x256xf32>
    %16 = math.cos %15 : vector<8x256xf32>
    %17 = arith.truncf %16 : vector<8x256xf32> to vector<8x256xbf16>
    %18 = math.sin %15 : vector<8x256xf32>
    %19 = arith.truncf %18 : vector<8x256xf32> to vector<8x256xbf16>
    %c0_4 = arith.constant 0 : index
    %c0_5 = arith.constant 0 : index
    %c0_6 = arith.constant 0 : index
    %20 = vector.load %arg4[%c0_4, %c0_5, %c0_6] : memref<1x512x1024xbf16, #tpu.memory_space<vmem>>, vector<1x512x1024xbf16>
    %21 = vector.shape_cast %20 : vector<1x512x1024xbf16> to vector<512x1024xbf16>
    %22 = vector.extract_strided_slice %21 {offsets = [0, 0], sizes = [256, 1024], strides = [1, 1]} : vector<512x1024xbf16> to vector<256x1024xbf16>
    %cst_7 = arith.constant dense<0.000000e+00> : vector<8x1024xf32>
    %23 = tpu.matmul %17, %22, %cst_7 {dimension_numbers = #tpu.dot_dimension_numbers<[1], [0], [0], [1], [0, 0, 1, 1], [], []>} : vector<8x256xbf16>, vector<256x1024xbf16>, vector<8x1024xf32> -> vector<8x1024xf32>
    %24 = vector.extract_strided_slice %21 {offsets = [256, 0], sizes = [256, 1024], strides = [1, 1]} : vector<512x1024xbf16> to vector<256x1024xbf16>
    %cst_8 = arith.constant dense<0.000000e+00> : vector<8x1024xf32>
    %25 = tpu.matmul %19, %24, %cst_8 {dimension_numbers = #tpu.dot_dimension_numbers<[1], [0], [0], [1], [0, 0, 1, 1], [], []>} : vector<8x256xbf16>, vector<256x1024xbf16>, vector<8x1024xf32> -> vector<8x1024xf32>
    %26 = arith.addf %23, %25 : vector<8x1024xf32>
    %c0_9 = arith.constant 0 : index
    %c0_10 = arith.constant 0 : index
    %c0_11 = arith.constant 0 : index
    %27 = vector.load %arg5[%c0_9, %c0_10, %c0_11] : memref<1x1x1024xf32, #tpu.memory_space<vmem>>, vector<1x1x1024xf32>
    %28 = vector.shape_cast %27 : vector<1x1x1024xf32> to vector<1x1024xf32>
    %29 = vector.broadcast %28 : vector<1x1024xf32> to vector<8x1024xf32>
    %30 = arith.addf %26, %29 : vector<8x1024xf32>
    %cst_12 = arith.constant 0.000000e+00 : f32
    %31 = vector.broadcast %cst_12 : f32 to vector<8x1024xf32>
    %32 = arith.maximumf %30, %31 : vector<8x1024xf32>
    %33 = arith.truncf %32 : vector<8x1024xf32> to vector<8x1024xbf16>
    %c0_13 = arith.constant 0 : index
    %c0_14 = arith.constant 0 : index
    %c0_15 = arith.constant 0 : index
    %34 = vector.load %arg6[%c0_13, %c0_14, %c0_15] : memref<1x1024x1024xbf16, #tpu.memory_space<vmem>>, vector<1x1024x1024xbf16>
    %35 = vector.shape_cast %34 : vector<1x1024x1024xbf16> to vector<1024x1024xbf16>
    %cst_16 = arith.constant dense<0.000000e+00> : vector<8x1024xf32>
    %36 = tpu.matmul %33, %35, %cst_16 {dimension_numbers = #tpu.dot_dimension_numbers<[1], [0], [0], [1], [0, 0, 1, 1], [], []>} : vector<8x1024xbf16>, vector<1024x1024xbf16>, vector<8x1024xf32> -> vector<8x1024xf32>
    %c0_17 = arith.constant 0 : index
    %c0_18 = arith.constant 0 : index
    %c0_19 = arith.constant 0 : index
    %37 = vector.load %arg7[%c0_17, %c0_18, %c0_19] : memref<1x1x1024xf32, #tpu.memory_space<vmem>>, vector<1x1x1024xf32>
    %38 = vector.shape_cast %37 : vector<1x1x1024xf32> to vector<1x1024xf32>
    %39 = vector.broadcast %38 : vector<1x1024xf32> to vector<8x1024xf32>
    %40 = arith.addf %36, %39 : vector<8x1024xf32>
    %cst_20 = arith.constant 0.000000e+00 : f32
    %41 = vector.broadcast %cst_20 : f32 to vector<8x1024xf32>
    %42 = arith.maximumf %40, %41 : vector<8x1024xf32>
    %43 = arith.truncf %42 : vector<8x1024xf32> to vector<8x1024xbf16>
    %c0_21 = arith.constant 0 : index
    %c0_22 = arith.constant 0 : index
    %c0_23 = arith.constant 0 : index
    %44 = vector.load %arg8[%c0_21, %c0_22, %c0_23] : memref<1x1024x1024xbf16, #tpu.memory_space<vmem>>, vector<1x1024x1024xbf16>
    %45 = vector.shape_cast %44 : vector<1x1024x1024xbf16> to vector<1024x1024xbf16>
    %cst_24 = arith.constant dense<0.000000e+00> : vector<8x1024xf32>
    %46 = tpu.matmul %43, %45, %cst_24 {dimension_numbers = #tpu.dot_dimension_numbers<[1], [0], [0], [1], [0, 0, 1, 1], [], []>} : vector<8x1024xbf16>, vector<1024x1024xbf16>, vector<8x1024xf32> -> vector<8x1024xf32>
    %c0_25 = arith.constant 0 : index
    %c0_26 = arith.constant 0 : index
    %c0_27 = arith.constant 0 : index
    %47 = vector.load %arg9[%c0_25, %c0_26, %c0_27] : memref<1x1x1024xf32, #tpu.memory_space<vmem>>, vector<1x1x1024xf32>
    %48 = vector.shape_cast %47 : vector<1x1x1024xf32> to vector<1x1024xf32>
    %49 = vector.broadcast %48 : vector<1x1024xf32> to vector<8x1024xf32>
    %50 = arith.addf %46, %49 : vector<8x1024xf32>
    %cst_28 = arith.constant 0.000000e+00 : f32
    %51 = vector.broadcast %cst_28 : f32 to vector<8x1024xf32>
    %52 = arith.maximumf %50, %51 : vector<8x1024xf32>
    %53 = arith.truncf %52 : vector<8x1024xf32> to vector<8x1024xbf16>
    %c0_29 = arith.constant 0 : index
    %c0_30 = arith.constant 0 : index
    %c0_31 = arith.constant 0 : index
    %54 = vector.load %arg10[%c0_29, %c0_30, %c0_31] : memref<1x1024x512xbf16, #tpu.memory_space<vmem>>, vector<1x1024x512xbf16>
    %55 = vector.shape_cast %54 : vector<1x1024x512xbf16> to vector<1024x512xbf16>
    %cst_32 = arith.constant dense<0.000000e+00> : vector<8x512xf32>
    %56 = tpu.matmul %53, %55, %cst_32 {dimension_numbers = #tpu.dot_dimension_numbers<[1], [0], [0], [1], [0, 0, 1, 1], [], []>} : vector<8x1024xbf16>, vector<1024x512xbf16>, vector<8x512xf32> -> vector<8x512xf32>
    %c0_33 = arith.constant 0 : index
    %c0_34 = arith.constant 0 : index
    %c0_35 = arith.constant 0 : index
    %57 = vector.load %arg11[%c0_33, %c0_34, %c0_35] : memref<1x1x512xf32, #tpu.memory_space<vmem>>, vector<1x1x512xf32>
    %58 = vector.shape_cast %57 : vector<1x1x512xf32> to vector<1x512xf32>
    %59 = vector.broadcast %58 : vector<1x512xf32> to vector<8x512xf32>
    %60 = arith.addf %56, %59 : vector<8x512xf32>
    %cst_36 = arith.constant 0.000000e+00 : f32
    %61 = vector.broadcast %cst_36 : f32 to vector<8x512xf32>
    %62 = arith.maximumf %60, %61 : vector<8x512xf32>
    %c0_37 = arith.constant 0 : index
    %c0_38 = arith.constant 0 : index
    %c0_39 = arith.constant 0 : index
    %63 = vector.load %arg12[%c0_37, %c0_38, %c0_39] : memref<1x8x512xf32, #tpu.memory_space<vmem>>, vector<1x8x512xf32>
    %64 = vector.shape_cast %63 : vector<1x8x512xf32> to vector<8x512xf32>
    %65 = vector.shape_cast %62 : vector<8x512xf32> to vector<1x8x512xf32>
    tpu.vector_store %arg12[%c0_37, %c0_38, %c0_39], %65 {strides = array<i32>} : memref<1x8x512xf32, #tpu.memory_space<vmem>>, vector<1x8x512xf32>,
    return
  }
  func.func @transform_0(%arg0: i32, %arg1: i32) -> (i32, i32) {
    %c0_i32 = arith.constant 0 : i32
    %c0_i32_0 = arith.constant 0 : i32
    return %arg1, %c0_i32 : i32, i32
  }
  func.func @transform_1(%arg0: i32, %arg1: i32) -> (i32, i32, i32) {
    %c0_i32 = arith.constant 0 : i32
    %c0_i32_0 = arith.constant 0 : i32
    %c0_i32_1 = arith.constant 0 : i32
    return %arg0, %c0_i32, %c0_i32_0 : i32, i32, i32
  }
  func.func @transform_2(%arg0: i32, %arg1: i32) -> (i32, i32, i32) {
    %c0_i32 = arith.constant 0 : i32
    %c0_i32_0 = arith.constant 0 : i32
    %c0_i32_1 = arith.constant 0 : i32
    return %arg0, %c0_i32, %c0_i32_0 : i32, i32, i32
  }
  func.func @transform_3(%arg0: i32, %arg1: i32) -> (i32, i32, i32) {
    %c0_i32 = arith.constant 0 : i32
    %c0_i32_0 = arith.constant 0 : i32
    %c0_i32_1 = arith.constant 0 : i32
    return %arg0, %c0_i32, %c0_i32_0 : i32, i32, i32
  }
  func.func @transform_4(%arg0: i32, %arg1: i32) -> (i32, i32, i32) {
    %c0_i32 = arith.constant 0 : i32
    %c0_i32_0 = arith.constant 0 : i32
    %c0_i32_1 = arith.constant 0 : i32
    return %arg0, %c0_i32, %c0_i32_0 : i32, i32, i32
  }
  func.func @transform_5(%arg0: i32, %arg1: i32) -> (i32, i32, i32) {
    %c0_i32 = arith.constant 0 : i32
    %c0_i32_0 = arith.constant 0 : i32
    %c0_i32_1 = arith.constant 0 : i32
    return %arg0, %c0_i32, %c0_i32_0 : i32, i32, i32
  }
  func.func @transform_6(%arg0: i32, %arg1: i32) -> (i32, i32, i32) {
    %c0_i32 = arith.constant 0 : i32
    %c0_i32_0 = arith.constant 0 : i32
    %c0_i32_1 = arith.constant 0 : i32
    return %arg0, %c0_i32, %c0_i32_0 : i32, i32, i32
  }
  func.func @transform_7(%arg0: i32, %arg1: i32) -> (i32, i32, i32) {
    %c0_i32 = arith.constant 0 : i32
    %c0_i32_0 = arith.constant 0 : i32
    %c0_i32_1 = arith.constant 0 : i32
    return %arg0, %c0_i32, %c0_i32_0 : i32, i32, i32
  }
  func.func @transform_8(%arg0: i32, %arg1: i32) -> (i32, i32, i32) {
    %c0_i32 = arith.constant 0 : i32
    %c0_i32_0 = arith.constant 0 : i32
    %c0_i32_1 = arith.constant 0 : i32
    return %arg0, %c0_i32, %c0_i32_0 : i32, i32, i32
  }
  func.func @transform_9(%arg0: i32, %arg1: i32) -> (i32, i32, i32) {
    %c0_i32 = arith.constant 0 : i32
    %c0_i32_0 = arith.constant 0 : i32
    %c0_i32_1 = arith.constant 0 : i32
    return %arg0, %c0_i32, %c0_i32_0 : i32, i32, i32
  }
  func.func @transform_10(%arg0: i32, %arg1: i32) -> (i32, i32, i32) {
    %c0_i32 = arith.constant 0 : i32
    %c0_i32_0 = arith.constant 0 : i32
    return %arg0, %arg1, %c0_i32 : i32, i32, i32
  }
}

</mosaic_0001>

<bundles_post_ra>
// kernel: rotate_encoder.1
= control target key start
LH: loop header
LB: loop body
LE: loop exit
PB: predicated region body
PF: predicated region fallthrough
CT: control target
= control target key end

     0   :  { %s17934_s0 = inlined_call_operand.vmem [shape: f32[8,2], index: 0, kind: input, shape index: {}]   ;;  %s17935_s1 = inlined_call_operand.hbm [shape: f32[3,2,256], index: 1, kind: input, shape index: {}]   ;;  %s17936_s2 = inlined_call_operand.hbm [shape: bf16[3,512,1024], index: 2, kind: input, shape index: {}]   ;;  %s17937_s3 = inlined_call_operand.hbm [shape: f32[3,1,1024], index: 3, kind: input, shape index: {}]   ;;  %s17938_s4 = inlined_call_operand.hbm [shape: bf16[3,1024,1024], index: 4, kind: input, shape index: {}]   ;;  %s17939_s5 = inlined_call_operand.hbm [shape: f32[3,1,1024], index: 5, kind: input, shape index: {}]   ;;  %s17940_s6 = inlined_call_operand.hbm [shape: bf16[3,1024,1024], index: 6, kind: input, shape index: {}]   ;;  %s17941_s7 = inlined_call_operand.hbm [shape: f32[3,1,1024], index: 7, kind: input, shape index: {}]   ;;  %s17942_s8 = inlined_call_operand.hbm [shape: bf16[3,1024,512], index: 8, kind: input, shape index: {}]   ;;  %s17943_s9 = inlined_call_operand.hbm [shape: f32[3,1,512], index: 9, kind: input, shape index: {}]   ;;  %s17944_s10 = inlined_call_operand.vmem [shape: f32[3,8,512], index: 10, kind: output, shape index: {}]  }
   0x1   :  { %17963 = sst [smem:[#allocation25_spill]] %s17935_s1 }
   0x2   :  { %17964 = sst [smem:[#allocation26_spill]] %s17936_s2 }
   0x3   :  { %17965 = sst [smem:[#allocation27_spill]] %s17937_s3 }
   0x4   :  { %17966 = sst [smem:[#allocation28_spill]] %s17938_s4 }
   0x5   :  { %17967 = sst [smem:[#allocation29_spill]] %s17940_s6 }
   0x6   :  { %17968 = sst [smem:[#allocation30_spill]] %s17942_s8 }
   0x7   :  { %17969 = sst [smem:[#allocation31_spill]] %s17944_s10 }
   0x8   :  { %15 = vsyncpa [#allocation3], 0 }
   0x9   :  { %17 = vsyncpa [#allocation3 + $0x1], 0 }
   0xa   :  { %18 = vsyncpa [#allocation5], 0 }
   0xb   :  { %20 = vsyncpa [#allocation5 + $0x1], 0 }
   0xc   :  { %21 = vsyncpa [#allocation8], 0 }
   0xd   :  { %23 = vsyncpa [#allocation8 + $0x1], 0 }
   0xe   :  { %24 = vsyncpa [#allocation11], 0 }
   0xf   :  { %26 = vsyncpa [#allocation11 + $0x1], 0 }
  0x10   :  { %27 = vsyncpa [#allocation14], 0 }
  0x11   :  { %29 = vsyncpa [#allocation14 + $0x1], 0  ;;  %s15543_s13 = smov 0   ;;  %s15545_s14 = smov 0  }
  0x12   :  { %s15547_s15 = smov 0   ;;  %s15549_s16 = smov 0  }
  0x13   :  { %s15551_s17 = smov 0   ;;  %s15553_s18 = smov 0  }
  0x14 LB: > { %17970 = sst [smem:[#allocation21_spill]] %s15453_s15  ;;  %s17945_s19 = sadd.s32 4294967295, %s15465_s18   ;;  %s15465_s18 = sphi %s15553_s18, %s35_s18   ;;  %s15461_s17 = sphi %s15551_s17, %s18010_s17   ;;  %s15457_s16 = sphi %s15549_s16, %s18009_s16   ;;  %s15453_s15 = sphi %s15547_s15, %s18005_s15   ;;  %s15449_s14 = sphi %s15545_s14, %s18008_s14   ;;  %s15445_s13 = sphi %s15543_s13, %s18007_s13  }
  0x15   : > { %17971 = sst [smem:[#allocation22_spill]] %s15457_s16  ;;  %s47_s20 = sadd.s32 1, %s15461_s17 }
  0x16   : > { %p49_p0 = scmp.ge.s32.totalorder %s47_s20, 3  ;;  %s80_s21 = sadd.s32 1, %s15453_s15 }
  0x17   : > { %p87_p1 = scmp.ne.s32.totalorder %s15453_s15, %s15449_s14  ;;  %p88_p2 = scmp.eq.s32.totalorder %s15465_s18, 0 }
  0x18   : > { %s18012_s20 = smov (%p49_p0, %s47_s20), 0  ;;  %p93_p4 = scmp.ne.s32.totalorder %s15449_s14, %s15445_s13 }
  0x19   : > { %17972 = sst [smem:[#allocation23_spill]] %s18012_s20  ;;  %p89_p3 = por %p88_p2, %p87_p1 }
  0x1a   : > { %s77_s22 = ssub.s32 %s15461_s17, %s18012_s20  ;;  %p94_p5 = scmp.eq.s32.totalorder %s17945_s19, 0 }
  0x1b   : > { %p78_p6 = scmp.eq.s32.totalorder %s77_s22, 0  ;;  %p14671_p8 = scmp.lt.s32.totalorder %s15465_s18, 3 }
  0x1c   : > { %p15584_p7 = por %p94_p5, %p93_p4  ;;  %s15593_s25 = sand.u32 1, %s15453_s15  }
  0x1d   : > { %s15590_s24 = scalar_select %p78_p6, %s15453_s15, %s80_s21  }
  0x1e   : > { %s17973_s23 = scalar_select %p15584_p7, 1, 0 }
  0x1f   : > { %17974 = sst [smem:[#allocation24_spill]] %s15590_s24  ;;  %p15595_p9 = pnand %p14671_p8, %p89_p3 }
  0x20   : > { %s15600_s27 = sand.u32 1, %s15465_s18   ;;  %s17947_s28 = sshll.u32 %s15593_s25, 11 }
  0x21   : > { %s17975_s26 = scalar_select %p15595_p9, 1, 0 }
  0x22   : > { %s17948_s29 = sshll.u32 %s15461_s17, 15  ;;  %s17976_s2 = sld [smem:[#allocation26_spill]] }
  0x23   : > { %s383_s13 = scalar_lea.vmem [#allocation4], %s17947_s28  ;;  %p15621_p12 = pneg %p15595_p9 }
  0x24   : > { %s390_s21 = sshll.u32 %s383_s13, 4  ;;  %s15613_s21 = int_to_ptr.vmem [resolvable:$true] %s390_s21 }
  0x28   : > { %s15609_s12 = scalar_lea.hbm %s17976_s2, %s17948_s29  ;;  %s15134_s28 = scalar_lea.hbm %s17976_s2, 98304 }
  0x29   : > { %s15129_s19 = scalar_lea.hbm %s15609_s12, 32768  ;;  %p15135_p1 = scmp.lt.u32.totalorder %s15609_s12, %s17976_s2 }
  0x2a   : > { %p15130_p11 = scmp.ne.s32.totalorder %s15609_s12, %s15129_s19  ;;  %p15136_p2 = scmp.lt.u32.totalorder %s15134_s28, %s15129_s19 }
  0x2b   : > { %p15138_p4 = scmp.lt.u32.totalorder %s15129_s19, %s15609_s12 }
  0x2c   : > { %p15132_p13 = pnand %p15621_p12, %p15130_p11  ;;  %p15137_p3 = por %p15136_p2, %p15135_p1 }
  0x2e   : > { %p15133_p0 = pneg %p15132_p13  ;;  %p15139_p5 = por %p15138_p4, %p15137_p3 }
  0x30   : > { %p15140_p6 = pnand %p15139_p5, %p15133_p0 }
  0x32   : > { %15143 = shalt.err (!%p15140_p6)
}
  0x33   : > { %s15144_s22 = scalar_lea.vmem %s15613_s21, 32768  ;;  %s15467_s30 = smov [#allocation4]  }
  0x34   : > { %p15145_p8 = scmp.ne.s32.totalorder %s15613_s21, %s15144_s22  ;;  %s15149_s11 = sshll.u32 %s15467_s30, 4  ;;  %s15150_s11 = int_to_ptr.vmem [resolvable:$false] %s15149_s11 }
  0x35   : > { %s15151_s29 = scalar_lea.vmem %s15150_s11, 65536  ;;  %p15152_p10 = scmp.lt.s32.totalorder %s15613_s21, %s15150_s11 }
  0x36   : > { %p15147_p11 = pnand %p15145_p8, %p15621_p12  ;;  %p15153_p7 = scmp.lt.s32.totalorder %s15151_s29, %s15144_s22 }
  0x38   : > { %p15148_p13 = pneg %p15147_p11  ;;  %p15154_p1 = por %p15153_p7, %p15152_p10 }
  0x3a   : > { %p15155_p2 = pnand %p15154_p1, %p15148_p13 }
  0x3c   : > { %15158 = shalt.err (!%p15155_p2)
}
  0x3d   : > { %s17950_s19 = smov 512   ;;  %s17952_s28 = smov 32  }
  0x3e   : > { %s17978_s22 = scalar_lea.sflag [#allocation5], %s15600_s27  ;;  %p537_p7 = scmp.lt.s32.totalorder %s15465_s18, 4 }
  0x3f   : > { %14649 = dma.hbm_to_vmem [thread:$0]  (!%p15595_p9), %s15609_s12, 32768, %s15613_s21, %s17978_s22, %s17950_s19, %s17950_s19, %s17952_s28  }
  0x40   : > { %s12883_s13 = sshll.u32 %s15593_s25, 12  ;;  %s17955_s30 = sshll.u32 %s15461_s17, 16 }
  0x41   : > { %p17979_p10 = scmp.ge.s32.totalorder %s15465_s18, 1  ;;  %s17981_s4 = sld [smem:[#allocation28_spill]] }
  0x42   : > { %s423_s12 = scalar_lea.vmem [#allocation7], %s12883_s13  ;;  %s17957_s22 = scalar_lea.sflag [#allocation8], %s15600_s27 }
  0x43   : > { %p15654_p0 = pnand %p17979_p10, %p537_p7  ;;  %s430_s21 = sshll.u32 %s423_s12, 4  ;;  %s15667_s21 = int_to_ptr.vmem [resolvable:$true] %s430_s21 }
  0x45   : > { %s17980_s11 = scalar_select %p15654_p0, 1, 0 }
  0x47   : > { %s15663_s24 = scalar_lea.hbm %s17981_s4, %s17955_s30  ;;  %s15164_s2 = scalar_lea.hbm %s17981_s4, 196608 }
  0x48   : > { %s15159_s19 = scalar_lea.hbm %s15663_s24, 65536  ;;  %p15165_p6 = scmp.lt.u32.totalorder %s15663_s24, %s17981_s4 }
  0x49   : > { %p15160_p3 = scmp.ne.s32.totalorder %s15663_s24, %s15159_s19  ;;  %p15166_p8 = scmp.lt.u32.totalorder %s15164_s2, %s15159_s19 }
  0x4a   : > { %p15168_p13 = scmp.lt.u32.totalorder %s15159_s19, %s15663_s24 }
  0x4b   : > { %p15162_p4 = pnand %p15160_p3, %p15621_p12  ;;  %p15167_p11 = por %p15166_p8, %p15165_p6 }
  0x4d   : > { %p15163_p5 = pneg %p15162_p4  ;;  %p15169_p1 = por %p15168_p13, %p15167_p11 }
  0x4f   : > { %p15170_p2 = pnand %p15169_p1, %p15163_p5 }
  0x51   : > { %15173 = shalt.err (!%p15170_p2)
}
  0x52   : > { %s15174_s12 = scalar_lea.vmem %s15667_s21, 65536  ;;  %s15470_s15 = smov [#allocation7]  }
  0x53   : > { %p15175_p7 = scmp.ne.s32.totalorder %s15667_s21, %s15174_s12  ;;  %s15179_s28 = sshll.u32 %s15470_s15, 4  ;;  %s15180_s28 = int_to_ptr.vmem [resolvable:$false] %s15179_s28 }
  0x54   : > { %s15181_s30 = scalar_lea.vmem %s15180_s28, 131072  ;;  %p15182_p4 = scmp.lt.s32.totalorder %s15667_s21, %s15180_s28 }
  0x55   : > { %p15177_p10 = pnand %p15175_p7, %p15621_p12  ;;  %p15183_p0 = scmp.lt.s32.totalorder %s15181_s30, %s15174_s12 }
  0x57   : > { %p15178_p3 = pneg %p15177_p10  ;;  %p15184_p6 = por %p15183_p0, %p15182_p4 }
  0x59   : > { %p15185_p8 = pnand %p15184_p6, %p15178_p3 }
  0x5b   : > { %15188 = shalt.err (!%p15185_p8)
}
  0x5c   : > { %s17982_s19 = smov 32   ;;  %s17983_s2 = smov 512  }
  0x5d   : > { %14655 = dma.hbm_to_vmem [thread:$0]  (!%p15595_p9), %s15663_s24, 65536, %s15667_s21, %s17957_s22, %s17983_s2, %s17983_s2, %s17982_s19  }
  0x5e   : > { %s17984_s29 = sshll.u32 %s15461_s17, 16  ;;  %s17985_s6 = sld [smem:[#allocation29_spill]] }
  0x5f   : > { %s463_s30 = scalar_lea.vmem [#allocation10], %s12883_s13  ;;  %s17958_s10 = scalar_lea.sflag [#allocation11], %s15600_s27 }
  0x60   : > { %s470_s4 = sshll.u32 %s463_s30, 4  ;;  %s15705_s4 = int_to_ptr.vmem [resolvable:$true] %s470_s4 }
  0x64   : > { %s15701_s28 = scalar_lea.hbm %s17985_s6, %s17984_s29  ;;  %s15194_s29 = scalar_lea.hbm %s17985_s6, 196608 }
  0x65   : > { %s15189_s16 = scalar_lea.hbm %s15701_s28, 65536  ;;  %p15195_p13 = scmp.lt.u32.totalorder %s15701_s28, %s17985_s6 }
  0x66   : > { %p15190_p0 = scmp.ne.s32.totalorder %s15701_s28, %s15189_s16  ;;  %p15196_p1 = scmp.lt.u32.totalorder %s15194_s29, %s15189_s16 }
  0x67   : > { %p15198_p7 = scmp.lt.u32.totalorder %s15189_s16, %s15701_s28 }
  0x68   : > { %p15192_p5 = pnand %p15190_p0, %p15621_p12  ;;  %p15197_p2 = por %p15196_p1, %p15195_p13 }
  0x6a   : > { %p15193_p11 = pneg %p15192_p5  ;;  %p15199_p10 = por %p15198_p7, %p15197_p2 }
  0x6c   : > { %p15200_p3 = pnand %p15199_p10, %p15193_p11 }
  0x6e   : > { %15203 = shalt.err (!%p15200_p3)
}
  0x6f   : > { %s15204_s13 = scalar_lea.vmem %s15705_s4, 65536  ;;  %s15471_s30 = smov [#allocation10]  }
  0x70   : > { %p15205_p4 = scmp.ne.s32.totalorder %s15705_s4, %s15204_s13  ;;  %s15209_s24 = sshll.u32 %s15471_s30, 4  ;;  %s15210_s24 = int_to_ptr.vmem [resolvable:$false] %s15209_s24 }
  0x71   : > { %s15211_s21 = scalar_lea.vmem %s15210_s24, 131072  ;;  %p15212_p0 = scmp.lt.s32.totalorder %s15705_s4, %s15210_s24 }
  0x72   : > { %p15207_p6 = pnand %p15205_p4, %p15621_p12  ;;  %p15213_p5 = scmp.lt.s32.totalorder %s15211_s21, %s15204_s13 }
  0x74   : > { %p15208_p8 = pneg %p15207_p6  ;;  %p15214_p13 = por %p15213_p5, %p15212_p0 }
  0x76   : > { %p15215_p1 = pnand %p15214_p13, %p15208_p8 }
  0x78   : > { %15218 = shalt.err (!%p15215_p1)
}
  0x79   : > { %14661 = dma.hbm_to_vmem [thread:$0]  (!%p15595_p9), %s15701_s28, 65536, %s15705_s4, %s17958_s10, %s17983_s2, %s17983_s2, %s17982_s19  }
  0x7a   : > { %s17986_s16 = sshll.u32 %s15461_s17, 15  ;;  %s17987_s8 = sld [smem:[#allocation30_spill]] }
  0x7b   : > { %s17988_s13 = sshll.u32 %s15593_s25, 11  ;;  %s17959_s21 = scalar_lea.sflag [#allocation14], %s15600_s27 }
  0x7c   : > { %s503_s30 = scalar_lea.vmem [#allocation13], %s17988_s13 }
  0x7d   : > { %s510_s24 = sshll.u32 %s503_s30, 4  ;;  %s15743_s24 = int_to_ptr.vmem [resolvable:$true] %s510_s24 }
  0x80   : > { %s15739_s12 = scalar_lea.hbm %s17987_s8, %s17986_s16  ;;  %s15224_s2 = scalar_lea.hbm %s17987_s8, 98304 }
  0x81   : > { %s15219_s22 = scalar_lea.hbm %s15739_s12, 32768  ;;  %p15225_p10 = scmp.lt.u32.totalorder %s15739_s12, %s17987_s8 }
  0x82   : > { %p15220_p11 = scmp.ne.s32.totalorder %s15739_s12, %s15219_s22  ;;  %p15226_p3 = scmp.lt.u32.totalorder %s15224_s2, %s15219_s22 }
  0x83   : > { %p15228_p6 = scmp.lt.u32.totalorder %s15219_s22, %s15739_s12 }
  0x84   : > { %p15222_p2 = pnand %p15220_p11, %p15621_p12  ;;  %p15227_p4 = por %p15226_p3, %p15225_p10 }
  0x86   : > { %p15223_p7 = pneg %p15222_p2  ;;  %p15229_p8 = por %p15228_p6, %p15227_p4 }
  0x88   : > { %p15230_p0 = pnand %p15229_p8, %p15223_p7 }
  0x8a   : > { %15233 = shalt.err (!%p15230_p0)
}
  0x8b   : > { %s15234_s29 = scalar_lea.vmem %s15743_s24, 32768  ;;  %s15472_s15 = smov [#allocation13]  }
  0x8c   : > { %p15235_p5 = scmp.ne.s32.totalorder %s15743_s24, %s15234_s29  ;;  %s15239_s13 = sshll.u32 %s15472_s15, 4  ;;  %s15240_s13 = int_to_ptr.vmem [resolvable:$false] %s15239_s13 }
  0x8d   : > { %s15241_s30 = scalar_lea.vmem %s15240_s13, 65536  ;;  %p15242_p11 = scmp.lt.s32.totalorder %s15743_s24, %s15240_s13 }
  0x8e   : > { %p15237_p13 = pnand %p15235_p5, %p15621_p12  ;;  %p15243_p2 = scmp.lt.s32.totalorder %s15241_s30, %s15234_s29 }
  0x90   : > { %p15238_p1 = pneg %p15237_p13  ;;  %p15244_p10 = por %p15243_p2, %p15242_p11 }
  0x92   : > { %p15245_p3 = pnand %p15244_p10, %p15238_p1 }
  0x94   : > { %15248 = shalt.err (!%p15245_p3)
}
  0x95   : > { %s15473_s22 = smov 256   ;;  %s15474_s4 = smov 16  }
  0x96   : > { %14667 = dma.hbm_to_vmem [thread:$0]  (!%p15595_p9), %s15739_s12, 32768, %s15743_s24, %s17959_s21, %s15473_s22, %s15473_s22, %s15474_s4  }
  0x97   : > { %s17960_s19 = sshll.u32 %s15593_s25, 2  ;;  %s14467_s2 = sshll.u32 %s15461_s17, 6 }
  0x98   : > { %s17989_s1 = sld [smem:[#allocation25_spill]]  ;;  %s364_s15 = scalar_lea.vmem [#allocation2], %s17960_s19 }
  0x99   : > { %s372_s13 = sshll.u32 %s364_s15, 4  ;;  %s15783_s12 = scalar_lea.hbm %s17943_s9, %s14467_s2  ;;  %s15778_s13 = int_to_ptr.vmem [resolvable:$true] %s372_s13 }
  0x9a   : > { %s361_s24 = scalar_lea.sflag [#allocation3], %s15593_s25 }
  0x9e   : > { %s15774_s29 = scalar_lea.hbm %s17989_s1, %s14467_s2  ;;  %s15254_s16 = scalar_lea.hbm %s17989_s1, 192 }
  0x9f   : > { %s15249_s22 = scalar_lea.hbm %s15774_s29, 64  ;;  %p15255_p8 = scmp.lt.u32.totalorder %s15774_s29, %s17989_s1 }
  0xa0   : > { %p15250_p7 = scmp.ne.s32.totalorder %s15774_s29, %s15249_s22  ;;  %p15256_p0 = scmp.lt.u32.totalorder %s15254_s16, %s15249_s22 }
  0xa1   : > { %p15258_p13 = scmp.lt.u32.totalorder %s15249_s22, %s15774_s29 }
  0xa2   : > { %p15252_p4 = pnand %p15250_p7, %p15621_p12  ;;  %p15257_p5 = por %p15256_p0, %p15255_p8 }
  0xa4   : > { %p15253_p6 = pneg %p15252_p4  ;;  %p15259_p1 = por %p15258_p13, %p15257_p5 }
  0xa6   : > { %p15260_p11 = pnand %p15259_p1, %p15253_p6 }
  0xa8   : > { %15263 = shalt.err (!%p15260_p11)
}
  0xa9   : > { %s15264_s10 = scalar_lea.vmem %s15778_s13, 64  ;;  %s15475_s2 = smov [#allocation2]  }
  0xaa   : > { %p15265_p2 = scmp.ne.s32.totalorder %s15778_s13, %s15264_s10  ;;  %s15269_s15 = sshll.u32 %s15475_s2, 4  ;;  %s15270_s15 = int_to_ptr.vmem [resolvable:$false] %s15269_s15 }
  0xab   : > { %s15271_s21 = scalar_lea.vmem %s15270_s15, 128  ;;  %p15272_p7 = scmp.lt.s32.totalorder %s15778_s13, %s15270_s15 }
  0xac   : > { %p15267_p10 = pnand %p15265_p2, %p15621_p12  ;;  %p15273_p4 = scmp.lt.s32.totalorder %s15271_s21, %s15264_s10 }
  0xae   : > { %p15268_p3 = pneg %p15267_p10  ;;  %p15274_p8 = por %p15273_p4, %p15272_p7 }
  0xb0   : > { %p15275_p0 = pnand %p15274_p8, %p15268_p3 }
  0xb2   : > { %15278 = shalt.err (!%p15275_p0)
}
  0xb3   : > { %14646 = dma.hbm_to_vmem [thread:$0]  (!%p15595_p9), %s15774_s29, 64, %s15778_s13, %s361_s24  }
  0xb4   : > { %s15808_s19 = sshll.u32 %s15593_s25, 3  ;;  %s15811_s30 = sshll.u32 %s15461_s17, 7 }
  0xb5   : > { %s17990_s3 = sld [smem:[#allocation27_spill]]  ;;  %s404_s16 = scalar_lea.vmem [#allocation6], %s15808_s19 }
  0xb6   : > { %s412_s10 = sshll.u32 %s404_s16, 4  ;;  %s15824_s24 = scalar_lea.hbm %s17939_s5, %s15811_s30  ;;  %s413_s10 = int_to_ptr.vmem [resolvable:$true] %s412_s10 }
  0xbb   : > { %s15817_s28 = scalar_lea.hbm %s17990_s3, %s15811_s30  ;;  %s15284_s22 = scalar_lea.hbm %s17990_s3, 384 }
  0xbc   : > { %s15279_s2 = scalar_lea.hbm %s15817_s28, 128  ;;  %p15285_p1 = scmp.lt.u32.totalorder %s15817_s28, %s17990_s3 }
  0xbd   : > { %p15280_p6 = scmp.ne.s32.totalorder %s15817_s28, %s15279_s2  ;;  %p15286_p11 = scmp.lt.u32.totalorder %s15284_s22, %s15279_s2 }
  0xbe   : > { %p15288_p10 = scmp.lt.u32.totalorder %s15279_s2, %s15817_s28 }
  0xbf   : > { %p15282_p5 = pnand %p15280_p6, %p15621_p12  ;;  %p15287_p2 = por %p15286_p11, %p15285_p1 }
  0xc1   : > { %p15283_p13 = pneg %p15282_p5  ;;  %p15289_p3 = por %p15288_p10, %p15287_p2 }
  0xc3   : > { %p15290_p7 = pnand %p15289_p3, %p15283_p13 }
  0xc5   : > { %15293 = shalt.err (!%p15290_p7)
}
  0xc6   : > { %s15294_s16 = scalar_lea.vmem %s413_s10, 128  ;;  %s15476_s29 = smov [#allocation6]  }
  0xc7   : > { %p15295_p4 = scmp.ne.s32.totalorder %s413_s10, %s15294_s16  ;;  %s15299_s13 = sshll.u32 %s15476_s29, 4  ;;  %s15300_s13 = int_to_ptr.vmem [resolvable:$false] %s15299_s13 }
  0xc8   : > { %s15301_s15 = scalar_lea.vmem %s15300_s13, 256  ;;  %p15302_p6 = scmp.lt.s32.totalorder %s413_s10, %s15300_s13 }
  0xc9   : > { %p15297_p8 = pnand %p15295_p4, %p15621_p12  ;;  %p15303_p5 = scmp.lt.s32.totalorder %s15301_s15, %s15294_s16 }
  0xcb   : > { %p15298_p0 = pneg %p15297_p8  ;;  %p15304_p9 = por %p15303_p5, %p15302_p6 }
  0xcd   : > { %p15305_p1 = pnand %p15304_p9, %p15298_p0 }
  0xcf   : > { %15308 = shalt.err (!%p15305_p1)
}
  0xd0   : > { %p17991_p11 = scmp.ne.s32.totalorder %s17975_s26, 0  ;;  %s17992_s1 = scalar_lea.sflag [#allocation5], %s15600_s27 }
  0xd1   : > { %s444_s2 = scalar_lea.vmem [#allocation9], %s15808_s19  ;;  %s15850_s16 = scalar_lea.hbm %s17941_s7, %s15811_s30 }
  0xd2   : > { %14652 = dma.hbm_to_vmem [thread:$0]  (!%p17991_p11), %s15817_s28, 128, %s413_s10, %s17992_s1  }
  0xd3   : > { %s452_s21 = sshll.u32 %s444_s2, 4  ;;  %s15309_s29 = scalar_lea.hbm %s15824_s24, 128  ;;  %s453_s21 = int_to_ptr.vmem [resolvable:$true] %s452_s21 }
  0xd4   : > { %p15310_p9 = scmp.ne.s32.totalorder %s15824_s24, %s15309_s29  ;;  %s15314_s3 = scalar_lea.hbm %s17939_s5, 384 }
  0xd5   : > { %p15315_p10 = scmp.lt.u32.totalorder %s15824_s24, %s17939_s5  ;;  %p15316_p3 = scmp.lt.u32.totalorder %s15314_s3, %s15309_s29 }
  0xd6   : > { %p15312_p13 = pnand %p15310_p9, %p15621_p12  ;;  %p15318_p4 = scmp.lt.u32.totalorder %s15309_s29, %s15824_s24 }
  0xd7   : > { %p15317_p7 = por %p15316_p3, %p15315_p10 }
  0xd8   : > { %p15313_p2 = pneg %p15312_p13 }
  0xd9   : > { %p15319_p8 = por %p15318_p4, %p15317_p7 }
  0xdb   : > { %p15320_p0 = pnand %p15319_p8, %p15313_p2 }
  0xdd   : > { %15323 = shalt.err (!%p15320_p0)
}
  0xde   : > { %s15324_s30 = scalar_lea.vmem %s453_s21, 128  ;;  %s15477_s28 = smov [#allocation9]  }
  0xdf   : > { %p15325_p6 = scmp.ne.s32.totalorder %s453_s21, %s15324_s30  ;;  %s15329_s10 = sshll.u32 %s15477_s28, 4  ;;  %s15330_s10 = int_to_ptr.vmem [resolvable:$false] %s15329_s10 }
  0xe0   : > { %s15331_s1 = scalar_lea.vmem %s15330_s10, 256  ;;  %p15332_p9 = scmp.lt.s32.totalorder %s453_s21, %s15330_s10 }
  0xe1   : > { %p15327_p5 = pnand %p15325_p6, %p15621_p12  ;;  %p15333_p13 = scmp.lt.s32.totalorder %s15331_s1, %s15324_s30 }
  0xe3   : > { %p15328_p1 = pneg %p15327_p5  ;;  %p15334_p11 = por %p15333_p13, %p15332_p9 }
  0xe5   : > { %p15335_p3 = pnand %p15334_p11, %p15328_p1 }
  0xe7   : > { %15338 = shalt.err (!%p15335_p3)
}
  0xe8   : > { %p17993_p10 = scmp.ne.s32.totalorder %s17975_s26, 0  ;;  %s17994_s3 = scalar_lea.sflag [#allocation8], %s15600_s27 }
  0xe9   : > { %s484_s6 = scalar_lea.vmem [#allocation12], %s15808_s19  ;;  %s17995_s2 = sshll.u32 %s15593_s25, 2 }
  0xea   : > { %14658 = dma.hbm_to_vmem [thread:$0]  (!%p17993_p10), %s15824_s24, 128, %s453_s21, %s17994_s3  }
  0xeb   : > { %s492_s8 = sshll.u32 %s484_s6, 4  ;;  %s524_s22 = scalar_lea.vmem [#allocation15], %s17995_s2  ;;  %s493_s8 = int_to_ptr.vmem [resolvable:$true] %s492_s8 }
  0xec   : > { %s532_s4 = sshll.u32 %s524_s22, 4  ;;  %s15339_s29 = scalar_lea.hbm %s15850_s16, 128  ;;  %s15874_s4 = int_to_ptr.vmem [resolvable:$true] %s532_s4 }
  0xed   : > { %p15340_p11 = scmp.ne.s32.totalorder %s15850_s16, %s15339_s29  ;;  %s15344_s30 = scalar_lea.hbm %s17941_s7, 384 }
  0xee   : > { %p15345_p4 = scmp.lt.u32.totalorder %s15850_s16, %s17941_s7  ;;  %p15346_p8 = scmp.lt.u32.totalorder %s15344_s30, %s15339_s29 }
  0xef   : > { %p15342_p2 = pnand %p15340_p11, %p15621_p12  ;;  %p15348_p6 = scmp.lt.u32.totalorder %s15339_s29, %s15850_s16 }
  0xf0   : > { %p15347_p0 = por %p15346_p8, %p15345_p4 }
  0xf1   : > { %p15343_p7 = pneg %p15342_p2 }
  0xf2   : > { %p15349_p5 = por %p15348_p6, %p15347_p0 }
  0xf4   : > { %p15350_p1 = pnand %p15349_p5, %p15343_p7 }
  0xf6   : > { %15353 = shalt.err (!%p15350_p1)
}
  0xf7   : > { %s15354_s25 = scalar_lea.vmem %s493_s8, 128  ;;  %s15478_s19 = smov [#allocation12]  }
  0xf8   : > { %p15355_p9 = scmp.ne.s32.totalorder %s493_s8, %s15354_s25  ;;  %s15359_s24 = sshll.u32 %s15478_s19, 4  ;;  %s15360_s24 = int_to_ptr.vmem [resolvable:$false] %s15359_s24 }
  0xf9   : > { %s15361_s21 = scalar_lea.vmem %s15360_s24, 256  ;;  %p15362_p11 = scmp.lt.s32.totalorder %s493_s8, %s15360_s24 }
  0xfa   : > { %p15357_p13 = pnand %p15355_p9, %p15621_p12  ;;  %p15363_p2 = scmp.lt.s32.totalorder %s15361_s21, %s15354_s25 }
  0xfc   : > { %p15358_p3 = pneg %p15357_p13  ;;  %p15364_p10 = por %p15363_p2, %p15362_p11 }
  0xfe   : > { %p15365_p4 = pnand %p15364_p10, %p15358_p3 }
 0x100   : > { %15368 = shalt.err (!%p15365_p4)
}
 0x101   : > { %p17996_p8 = scmp.ne.s32.totalorder %s17975_s26, 0  ;;  %s17997_s1 = scalar_lea.sflag [#allocation11], %s15600_s27 }
 0x102   : > { %s15369_s3 = scalar_lea.hbm %s15783_s12, 64  ;;  %s15374_s22 = scalar_lea.hbm %s17943_s9, 192 }
 0x103   : > { %14664 = dma.hbm_to_vmem [thread:$0]  (!%p17996_p8), %s15850_s16, 128, %s493_s8, %s17997_s1  }
 0x104   : > { %p15370_p7 = scmp.ne.s32.totalorder %s15783_s12, %s15369_s3  ;;  %p15375_p10 = scmp.lt.u32.totalorder %s15783_s12, %s17943_s9 }
 0x105   : > { %p15376_p5 = scmp.lt.u32.totalorder %s15374_s22, %s15369_s3  ;;  %p15378_p9 = scmp.lt.u32.totalorder %s15369_s3, %s15783_s12 }
 0x106   : > { %p15372_p0 = pnand %p15370_p7, %p15621_p12 }
 0x107   : > { %p15377_p1 = por %p15376_p5, %p15375_p10 }
 0x108   : > { %p15373_p6 = pneg %p15372_p0 }
 0x109   : > { %p15379_p13 = por %p15378_p9, %p15377_p1 }
 0x10b   : > { %p15380_p3 = pnand %p15379_p13, %p15373_p6 }
 0x10d   : > { %15383 = shalt.err (!%p15380_p3)
}
 0x10e   : > { %s15384_s16 = scalar_lea.vmem %s15874_s4, 64  ;;  %s15479_s8 = smov [#allocation15]  }
 0x10f   : > { %p15385_p11 = scmp.ne.s32.totalorder %s15874_s4, %s15384_s16  ;;  %s15389_s15 = sshll.u32 %s15479_s8, 4  ;;  %s15390_s15 = int_to_ptr.vmem [resolvable:$false] %s15389_s15 }
 0x110   : > { %s15391_s30 = scalar_lea.vmem %s15390_s15, 128  ;;  %p15392_p7 = scmp.lt.s32.totalorder %s15874_s4, %s15390_s15 }
 0x111   : > { %p15387_p2 = pnand %p15385_p11, %p15621_p12  ;;  %p15393_p0 = scmp.lt.s32.totalorder %s15391_s30, %s15384_s16 }
 0x113   : > { %p15388_p4 = pneg %p15387_p2  ;;  %p15394_p10 = por %p15393_p0, %p15392_p7 }
 0x115   : > { %p15395_p5 = pnand %p15394_p10, %p15388_p4 }
 0x117   : > { %15398 = shalt.err (!%p15395_p5)
}
 0x118   : > { %s17998_s28 = scalar_lea.sflag [#allocation14], %s15600_s27  ;;  %p17999_p6 = scmp.ne.s32.totalorder %s17980_s11, 0 }
 0x119   : > { %14670 = dma.hbm_to_vmem [thread:$0]  (!%p17996_p8), %s15783_s12, 64, %s15874_s4, %s17998_s28  }
 0x11a   : > { %541 = sbr.rel (%p17999_p6) target bundleno = 2377 (0x949), region = 60  ;;  %s15921_s20 = sand.u32 (!%p17999_p6), 1, %s15449_s14  }
 0x11b   : > { %s12902_s10 = sshll.u32 (!%p17999_p6), %s15921_s20, 2  ;;  %s544_s25 = scalar_lea.sflag (!%p17999_p6), [#allocation3], %s15921_s20 }
 0x11c   : > { %s15927_s19 = scalar_lea.vmem (!%p17999_p6), [#allocation2], %s12902_s10  ;;  %p18000_p12 = scmp.ne.s32.totalorder (!%p17999_p6), %s17973_s23, 0 }
 0x121   : > { %15424 = dma.done.wait (%p18000_p12), %s544_s25, 64  }
 0x122   : > { %15426 = vsyncadd (%p18000_p12), %s544_s25, 4294967232  ;;  %s18001_s26 = sadd.s32 4294967295, %s15465_s18   ;;  %s12903_s11 = sshll.u32 %s15921_s20, 11 }
 0x123   : > { %s552_s27 = sand.u32 1, %s18001_s26   ;;  %s15936_s4 = scalar_lea.vmem [#allocation4], %s12903_s11 }
 0x124   : > { %s553_s12 = scalar_lea.sflag [#allocation5], %s552_s27 }
 0x125   : > { %15428 = dma.done.wait (%p18000_p12), %s553_s12, 32896  }
 0x126   : > { %15430 = vsyncadd (%p18000_p12), %s553_s12, 4294934400  ;;  %s15943_s24 = sshll.u32 %s15921_s20, 3  ;;  %s12905_s21 = sshll.u32 %s15921_s20, 12 }
 0x127   : > { %s565_s1 = scalar_lea.vmem [#allocation6], %s15943_s24  ;;  %s571_s3 = scalar_lea.sflag [#allocation8], %s552_s27 }
 0x128   : > { %s15947_s6 = scalar_lea.vmem [#allocation7], %s12905_s21 }
 0x129   : > { %15432 = dma.done.wait (%p18000_p12), %s571_s3, 65664  }
 0x12a   : > { %15434 = vsyncadd (%p18000_p12), %s571_s3, 4294901632  ;;  %s583_s2 = scalar_lea.vmem [#allocation9], %s15943_s24  ;;  %s589_s22 = scalar_lea.sflag [#allocation11], %s552_s27 }
 0x12b   : > { %s15954_s29 = scalar_lea.vmem [#allocation10], %s12905_s21 }
 0x12c   : > { %15436 = dma.done.wait (%p18000_p12), %s589_s22, 65664  }
 0x12d   : > { %15438 = vsyncadd (%p18000_p12), %s589_s22, 4294901632  ;;  %s601_s13 = scalar_lea.vmem [#allocation12], %s15943_s24  ;;  %s607_s16 = scalar_lea.sflag [#allocation14], %s552_s27 }
 0x12e   : > { %s15961_s8 = scalar_lea.vmem [#allocation13], %s12903_s11 }
 0x12f   : > { %15440 = dma.done.wait (%p18000_p12), %s607_s16, 32832  }
 0x130   : > { %15442 = vsyncadd (%p18000_p12), %s607_s16, 4294934464  ;;  %v15480_v0 = vmov 0   ;;  %v717_v1 = vld [vmem:[%s17934_s0] sm:$0xff]  ;;  %v15481_v2 = vmov 1   ;;  %v1319_v3 = vld [vmem:[%s15936_s4 + $0x400] sm:$0xff]  ;;  %s18002_s23 = sld [smem:[#allocation22_spill]] }
 0x131   : > { %14732 = vset.pattern.permute.xlu0 %v15480_v0  ;;  %v1323_v4 = vld [vmem:[%s15936_s4 + $0x420] sm:$0xff]  ;;  %v1320_v5 = vld [vmem:[%s15936_s4 + $0x408] sm:$0xff]  ;;  %s619_s28 = scalar_lea.vmem [#allocation15], %s12902_s10  ;;  %s18003_s10 = sld [smem:[#allocation31_spill]] }
 0x132   : > { %721 = vperm.xlu0 %14732, %v717_v1   ;;  %v12930_v6 = vcombine.high %v1319_v3, %v1323_v4  ;;  %v1324_v7 = vld [vmem:[%s15936_s4 + $0x428] sm:$0xff]  ;;  %v12929_v9 = vcombine.low %v1319_v3, %v1323_v4  ;;  %v1327_v11 = vld [vmem:[%s15936_s4 + $0x440] sm:$0xff] }
 0x133   : > { %v12932_v8 = vcombine.high %v1320_v5, %v1324_v7  ;;  %v12931_v10 = vcombine.low %v1320_v5, %v1324_v7  ;;  %v1331_v12 = vld [vmem:[%s15936_s4 + $0x460] sm:$0xff]  ;;  %v1328_v13 = vld [vmem:[%s15936_s4 + $0x448] sm:$0xff] }
 0x134   : > { %2087 = vmatprep.subr.bf16.mxu0 %v12930_v6  ;;  %v12938_v14 = vcombine.high %v1327_v11, %v1331_v12  ;;  %v1332_v15 = vld [vmem:[%s15936_s4 + $0x468] sm:$0xff]  ;;  %v12937_v17 = vcombine.low %v1327_v11, %v1331_v12  ;;  %v1335_v19 = vld [vmem:[%s15936_s4 + $0x480] sm:$0xff] }
 0x135   : > { %2128 = vmatprep.subr.bf16.mxu1 %v12932_v8  ;;  %2088 = vmatpush1.bf16.msra.mxu0 %v12929_v9  ;;  %v12940_v16 = vcombine.high %v1328_v13, %v1332_v15  ;;  %v12939_v18 = vcombine.low %v1328_v13, %v1332_v15  ;;  %v1339_v20 = vld [vmem:[%s15936_s4 + $0x4a0] sm:$0xff]  ;;  %v1336_v21 = vld [vmem:[%s15936_s4 + $0x488] sm:$0xff] }
 0x136   : > { %14733 = vset.pattern.permute.xlu0 %v15481_v2  ;;  %2129 = vmatpush1.bf16.msra.mxu1 %v12931_v10  ;;  %v12946_v22 = vcombine.high %v1335_v19, %v1339_v20  ;;  %v1340_v23 = vld [vmem:[%s15936_s4 + $0x4a8] sm:$0xff]  ;;  %v12945_v25 = vcombine.low %v1335_v19, %v1339_v20  ;;  %v1343_v27 = vld [vmem:[%s15936_s4 + $0x4c0] sm:$0xff]  ;;  %p708_p8 = scmp.lt.s32.totalorder %s18002_s23, 2 }
 0x137   : > { %746 = vperm.xlu0 %14733, %v717_v1   ;;  %2089 = vmatprep.subr.bf16.mxu0 %v12938_v14  ;;  %v12948_v24 = vcombine.high %v1336_v21, %v1340_v23  ;;  %v12947_v26 = vcombine.low %v1336_v21, %v1340_v23  ;;  %v1347_v28 = vld [vmem:[%s15936_s4 + $0x4e0] sm:$0xff]  ;;  %v1344_v29 = vld [vmem:[%s15936_s4 + $0x4c8] sm:$0xff] }
 0x138   : > { %2130 = vmatprep.subr.bf16.mxu1 %v12940_v16  ;;  %v12954_v30 = vcombine.high %v1343_v27, %v1347_v28  ;;  %v1348_v31 = vld [vmem:[%s15936_s4 + $0x4e8] sm:$0xff]  ;;  %v12953_v33 = vcombine.low %v1343_v27, %v1347_v28  ;;  %v1351_v35 = vld [vmem:[%s15936_s4 + $0x500] sm:$0xff]  ;;  %s18014_s23 = smov (!%p708_p8, %s18002_s23), 2 }
 0x139   : > { %2090 = vmatpush1.bf16.msra.mxu0 %v12937_v17  ;;  %v12956_v32 = vcombine.high %v1344_v29, %v1348_v31  ;;  %v12955_v34 = vcombine.low %v1344_v29, %v1348_v31  ;;  %v1355_v36 = vld [vmem:[%s15936_s4 + $0x520] sm:$0xff]  ;;  %v1352_v37 = vld [vmem:[%s15936_s4 + $0x508] sm:$0xff]  ;;  %s14476_s25 = sshll.u32 %s18014_s23, 5 }
 0x13a   : > { %2131 = vmatpush1.bf16.msra.mxu1 %v12939_v18  ;;  %2091 = vmatprep.subr.bf16.mxu0 %v12946_v22  ;;  %v12962_v38 = vcombine.high %v1351_v35, %v1355_v36  ;;  %v1356_v39 = vld [vmem:[%s15936_s4 + $0x528] sm:$0xff]  ;;  %v12961_v41 = vcombine.low %v1351_v35, %v1355_v36  ;;  %v1359_v43 = vld [vmem:[%s15936_s4 + $0x540] sm:$0xff]  ;;  %s716_s26 = scalar_lea.vmem %s18003_s10, %s14476_s25 }
 0x13b   : > { %2132 = vmatprep.subr.bf16.mxu1 %v12948_v24  ;;  %v12964_v40 = vcombine.high %v1352_v37, %v1356_v39  ;;  %v12963_v42 = vcombine.low %v1352_v37, %v1356_v39  ;;  %v1363_v44 = vld [vmem:[%s15936_s4 + $0x560] sm:$0xff]  ;;  %v1360_v45 = vld [vmem:[%s15936_s4 + $0x548] sm:$0xff] }
 0x13c   : > { %v12970_v46 = vcombine.high %v1359_v43, %v1363_v44  ;;  %v1364_v47 = vld [vmem:[%s15936_s4 + $0x568] sm:$0xff]  ;;  %v12969_v49 = vcombine.low %v1359_v43, %v1363_v44  ;;  %v1367_v51 = vld [vmem:[%s15936_s4 + $0x580] sm:$0xff] }
 0x13d   : > { %2092 = vmatpush1.bf16.msra.mxu0 %v12945_v25  ;;  %v12972_v48 = vcombine.high %v1360_v45, %v1364_v47  ;;  %v12971_v50 = vcombine.low %v1360_v45, %v1364_v47  ;;  %v1371_v52 = vld [vmem:[%s15936_s4 + $0x5a0] sm:$0xff]  ;;  %v1368_v53 = vld [vmem:[%s15936_s4 + $0x588] sm:$0xff] }
 0x13e   : > { %2133 = vmatpush1.bf16.msra.mxu1 %v12947_v26  ;;  %2093 = vmatprep.subr.bf16.mxu0 %v12954_v30  ;;  %v12978_v54 = vcombine.high %v1367_v51, %v1371_v52  ;;  %v1372_v55 = vld [vmem:[%s15936_s4 + $0x5a8] sm:$0xff]  ;;  %v12977_v57 = vcombine.low %v1367_v51, %v1371_v52  ;;  %v1375_v59 = vld [vmem:[%s15936_s4 + $0x5c0] sm:$0xff] }
 0x13f   : > { %2134 = vmatprep.subr.bf16.mxu1 %v12956_v32  ;;  %v12980_v56 = vcombine.high %v1368_v53, %v1372_v55  ;;  %v12979_v58 = vcombine.low %v1368_v53, %v1372_v55  ;;  %v1379_v60 = vld [vmem:[%s15936_s4 + $0x5e0] sm:$0xff]  ;;  %v1376_v61 = vld [vmem:[%s15936_s4 + $0x5c8] sm:$0xff] }
 0x140   : > { %v12986_v62 = vcombine.high %v1375_v59, %v1379_v60  ;;  %v1380_v63 = vld [vmem:[%s15936_s4 + $0x5e8] sm:$0xff]  ;;  %v12985_v1 = vcombine.low %v1375_v59, %v1379_v60  ;;  %v1383_v3 = vld [vmem:[%s15936_s4 + $0x600] sm:$0xff] }
 0x141   : > { %2094 = vmatpush1.bf16.msra.mxu0 %v12953_v33  ;;  %v12988_v0 = vcombine.high %v1376_v61, %v1380_v63  ;;  %v12987_v2 = vcombine.low %v1376_v61, %v1380_v63  ;;  %v1387_v4 = vld [vmem:[%s15936_s4 + $0x620] sm:$0xff]  ;;  %v1384_v5 = vld [vmem:[%s15936_s4 + $0x608] sm:$0xff] }
 0x142   : > { %2135 = vmatpush1.bf16.msra.mxu1 %v12955_v34  ;;  %2095 = vmatprep.subr.bf16.mxu0 %v12962_v38  ;;  %v12994_v6 = vcombine.high %v1383_v3, %v1387_v4  ;;  %v1388_v7 = vld [vmem:[%s15936_s4 + $0x628] sm:$0xff]  ;;  %v12993_v9 = vcombine.low %v1383_v3, %v1387_v4  ;;  %v1391_v11 = vld [vmem:[%s15936_s4 + $0x640] sm:$0xff]  ;;  %v16035_v3 = vld [vmem:[%s15936_s4 + $0x410] sm:$0xff] }
 0x143   : > { %2136 = vmatprep.subr.bf16.mxu1 %v12964_v40  ;;  %v12996_v8 = vcombine.high %v1384_v5, %v1388_v7  ;;  %v12995_v10 = vcombine.low %v1384_v5, %v1388_v7  ;;  %v1395_v12 = vld [vmem:[%s15936_s4 + $0x660] sm:$0xff]  ;;  %v1392_v13 = vld [vmem:[%s15936_s4 + $0x648] sm:$0xff]  ;;  %v16038_v4 = vld [vmem:[%s15936_s4 + $0x430] sm:$0xff] }
 0x144   : > { %v13002_v14 = vcombine.high %v1391_v11, %v1395_v12  ;;  %v1396_v15 = vld [vmem:[%s15936_s4 + $0x668] sm:$0xff]  ;;  %v13001_v17 = vcombine.low %v1391_v11, %v1395_v12  ;;  %v1399_v19 = vld [vmem:[%s15936_s4 + $0x680] sm:$0xff]  ;;  %v16041_v5 = vld [vmem:[%s15936_s4 + $0x418] sm:$0xff]  ;;  %v12934_v7 = vcombine.high %v16035_v3, %v16038_v4  ;;  %v725_v11 = vlaneseq }
 0x145   : > { %2096 = vmatpush1.bf16.msra.mxu0 %v12961_v41  ;;  %v13004_v16 = vcombine.high %v1392_v13, %v1396_v15  ;;  %v13003_v18 = vcombine.low %v1392_v13, %v1396_v15  ;;  %v1403_v20 = vld [vmem:[%s15936_s4 + $0x6a0] sm:$0xff]  ;;  %v1400_v21 = vld [vmem:[%s15936_s4 + $0x688] sm:$0xff] }
 0x146   : > { %2137 = vmatpush1.bf16.msra.mxu1 %v12963_v42  ;;  %2097 = vmatprep.subr.bf16.mxu0 %v12970_v46  ;;  %v13010_v22 = vcombine.high %v1399_v19, %v1403_v20  ;;  %v1404_v23 = vld [vmem:[%s15936_s4 + $0x6a8] sm:$0xff]  ;;  %v13009_v25 = vcombine.low %v1399_v19, %v1403_v20  ;;  %v1407_v27 = vld [vmem:[%s15936_s4 + $0x6c0] sm:$0xff]  ;;  %v16054_v12 = vshrl.u32 %v725_v11, 7 }
 0x147   : > { %2138 = vmatprep.subr.bf16.mxu1 %v12972_v48  ;;  %v13012_v24 = vcombine.high %v1400_v21, %v1404_v23  ;;  %v13011_v26 = vcombine.low %v1400_v21, %v1404_v23  ;;  %v1411_v28 = vld [vmem:[%s15936_s4 + $0x6e0] sm:$0xff]  ;;  %v1408_v29 = vld [vmem:[%s15936_s4 + $0x6c8] sm:$0xff] }
 0x148   : > { %v13018_v30 = vcombine.high %v1407_v27, %v1411_v28  ;;  %v1412_v31 = vld [vmem:[%s15936_s4 + $0x6e8] sm:$0xff]  ;;  %v13017_v32 = vcombine.low %v1407_v27, %v1411_v28  ;;  %v1415_v33 = vld [vmem:[%s15936_s4 + $0x700] sm:$0xff]  ;;  %v16057_v13 = vsub.s32 0, %v16054_v12  ;;  %v16063_v15 = vsub.s32 1, %v16054_v12 }
 0x149   : > { %2098 = vmatpush1.bf16.msra.mxu0 %v12969_v49  ;;  %v1419_v34 = vld [vmem:[%s15936_s4 + $0x720] sm:$0xff]  ;;  %v13020_v35 = vcombine.high %v1408_v29, %v1412_v31  ;;  %v13019_v36 = vcombine.low %v1408_v29, %v1412_v31  ;;  %v1416_v38 = vld [vmem:[%s15936_s4 + $0x708] sm:$0xff] }
 0x14a   : > { %2139 = vmatpush1.bf16.msra.mxu1 %v12971_v50  ;;  %2099 = vmatprep.subr.bf16.mxu0 %v12978_v54  ;;  %v13026_v37 = vcombine.high %v1415_v33, %v1419_v34  ;;  %v1420_v39 = vld [vmem:[%s15936_s4 + $0x728] sm:$0xff]  ;;  %v1423_v40 = vld [vmem:[%s15936_s4 + $0x740] sm:$0xff]  ;;  %v13025_v45 = vcombine.low %v1415_v33, %v1419_v34 }
 0x14b   : > { %2140 = vmatprep.subr.bf16.mxu1 %v12980_v56  ;;  %v13028_v41 = vcombine.high %v1416_v38, %v1420_v39  ;;  %v1427_v42 = vld [vmem:[%s15936_s4 + $0x760] sm:$0xff]  ;;  %v1424_v43 = vld [vmem:[%s15936_s4 + $0x748] sm:$0xff]  ;;  %v13027_v46 = vcombine.low %v1416_v38, %v1420_v39 }
 0x14c   : > { %v1428_v44 = vld [vmem:[%s15936_s4 + $0x768] sm:$0xff]  ;;  %v13034_v47 = vcombine.high %v1423_v40, %v1427_v42  ;;  %v1431_v48 = vld [vmem:[%s15936_s4 + $0x780] sm:$0xff]  ;;  %v13033_v53 = vcombine.low %v1423_v40, %v1427_v42 }
 0x14d   : > { %2100 = vmatpush1.bf16.msra.mxu0 %v12977_v57  ;;  %v1435_v49 = vld [vmem:[%s15936_s4 + $0x7a0] sm:$0xff]  ;;  %v13036_v50 = vcombine.high %v1424_v43, %v1428_v44  ;;  %v1432_v51 = vld [vmem:[%s15936_s4 + $0x788] sm:$0xff]  ;;  %v13035_v56 = vcombine.low %v1424_v43, %v1428_v44 }
 0x14e   : > { %2141 = vmatpush1.bf16.msra.mxu1 %v12979_v58  ;;  %2101 = vmatprep.subr.bf16.mxu0 %v12986_v62  ;;  %v1436_v52 = vld [vmem:[%s15936_s4 + $0x7a8] sm:$0xff]  ;;  %v1439_v54 = vld [vmem:[%s15936_s4 + $0x7c0] sm:$0xff]  ;;  %v13042_v57 = vcombine.high %v1431_v48, %v1435_v49  ;;  %v13041_v61 = vcombine.low %v1431_v48, %v1435_v49 }
 0x14f   : > { %2142 = vmatprep.subr.bf16.mxu1 %v12988_v0  ;;  %v1443_v55 = vld [vmem:[%s15936_s4 + $0x7e0] sm:$0xff]  ;;  %v1440_v58 = vld [vmem:[%s15936_s4 + $0x7c8] sm:$0xff]  ;;  %v13044_v60 = vcombine.high %v1432_v51, %v1436_v52  ;;  %v13043_v62 = vcombine.low %v1432_v51, %v1436_v52 }
 0x150   : > { %v1444_v59 = vld [vmem:[%s15936_s4 + $0x7e8] sm:$0xff]  ;;  %v13050_v63 = vcombine.high %v1439_v54, %v1443_v55 }
 0x151   : > { %2102 = vmatpush1.bf16.msra.mxu0 %v12985_v1  ;;  %v13052_v0 = vcombine.high %v1440_v58, %v1444_v59  ;;  %v13049_v1 = vcombine.low %v1439_v54, %v1443_v55 }
 0x152   : > { %2143 = vmatpush1.bf16.msra.mxu1 %v12987_v2  ;;  %2103 = vmatprep.subr.bf16.mxu0 %v12994_v6  ;;  %v13051_v2 = vcombine.low %v1440_v58, %v1444_v59  ;;  %v12933_v6 = vcombine.low %v16035_v3, %v16038_v4  ;;  %v1346_v3 = vld [vmem:[%s15936_s4 + $0x4d8] sm:$0xff] }
 0x153   : > { %2144 = vmatprep.subr.bf16.mxu1 %v12996_v8  ;;  %v16048_v8 = vld [vmem:[%s15936_s4 + $0x438] sm:$0xff] }
 0x154   : > { %v1350_v4 = vld [vmem:[%s15936_s4 + $0x4f8] sm:$0xff] }
 0x155   : > { %2104 = vmatpush1.bf16.msra.mxu0 %v12993_v9  ;;  %v12935_v9 = vcombine.low %v16041_v5, %v16048_v8 }
 0x156   : > { %2145 = vmatpush1.bf16.msra.mxu1 %v12995_v10  ;;  %2105 = vmatprep.subr.bf16.mxu0 %v13002_v14  ;;  %v12936_v10 = vcombine.high %v16041_v5, %v16048_v8  ;;  %v16060_v14 = vsub.s32 2, %v16054_v12 }
 0x157   : > { %2146 = vmatprep.subr.bf16.mxu1 %v13004_v16  ;;  %v16066_v16 = vsub.s32 3, %v16054_v12 }
 0x159   : > { %2106 = vmatpush1.bf16.msra.mxu0 %v13001_v17  ;;  %v718_v17 = vld [vmem:[%s15927_s19] sm:$0xf] }
 0x15a   : > { %2147 = vmatpush1.bf16.msra.mxu1 %v13003_v18  ;;  %2107 = vmatprep.subr.bf16.mxu0 %v13010_v22  ;;  %v728_v18 = vrot.slane %v718_v17, %v16057_v13  ;;  %v732_v19 = vrot.slane %v718_v17, %v16060_v14  ;;  %v752_v20 = vrot.slane %v718_v17, %v16063_v15 }
 0x15b   : > { %2148 = vmatprep.subr.bf16.mxu1 %v13012_v24  ;;  %v756_v21 = vrot.slane %v718_v17, %v16066_v16 }
 0x15c   : > { %v738_v23 = vrot.slane %v728_v18, %v16057_v13  ;;  %v742_v24 = vrot.slane %v732_v19, %v16057_v13 }
 0x15d   : > { %2108 = vmatpush1.bf16.msra.mxu0 %v13009_v25  ;;  %v762_v25 = vrot.slane %v752_v20, %v16063_v15  ;;  %v15487_v20 = vmov 1326507024  }
 0x15e   : > { %2149 = vmatpush1.bf16.msra.mxu1 %v13011_v26  ;;  %2109 = vmatprep.subr.bf16.mxu0 %v13018_v30  ;;  %v766_v26 = vrot.slane %v756_v21, %v16063_v15 }
 0x15f   : > { %2150 = vmatprep.subr.bf16.mxu1 %v13020_v35 }
 0x161   : > { %2110 = vmatpush1.bf16.msra.mxu0 %v13017_v32 }
 0x162   : > { %2151 = vmatpush1.bf16.msra.mxu1 %v13019_v36  ;;  %2111 = vmatprep.subr.bf16.mxu0 %v13026_v37 }
 0x163   : > { %2152 = vmatprep.subr.bf16.mxu1 %v13028_v41 }
 0x165   : > { %2112 = vmatpush1.bf16.msra.mxu0 %v13025_v45 }
 0x166   : > { %2153 = vmatpush1.bf16.msra.mxu1 %v13027_v46  ;;  %2113 = vmatprep.subr.bf16.mxu0 %v13034_v47 }
 0x167   : > { %2154 = vmatprep.subr.bf16.mxu1 %v13036_v50 }
 0x169   : > { %2114 = vmatpush1.bf16.msra.mxu0 %v13033_v53 }
 0x16a   : > { %2155 = vmatpush1.bf16.msra.mxu1 %v13035_v56  ;;  %2115 = vmatprep.subr.bf16.mxu0 %v13042_v57  ;;  %v15482_v56 = vmov 683565275  }
 0x16b   : > { %2156 = vmatprep.subr.bf16.mxu1 %v13044_v60  ;;  %v15483_v60 = vmov 2475754826  }
 0x16d   : > { %2116 = vmatpush1.bf16.msra.mxu0 %v13041_v61 }
 0x16e   : > { %2157 = vmatpush1.bf16.msra.mxu1 %v13043_v62  ;;  %2117 = vmatprep.subr.bf16.mxu0 %v13050_v63  ;;  %v15484_v62 = vmov 2131351028  }
 0x16f   : > { %2158 = vmatprep.subr.bf16.mxu1 %v13052_v0  ;;  %v15485_v0 = vmov 2102212464  }
 0x171   : > { %2118 = vmatpush1.bf16.msra.mxu0 %v13049_v1 }
 0x172   : > { %2159 = vmatpush1.bf16.msra.mxu1 %v13051_v2  ;;  %2169 = vmatprep.subr.bf16.mxu0 %v12934_v7  ;;  %v15486_v2 = vmov 920167782  }
 0x173   : > { %2210 = vmatprep.subr.bf16.mxu1 %v12936_v10 }
 0x1b1   : > { %v722_v22 = vpop.permute.xlu0 %721 }
 0x1b2   : > { %v743_v28 = vmul.f32 %v738_v23, %v722_v22  ;;  %v744_v29 = vmul.f32 %v742_v24, %v722_v22 }
 0x1b6   : > { %v747_v27 = vpop.permute.xlu0 %746 }
 0x1b7   : > { %v767_v30 = vmul.f32 %v762_v25, %v747_v27  ;;  %v768_v31 = vmul.f32 %v766_v26, %v747_v27 }
 0x1b9   : > { %v769_v32 = vadd.f32 %v767_v30, %v743_v28  ;;  %v770_v33 = vadd.f32 %v768_v31, %v744_v29 }
 0x1bb   : > { %v16077_v34 = vmul.f32 6.2831855, %v769_v32  ;;  %v16079_v35 = vmul.f32 6.2831855, %v770_v33 }
 0x1bd   : > { %v773_v36 = vand.u32 2147483647, %v16077_v34  ;;  %v776_v37 = vand.u32 2139095040, %v16077_v34  ;;  %v879_v38 = vand.u32 2139095040, %v16079_v35  ;;  %v876_v41 = vand.u32 2147483647, %v16079_v35 }
 0x1be   : > { %vm775_vm14 = vcmp.lt.s32.totalorder %v16077_v34, 0 }
 0x1bf   : > { %v777_v39 = vshrl.u32 %v776_v37, 23  ;;  %v780_v40 = vand.u32 8388607, %v773_v36  ;;  %v880_v42 = vshrl.u32 %v879_v38, 23  ;;  %v16089_v47 = vand.u32 8388607, %v876_v41 }
 0x1c0   : > { %vm774_vm15 = vcmp.le.f32.partialorder %v773_v36, 0.7853982 }
 0x1c1   : > { %v12913_v43 = vadd.s32 4294967169, %v777_v39  ;;  %v12917_v44 = vadd.s32 4294967169, %v880_v42  ;;  %v781_v46 = vor.u32 8388608, %v780_v40  ;;  %v884_v54 = vor.u32 8388608, %v16089_v47 }
 0x1c3   : > { %v783_v45 = vadd.s32 1, %v12913_v43  ;;  %v886_v48 = vadd.s32 1, %v12917_v44  ;;  %v16091_v53 = vshll.u32 %v781_v46, 8 }
 0x1c5   : > { %vm784_vm0 = vcmp.gt.s32.totalorder %v783_v45, 0  ;;  %vm887_vm1 = vcmp.gt.s32.totalorder %v886_v48, 0 }
 0x1c6   : > { %v785_v49 = vsel %vm784_vm0, %v783_v45, 0  ;;  %v888_v52 = vsel %vm887_vm1, %v886_v48, 0  ;;  %vm878_vm0 = vcmp.lt.s32.totalorder %v16079_v35, 0  ;;  %vm877_vm1 = vcmp.le.f32.partialorder %v876_v41, 0.7853982 }
 0x1c7   : > { %v786_v50 = vshrl.u32 %v785_v49, 5  ;;  %v787_v51 = vand.u32 31, %v785_v49  ;;  %v16094_v58 = vshrl.u32 %v888_v52, 5  ;;  %v890_v59 = vand.u32 31, %v888_v52 }
 0x1c9   : > { %v788_v55 = vsub.s32 32, %v787_v51  ;;  %v790_v57 = vshll.u32 %v15482_v56, %v787_v51  ;;  %v793_v61 = vshll.u32 %v15483_v60, %v787_v51  ;;  %v796_v63 = vshll.u32 %v15484_v62, %v787_v51 }
 0x1ca   : > { %v799_v1 = vshll.u32 %v15485_v0, %v787_v51  ;;  %v802_v7 = vshll.u32 %v15486_v2, %v787_v51  ;;  %vm805_vm2 = vcmp.lt.s32.totalorder %v786_v50, 1  ;;  %vm806_vm3 = vcmp.lt.s32.totalorder %v786_v50, 2 }
 0x1cb   : > { %v791_v10 = vshrl.u32 %v15483_v60, %v788_v55  ;;  %v794_v11 = vshrl.u32 %v15484_v62, %v788_v55  ;;  %v797_v17 = vshrl.u32 %v15485_v0, %v788_v55  ;;  %v789_v18 = vshrl.u32 %v15482_v56, %v788_v55 }
 0x1cc   : > { %v800_v19 = vshrl.u32 %v15486_v2, %v788_v55  ;;  %v803_v21 = vshrl.u32 %v15487_v20, %v788_v55  ;;  %v891_v25 = vsub.s32 32, %v890_v59  ;;  %vm807_vm4 = vcmp.lt.s32.totalorder %v786_v50, 3 }
 0x1cd   : > { %v792_v22 = vor.u32 %v791_v10, %v790_v57  ;;  %v795_v23 = vor.u32 %v794_v11, %v793_v61  ;;  %v798_v24 = vor.u32 %v797_v17, %v796_v63  ;;  %vm808_vm5 = vcmp.lt.s32.totalorder %v786_v50, 4 }
 0x1ce   : > { %v801_v26 = vor.u32 %v800_v19, %v799_v1  ;;  %v804_v27 = vor.u32 %v803_v21, %v802_v7  ;;  %v893_v38 = vshll.u32 %v15482_v56, %v890_v59  ;;  %v894_v42 = vshrl.u32 %v15483_v60, %v891_v25 }
 0x1cf   : > { %v809_v28 = vsel %vm805_vm2, %v789_v18, %v792_v22  ;;  %v810_v29 = vsel %vm808_vm5, %v798_v24, 2102212464  ;;  %v813_v30 = vsel %vm805_vm2, %v792_v22, %v795_v23  ;;  %v817_v31 = vsel %vm805_vm2, %v795_v23, %v798_v24 }
 0x1d0   : > { %v811_v32 = vsel %vm807_vm4, %v795_v23, %v810_v29  ;;  %v814_v33 = vsel %vm808_vm5, %v801_v26, 920167782  ;;  %v818_v37 = vsel %vm808_vm5, %v804_v27, 1326507024  ;;  %v896_v43 = vshll.u32 %v15483_v60, %v890_v59 }
 0x1d1   : > { %v815_v39 = vsel %vm807_vm4, %v798_v24, %v814_v33  ;;  %v819_v40 = vsel %vm807_vm4, %v801_v26, %v818_v37  ;;  %v812_v44 = vsel %vm806_vm3, %v809_v28, %v811_v32  ;;  %v897_v47 = vshrl.u32 %v15484_v62, %v891_v25 }
 0x1d2   : > { %v816_v45 = vsel %vm806_vm3, %v813_v30, %v815_v39  ;;  %v820_v46 = vsel %vm806_vm3, %v817_v31, %v819_v40  ;;  %v895_v55 = vor.u32 %v894_v42, %v893_v38  ;;  %v899_v61 = vshll.u32 %v15484_v62, %v890_v59 }
 0x1d3   : > { %v16103_v48 = vmul.u32.u64.low %v16091_v53, %v820_v46  ;;  %v16104_v49 = vmul.u32.u64.high %v16091_v53, %v820_v46, %v16103_v48  ;;  %v16107_v51 = vmul.u32.u64.low %v16091_v53, %v816_v45  ;;  %v16108_v52 = vmul.u32.u64.high %v16091_v53, %v816_v45, %v16107_v51 }
 0x1d4   : > { %v898_v57 = vor.u32 %v897_v47, %v896_v43  ;;  %v900_v63 = vshrl.u32 %v15485_v0, %v891_v25  ;;  %v902_v60 = vshll.u32 %v15485_v0, %v890_v59  ;;  %v903_v1 = vshrl.u32 %v15486_v2, %v891_v25 }
 0x1d5   : > { %v906_v7 = vshrl.u32 %v15487_v20, %v891_v25  ;;  %v924_v10 = vshll.u32 %v884_v54, 8  ;;  %v828_v50 = vmul.u32 %v16091_v53, %v812_v44  ;;  %v892_v11 = vshrl.u32 %v15482_v56, %v891_v25 }
 0x1d6   : > { %v901_v17 = vor.u32 %v900_v63, %v899_v61  ;;  %v905_v18 = vshll.u32 %v15486_v2, %v890_v59  ;;  %vm830_vm6 = vc.u32 %v16104_v49, %v16107_v51  ;;  %v831_v19 = vadd.s32 1, %v16108_v52 }
 0x1d7   : > { %v904_v21 = vor.u32 %v903_v1, %v902_v60  ;;  %vm908_vm7 = vcmp.lt.s32.totalorder %v16094_v58, 1  ;;  %vm910_vm8 = vcmp.lt.s32.totalorder %v16094_v58, 3  ;;  %vm911_vm9 = vcmp.lt.s32.totalorder %v16094_v58, 4 }
 0x1d8   : > { %v907_v22 = vor.u32 %v906_v7, %v905_v18  ;;  %v916_v62 = vsel %vm908_vm7, %v895_v55, %v898_v57  ;;  %v832_v54 = vsel %vm830_vm6, %v831_v19, %v16108_v52  ;;  %v913_v0 = vsel %vm911_vm9, %v901_v17, 2102212464 }
 0x1d9   : > { %v917_v53 = vsel %vm911_vm9, %v904_v21, 920167782  ;;  %v920_v56 = vsel %vm908_vm7, %v898_v57, %v901_v17  ;;  %v833_v20 = vadd.s32 %v832_v54, %v828_v50  ;;  %vm909_vm10 = vcmp.lt.s32.totalorder %v16094_v58, 2 }
 0x1da   : > { %v918_v59 = vsel %vm910_vm8, %v901_v17, %v917_v53  ;;  %v921_v2 = vsel %vm911_vm9, %v907_v22, 1326507024  ;;  %v912_v23 = vsel %vm908_vm7, %v892_v11, %v895_v55  ;;  %v914_v24 = vsel %vm910_vm8, %v898_v57, %v913_v0 }
 0x1db   : > { %v919_v25 = vsel %vm909_vm10, %v916_v62, %v918_v59  ;;  %v922_v26 = vsel %vm910_vm8, %v904_v21, %v921_v2  ;;  %v834_v27 = vadd.s32 536870912, %v833_v20  ;;  %v915_v37 = vsel %vm909_vm10, %v912_v23, %v914_v24 }
 0x1dc   : > { %v923_v28 = vsel %vm909_vm10, %v920_v56, %v922_v26  ;;  %v16118_v29 = vmul.u32.u64.low %v924_v10, %v919_v25  ;;  %v16119_v30 = vmul.u32.u64.high %v924_v10, %v919_v25, %v16118_v29  ;;  %v931_v58 = vmul.u32 %v924_v10, %v915_v37 }
 0x1dd   : > { %v16121_v31 = vmul.u32.u64.low %v924_v10, %v923_v28  ;;  %v16122_v32 = vmul.u32.u64.high %v924_v10, %v923_v28, %v16121_v31  ;;  %v835_v33 = vshrl.u32 %v834_v27, 30  ;;  %v829_v60 = vadd.s32 %v16107_v51, %v16104_v49 }
 0x1de   : > { %v934_v39 = vadd.s32 1, %v16119_v30  ;;  %vm865_vm5 = vweird.f32 %v16077_v34 }
 0x1df   : > { %v836_v38 = vshll.u32 %v835_v33, 30  ;;  %vm933_vm11 = vc.u32 %v16122_v32, %v16118_v29  ;;  %v932_v56 = vadd.s32 %v16118_v29, %v16122_v32  ;;  %v859_v25 = vsub.s32 4, %v835_v33 }
 0x1e0   : > { %v935_v42 = vsel %vm933_vm11, %v934_v39, %v16119_v30 }
 0x1e1   : > { %v837_v40 = vsub.s32 %v833_v20, %v836_v38  ;;  %v936_v43 = vadd.s32 %v935_v42, %v931_v58  ;;  %v860_v29 = vsel %vm775_vm14, %v859_v25, %v835_v33 }
 0x1e2   : > { %v862_v58 = vsel %vm774_vm15, 0, %v860_v29 }
 0x1e3   : > { %v839_v44 = vsub.s32 0, %v837_v40  ;;  %v937_v45 = vadd.s32 536870912, %v936_v43 }
 0x1e5   : > { %v12914_v46 = vmin.u32 %v839_v44, %v837_v40  ;;  %v938_v47 = vshrl.u32 %v937_v45, 30  ;;  %v866_v45 = vand.u32 3, %v862_v58 }
 0x1e7   : > { %v841_v48 = vclz %v12914_v46  ;;  %v939_v52 = vshll.u32 %v938_v47, 30  ;;  %v962_v39 = vsub.s32 4, %v938_v47  ;;  %vm871_vm2 = vcmp.eq.s32.totalorder %v866_v45, 2 }
 0x1e8   : > { %vm868_vm3 = vcmp.eq.s32.totalorder %v866_v45, 0  ;;  %vm867_vm4 = vcmp.lt.s32.totalorder %v866_v45, 2  ;;  %v12959_v45 = vcombine.low %v1346_v3, %v1350_v4 }
 0x1e9   : > { %v12915_v55 = vadd.s32 4294967294, %v841_v48  ;;  %v940_v57 = vsub.s32 %v936_v43, %v939_v52  ;;  %v963_v36 = vsel %vm878_vm0, %v962_v39, %v938_v47  ;;  %v1074_v43 = vadd.s32 3, %v862_v58  ;;  %v1345_v39 = vld [vmem:[%s15936_s4 + $0x4d0] sm:$0xff] }
 0x1ea   : > { %v965_v46 = vsel %vm877_vm1, 0, %v963_v36  ;;  %v1349_v58 = vld [vmem:[%s15936_s4 + $0x4f0] sm:$0xff]  ;;  %v1354_v36 = vld [vmem:[%s15936_s4 + $0x518] sm:$0xff] }
 0x1eb   : > { %vm12916_vm12 = vcmp.lt.s32.totalorder %v12915_v55, 0  ;;  %v942_v63 = vsub.s32 0, %v940_v57  ;;  %v12958_v8 = vcombine.high %v1345_v39, %v1349_v58 }
 0x1ec   : > { %v844_v61 = vsel %vm12916_vm12, 0, %v12915_v55  ;;  %v1075_v55 = vand.u32 3, %v1074_v43  ;;  %v1358_v43 = vld [vmem:[%s15936_s4 + $0x538] sm:$0xff] }
 0x1ed   : > { %v845_v1 = vsub.s32 32, %v844_v61  ;;  %v849_v7 = vsub.s32 4294967266, %v844_v61  ;;  %v12918_v10 = vmin.u32 %v942_v63, %v940_v57  ;;  %v846_v50 = vshll.u32 %v837_v40, %v844_v61 }
 0x1ee   : > { %v1178_v61 = vadd.s32 3, %v965_v46  ;;  %vm1077_vm6 = vcmp.eq.s32.totalorder %v1075_v55, 0  ;;  %vm1080_vm7 = vcmp.eq.s32.totalorder %v1075_v55, 2  ;;  %vm1076_vm8 = vcmp.lt.s32.totalorder %v1075_v55, 2  ;;  %v1362_v55 = vld [vmem:[%s15936_s4 + $0x558] sm:$0xff] }
 0x1ef   : > { %v847_v11 = vshrl.u32 %v829_v60, %v845_v1  ;;  %v850_v17 = vadd.s32 127, %v849_v7  ;;  %v944_v18 = vclz %v12918_v10 }
 0x1f0   : > { %v1179_v10 = vand.u32 3, %v1178_v61 }
 0x1f1   : > { %v848_v19 = vor.u32 %v847_v11, %v846_v50  ;;  %v851_v21 = vshll.u32 %v850_v17, 23  ;;  %v12919_v22 = vadd.s32 4294967294, %v944_v18  ;;  %v969_v50 = vand.u32 3, %v965_v46 }
 0x1f2   : > { %vm1184_vm9 = vcmp.eq.s32.totalorder %v1179_v10, 2  ;;  %vm1181_vm12 = vcmp.eq.s32.totalorder %v1179_v10, 0  ;;  %v12968_v46 = vcombine.high %v1354_v36, %v1358_v43 }
 0x1f3   : > { %v852_v62 = vor.u32 4788187, %v851_v21  ;;  %vm12920_vm13 = vcmp.lt.s32.totalorder %v12919_v22, 0  ;;  %v855_v0 = vcvt.s32.f32 %v848_v19  ;;  %vm971_vm10 = vcmp.eq.s32.totalorder %v969_v50, 0 }
 0x1f4   : > { %v947_v53 = vsel %vm12920_vm13, 0, %v12919_v22  ;;  %vm974_vm11 = vcmp.eq.s32.totalorder %v969_v50, 2  ;;  %vm1180_vm13 = vcmp.lt.s32.totalorder %v1179_v10, 2  ;;  %v1370_v10 = vld [vmem:[%s15936_s4 + $0x598] sm:$0xff] }
 0x1f5   : > { %v853_v54 = vand.u32 2147483647, %v852_v62  ;;  %v948_v20 = vsub.s32 32, %v947_v53  ;;  %v952_v59 = vsub.s32 4294967266, %v947_v53  ;;  %v949_v51 = vshll.u32 %v940_v57, %v947_v53 }
 0x1f7   : > { %v856_v49 = vmul.f32 %v855_v0, %v853_v54  ;;  %v950_v2 = vshrl.u32 %v932_v56, %v948_v20  ;;  %v953_v23 = vadd.s32 127, %v952_v59  ;;  %v1329_v20 = vld [vmem:[%s15936_s4 + $0x450] sm:$0xff] }
 0x1f9   : > { %v857_v24 = vxor.u32 2147483648, %v856_v49  ;;  %v951_v26 = vor.u32 %v950_v2, %v949_v51  ;;  %v954_v27 = vshll.u32 %v953_v23, 23  ;;  %v1333_v2 = vld [vmem:[%s15936_s4 + $0x470] sm:$0xff]  ;;  %v1334_v23 = vld [vmem:[%s15936_s4 + $0x478] sm:$0xff] }
 0x1fa   : > { %v12941_v29 = vcombine.low %v1329_v20, %v1333_v2 }
 0x1fb   : > { %v858_v28 = vsel %vm775_vm14, %v857_v24, %v856_v49  ;;  %v955_v31 = vor.u32 4788187, %v954_v27  ;;  %v958_v37 = vcvt.s32.f32 %v951_v26  ;;  %vm970_vm14 = vcmp.lt.s32.totalorder %v969_v50, 2  ;;  %v1337_v26 = vld [vmem:[%s15936_s4 + $0x490] sm:$0xff]  ;;  %v1374_v50 = vld [vmem:[%s15936_s4 + $0x5b8] sm:$0xff] }
 0x1fc   : > { %v861_v30 = vsel %vm774_vm15, %v16077_v34, %v858_v28  ;;  %vm968_vm15 = vweird.f32 %v16079_v35  ;;  %v1330_v34 = vld [vmem:[%s15936_s4 + $0x458] sm:$0xff]  ;;  %v1341_v28 = vld [vmem:[%s15936_s4 + $0x4b0] sm:$0xff] }
 0x1fd   : > { %15118 = vcosq.f32 %v861_v30  ;;  %v956_v32 = vand.u32 2147483647, %v955_v31  ;;  %v12944_v27 = vcombine.high %v1330_v34, %v1334_v23  ;;  %v1342_v31 = vld [vmem:[%s15936_s4 + $0x4b8] sm:$0xff]  ;;  %v12949_v5 = vcombine.low %v1337_v26, %v1341_v28 }
 0x1fe   : > { %15120 = vsinq.f32 %v861_v30  ;;  %v1338_v30 = vld [vmem:[%s15936_s4 + $0x498] sm:$0xff] }
 0x1ff   : > { %v959_v38 = vmul.f32 %v958_v37, %v956_v32  ;;  %v12943_v32 = vcombine.low %v1330_v34, %v1334_v23  ;;  %v12950_v37 = vcombine.high %v1337_v26, %v1341_v28  ;;  %v1390_v34 = vld [vmem:[%s15936_s4 + $0x638] sm:$0xff]  ;;  %v1397_v28 = vld [vmem:[%s15936_s4 + $0x670] sm:$0xff] }
 0x201   : > { %v960_v40 = vxor.u32 2147483648, %v959_v38 }
 0x203   : > { %v961_v42 = vsel %vm878_vm0, %v960_v40, %v959_v38  ;;  %v12952_v38 = vcombine.high %v1338_v30, %v1342_v31  ;;  %v1353_v40 = vld [vmem:[%s15936_s4 + $0x510] sm:$0xff] }
 0x204   : > { %v964_v44 = vsel %vm877_vm1, %v16079_v35, %v961_v42  ;;  %v12942_v35 = vcombine.high %v1329_v20, %v1333_v2  ;;  %v1357_v42 = vld [vmem:[%s15936_s4 + $0x530] sm:$0xff]  ;;  %v1386_v2 = vld [vmem:[%s15936_s4 + $0x618] sm:$0xff] }
 0x205   : > { %15122 = vcosq.f32 %v964_v44  ;;  %v12965_v61 = vcombine.low %v1353_v40, %v1357_v42 }
 0x206   : > { %15124 = vsinq.f32 %v964_v44  ;;  %v12957_v44 = vcombine.low %v1345_v39, %v1349_v58  ;;  %v1401_v39 = vld [vmem:[%s15936_s4 + $0x690] sm:$0xff] }
 0x207   : > { %v15119_v33 = vpop.eup %15118  ;;  %v1405_v58 = vld [vmem:[%s15936_s4 + $0x6b0] sm:$0xff] }
 0x208   : > { %v15121_v48 = vpop.eup %15120  ;;  %v872_v52 = vxor.u32 2147483648, %v15119_v33 }
 0x209   : > { %v869_v57 = vxor.u32 2147483648, %v15121_v48 }
 0x20a   : > { %v873_v63 = vsel %vm871_vm2, %v872_v52, %v15121_v48  ;;  %v1082_v1 = vsel %vm1080_vm7, %v872_v52, %v15121_v48  ;;  %v1361_v48 = vld [vmem:[%s15936_s4 + $0x550] sm:$0xff] }
 0x20b   : > { %v870_v41 = vsel %vm868_vm3, %v15119_v33, %v869_v57  ;;  %v1079_v60 = vsel %vm1077_vm6, %v15119_v33, %v869_v57  ;;  %v12966_v33 = vcombine.high %v1353_v40, %v1357_v42  ;;  %v1365_v52 = vld [vmem:[%s15936_s4 + $0x570] sm:$0xff]  ;;  %v1366_v57 = vld [vmem:[%s15936_s4 + $0x578] sm:$0xff] }
 0x20c   : > { %v874_v47 = vsel %vm867_vm4, %v870_v41, %v873_v63  ;;  %v1083_v17 = vsel %vm1076_vm8, %v1079_v60, %v1082_v1  ;;  %v12967_v63 = vcombine.low %v1354_v36, %v1358_v43  ;;  %v12974_v41 = vcombine.high %v1361_v48, %v1365_v52  ;;  %v1369_v60 = vld [vmem:[%s15936_s4 + $0x590] sm:$0xff]  ;;  %v1410_v36 = vld [vmem:[%s15936_s4 + $0x6d8] sm:$0xff] }
 0x20d   : > { %v16140_v7 = vsel %vm865_vm5, nan, %v874_v47  ;;  %v1084_v62 = vsel %vm865_vm5, nan, %v1083_v17  ;;  %v12976_v47 = vcombine.high %v1362_v55, %v1366_v57  ;;  %v1373_v1 = vld [vmem:[%s15936_s4 + $0x5b0] sm:$0xff]  ;;  %v12975_v17 = vcombine.low %v1362_v55, %v1366_v57  ;;  %v1414_v43 = vld [vmem:[%s15936_s4 + $0x6f8] sm:$0xff] }
 0x20e   : > { %v16146_v51 = vpack.c.bf16 %v1084_v62, %v1084_v62  ;;  %v1378_v62 = vld [vmem:[%s15936_s4 + $0x5d8] sm:$0xff]  ;;  %v1409_v40 = vld [vmem:[%s15936_s4 + $0x6d0] sm:$0xff] }
 0x20f   : > { %v15123_v11 = vpop.eup %15122  ;;  %v1413_v42 = vld [vmem:[%s15936_s4 + $0x6f0] sm:$0xff]  ;;  %v1418_v55 = vld [vmem:[%s15936_s4 + $0x718] sm:$0xff] }
 0x210   : > { %v15125_v18 = vpop.eup %15124  ;;  %v975_v19 = vxor.u32 2147483648, %v15123_v11  ;;  %v1422_v57 = vld [vmem:[%s15936_s4 + $0x738] sm:$0xff] }
 0x211   : > { %v972_v21 = vxor.u32 2147483648, %v15125_v18 }
 0x212   : > { %v1186_v22 = vsel %vm1184_vm9, %v975_v19, %v15125_v18  ;;  %v976_v54 = vsel %vm974_vm11, %v975_v19, %v15125_v18  ;;  %v12982_v18 = vcombine.high %v1369_v60, %v1373_v1  ;;  %v12984_v19 = vcombine.high %v1370_v10, %v1374_v50 }
 0x213   : > { %v1183_v0 = vsel %vm1181_vm12, %v15123_v11, %v972_v21  ;;  %v973_v53 = vsel %vm971_vm10, %v15123_v11, %v972_v21  ;;  %v12973_v11 = vcombine.low %v1361_v48, %v1365_v52  ;;  %v1377_v21 = vld [vmem:[%s15936_s4 + $0x5d0] sm:$0xff] }
 0x214   : > { %v1187_v56 = vsel %vm1180_vm13, %v1183_v0, %v1186_v22  ;;  %v977_v59 = vsel %vm970_vm14, %v973_v53, %v976_v54  ;;  %v1381_v22 = vld [vmem:[%s15936_s4 + $0x5f0] sm:$0xff]  ;;  %v1382_v54 = vld [vmem:[%s15936_s4 + $0x5f8] sm:$0xff]  ;;  %v12981_v0 = vcombine.low %v1369_v60, %v1373_v1  ;;  %v12983_v53 = vcombine.low %v1370_v10, %v1374_v50 }
 0x215   : > { %v1188_v49 = vsel %vm968_vm15, nan, %v1187_v56  ;;  %v16151_v24 = vsel %vm968_vm15, nan, %v977_v59  ;;  %v12990_v56 = vcombine.high %v1377_v21, %v1381_v22  ;;  %v12992_v20 = vcombine.high %v1378_v62, %v1382_v54  ;;  %v1385_v59 = vld [vmem:[%s15936_s4 + $0x610] sm:$0xff]  ;;  %v1426_v10 = vld [vmem:[%s15936_s4 + $0x758] sm:$0xff] }
 0x216   : > { %v1190_v25 = vpack.c.bf16 %v1188_v49, %v1188_v49  ;;  %v1389_v49 = vld [vmem:[%s15936_s4 + $0x630] sm:$0xff]  ;;  %v12989_v23 = vcombine.low %v1377_v21, %v1381_v22  ;;  %v1430_v50 = vld [vmem:[%s15936_s4 + $0x778] sm:$0xff] }
 0x217   : > { %v12998_v26 = vcombine.high %v1385_v59, %v1389_v49  ;;  %v1417_v48 = vld [vmem:[%s15936_s4 + $0x710] sm:$0xff] }
 0x218   : > { %2119 = vmatprep.mubr.bf16.mxu0 %v1190_v25  ;;  %2160 = vmatprep.mubr.bf16.mxu1 %v1190_v25  ;;  %v1421_v52 = vld [vmem:[%s15936_s4 + $0x730] sm:$0xff] }
 0x219   : > { %2120 = vmatmul.mubr.bf16.vlgmr.msra.gmra.mrb[0].mxu0 %v16146_v51  ;;  %2161 = vmatmul.mubr.bf16.vlgmr.msra.gmra.mrb[0].mxu1 %v16146_v51  ;;  %v1425_v60 = vld [vmem:[%s15936_s4 + $0x750] sm:$0xff] }
 0x21a   : > { %2170 = vmatpush1.bf16.msra.mxu0 %v12933_v6  ;;  %2211 = vmatpush1.bf16.msra.mxu1 %v12935_v9  ;;  %v12951_v6 = vcombine.low %v1338_v30, %v1342_v31  ;;  %v12960_v9 = vcombine.high %v1346_v3, %v1350_v4  ;;  %v1394_v30 = vld [vmem:[%s15936_s4 + $0x658] sm:$0xff]  ;;  %v1429_v1 = vld [vmem:[%s15936_s4 + $0x770] sm:$0xff] }
 0x21b   : > { %2201 = vmatprep.mubr.bf16.mxu0 %v1190_v25  ;;  %2242 = vmatprep.mubr.bf16.mxu1 %v1190_v25  ;;  %v12991_v25 = vcombine.low %v1378_v62, %v1382_v54  ;;  %v1398_v31 = vld [vmem:[%s15936_s4 + $0x678] sm:$0xff]  ;;  %v1433_v21 = vld [vmem:[%s15936_s4 + $0x790] sm:$0xff] }
 0x21c   : > { %2171 = vmatprep.subr.bf16.mxu0 %v12942_v35  ;;  %2212 = vmatprep.subr.bf16.mxu1 %v12944_v27  ;;  %v13000_v35 = vcombine.high %v1386_v2, %v1390_v34  ;;  %v1393_v27 = vld [vmem:[%s15936_s4 + $0x650] sm:$0xff]  ;;  %v1402_v3 = vld [vmem:[%s15936_s4 + $0x698] sm:$0xff] }
 0x21d   : > { %v1406_v4 = vld [vmem:[%s15936_s4 + $0x6b8] sm:$0xff]  ;;  %v1437_v22 = vld [vmem:[%s15936_s4 + $0x7b0] sm:$0xff] }
 0x21e   : > { %2172 = vmatpush1.bf16.msra.mxu0 %v12941_v29  ;;  %2213 = vmatpush1.bf16.msra.mxu1 %v12943_v32  ;;  %v12997_v29 = vcombine.low %v1385_v59, %v1389_v49  ;;  %v12999_v32 = vcombine.low %v1386_v2, %v1390_v34  ;;  %v1434_v62 = vld [vmem:[%s15936_s4 + $0x798] sm:$0xff]  ;;  %v1441_v59 = vld [vmem:[%s15936_s4 + $0x7d0] sm:$0xff] }
 0x21f   : > { %2173 = vmatprep.subr.bf16.mxu0 %v12950_v37  ;;  %2214 = vmatprep.subr.bf16.mxu1 %v12952_v38  ;;  %v13006_v37 = vcombine.high %v1393_v27, %v1397_v28  ;;  %v13008_v38 = vcombine.high %v1394_v30, %v1398_v31  ;;  %v1438_v54 = vld [vmem:[%s15936_s4 + $0x7b8] sm:$0xff]  ;;  %v1445_v49 = vld [vmem:[%s15936_s4 + $0x7f0] sm:$0xff] }
 0x220   : > { %v1442_v2 = vld [vmem:[%s15936_s4 + $0x7d8] sm:$0xff] }
 0x221   : > { %v1446_v34 = vld [vmem:[%s15936_s4 + $0x7f8] sm:$0xff] }
 0x222   : > { %2174 = vmatpush1.bf16.msra.mxu0 %v12949_v5  ;;  %2215 = vmatpush1.bf16.msra.mxu1 %v12951_v6  ;;  %v13005_v5 = vcombine.low %v1393_v27, %v1397_v28  ;;  %v13007_v6 = vcombine.low %v1394_v30, %v1398_v31  ;;  %v1191_v27 = vld [vmem:[%s15936_s4] sm:$0xff]  ;;  %v1192_v30 = vld [vmem:[%s15936_s4 + $0x8] sm:$0xff] }
 0x223   : > { %2175 = vmatprep.subr.bf16.mxu0 %v12958_v8  ;;  %2216 = vmatprep.subr.bf16.mxu1 %v12960_v9  ;;  %v13014_v8 = vcombine.high %v1401_v39, %v1405_v58  ;;  %v13016_v9 = vcombine.high %v1402_v3, %v1406_v4  ;;  %v1195_v28 = vld [vmem:[%s15936_s4 + $0x20] sm:$0xff]  ;;  %v1196_v31 = vld [vmem:[%s15936_s4 + $0x28] sm:$0xff] }
 0x226   : > { %2176 = vmatpush1.bf16.msra.mxu0 %v12957_v44  ;;  %2217 = vmatpush1.bf16.msra.mxu1 %v12959_v45  ;;  %v13013_v44 = vcombine.low %v1401_v39, %v1405_v58  ;;  %v13015_v45 = vcombine.low %v1402_v3, %v1406_v4  ;;  %v1199_v39 = vld [vmem:[%s15936_s4 + $0x40] sm:$0xff]  ;;  %v1200_v3 = vld [vmem:[%s15936_s4 + $0x48] sm:$0xff] }
 0x227   : > { %2177 = vmatprep.subr.bf16.mxu0 %v12966_v33  ;;  %2218 = vmatprep.subr.bf16.mxu1 %v12968_v46  ;;  %v13022_v33 = vcombine.high %v1409_v40, %v1413_v42  ;;  %v13024_v46 = vcombine.high %v1410_v36, %v1414_v43  ;;  %v1203_v58 = vld [vmem:[%s15936_s4 + $0x60] sm:$0xff]  ;;  %v1204_v4 = vld [vmem:[%s15936_s4 + $0x68] sm:$0xff] }
 0x22a   : > { %2178 = vmatpush1.bf16.msra.mxu0 %v12965_v61  ;;  %2219 = vmatpush1.bf16.msra.mxu1 %v12967_v63  ;;  %v13021_v61 = vcombine.low %v1409_v40, %v1413_v42  ;;  %v13023_v63 = vcombine.low %v1410_v36, %v1414_v43  ;;  %v13068_v40 = vcombine.high %v1200_v3, %v1204_v4  ;;  %v1207_v42 = vld [vmem:[%s15936_s4 + $0x80] sm:$0xff]  ;;  %v1208_v43 = vld [vmem:[%s15936_s4 + $0x88] sm:$0xff] }
 0x22b   : > { %2179 = vmatprep.subr.bf16.mxu0 %v12974_v41  ;;  %2220 = vmatprep.subr.bf16.mxu1 %v12976_v47  ;;  %v13030_v41 = vcombine.high %v1417_v48, %v1421_v52  ;;  %v13032_v47 = vcombine.high %v1418_v55, %v1422_v57  ;;  %v1211_v36 = vld [vmem:[%s15936_s4 + $0xa0] sm:$0xff] }
 0x22e   : > { %2180 = vmatpush1.bf16.msra.mxu0 %v12973_v11  ;;  %2221 = vmatpush1.bf16.msra.mxu1 %v12975_v17  ;;  %v13029_v11 = vcombine.low %v1417_v48, %v1421_v52  ;;  %v13031_v17 = vcombine.low %v1418_v55, %v1422_v57  ;;  %v1219_v48 = vld [vmem:[%s15936_s4 + $0xe0] sm:$0xff]  ;;  %v1216_v52 = vld [vmem:[%s15936_s4 + $0xc8] sm:$0xff]  ;;  %v13073_v57 = vcombine.low %v1207_v42, %v1211_v36 }
 0x22f   : > { %2181 = vmatprep.subr.bf16.mxu0 %v12982_v18  ;;  %2222 = vmatprep.subr.bf16.mxu1 %v12984_v19  ;;  %v13038_v18 = vcombine.high %v1425_v60, %v1429_v1  ;;  %v13040_v19 = vcombine.high %v1426_v10, %v1430_v50  ;;  %v1220_v55 = vld [vmem:[%s15936_s4 + $0xe8] sm:$0xff] }
 0x232   : > { %2182 = vmatpush1.bf16.msra.mxu0 %v12981_v0  ;;  %2223 = vmatpush1.bf16.msra.mxu1 %v12983_v53  ;;  %v13037_v0 = vcombine.low %v1425_v60, %v1429_v1  ;;  %v13039_v53 = vcombine.low %v1426_v10, %v1430_v50  ;;  %v1227_v60 = vld [vmem:[%s15936_s4 + $0x120] sm:$0xff]  ;;  %v1224_v1 = vld [vmem:[%s15936_s4 + $0x108] sm:$0xff] }
 0x233   : > { %2183 = vmatprep.subr.bf16.mxu0 %v12990_v56  ;;  %2224 = vmatprep.subr.bf16.mxu1 %v12992_v20  ;;  %v13046_v56 = vcombine.high %v1433_v21, %v1437_v22  ;;  %v13048_v20 = vcombine.high %v1434_v62, %v1438_v54  ;;  %v1228_v10 = vld [vmem:[%s15936_s4 + $0x128] sm:$0xff] }
 0x236   : > { %2184 = vmatpush1.bf16.msra.mxu0 %v12989_v23  ;;  %2225 = vmatpush1.bf16.msra.mxu1 %v12991_v25  ;;  %v13045_v23 = vcombine.low %v1433_v21, %v1437_v22  ;;  %v13047_v25 = vcombine.low %v1434_v62, %v1438_v54  ;;  %v1235_v21 = vld [vmem:[%s15936_s4 + $0x160] sm:$0xff]  ;;  %v1232_v22 = vld [vmem:[%s15936_s4 + $0x148] sm:$0xff] }
 0x237   : > { %2185 = vmatprep.subr.bf16.mxu0 %v12998_v26  ;;  %2226 = vmatprep.subr.bf16.mxu1 %v13000_v35  ;;  %v13054_v26 = vcombine.high %v1441_v59, %v1445_v49  ;;  %v13056_v35 = vcombine.high %v1442_v2, %v1446_v34  ;;  %v1236_v62 = vld [vmem:[%s15936_s4 + $0x168] sm:$0xff] }
 0x23a   : > { %2186 = vmatpush1.bf16.msra.mxu0 %v12997_v29  ;;  %2227 = vmatpush1.bf16.msra.mxu1 %v12999_v32  ;;  %v13053_v29 = vcombine.low %v1441_v59, %v1445_v49  ;;  %v13055_v32 = vcombine.low %v1442_v2, %v1446_v34  ;;  %v1243_v59 = vld [vmem:[%s15936_s4 + $0x1a0] sm:$0xff]  ;;  %v1240_v49 = vld [vmem:[%s15936_s4 + $0x188] sm:$0xff] }
 0x23b   : > { %2187 = vmatprep.subr.bf16.mxu0 %v13006_v37  ;;  %2228 = vmatprep.subr.bf16.mxu1 %v13008_v38  ;;  %v13058_v37 = vcombine.high %v1191_v27, %v1195_v28  ;;  %v13060_v38 = vcombine.high %v1192_v30, %v1196_v31  ;;  %v1244_v2 = vld [vmem:[%s15936_s4 + $0x1a8] sm:$0xff] }
 0x23e   : > { %2188 = vmatpush1.bf16.msra.mxu0 %v13005_v5  ;;  %2229 = vmatpush1.bf16.msra.mxu1 %v13007_v6  ;;  %v13057_v5 = vcombine.low %v1191_v27, %v1195_v28  ;;  %v13059_v6 = vcombine.low %v1192_v30, %v1196_v31  ;;  %v1251_v27 = vld [vmem:[%s15936_s4 + $0x1e0] sm:$0xff]  ;;  %v1248_v28 = vld [vmem:[%s15936_s4 + $0x1c8] sm:$0xff] }
 0x23f   : > { %2189 = vmatprep.subr.bf16.mxu0 %v13014_v8  ;;  %2230 = vmatprep.subr.bf16.mxu1 %v13016_v9  ;;  %v16227_v8 = vpack.c.bf16 %v16151_v24, %v16151_v24  ;;  %v13066_v9 = vcombine.high %v1199_v39, %v1203_v58  ;;  %v13067_v24 = vcombine.low %v1200_v3, %v1204_v4  ;;  %v1252_v30 = vld [vmem:[%s15936_s4 + $0x1e8] sm:$0xff] }
 0x240   : > { %v1260_v3 = vld [vmem:[%s15936_s4 + $0x228] sm:$0xff] }
 0x242   : > { %2190 = vmatpush1.bf16.msra.mxu0 %v13013_v44  ;;  %2231 = vmatpush1.bf16.msra.mxu1 %v13015_v45  ;;  %v1212_v44 = vld [vmem:[%s15936_s4 + $0xa8] sm:$0xff]  ;;  %v13065_v45 = vcombine.low %v1199_v39, %v1203_v58  ;;  %v1259_v39 = vld [vmem:[%s15936_s4 + $0x220] sm:$0xff] }
 0x243   : > { %2191 = vmatprep.subr.bf16.mxu0 %v13022_v33  ;;  %2232 = vmatprep.subr.bf16.mxu1 %v13024_v46  ;;  %v13074_v33 = vcombine.high %v1207_v42, %v1211_v36  ;;  %v13076_v46 = vcombine.high %v1208_v43, %v1212_v44  ;;  %v1256_v58 = vld [vmem:[%s15936_s4 + $0x208] sm:$0xff]  ;;  %v1267_v42 = vld [vmem:[%s15936_s4 + $0x260] sm:$0xff] }
 0x244   : > { %v1264_v36 = vld [vmem:[%s15936_s4 + $0x248] sm:$0xff] }
 0x246   : > { %2192 = vmatpush1.bf16.msra.mxu0 %v13021_v61  ;;  %2233 = vmatpush1.bf16.msra.mxu1 %v13023_v63  ;;  %v13075_v61 = vcombine.low %v1208_v43, %v1212_v44  ;;  %v1268_v43 = vld [vmem:[%s15936_s4 + $0x268] sm:$0xff] }
 0x247   : > { %2193 = vmatprep.subr.bf16.mxu0 %v13030_v41  ;;  %2234 = vmatprep.subr.bf16.mxu1 %v13032_v47  ;;  %v13084_v41 = vcombine.high %v1216_v52, %v1220_v55  ;;  %v1223_v47 = vld [vmem:[%s15936_s4 + $0x100] sm:$0xff] }
 0x248   : > { %v13089_v54 = vcombine.low %v1223_v47, %v1227_v60 }
 0x24a   : > { %2194 = vmatpush1.bf16.msra.mxu0 %v13029_v11  ;;  %2235 = vmatpush1.bf16.msra.mxu1 %v13031_v17  ;;  %v13083_v11 = vcombine.low %v1216_v52, %v1220_v55  ;;  %v13090_v17 = vcombine.high %v1223_v47, %v1227_v60  ;;  %v1276_v52 = vld [vmem:[%s15936_s4 + $0x2a8] sm:$0xff]  ;;  %v1283_v47 = vld [vmem:[%s15936_s4 + $0x2e0] sm:$0xff] }
 0x24b   : > { %2195 = vmatprep.subr.bf16.mxu0 %v13038_v18  ;;  %2236 = vmatprep.subr.bf16.mxu1 %v13040_v19  ;;  %v13092_v18 = vcombine.high %v1224_v1, %v1228_v10  ;;  %v1231_v19 = vld [vmem:[%s15936_s4 + $0x140] sm:$0xff]  ;;  %v1280_v60 = vld [vmem:[%s15936_s4 + $0x2c8] sm:$0xff] }
 0x24c   : > { %v13097_v34 = vcombine.low %v1231_v19, %v1235_v21 }
 0x24e   : > { %2196 = vmatpush1.bf16.msra.mxu0 %v13037_v0  ;;  %2237 = vmatpush1.bf16.msra.mxu1 %v13039_v53  ;;  %v13091_v0 = vcombine.low %v1224_v1, %v1228_v10  ;;  %v13098_v53 = vcombine.high %v1231_v19, %v1235_v21  ;;  %v1284_v1 = vld [vmem:[%s15936_s4 + $0x2e8] sm:$0xff]  ;;  %v1291_v19 = vld [vmem:[%s15936_s4 + $0x320] sm:$0xff] }
 0x24f   : > { %2197 = vmatprep.subr.bf16.mxu0 %v13046_v56  ;;  %2238 = vmatprep.subr.bf16.mxu1 %v13048_v20  ;;  %v13100_v56 = vcombine.high %v1232_v22, %v1236_v62  ;;  %v1239_v20 = vld [vmem:[%s15936_s4 + $0x180] sm:$0xff]  ;;  %v1288_v21 = vld [vmem:[%s15936_s4 + $0x308] sm:$0xff] }
 0x250   : > { %v13105_v31 = vcombine.low %v1239_v20, %v1243_v59 }
 0x252   : > { %2198 = vmatpush1.bf16.msra.mxu0 %v13045_v23  ;;  %2239 = vmatpush1.bf16.msra.mxu1 %v13047_v25  ;;  %v13099_v23 = vcombine.low %v1232_v22, %v1236_v62  ;;  %v13106_v25 = vcombine.high %v1239_v20, %v1243_v59  ;;  %v1292_v22 = vld [vmem:[%s15936_s4 + $0x328] sm:$0xff]  ;;  %v1299_v20 = vld [vmem:[%s15936_s4 + $0x360] sm:$0xff] }
 0x253   : > { %2199 = vmatprep.subr.bf16.mxu0 %v13054_v26  ;;  %2240 = vmatprep.subr.bf16.mxu1 %v13056_v35  ;;  %v13108_v26 = vcombine.high %v1240_v49, %v1244_v2  ;;  %v1247_v35 = vld [vmem:[%s15936_s4 + $0x1c0] sm:$0xff]  ;;  %v1296_v59 = vld [vmem:[%s15936_s4 + $0x348] sm:$0xff] }
 0x254   : > { %v13113_v4 = vcombine.low %v1247_v35, %v1251_v27 }
 0x256   : > { %2200 = vmatpush1.bf16.msra.mxu0 %v13053_v29  ;;  %2241 = vmatpush1.bf16.msra.mxu1 %v13055_v32  ;;  %v13107_v29 = vcombine.low %v1240_v49, %v1244_v2  ;;  %v13114_v32 = vcombine.high %v1247_v35, %v1251_v27  ;;  %v1300_v49 = vld [vmem:[%s15936_s4 + $0x368] sm:$0xff]  ;;  %v1307_v35 = vld [vmem:[%s15936_s4 + $0x3a0] sm:$0xff] }
 0x257   : > { %2891 = vmatprep.subr.bf16.mxu0 %v13058_v37  ;;  %2932 = vmatprep.subr.bf16.mxu1 %v13060_v38  ;;  %v13116_v37 = vcombine.high %v1248_v28, %v1252_v30  ;;  %v1255_v38 = vld [vmem:[%s15936_s4 + $0x200] sm:$0xff]  ;;  %v1304_v27 = vld [vmem:[%s15936_s4 + $0x388] sm:$0xff] }
 0x258   : > { %v13121_v44 = vcombine.low %v1255_v38, %v1259_v39 }
 0x259   : > { %2202 = vmatmul.mubr.bf16.vlgmr.msra.gmra.mrb[4].mxu0 %v16146_v51  ;;  %2243 = vmatmul.mubr.bf16.vlgmr.msra.gmra.mrb[4].mxu1 %v16146_v51  ;;  %v1215_v51 = vld [vmem:[%s15936_s4 + $0xc0] sm:$0xff] }
 0x25a   : > { %2892 = vmatpush1.bf16.msra.mxu0 %v13057_v5  ;;  %2923 = vmatprep.mubr.bf16.mxu0 %v16227_v8  ;;  %v13082_v63 = vcombine.high %v1215_v51, %v1219_v48  ;;  %v13081_v50 = vcombine.low %v1215_v51, %v1219_v48  ;;  %v13115_v5 = vcombine.low %v1248_v28, %v1252_v30  ;;  %v1275_v51 = vld [vmem:[%s15936_s4 + $0x2a0] sm:$0xff]  ;;  %v1272_v48 = vld [vmem:[%s15936_s4 + $0x288] sm:$0xff] }
 0x25b   : > { %2933 = vmatpush1.bf16.msra.mxu1 %v13059_v6  ;;  %2964 = vmatprep.mubr.bf16.mxu1 %v16227_v8  ;;  %v13122_v6 = vcombine.high %v1255_v38, %v1259_v39  ;;  %v1308_v28 = vld [vmem:[%s15936_s4 + $0x3a8] sm:$0xff]  ;;  %v1315_v38 = vld [vmem:[%s15936_s4 + $0x3e0] sm:$0xff] }
 0x25c   : > { %2893 = vmatprep.subr.bf16.mxu0 %v13066_v9  ;;  %2934 = vmatprep.subr.bf16.mxu1 %v13068_v40  ;;  %v13124_v9 = vcombine.high %v1256_v58, %v1260_v3  ;;  %v1263_v40 = vld [vmem:[%s15936_s4 + $0x240] sm:$0xff]  ;;  %v1312_v39 = vld [vmem:[%s15936_s4 + $0x3c8] sm:$0xff] }
 0x25d   : > { %v13129_v55 = vcombine.low %v1263_v40, %v1267_v42 }
 0x25e   : > { %2894 = vmatpush1.bf16.msra.mxu0 %v13065_v45  ;;  %v13123_v45 = vcombine.low %v1256_v58, %v1260_v3  ;;  %v1316_v58 = vld [vmem:[%s15936_s4 + $0x3e8] sm:$0xff] }
 0x25f   : > { %2935 = vmatpush1.bf16.msra.mxu1 %v13067_v24  ;;  %2895 = vmatprep.subr.bf16.mxu0 %v13074_v33  ;;  %v13130_v24 = vcombine.high %v1263_v40, %v1267_v42  ;;  %v13132_v33 = vcombine.high %v1264_v36, %v1268_v43  ;;  %v1197_v40 = vld [vmem:[%s15936_s4 + $0x30] sm:$0xff]  ;;  %v1194_v42 = vld [vmem:[%s15936_s4 + $0x18] sm:$0xff] }
 0x260   : > { %2936 = vmatprep.subr.bf16.mxu1 %v13076_v46  ;;  %v1271_v46 = vld [vmem:[%s15936_s4 + $0x280] sm:$0xff] }
 0x261   : > { %v13137_v10 = vcombine.low %v1271_v46, %v1275_v51 }
 0x262   : > { %2896 = vmatpush1.bf16.msra.mxu0 %v13073_v57  ;;  %v13131_v57 = vcombine.low %v1264_v36, %v1268_v43  ;;  %v1198_v36 = vld [vmem:[%s15936_s4 + $0x38] sm:$0xff] }
 0x263   : > { %2937 = vmatpush1.bf16.msra.mxu1 %v13075_v61  ;;  %2897 = vmatprep.subr.bf16.mxu0 %v13082_v63  ;;  %v13138_v61 = vcombine.high %v1271_v46, %v1275_v51  ;;  %v13140_v63 = vcombine.high %v1272_v48, %v1276_v52  ;;  %v1205_v46 = vld [vmem:[%s15936_s4 + $0x70] sm:$0xff] }
 0x264   : > { %2938 = vmatprep.subr.bf16.mxu1 %v13084_v41  ;;  %v1279_v41 = vld [vmem:[%s15936_s4 + $0x2c0] sm:$0xff] }
 0x265   : > { %v13145_v62 = vcombine.low %v1279_v41, %v1283_v47 }
 0x266   : > { %2898 = vmatpush1.bf16.msra.mxu0 %v13081_v50  ;;  %v13139_v50 = vcombine.low %v1272_v48, %v1276_v52  ;;  %v1202_v48 = vld [vmem:[%s15936_s4 + $0x58] sm:$0xff] }
 0x267   : > { %2939 = vmatpush1.bf16.msra.mxu1 %v13083_v11  ;;  %2899 = vmatprep.subr.bf16.mxu0 %v13090_v17  ;;  %v13146_v11 = vcombine.high %v1279_v41, %v1283_v47  ;;  %v13148_v17 = vcombine.high %v1280_v60, %v1284_v1  ;;  %v1206_v52 = vld [vmem:[%s15936_s4 + $0x78] sm:$0xff]  ;;  %v1213_v41 = vld [vmem:[%s15936_s4 + $0xb0] sm:$0xff] }
 0x268   : > { %2940 = vmatprep.subr.bf16.mxu1 %v13092_v18  ;;  %v1287_v18 = vld [vmem:[%s15936_s4 + $0x300] sm:$0xff]  ;;  %v13072_v47 = vcombine.high %v1202_v48, %v1206_v52 }
 0x269   : > { %v13153_v2 = vcombine.low %v1287_v18, %v1291_v19 }
 0x26a   : > { %2900 = vmatpush1.bf16.msra.mxu0 %v13089_v54  ;;  %v13147_v54 = vcombine.low %v1280_v60, %v1284_v1  ;;  %v1210_v60 = vld [vmem:[%s15936_s4 + $0x98] sm:$0xff] }
 0x26b   : > { %2941 = vmatpush1.bf16.msra.mxu1 %v13091_v0  ;;  %2901 = vmatprep.subr.bf16.mxu0 %v13098_v53  ;;  %v13154_v0 = vcombine.high %v1287_v18, %v1291_v19  ;;  %v13156_v53 = vcombine.high %v1288_v21, %v1292_v22  ;;  %v1214_v1 = vld [vmem:[%s15936_s4 + $0xb8] sm:$0xff]  ;;  %v1221_v18 = vld [vmem:[%s15936_s4 + $0xf0] sm:$0xff] }
 0x26c   : > { %2942 = vmatprep.subr.bf16.mxu1 %v13100_v56  ;;  %v1295_v56 = vld [vmem:[%s15936_s4 + $0x340] sm:$0xff]  ;;  %v1218_v19 = vld [vmem:[%s15936_s4 + $0xd8] sm:$0xff] }
 0x26d   : > { %v13161_v30 = vcombine.low %v1295_v56, %v1299_v20 }
 0x26e   : > { %2902 = vmatpush1.bf16.msra.mxu0 %v13097_v34  ;;  %v13155_v34 = vcombine.low %v1288_v21, %v1292_v22  ;;  %v1222_v21 = vld [vmem:[%s15936_s4 + $0xf8] sm:$0xff] }
 0x26f   : > { %2943 = vmatpush1.bf16.msra.mxu1 %v13099_v23  ;;  %2903 = vmatprep.subr.bf16.mxu0 %v13106_v25  ;;  %v13162_v23 = vcombine.high %v1295_v56, %v1299_v20  ;;  %v13164_v25 = vcombine.high %v1296_v59, %v1300_v49  ;;  %v1226_v56 = vld [vmem:[%s15936_s4 + $0x118] sm:$0xff] }
 0x270   : > { %2944 = vmatprep.subr.bf16.mxu1 %v13108_v26  ;;  %v1303_v26 = vld [vmem:[%s15936_s4 + $0x380] sm:$0xff]  ;;  %v1230_v20 = vld [vmem:[%s15936_s4 + $0x138] sm:$0xff] }
 0x271   : > { %v13169_v3 = vcombine.low %v1303_v26, %v1307_v35 }
 0x272   : > { %2904 = vmatpush1.bf16.msra.mxu0 %v13105_v31  ;;  %v13163_v31 = vcombine.low %v1296_v59, %v1300_v49  ;;  %v13087_v49 = vcombine.low %v1218_v19, %v1222_v21 }
 0x273   : > { %2945 = vmatpush1.bf16.msra.mxu1 %v13107_v29  ;;  %2905 = vmatprep.subr.bf16.mxu0 %v13114_v32  ;;  %v13170_v29 = vcombine.high %v1303_v26, %v1307_v35  ;;  %v13172_v32 = vcombine.high %v1304_v27, %v1308_v28  ;;  %v1234_v26 = vld [vmem:[%s15936_s4 + $0x158] sm:$0xff] }
 0x274   : > { %2946 = vmatprep.subr.bf16.mxu1 %v13116_v37  ;;  %v1311_v37 = vld [vmem:[%s15936_s4 + $0x3c0] sm:$0xff]  ;;  %v1238_v35 = vld [vmem:[%s15936_s4 + $0x178] sm:$0xff] }
 0x275   : > { %v13177_v43 = vcombine.low %v1311_v37, %v1315_v38 }
 0x276   : > { %2906 = vmatpush1.bf16.msra.mxu0 %v13113_v4  ;;  %v13171_v4 = vcombine.low %v1304_v27, %v1308_v28  ;;  %v13095_v28 = vcombine.low %v1226_v56, %v1230_v20 }
 0x277   : > { %2947 = vmatpush1.bf16.msra.mxu1 %v13115_v5  ;;  %2907 = vmatprep.subr.bf16.mxu0 %v13122_v6  ;;  %v13178_v5 = vcombine.high %v1311_v37, %v1315_v38  ;;  %v13180_v6 = vcombine.high %v1312_v39, %v1316_v58  ;;  %v1242_v37 = vld [vmem:[%s15936_s4 + $0x198] sm:$0xff] }
 0x278   : > { %2948 = vmatprep.subr.bf16.mxu1 %v13124_v9  ;;  %v1193_v9 = vld [vmem:[%s15936_s4 + $0x10] sm:$0xff]  ;;  %v1246_v38 = vld [vmem:[%s15936_s4 + $0x1b8] sm:$0xff] }
 0x279   : > { %v13061_v51 = vcombine.low %v1193_v9, %v1197_v40 }
 0x27a   : > { %2908 = vmatpush1.bf16.msra.mxu0 %v13121_v44  ;;  %v13179_v44 = vcombine.low %v1312_v39, %v1316_v58  ;;  %v13103_v58 = vcombine.low %v1234_v26, %v1238_v35 }
 0x27b   : > { %2949 = vmatpush1.bf16.msra.mxu1 %v13123_v45  ;;  %2909 = vmatprep.subr.bf16.mxu0 %v13130_v24  ;;  %v13062_v45 = vcombine.high %v1193_v9, %v1197_v40  ;;  %v13064_v24 = vcombine.high %v1194_v42, %v1198_v36  ;;  %v1250_v9 = vld [vmem:[%s15936_s4 + $0x1d8] sm:$0xff] }
 0x27c   : > { %2950 = vmatprep.subr.bf16.mxu1 %v13132_v33  ;;  %v1201_v33 = vld [vmem:[%s15936_s4 + $0x50] sm:$0xff]  ;;  %v1254_v40 = vld [vmem:[%s15936_s4 + $0x1f8] sm:$0xff] }
 0x27e   : > { %2910 = vmatpush1.bf16.msra.mxu0 %v13129_v55  ;;  %v16299_v55 = vpack.c.bf16 %v16140_v7, %v16140_v7  ;;  %v13069_v7 = vcombine.low %v1201_v33, %v1205_v46 }
 0x27f   : > { %2951 = vmatpush1.bf16.msra.mxu1 %v13131_v57  ;;  %2911 = vmatprep.subr.bf16.mxu0 %v13138_v61  ;;  %v13063_v57 = vcombine.low %v1194_v42, %v1198_v36  ;;  %v13070_v61 = vcombine.high %v1201_v33, %v1205_v46  ;;  %v13111_v36 = vcombine.low %v1242_v37, %v1246_v38  ;;  %v1258_v33 = vld [vmem:[%s15936_s4 + $0x218] sm:$0xff] }
 0x280   : > { %2952 = vmatprep.subr.bf16.mxu1 %v13140_v63  ;;  %v1209_v63 = vld [vmem:[%s15936_s4 + $0x90] sm:$0xff]  ;;  %v1262_v46 = vld [vmem:[%s15936_s4 + $0x238] sm:$0xff] }
 0x281   : > { %v13077_v22 = vcombine.low %v1209_v63, %v1213_v41 }
 0x282   : > { %2912 = vmatpush1.bf16.msra.mxu0 %v13137_v10  ;;  %v13071_v10 = vcombine.low %v1202_v48, %v1206_v52  ;;  %v13119_v48 = vcombine.low %v1250_v9, %v1254_v40 }
 0x283   : > { %2953 = vmatpush1.bf16.msra.mxu1 %v13139_v50  ;;  %2913 = vmatprep.subr.bf16.mxu0 %v13146_v11  ;;  %v13078_v50 = vcombine.high %v1209_v63, %v1213_v41  ;;  %v13080_v11 = vcombine.high %v1210_v60, %v1214_v1  ;;  %v1269_v63 = vld [vmem:[%s15936_s4 + $0x270] sm:$0xff]  ;;  %v1266_v41 = vld [vmem:[%s15936_s4 + $0x258] sm:$0xff] }
 0x284   : > { %2954 = vmatprep.subr.bf16.mxu1 %v13148_v17  ;;  %v1217_v17 = vld [vmem:[%s15936_s4 + $0xd0] sm:$0xff] }
 0x285   : > { %v13085_v59 = vcombine.low %v1217_v17, %v1221_v18 }
 0x286   : > { %2914 = vmatpush1.bf16.msra.mxu0 %v13145_v62  ;;  %v13079_v62 = vcombine.low %v1210_v60, %v1214_v1  ;;  %v13127_v1 = vcombine.low %v1258_v33, %v1262_v46 }
 0x287   : > { %2955 = vmatpush1.bf16.msra.mxu1 %v13147_v54  ;;  %2915 = vmatprep.subr.bf16.mxu0 %v13154_v0  ;;  %v13086_v54 = vcombine.high %v1217_v17, %v1221_v18  ;;  %v1225_v0 = vld [vmem:[%s15936_s4 + $0x110] sm:$0xff]  ;;  %v1274_v17 = vld [vmem:[%s15936_s4 + $0x298] sm:$0xff] }
 0x288   : > { %2956 = vmatprep.subr.bf16.mxu1 %v13156_v53  ;;  %v1229_v53 = vld [vmem:[%s15936_s4 + $0x130] sm:$0xff]  ;;  %v1278_v18 = vld [vmem:[%s15936_s4 + $0x2b8] sm:$0xff] }
 0x289   : > { %v13093_v27 = vcombine.low %v1225_v0, %v1229_v53 }
 0x28a   : > { %2916 = vmatpush1.bf16.msra.mxu0 %v13153_v2  ;;  %v13094_v2 = vcombine.high %v1225_v0, %v1229_v53  ;;  %v1282_v0 = vld [vmem:[%s15936_s4 + $0x2d8] sm:$0xff] }
 0x28b   : > { %2957 = vmatpush1.bf16.msra.mxu1 %v13155_v34  ;;  %2917 = vmatprep.subr.bf16.mxu0 %v13162_v23  ;;  %v13096_v34 = vcombine.high %v1226_v56, %v1230_v20  ;;  %v1233_v23 = vld [vmem:[%s15936_s4 + $0x150] sm:$0xff]  ;;  %v1286_v53 = vld [vmem:[%s15936_s4 + $0x2f8] sm:$0xff]  ;;  %v13143_v20 = vcombine.low %v1274_v17, %v1278_v18 }
 0x28c   : > { %2958 = vmatprep.subr.bf16.mxu1 %v13164_v25  ;;  %v1237_v25 = vld [vmem:[%s15936_s4 + $0x170] sm:$0xff] }
 0x28d   : > { %v13101_v39 = vcombine.low %v1233_v23, %v1237_v25 }
 0x28e   : > { %2918 = vmatpush1.bf16.msra.mxu0 %v13161_v30  ;;  %v13102_v30 = vcombine.high %v1233_v23, %v1237_v25  ;;  %v1290_v23 = vld [vmem:[%s15936_s4 + $0x318] sm:$0xff] }
 0x28f   : > { %2959 = vmatpush1.bf16.msra.mxu1 %v13163_v31  ;;  %2919 = vmatprep.subr.bf16.mxu0 %v13170_v29  ;;  %v13104_v31 = vcombine.high %v1234_v26, %v1238_v35  ;;  %v1241_v29 = vld [vmem:[%s15936_s4 + $0x190] sm:$0xff]  ;;  %v1294_v25 = vld [vmem:[%s15936_s4 + $0x338] sm:$0xff]  ;;  %v13151_v35 = vcombine.low %v1282_v0, %v1286_v53 }
 0x290   : > { %2960 = vmatprep.subr.bf16.mxu1 %v13172_v32  ;;  %v1245_v32 = vld [vmem:[%s15936_s4 + $0x1b0] sm:$0xff] }
 0x291   : > { %v13109_v42 = vcombine.low %v1241_v29, %v1245_v32 }
 0x292   : > { %2920 = vmatpush1.bf16.msra.mxu0 %v13169_v3  ;;  %v13110_v3 = vcombine.high %v1241_v29, %v1245_v32  ;;  %v1298_v29 = vld [vmem:[%s15936_s4 + $0x358] sm:$0xff] }
 0x293   : > { %2961 = vmatpush1.bf16.msra.mxu1 %v13171_v4  ;;  %2921 = vmatprep.subr.bf16.mxu0 %v13178_v5  ;;  %v13112_v4 = vcombine.high %v1242_v37, %v1246_v38  ;;  %v1249_v5 = vld [vmem:[%s15936_s4 + $0x1d0] sm:$0xff]  ;;  %v1302_v32 = vld [vmem:[%s15936_s4 + $0x378] sm:$0xff]  ;;  %v13159_v38 = vcombine.low %v1290_v23, %v1294_v25 }
 0x294   : > { %2962 = vmatprep.subr.bf16.mxu1 %v13180_v6  ;;  %v1253_v6 = vld [vmem:[%s15936_s4 + $0x1f0] sm:$0xff] }
 0x296   : > { %2922 = vmatpush1.bf16.msra.mxu0 %v13177_v43  ;;  %v13118_v43 = vcombine.high %v1249_v5, %v1253_v6 }
 0x297   : > { %2963 = vmatpush1.bf16.msra.mxu1 %v13179_v44  ;;  %2973 = vmatprep.subr.bf16.mxu0 %v13062_v45  ;;  %v13120_v44 = vcombine.high %v1250_v9, %v1254_v40  ;;  %v1257_v45 = vld [vmem:[%s15936_s4 + $0x210] sm:$0xff]  ;;  %v13167_v40 = vcombine.low %v1298_v29, %v1302_v32 }
 0x298   : > { %3014 = vmatprep.subr.bf16.mxu1 %v13064_v24  ;;  %v1261_v24 = vld [vmem:[%s15936_s4 + $0x230] sm:$0xff] }
 0x299   : > { %2924 = vmatmul.mubr.bf16.vlgmr.msra.gmra.mrb[8].mxu0 %v16299_v55  ;;  %v13126_v52 = vcombine.high %v1257_v45, %v1261_v24  ;;  %v13125_v60 = vcombine.low %v1257_v45, %v1261_v24  ;;  %v1314_v45 = vld [vmem:[%s15936_s4 + $0x3d8] sm:$0xff] }
 0x29a   : > { %2965 = vmatmul.mubr.bf16.vlgmr.msra.gmra.mrb[8].mxu1 %v16299_v55  ;;  %2974 = vmatpush1.bf16.msra.mxu0 %v13061_v51  ;;  %v13117_v51 = vcombine.low %v1249_v5, %v1253_v6  ;;  %v1306_v5 = vld [vmem:[%s15936_s4 + $0x398] sm:$0xff] }
 0x29b   : > { %3005 = vmatprep.mubr.bf16.mxu0 %v16227_v8  ;;  %3015 = vmatpush1.bf16.msra.mxu1 %v13063_v57  ;;  %v13128_v57 = vcombine.high %v1258_v33, %v1262_v46  ;;  %v1310_v6 = vld [vmem:[%s15936_s4 + $0x3b8] sm:$0xff] }
 0x29c   : > { %3046 = vmatprep.mubr.bf16.mxu1 %v16227_v8  ;;  %2975 = vmatprep.subr.bf16.mxu0 %v13070_v61  ;;  %v13088_v8 = vcombine.high %v1218_v19, %v1222_v21  ;;  %v1265_v61 = vld [vmem:[%s15936_s4 + $0x250] sm:$0xff]  ;;  %v1318_v24 = vld [vmem:[%s15936_s4 + $0x3f8] sm:$0xff]  ;;  %v13175_v46 = vcombine.low %v1306_v5, %v1310_v6 }
 0x29d   : > { %3016 = vmatprep.subr.bf16.mxu1 %v13072_v47  ;;  %v1270_v47 = vld [vmem:[%s15936_s4 + $0x278] sm:$0xff]  ;;  %v13133_v19 = vcombine.low %v1265_v61, %v1269_v63 }
 0x29e   : > { %2976 = vmatpush1.bf16.msra.mxu0 %v13069_v7  ;;  %v13134_v7 = vcombine.high %v1265_v61, %v1269_v63  ;;  %v13135_v21 = vcombine.low %v1266_v41, %v1270_v47  ;;  %v3122_v61 = vld [vmem:[%s15947_s6 + $0x8] sm:$0xff] }
 0x29f   : > { %3017 = vmatpush1.bf16.msra.mxu1 %v13071_v10  ;;  %2977 = vmatprep.subr.bf16.mxu0 %v13078_v50  ;;  %v13136_v10 = vcombine.high %v1266_v41, %v1270_v47  ;;  %v1273_v50 = vld [vmem:[%s15936_s4 + $0x290] sm:$0xff]  ;;  %v3126_v63 = vld [vmem:[%s15947_s6 + $0x28] sm:$0xff]  ;;  %v13183_v47 = vcombine.low %v1314_v45, %v1318_v24 }
 0x2a0   : > { %3018 = vmatprep.subr.bf16.mxu1 %v13080_v11  ;;  %v1277_v11 = vld [vmem:[%s15936_s4 + $0x2b0] sm:$0xff] }
 0x2a1   : > { %v13141_v56 = vcombine.low %v1273_v50, %v1277_v11 }
 0x2a2   : > { %2978 = vmatpush1.bf16.msra.mxu0 %v13077_v22  ;;  %v13142_v22 = vcombine.high %v1273_v50, %v1277_v11  ;;  %v3130_v50 = vld [vmem:[%s15947_s6 + $0x48] sm:$0xff] }
 0x2a3   : > { %3019 = vmatpush1.bf16.msra.mxu1 %v13079_v62  ;;  %2979 = vmatprep.subr.bf16.mxu0 %v13086_v54  ;;  %v13144_v62 = vcombine.high %v1274_v17, %v1278_v18  ;;  %v1281_v54 = vld [vmem:[%s15936_s4 + $0x2d0] sm:$0xff]  ;;  %v3134_v11 = vld [vmem:[%s15947_s6 + $0x68] sm:$0xff]  ;;  %v13187_v18 = vcombine.low %v3122_v61, %v3126_v63 }
 0x2a4   : > { %3020 = vmatprep.subr.bf16.mxu1 %v13088_v8  ;;  %v1285_v8 = vld [vmem:[%s15936_s4 + $0x2f0] sm:$0xff] }
 0x2a5   : > { %v13149_v26 = vcombine.low %v1281_v54, %v1285_v8 }
 0x2a6   : > { %2980 = vmatpush1.bf16.msra.mxu0 %v13085_v59  ;;  %v13150_v59 = vcombine.high %v1281_v54, %v1285_v8  ;;  %v3138_v54 = vld [vmem:[%s15947_s6 + $0x88] sm:$0xff] }
 0x2a7   : > { %3021 = vmatpush1.bf16.msra.mxu1 %v13087_v49  ;;  %2981 = vmatprep.subr.bf16.mxu0 %v13094_v2  ;;  %v13152_v49 = vcombine.high %v1282_v0, %v1286_v53  ;;  %v1289_v2 = vld [vmem:[%s15936_s4 + $0x310] sm:$0xff]  ;;  %v3142_v8 = vld [vmem:[%s15947_s6 + $0xa8] sm:$0xff]  ;;  %v13195_v53 = vcombine.low %v3130_v50, %v3134_v11 }
 0x2a8   : > { %3022 = vmatprep.subr.bf16.mxu1 %v13096_v34  ;;  %v1293_v34 = vld [vmem:[%s15936_s4 + $0x330] sm:$0xff] }
 0x2a9   : > { %v13157_v37 = vcombine.low %v1289_v2, %v1293_v34 }
 0x2aa   : > { %2982 = vmatpush1.bf16.msra.mxu0 %v13093_v27  ;;  %v13158_v27 = vcombine.high %v1289_v2, %v1293_v34  ;;  %v3146_v2 = vld [vmem:[%s15947_s6 + $0xc8] sm:$0xff] }
 0x2ab   : > { %3023 = vmatpush1.bf16.msra.mxu1 %v13095_v28  ;;  %2983 = vmatprep.subr.bf16.mxu0 %v13102_v30  ;;  %v13160_v28 = vcombine.high %v1290_v23, %v1294_v25  ;;  %v1297_v30 = vld [vmem:[%s15936_s4 + $0x350] sm:$0xff]  ;;  %v3150_v34 = vld [vmem:[%s15947_s6 + $0xe8] sm:$0xff] }
 0x2ac   : > { %3024 = vmatprep.subr.bf16.mxu1 %v13104_v31  ;;  %v1301_v31 = vld [vmem:[%s15936_s4 + $0x370] sm:$0xff] }
 0x2ad   : > { %v13165_v9 = vcombine.low %v1297_v30, %v1301_v31 }
 0x2ae   : > { %2984 = vmatpush1.bf16.msra.mxu0 %v13101_v39  ;;  %v13166_v39 = vcombine.high %v1297_v30, %v1301_v31  ;;  %v3158_v30 = vld [vmem:[%s15947_s6 + $0x128] sm:$0xff] }
 0x2af   : > { %3025 = vmatpush1.bf16.msra.mxu1 %v13103_v58  ;;  %2985 = vmatprep.subr.bf16.mxu0 %v13110_v3  ;;  %v13168_v58 = vcombine.high %v1298_v29, %v1302_v32  ;;  %v1305_v3 = vld [vmem:[%s15936_s4 + $0x390] sm:$0xff]  ;;  %v13211_v29 = vcombine.low %v3146_v2, %v3150_v34 }
 0x2b0   : > { %3026 = vmatprep.subr.bf16.mxu1 %v13112_v4  ;;  %v1309_v4 = vld [vmem:[%s15936_s4 + $0x3b0] sm:$0xff] }
 0x2b1   : > { %v13173_v33 = vcombine.low %v1305_v3, %v1309_v4 }
 0x2b2   : > { %2986 = vmatpush1.bf16.msra.mxu0 %v13109_v42  ;;  %v13174_v42 = vcombine.high %v1305_v3, %v1309_v4  ;;  %v3166_v3 = vld [vmem:[%s15947_s6 + $0x168] sm:$0xff] }
 0x2b3   : > { %3027 = vmatpush1.bf16.msra.mxu1 %v13111_v36  ;;  %2987 = vmatprep.subr.bf16.mxu0 %v13118_v43  ;;  %v13176_v36 = vcombine.high %v1306_v5, %v1310_v6  ;;  %v1313_v43 = vld [vmem:[%s15936_s4 + $0x3d0] sm:$0xff] }
 0x2b4   : > { %3028 = vmatprep.subr.bf16.mxu1 %v13120_v44  ;;  %v1317_v44 = vld [vmem:[%s15936_s4 + $0x3f0] sm:$0xff] }
 0x2b5   : > { %v13181_v41 = vcombine.low %v1313_v43, %v1317_v44 }
 0x2b6   : > { %2988 = vmatpush1.bf16.msra.mxu0 %v13117_v51  ;;  %v13182_v51 = vcombine.high %v1313_v43, %v1317_v44  ;;  %v3174_v43 = vld [vmem:[%s15947_s6 + $0x1a8] sm:$0xff] }
 0x2b7   : > { %3029 = vmatpush1.bf16.msra.mxu1 %v13119_v48  ;;  %2989 = vmatprep.subr.bf16.mxu0 %v13126_v52  ;;  %v13184_v48 = vcombine.high %v1314_v45, %v1318_v24  ;;  %v3121_v52 = vld [vmem:[%s15947_s6] sm:$0xff] }
 0x2b8   : > { %3030 = vmatprep.subr.bf16.mxu1 %v13128_v57  ;;  %v3125_v57 = vld [vmem:[%s15947_s6 + $0x20] sm:$0xff] }
 0x2b9   : > { %v13185_v17 = vcombine.low %v3121_v52, %v3125_v57 }
 0x2ba   : > { %2990 = vmatpush1.bf16.msra.mxu0 %v13125_v60  ;;  %v13186_v60 = vcombine.high %v3121_v52, %v3125_v57  ;;  %v3181_v52 = vld [vmem:[%s15947_s6 + $0x1e0] sm:$0xff] }
 0x2bb   : > { %3031 = vmatpush1.bf16.msra.mxu1 %v13127_v1  ;;  %2991 = vmatprep.subr.bf16.mxu0 %v13134_v7  ;;  %v13188_v1 = vcombine.high %v3122_v61, %v3126_v63  ;;  %v3129_v7 = vld [vmem:[%s15947_s6 + $0x40] sm:$0xff]  ;;  %v3178_v63 = vld [vmem:[%s15947_s6 + $0x1c8] sm:$0xff] }
 0x2bc   : > { %3032 = vmatprep.subr.bf16.mxu1 %v13136_v10  ;;  %v3133_v10 = vld [vmem:[%s15947_s6 + $0x60] sm:$0xff] }
 0x2bd   : > { %v13193_v0 = vcombine.low %v3129_v7, %v3133_v10 }
 0x2be   : > { %2992 = vmatpush1.bf16.msra.mxu0 %v13133_v19  ;;  %v13194_v19 = vcombine.high %v3129_v7, %v3133_v10 }
 0x2bf   : > { %3033 = vmatpush1.bf16.msra.mxu1 %v13135_v21  ;;  %2993 = vmatprep.subr.bf16.mxu0 %v13142_v22  ;;  %v13196_v21 = vcombine.high %v3130_v50, %v3134_v11  ;;  %v3137_v22 = vld [vmem:[%s15947_s6 + $0x80] sm:$0xff] }
 0x2c0   : > { %3034 = vmatprep.subr.bf16.mxu1 %v13144_v62  ;;  %v3141_v62 = vld [vmem:[%s15947_s6 + $0xa0] sm:$0xff] }
 0x2c1   : > { %v13201_v23 = vcombine.low %v3137_v22, %v3141_v62 }
 0x2c2   : > { %2994 = vmatpush1.bf16.msra.mxu0 %v13141_v56  ;;  %v13202_v56 = vcombine.high %v3137_v22, %v3141_v62  ;;  %v3190_v22 = vld [vmem:[%s15947_s6 + $0x228] sm:$0xff] }
 0x2c3   : > { %3035 = vmatpush1.bf16.msra.mxu1 %v13143_v20  ;;  %2995 = vmatprep.subr.bf16.mxu0 %v13150_v59  ;;  %v13204_v20 = vcombine.high %v3138_v54, %v3142_v8  ;;  %v3145_v59 = vld [vmem:[%s15947_s6 + $0xc0] sm:$0xff] }
 0x2c4   : > { %3036 = vmatprep.subr.bf16.mxu1 %v13152_v49  ;;  %v3149_v49 = vld [vmem:[%s15947_s6 + $0xe0] sm:$0xff] }
 0x2c5   : > { %v13210_v25 = vcombine.high %v3145_v59, %v3149_v49  ;;  %v13209_v31 = vcombine.low %v3145_v59, %v3149_v49  ;;  %v3198_v59 = vld [vmem:[%s15947_s6 + $0x268] sm:$0xff] }
 0x2c6   : > { %2996 = vmatpush1.bf16.msra.mxu0 %v13149_v26  ;;  %v13212_v26 = vcombine.high %v3146_v2, %v3150_v34  ;;  %v16412_v2 = vld [vmem:[%s15947_s6 + $0x400] sm:$0xff] }
 0x2c7   : > { %3037 = vmatpush1.bf16.msra.mxu1 %v13151_v35  ;;  %2997 = vmatprep.subr.bf16.mxu0 %v13158_v27  ;;  %v3153_v35 = vld [vmem:[%s15947_s6 + $0x100] sm:$0xff] }
 0x2c8   : > { %3038 = vmatprep.subr.bf16.mxu1 %v13160_v28  ;;  %v3157_v27 = vld [vmem:[%s15947_s6 + $0x120] sm:$0xff]  ;;  %v3154_v28 = vld [vmem:[%s15947_s6 + $0x108] sm:$0xff] }
 0x2c9   : > { %v13218_v32 = vcombine.high %v3153_v35, %v3157_v27  ;;  %v13217_v4 = vcombine.low %v3153_v35, %v3157_v27  ;;  %v13219_v5 = vcombine.low %v3154_v28, %v3158_v30  ;;  %v16415_v34 = vld [vmem:[%s15947_s6 + $0x420] sm:$0xff]  ;;  %v16423_v35 = vld [vmem:[%s15947_s6 + $0x428] sm:$0xff] }
 0x2ca   : > { %2998 = vmatpush1.bf16.msra.mxu0 %v13157_v37  ;;  %v13220_v37 = vcombine.high %v3154_v28, %v3158_v30  ;;  %v3201_v28 = vld [vmem:[%s15947_s6 + $0x280] sm:$0xff] }
 0x2cb   : > { %3039 = vmatpush1.bf16.msra.mxu1 %v13159_v38  ;;  %2999 = vmatprep.subr.bf16.mxu0 %v13166_v39  ;;  %v3161_v38 = vld [vmem:[%s15947_s6 + $0x140] sm:$0xff] }
 0x2cc   : > { %3040 = vmatprep.subr.bf16.mxu1 %v13168_v58  ;;  %v3165_v39 = vld [vmem:[%s15947_s6 + $0x160] sm:$0xff]  ;;  %v3162_v58 = vld [vmem:[%s15947_s6 + $0x148] sm:$0xff] }
 0x2cd   : > { %v13226_v6 = vcombine.high %v3161_v38, %v3165_v39  ;;  %v13225_v44 = vcombine.low %v3161_v38, %v3165_v39  ;;  %v13227_v45 = vcombine.low %v3162_v58, %v3166_v3  ;;  %v3205_v30 = vld [vmem:[%s15947_s6 + $0x2a0] sm:$0xff] }
 0x2ce   : > { %3000 = vmatpush1.bf16.msra.mxu0 %v13165_v9  ;;  %v13228_v9 = vcombine.high %v3162_v58, %v3166_v3  ;;  %v13266_v39 = vcombine.high %v3201_v28, %v3205_v30  ;;  %v3209_v3 = vld [vmem:[%s15947_s6 + $0x2c0] sm:$0xff] }
 0x2cf   : > { %3041 = vmatpush1.bf16.msra.mxu1 %v13167_v40  ;;  %3001 = vmatprep.subr.bf16.mxu0 %v13174_v42  ;;  %v3169_v40 = vld [vmem:[%s15947_s6 + $0x180] sm:$0xff] }
 0x2d0   : > { %3042 = vmatprep.subr.bf16.mxu1 %v13176_v36  ;;  %v3173_v42 = vld [vmem:[%s15947_s6 + $0x1a0] sm:$0xff]  ;;  %v3170_v36 = vld [vmem:[%s15947_s6 + $0x188] sm:$0xff] }
 0x2d1   : > { %v13234_v24 = vcombine.high %v3169_v40, %v3173_v42  ;;  %v13235_v50 = vcombine.low %v3170_v36, %v3174_v43 }
 0x2d2   : > { %3002 = vmatpush1.bf16.msra.mxu0 %v13173_v33 }
 0x2d3   : > { %3043 = vmatpush1.bf16.msra.mxu1 %v13175_v46  ;;  %3003 = vmatprep.subr.bf16.mxu0 %v13182_v51  ;;  %v13236_v51 = vcombine.high %v3170_v36, %v3174_v43  ;;  %v3217_v43 = vld [vmem:[%s15947_s6 + $0x300] sm:$0xff] }
 0x2d4   : > { %3044 = vmatprep.subr.bf16.mxu1 %v13184_v48  ;;  %v3177_v48 = vld [vmem:[%s15947_s6 + $0x1c0] sm:$0xff] }
 0x2d5   : > { %v13242_v11 = vcombine.high %v3177_v48, %v3181_v52  ;;  %v13241_v62 = vcombine.low %v3177_v48, %v3181_v52 }
 0x2d6   : > { %3004 = vmatpush1.bf16.msra.mxu0 %v13181_v41  ;;  %v3182_v41 = vld [vmem:[%s15947_s6 + $0x1e8] sm:$0xff] }
 0x2d7   : > { %3045 = vmatpush1.bf16.msra.mxu1 %v13183_v47  ;;  %6235 = vmatprep.subr.bf16.mxu0 %v13186_v60 }
 0x2d8   : > { %6399 = vmatprep.subr.bf16.mxu1 %v13188_v1  ;;  %v13233_v1 = vcombine.low %v3169_v40, %v3173_v42 }
 0x2d9   : > { %3006 = vmatmul.mubr.bf16.vlgmr.msra.gmra.mrb[12].mxu0 %v16299_v55 }
 0x2da   : > { %3047 = vmatmul.mubr.bf16.vlgmr.msra.gmra.mrb[12].mxu1 %v16299_v55  ;;  %6236 = vmatpush1.bf16.msra.mxu0 %v13185_v17  ;;  %v13203_v55 = vcombine.low %v3138_v54, %v3142_v8  ;;  %v13244_v17 = vcombine.high %v3178_v63, %v3182_v41  ;;  %v13243_v54 = vcombine.low %v3178_v63, %v3182_v41  ;;  %v3225_v41 = vld [vmem:[%s15947_s6 + $0x340] sm:$0xff] }
 0x2db   : > { %6400 = vmatpush1.bf16.msra.mxu1 %v13187_v18  ;;  %6237 = vmatprep.subr.bf16.mxu0 %v13194_v19  ;;  %v3185_v18 = vld [vmem:[%s15947_s6 + $0x200] sm:$0xff] }
 0x2dc   : > { %6401 = vmatprep.subr.bf16.mxu1 %v13196_v21  ;;  %v3189_v19 = vld [vmem:[%s15947_s6 + $0x220] sm:$0xff]  ;;  %v3186_v21 = vld [vmem:[%s15947_s6 + $0x208] sm:$0xff] }
 0x2dd   : > { %v13250_v8 = vcombine.high %v3185_v18, %v3189_v19  ;;  %v13249_v49 = vcombine.low %v3185_v18, %v3189_v19  ;;  %v3237_v18 = vld [vmem:[%s15947_s6 + $0x3a0] sm:$0xff]  ;;  %v3234_v19 = vld [vmem:[%s15947_s6 + $0x388] sm:$0xff] }
 0x2de   : > { %6238 = vmatpush1.bf16.msra.mxu0 %v13193_v0  ;;  %v13252_v0 = vcombine.high %v3186_v21, %v3190_v22 }
 0x2df   : > { %6402 = vmatpush1.bf16.msra.mxu1 %v13195_v53  ;;  %6239 = vmatprep.subr.bf16.mxu0 %v13202_v56  ;;  %v3193_v53 = vld [vmem:[%s15947_s6 + $0x240] sm:$0xff] }
 0x2e0   : > { %6403 = vmatprep.subr.bf16.mxu1 %v13204_v20  ;;  %v3197_v56 = vld [vmem:[%s15947_s6 + $0x260] sm:$0xff]  ;;  %v3194_v20 = vld [vmem:[%s15947_s6 + $0x248] sm:$0xff] }
 0x2e1   : > { %v13260_v27 = vcombine.high %v3194_v20, %v3198_v59  ;;  %v13259_v38 = vcombine.low %v3194_v20, %v3198_v59  ;;  %v3246_v20 = vld [vmem:[%s15947_s6 + $0x3e8] sm:$0xff] }
 0x2e2   : > { %6240 = vmatpush1.bf16.msra.mxu0 %v13201_v23  ;;  %v13251_v23 = vcombine.low %v3186_v21, %v3190_v22  ;;  %v3238_v21 = vld [vmem:[%s15947_s6 + $0x3a8] sm:$0xff] }
 0x2e3   : > { %6404 = vmatpush1.bf16.msra.mxu1 %v13203_v55  ;;  %6241 = vmatprep.subr.bf16.mxu0 %v13210_v25  ;;  %v13258_v55 = vcombine.high %v3193_v53, %v3197_v56  ;;  %v13313_v25 = vcombine.low %v16412_v2, %v16415_v34 }
 0x2e4   : > { %6405 = vmatprep.subr.bf16.mxu1 %v13212_v26  ;;  %v16420_v26 = vld [vmem:[%s15947_s6 + $0x408] sm:$0xff] }
 0x2e6   : > { %6242 = vmatpush1.bf16.msra.mxu0 %v13209_v31  ;;  %v13315_v31 = vcombine.low %v16420_v26, %v16423_v35 }
 0x2e7   : > { %6406 = vmatpush1.bf16.msra.mxu1 %v13211_v29  ;;  %6243 = vmatprep.subr.bf16.mxu0 %v13218_v32  ;;  %v3202_v29 = vld [vmem:[%s15947_s6 + $0x288] sm:$0xff] }
 0x2e8   : > { %6407 = vmatprep.subr.bf16.mxu1 %v13220_v37  ;;  %v3206_v32 = vld [vmem:[%s15947_s6 + $0x2a8] sm:$0xff]  ;;  %v13257_v37 = vcombine.low %v3193_v53, %v3197_v56  ;;  %v3245_v53 = vld [vmem:[%s15947_s6 + $0x3e0] sm:$0xff] }
 0x2e9   : > { %v13268_v58 = vcombine.high %v3202_v29, %v3206_v32  ;;  %v13267_v40 = vcombine.low %v3202_v29, %v3206_v32  ;;  %v3242_v56 = vld [vmem:[%s15947_s6 + $0x3c8] sm:$0xff]  ;;  %v13316_v29 = vcombine.high %v16420_v26, %v16423_v35 }
 0x2ea   : > { %6244 = vmatpush1.bf16.msra.mxu0 %v13217_v4  ;;  %v3213_v4 = vld [vmem:[%s15947_s6 + $0x2e0] sm:$0xff] }
 0x2eb   : > { %6408 = vmatpush1.bf16.msra.mxu1 %v13219_v5  ;;  %6245 = vmatprep.subr.bf16.mxu0 %v13226_v6  ;;  %v3210_v5 = vld [vmem:[%s15947_s6 + $0x2c8] sm:$0xff]  ;;  %v13274_v42 = vcombine.high %v3209_v3, %v3213_v4 }
 0x2ec   : > { %v16391_v33 = vpop.f32.mrb[0].mxu0  ;;  %v16393_v46 = vpop.f32.mrb[0].mxu1  ;;  %6409 = vmatprep.subr.bf16.mxu1 %v13228_v9  ;;  %v3214_v6 = vld [vmem:[%s15947_s6 + $0x2e8] sm:$0xff]  ;;  %v13265_v9 = vcombine.low %v3201_v28, %v3205_v30  ;;  %v13307_v28 = vcombine.low %v3242_v56, %v3246_v20  ;;  %v13314_v30 = vcombine.high %v16412_v2, %v16415_v34  ;;  %v3277_v2 = vld [vmem:[%s15947_s6 + $0x4e0] sm:$0xff] }
 0x2ed   : > { %v16397_v57 = vpop.f32.mrb[1].mxu0  ;;  %v16399_v61 = vpop.f32.mrb[1].mxu1  ;;  %v13276_v36 = vcombine.high %v3210_v5, %v3214_v6  ;;  %v13275_v48 = vcombine.low %v3210_v5, %v3214_v6  ;;  %v16465_v6 = vld [vmem:[%s565_s1] sm:$0xff]  ;;  %v3274_v34 = vld [vmem:[%s15947_s6 + $0x4c8] sm:$0xff] }
 0x2ee   : > { %v2125_v47 = vpop.f32.mrb[2].mxu0  ;;  %v2166_v60 = vpop.f32.mrb[2].mxu1  ;;  %6246 = vmatpush1.bf16.msra.mxu0 %v13225_v44  ;;  %v3221_v44 = vld [vmem:[%s15947_s6 + $0x320] sm:$0xff] }
 0x2ef   : > { %v2126_v7 = vpop.f32.mrb[3].mxu0  ;;  %v2167_v10 = vpop.f32.mrb[3].mxu1  ;;  %6410 = vmatpush1.bf16.msra.mxu1 %v13227_v45  ;;  %6247 = vmatprep.subr.bf16.mxu0 %v13234_v24  ;;  %v3218_v45 = vld [vmem:[%s15947_s6 + $0x308] sm:$0xff]  ;;  %v13282_v52 = vcombine.high %v3217_v43, %v3221_v44  ;;  %v3229_v47 = vld [vmem:[%s15947_s6 + $0x360] sm:$0xff] }
 0x2f0   : > { %6411 = vmatprep.subr.bf16.mxu1 %v13236_v51  ;;  %v3222_v24 = vld [vmem:[%s15947_s6 + $0x328] sm:$0xff]  ;;  %v13273_v51 = vcombine.low %v3209_v3, %v3213_v4  ;;  %v13281_v7 = vcombine.low %v3217_v43, %v3221_v44  ;;  %v13289_v22 = vcombine.low %v3225_v41, %v3229_v47 }
 0x2f1   : > { %v13284_v63 = vcombine.high %v3218_v45, %v3222_v24  ;;  %v3226_v60 = vld [vmem:[%s15947_s6 + $0x348] sm:$0xff]  ;;  %v13283_v10 = vcombine.low %v3218_v45, %v3222_v24  ;;  %v3072_v45 = vrot.slane %v16465_v6, %v16066_v16 }
 0x2f2   : > { %6248 = vmatpush1.bf16.msra.mxu0 %v13233_v1  ;;  %v3230_v1 = vld [vmem:[%s15947_s6 + $0x368] sm:$0xff] }
 0x2f3   : > { %6412 = vmatpush1.bf16.msra.mxu1 %v13235_v50  ;;  %6249 = vmatprep.subr.bf16.mxu0 %v13242_v11  ;;  %v13290_v50 = vcombine.high %v3225_v41, %v3229_v47  ;;  %v13292_v11 = vcombine.high %v3226_v60, %v3230_v1 }
 0x2f4   : > { %6413 = vmatprep.subr.bf16.mxu1 %v13244_v17  ;;  %v3233_v17 = vld [vmem:[%s15947_s6 + $0x380] sm:$0xff] }
 0x2f5   : > { %v13297_v59 = vcombine.low %v3233_v17, %v3237_v18 }
 0x2f6   : > { %6250 = vmatpush1.bf16.msra.mxu0 %v13241_v62  ;;  %v13291_v62 = vcombine.low %v3226_v60, %v3230_v1 }
 0x2f7   : > { %6414 = vmatpush1.bf16.msra.mxu1 %v13243_v54  ;;  %6251 = vmatprep.subr.bf16.mxu0 %v13250_v8  ;;  %v13298_v54 = vcombine.high %v3233_v17, %v3237_v18  ;;  %v13300_v8 = vcombine.high %v3234_v19, %v3238_v21  ;;  %v3258_v17 = vld [vmem:[%s15947_s6 + $0x448] sm:$0xff] }
 0x2f8   : > { %6415 = vmatprep.subr.bf16.mxu1 %v13252_v0  ;;  %v3241_v0 = vld [vmem:[%s15947_s6 + $0x3c0] sm:$0xff]  ;;  %v3262_v18 = vld [vmem:[%s15947_s6 + $0x468] sm:$0xff] }
 0x2fa   : > { %6252 = vmatpush1.bf16.msra.mxu0 %v13249_v49  ;;  %v13299_v49 = vcombine.low %v3234_v19, %v3238_v21 }
 0x2fb   : > { %6416 = vmatpush1.bf16.msra.mxu1 %v13251_v23  ;;  %6253 = vmatprep.subr.bf16.mxu0 %v13258_v55  ;;  %v13306_v23 = vcombine.high %v3241_v0, %v3245_v53  ;;  %v13308_v55 = vcombine.high %v3242_v56, %v3246_v20  ;;  %v13323_v20 = vcombine.low %v3258_v17, %v3262_v18 }
 0x2fc   : > { %6417 = vmatprep.subr.bf16.mxu1 %v13260_v27  ;;  %v13305_v27 = vcombine.low %v3241_v0, %v3245_v53  ;;  %v3270_v0 = vld [vmem:[%s15947_s6 + $0x4a8] sm:$0xff] }
 0x2fe   : > { %6254 = vmatpush1.bf16.msra.mxu0 %v13257_v37 }
 0x2ff   : > { %6418 = vmatpush1.bf16.msra.mxu1 %v13259_v38  ;;  %6255 = vmatprep.subr.bf16.mxu0 %v13266_v39 }
 0x300   : > { %6419 = vmatprep.subr.bf16.mxu1 %v13268_v58 }
 0x302   : > { %6256 = vmatpush1.bf16.msra.mxu0 %v13265_v9  ;;  %v3060_v9 = vrot.slane %v16465_v6, %v16057_v13 }
 0x303   : > { %6420 = vmatpush1.bf16.msra.mxu1 %v13267_v40  ;;  %6257 = vmatprep.subr.bf16.mxu0 %v13274_v42  ;;  %v3064_v42 = vrot.slane %v16465_v6, %v16063_v15 }
 0x304   : > { %6421 = vmatprep.subr.bf16.mxu1 %v13276_v36 }
 0x306   : > { %6258 = vmatpush1.bf16.msra.mxu0 %v13273_v51 }
 0x307   : > { %6422 = vmatpush1.bf16.msra.mxu1 %v13275_v48  ;;  %6259 = vmatprep.subr.bf16.mxu0 %v13282_v52 }
 0x308   : > { %6423 = vmatprep.subr.bf16.mxu1 %v13284_v63 }
 0x30a   : > { %6260 = vmatpush1.bf16.msra.mxu0 %v13281_v7 }
 0x30b   : > { %6424 = vmatpush1.bf16.msra.mxu1 %v13283_v10  ;;  %6261 = vmatprep.subr.bf16.mxu0 %v13290_v50  ;;  %v3257_v50 = vld [vmem:[%s15947_s6 + $0x440] sm:$0xff] }
 0x30c   : > { %6425 = vmatprep.subr.bf16.mxu1 %v13292_v11 }
 0x30e   : > { %6262 = vmatpush1.bf16.msra.mxu0 %v13289_v22 }
 0x30f   : > { %6426 = vmatpush1.bf16.msra.mxu1 %v13291_v62  ;;  %6263 = vmatprep.subr.bf16.mxu0 %v13298_v54  ;;  %v13324_v62 = vcombine.high %v3258_v17, %v3262_v18  ;;  %v3269_v54 = vld [vmem:[%s15947_s6 + $0x4a0] sm:$0xff] }
 0x310   : > { %6427 = vmatprep.subr.bf16.mxu1 %v13300_v8  ;;  %v3266_v8 = vld [vmem:[%s15947_s6 + $0x488] sm:$0xff] }
 0x311   : > { %v13331_v35 = vcombine.low %v3266_v8, %v3270_v0 }
 0x312   : > { %6264 = vmatpush1.bf16.msra.mxu0 %v13297_v59 }
 0x313   : > { %6428 = vmatpush1.bf16.msra.mxu1 %v13299_v49  ;;  %6265 = vmatprep.subr.bf16.mxu0 %v13306_v23  ;;  %v13332_v49 = vcombine.high %v3266_v8, %v3270_v0  ;;  %v3273_v23 = vld [vmem:[%s15947_s6 + $0x4c0] sm:$0xff] }
 0x314   : > { %6429 = vmatprep.subr.bf16.mxu1 %v13308_v55 }
 0x316   : > { %6266 = vmatpush1.bf16.msra.mxu0 %v13305_v27  ;;  %v3281_v27 = vld [vmem:[%s15947_s6 + $0x500] sm:$0xff] }
 0x317   : > { %6430 = vmatpush1.bf16.msra.mxu1 %v13307_v28  ;;  %6276 = vmatprep.subr.bf16.mxu0 %v13314_v30  ;;  %v3285_v28 = vld [vmem:[%s15947_s6 + $0x520] sm:$0xff]  ;;  %v3282_v30 = vld [vmem:[%s15947_s6 + $0x508] sm:$0xff] }
 0x318   : > { %6440 = vmatprep.subr.bf16.mxu1 %v13316_v29  ;;  %v3286_v29 = vld [vmem:[%s15947_s6 + $0x528] sm:$0xff] }
 0x32c   : > { %v16455_v32 = vpop.f32.mrb[4].mxu0  ;;  %v16457_v37 = vpop.f32.mrb[4].mxu1 }
 0x32d   : > { %v16459_v38 = vpop.f32.mrb[5].mxu0  ;;  %v16461_v39 = vpop.f32.mrb[5].mxu1 }
 0x32e   : > { %v2207_v58 = vpop.f32.mrb[6].mxu0  ;;  %v2248_v3 = vpop.f32.mrb[6].mxu1 }
 0x32f   : > { %v2208_v4 = vpop.f32.mrb[7].mxu0  ;;  %v2249_v5 = vpop.f32.mrb[7].mxu1  ;;  %v13337_v58 = vcombine.low %v3273_v23, %v3277_v2 }
 0x330   : > { %v13346_v4 = vcombine.high %v3281_v27, %v3285_v28  ;;  %v13348_v5 = vcombine.high %v3282_v30, %v3286_v29 }
 0x36c   : > { %v2925_v40 = vpop.f32.mrb[8].mxu0 }
 0x36d   : > { %v2926_v36 = vadd.f32 %v2925_v40, %v16391_v33  ;;  %v2966_v43 = vpop.f32.mrb[8].mxu1  ;;  %v2927_v44 = vpop.f32.mrb[9].mxu0  ;;  %v3293_v40 = vld [vmem:[%s15947_s6 + $0x560] sm:$0xff] }
 0x36e   : > { %v16475_v24 = vadd.f32 %v2966_v43, %v16393_v46  ;;  %v2928_v51 = vadd.f32 %v2927_v44, %v16397_v57  ;;  %v2968_v48 = vpop.f32.mrb[9].mxu1  ;;  %v2929_v52 = vpop.f32.mrb[10].mxu0  ;;  %v3261_v57 = vld [vmem:[%s15947_s6 + $0x460] sm:$0xff]  ;;  %v13345_v43 = vcombine.low %v3281_v27, %v3285_v28  ;;  %v13347_v44 = vcombine.low %v3282_v30, %v3286_v29  ;;  %v3330_v27 = vld [vmem:[%s15947_s6 + $0x688] sm:$0xff] }
 0x36f   : > { %v3097_v63 = vadd.f32 %v3060_v9, %v2926_v36  ;;  %v2969_v33 = vadd.f32 %v2968_v48, %v16399_v61  ;;  %v2970_v41 = vpop.f32.mrb[10].mxu1  ;;  %v2930_v47 = vpop.f32.mrb[11].mxu0  ;;  %v3265_v61 = vld [vmem:[%s15947_s6 + $0x480] sm:$0xff]  ;;  %v13322_v22 = vcombine.high %v3257_v50, %v3261_v57  ;;  %v13321_v56 = vcombine.low %v3257_v50, %v3261_v57  ;;  %v3294_v36 = vld [vmem:[%s15947_s6 + $0x568] sm:$0xff] }
 0x370   : > { %v3098_v60 = vadd.f32 %v3064_v42, %v2928_v51  ;;  %v2971_v1 = vpop.f32.mrb[11].mxu1  ;;  %v13330_v59 = vcombine.high %v3265_v61, %v3269_v54  ;;  %v13329_v26 = vcombine.low %v3265_v61, %v3269_v54  ;;  %v3289_v9 = vld [vmem:[%s15947_s6 + $0x540] sm:$0xff]  ;;  %v3290_v42 = vld [vmem:[%s15947_s6 + $0x548] sm:$0xff] }
 0x371   : > { %v3105_v7 = vmax.f32 %v3097_v63, 0.0  ;;  %v3100_v10 = vadd.f32 %v3072_v45, %v2969_v33  ;;  %v13354_v45 = vcombine.high %v3289_v9, %v3293_v40  ;;  %v13356_v51 = vcombine.high %v3290_v42, %v3294_v36  ;;  %v3297_v48 = vld [vmem:[%s15947_s6 + $0x580] sm:$0xff]  ;;  %v3298_v63 = vld [vmem:[%s15947_s6 + $0x588] sm:$0xff] }
 0x372   : > { %v3106_v46 = vmax.f32 %v3098_v60, 0.0  ;;  %v3301_v52 = vld [vmem:[%s15947_s6 + $0x5a0] sm:$0xff]  ;;  %v3302_v33 = vld [vmem:[%s15947_s6 + $0x5a8] sm:$0xff]  ;;  %v13353_v41 = vcombine.low %v3289_v9, %v3293_v40  ;;  %v13355_v47 = vcombine.low %v3290_v42, %v3294_v36 }
 0x373   : > { %v3108_v11 = vmax.f32 %v3100_v10, 0.0  ;;  %v16485_v21 = vpack.c.bf16 %v3105_v7, %v3105_v7  ;;  %v13362_v60 = vcombine.high %v3297_v48, %v3301_v52  ;;  %v13364_v1 = vcombine.high %v3298_v63, %v3302_v33  ;;  %v3305_v7 = vld [vmem:[%s15947_s6 + $0x5c0] sm:$0xff]  ;;  %v3310_v50 = vld [vmem:[%s15947_s6 + $0x5e8] sm:$0xff] }
 0x374   : > { %v16483_v19 = vpack.c.bf16 %v3106_v46, %v3106_v46  ;;  %v3309_v10 = vld [vmem:[%s15947_s6 + $0x5e0] sm:$0xff]  ;;  %v3306_v46 = vld [vmem:[%s15947_s6 + $0x5c8] sm:$0xff]  ;;  %v13363_v57 = vcombine.low %v3298_v63, %v3302_v33 }
 0x375   : > { %v16493_v53 = vpack.c.bf16 %v3108_v11, %v3108_v11  ;;  %v13361_v11 = vcombine.low %v3297_v48, %v3301_v52  ;;  %v13370_v17 = vcombine.high %v3305_v7, %v3309_v10  ;;  %v13372_v18 = vcombine.high %v3306_v46, %v3310_v50  ;;  %v3313_v61 = vld [vmem:[%s15947_s6 + $0x600] sm:$0xff]  ;;  %v3318_v54 = vld [vmem:[%s15947_s6 + $0x628] sm:$0xff] }
 0x376   : > { %6267 = vmatprep.mubr.bf16.mxu0 %v16483_v19  ;;  %6431 = vmatprep.mubr.bf16.mxu1 %v16483_v19  ;;  %v13369_v8 = vcombine.low %v3305_v7, %v3309_v10  ;;  %v13371_v0 = vcombine.low %v3306_v46, %v3310_v50  ;;  %v3334_v28 = vld [vmem:[%s15947_s6 + $0x6a8] sm:$0xff] }
 0x377   : > { %6268 = vmatmul.mubr.bf16.vlgmr.msra.gmra.mrb[16].mxu0 %v16485_v21  ;;  %6432 = vmatmul.mubr.bf16.vlgmr.msra.gmra.mrb[16].mxu1 %v16485_v21  ;;  %v3338_v9 = vld [vmem:[%s15947_s6 + $0x6c8] sm:$0xff]  ;;  %v13395_v36 = vcombine.low %v3330_v27, %v3334_v28 }
 0x378   : > { %6277 = vmatpush1.bf16.msra.mxu0 %v13313_v25  ;;  %6441 = vmatpush1.bf16.msra.mxu1 %v13315_v31  ;;  %v3278_v25 = vld [vmem:[%s15947_s6 + $0x4e8] sm:$0xff]  ;;  %v13338_v31 = vcombine.high %v3273_v23, %v3277_v2 }
 0x379   : > { %6308 = vmatprep.mubr.bf16.mxu0 %v16493_v53  ;;  %6472 = vmatprep.mubr.bf16.mxu1 %v16493_v53  ;;  %v13340_v55 = vcombine.high %v3274_v34, %v3278_v25  ;;  %v13339_v3 = vcombine.low %v3274_v34, %v3278_v25  ;;  %v3322_v23 = vld [vmem:[%s15947_s6 + $0x648] sm:$0xff] }
 0x37a   : > { %6278 = vmatprep.subr.bf16.mxu0 %v13322_v22  ;;  %6442 = vmatprep.subr.bf16.mxu1 %v13324_v62  ;;  %v3317_v22 = vld [vmem:[%s15947_s6 + $0x620] sm:$0xff]  ;;  %v3314_v62 = vld [vmem:[%s15947_s6 + $0x608] sm:$0xff] }
 0x37b   : > { %v3326_v2 = vld [vmem:[%s15947_s6 + $0x668] sm:$0xff]  ;;  %v13377_v34 = vcombine.low %v3313_v61, %v3317_v22  ;;  %v13379_v25 = vcombine.low %v3314_v62, %v3318_v54 }
 0x37c   : > { %6279 = vmatpush1.bf16.msra.mxu0 %v13321_v56  ;;  %6443 = vmatpush1.bf16.msra.mxu1 %v13323_v20  ;;  %v13378_v56 = vcombine.high %v3313_v61, %v3317_v22  ;;  %v13380_v20 = vcombine.high %v3314_v62, %v3318_v54  ;;  %v13387_v29 = vcombine.low %v3322_v23, %v3326_v2  ;;  %v3342_v40 = vld [vmem:[%s15947_s6 + $0x6e8] sm:$0xff] }
 0x37d   : > { %6280 = vmatprep.subr.bf16.mxu0 %v13330_v59  ;;  %6444 = vmatprep.subr.bf16.mxu1 %v13332_v49  ;;  %v3321_v59 = vld [vmem:[%s15947_s6 + $0x640] sm:$0xff]  ;;  %v3346_v48 = vld [vmem:[%s15947_s6 + $0x708] sm:$0xff]  ;;  %v13403_v33 = vcombine.low %v3338_v9, %v3342_v40 }
 0x37e   : > { %v3325_v49 = vld [vmem:[%s15947_s6 + $0x660] sm:$0xff]  ;;  %v3350_v52 = vld [vmem:[%s15947_s6 + $0x728] sm:$0xff] }
 0x37f   : > { %v13385_v30 = vcombine.low %v3321_v59, %v3325_v49  ;;  %v3354_v7 = vld [vmem:[%s15947_s6 + $0x748] sm:$0xff]  ;;  %v13411_v50 = vcombine.low %v3346_v48, %v3350_v52 }
 0x380   : > { %6281 = vmatpush1.bf16.msra.mxu0 %v13329_v26  ;;  %6445 = vmatpush1.bf16.msra.mxu1 %v13331_v35  ;;  %v13386_v26 = vcombine.high %v3321_v59, %v3325_v49  ;;  %v13388_v35 = vcombine.high %v3322_v23, %v3326_v2  ;;  %v3358_v10 = vld [vmem:[%s15947_s6 + $0x768] sm:$0xff]  ;;  %v3369_v59 = vld [vmem:[%s15947_s6 + $0x7c0] sm:$0xff] }
 0x381   : > { %6282 = vmatprep.subr.bf16.mxu0 %v13338_v31  ;;  %6446 = vmatprep.subr.bf16.mxu1 %v13340_v55  ;;  %v3329_v31 = vld [vmem:[%s15947_s6 + $0x680] sm:$0xff]  ;;  %v3362_v61 = vld [vmem:[%s15947_s6 + $0x788] sm:$0xff]  ;;  %v13419_v54 = vcombine.low %v3354_v7, %v3358_v10 }
 0x382   : > { %v3333_v55 = vld [vmem:[%s15947_s6 + $0x6a0] sm:$0xff]  ;;  %v3366_v22 = vld [vmem:[%s15947_s6 + $0x7a8] sm:$0xff] }
 0x383   : > { %v13393_v42 = vcombine.low %v3329_v31, %v3333_v55  ;;  %v3373_v49 = vld [vmem:[%s15947_s6 + $0x7e0] sm:$0xff]  ;;  %v3370_v23 = vld [vmem:[%s15947_s6 + $0x7c8] sm:$0xff] }
 0x384   : > { %6283 = vmatpush1.bf16.msra.mxu0 %v13337_v58  ;;  %6447 = vmatpush1.bf16.msra.mxu1 %v13339_v3  ;;  %v13394_v58 = vcombine.high %v3329_v31, %v3333_v55  ;;  %v13396_v3 = vcombine.high %v3330_v27, %v3334_v28  ;;  %v3374_v2 = vld [vmem:[%s15947_s6 + $0x7e8] sm:$0xff]  ;;  %v13434_v31 = vcombine.high %v3369_v59, %v3373_v49 }
 0x385   : > { %6284 = vmatprep.subr.bf16.mxu0 %v13346_v4  ;;  %6448 = vmatprep.subr.bf16.mxu1 %v13348_v5  ;;  %v3337_v4 = vld [vmem:[%s15947_s6 + $0x6c0] sm:$0xff] }
 0x386   : > { %v3341_v5 = vld [vmem:[%s15947_s6 + $0x6e0] sm:$0xff] }
 0x387   : > { %v13401_v63 = vcombine.low %v3337_v4, %v3341_v5 }
 0x388   : > { %6285 = vmatpush1.bf16.msra.mxu0 %v13345_v43  ;;  %6449 = vmatpush1.bf16.msra.mxu1 %v13347_v44  ;;  %v13402_v43 = vcombine.high %v3337_v4, %v3341_v5  ;;  %v13404_v44 = vcombine.high %v3338_v9, %v3342_v40  ;;  %v3381_v40 = vld [vmem:[%s15947_s6 + $0x820] sm:$0xff] }
 0x389   : > { %6286 = vmatprep.subr.bf16.mxu0 %v13354_v45  ;;  %6450 = vmatprep.subr.bf16.mxu1 %v13356_v51  ;;  %v3345_v45 = vld [vmem:[%s15947_s6 + $0x700] sm:$0xff] }
 0x38a   : > { %v3349_v51 = vld [vmem:[%s15947_s6 + $0x720] sm:$0xff] }
 0x38b   : > { %v13409_v46 = vcombine.low %v3345_v45, %v3349_v51 }
 0x38c   : > { %6287 = vmatpush1.bf16.msra.mxu0 %v13353_v41  ;;  %6451 = vmatpush1.bf16.msra.mxu1 %v13355_v47  ;;  %v13410_v41 = vcombine.high %v3345_v45, %v3349_v51  ;;  %v13412_v47 = vcombine.high %v3346_v48, %v3350_v52 }
 0x38d   : > { %6288 = vmatprep.subr.bf16.mxu0 %v13362_v60  ;;  %6452 = vmatprep.subr.bf16.mxu1 %v13364_v1  ;;  %v3353_v60 = vld [vmem:[%s15947_s6 + $0x740] sm:$0xff] }
 0x38e   : > { %v3357_v1 = vld [vmem:[%s15947_s6 + $0x760] sm:$0xff] }
 0x38f   : > { %v13417_v62 = vcombine.low %v3353_v60, %v3357_v1 }
 0x390   : > { %6289 = vmatpush1.bf16.msra.mxu0 %v13361_v11  ;;  %6453 = vmatpush1.bf16.msra.mxu1 %v13363_v57  ;;  %v13418_v11 = vcombine.high %v3353_v60, %v3357_v1  ;;  %v13420_v57 = vcombine.high %v3354_v7, %v3358_v10 }
 0x391   : > { %6290 = vmatprep.subr.bf16.mxu0 %v13370_v17  ;;  %6454 = vmatprep.subr.bf16.mxu1 %v13372_v18  ;;  %v3361_v17 = vld [vmem:[%s15947_s6 + $0x780] sm:$0xff] }
 0x392   : > { %v3365_v18 = vld [vmem:[%s15947_s6 + $0x7a0] sm:$0xff] }
 0x394   : > { %6291 = vmatpush1.bf16.msra.mxu0 %v13369_v8  ;;  %6455 = vmatpush1.bf16.msra.mxu1 %v13371_v0  ;;  %v16554_v8 = vsub.s32 5, %v16054_v12  ;;  %v3068_v0 = vrot.slane %v16465_v6, %v16060_v14 }
 0x395   : > { %6292 = vmatprep.subr.bf16.mxu0 %v13378_v56  ;;  %6456 = vmatprep.subr.bf16.mxu1 %v13380_v20  ;;  %v13426_v56 = vcombine.high %v3361_v17, %v3365_v18  ;;  %v13428_v20 = vcombine.high %v3362_v61, %v3366_v22 }
 0x396   : > { %v3099_v55 = vadd.f32 %v3068_v0, %v16475_v24  ;;  %v3401_v0 = vld [vmem:[%s15947_s6 + $0x8c0] sm:$0xff] }
 0x398   : > { %6293 = vmatpush1.bf16.msra.mxu0 %v13377_v34  ;;  %6457 = vmatpush1.bf16.msra.mxu1 %v13379_v25  ;;  %v13425_v34 = vcombine.low %v3361_v17, %v3365_v18  ;;  %v3107_v51 = vmax.f32 %v3099_v55, 0.0  ;;  %v3394_v17 = vld [vmem:[%s15947_s6 + $0x888] sm:$0xff] }
 0x399   : > { %6294 = vmatprep.subr.bf16.mxu0 %v13386_v26  ;;  %6458 = vmatprep.subr.bf16.mxu1 %v13388_v35  ;;  %v3080_v26 = vrot.slane %v16465_v6, %v16554_v8  ;;  %v13427_v35 = vcombine.low %v3362_v61, %v3366_v22  ;;  %v3398_v18 = vld [vmem:[%s15947_s6 + $0x8a8] sm:$0xff] }
 0x39a   : > { %v16585_v7 = vpack.c.bf16 %v3107_v51, %v3107_v51 }
 0x39c   : > { %6295 = vmatpush1.bf16.msra.mxu0 %v13385_v30  ;;  %6459 = vmatpush1.bf16.msra.mxu1 %v13387_v29  ;;  %v13436_v29 = vcombine.high %v3370_v23, %v3374_v2 }
 0x39d   : > { %6296 = vmatprep.subr.bf16.mxu0 %v13394_v58  ;;  %6460 = vmatprep.subr.bf16.mxu1 %v13396_v3  ;;  %v3377_v58 = vld [vmem:[%s15947_s6 + $0x800] sm:$0xff] }
 0x39e   : > { %v13442_v48 = vcombine.high %v3377_v58, %v3381_v40  ;;  %v13441_v1 = vcombine.low %v3377_v58, %v3381_v40  ;;  %v3417_v58 = vld [vmem:[%s15947_s6 + $0x940] sm:$0xff] }
 0x3a0   : > { %6297 = vmatpush1.bf16.msra.mxu0 %v13393_v42  ;;  %6461 = vmatpush1.bf16.msra.mxu1 %v13395_v36  ;;  %v3378_v42 = vld [vmem:[%s15947_s6 + $0x808] sm:$0xff] }
 0x3a1   : > { %6298 = vmatprep.subr.bf16.mxu0 %v13402_v43  ;;  %6462 = vmatprep.subr.bf16.mxu1 %v13404_v44  ;;  %v3382_v36 = vld [vmem:[%s15947_s6 + $0x828] sm:$0xff] }
 0x3a2   : > { %v13444_v52 = vcombine.high %v3378_v42, %v3382_v36  ;;  %v13443_v10 = vcombine.low %v3378_v42, %v3382_v36 }
 0x3a4   : > { %6299 = vmatpush1.bf16.msra.mxu0 %v13401_v63  ;;  %6463 = vmatpush1.bf16.msra.mxu1 %v13403_v33  ;;  %v3389_v33 = vld [vmem:[%s15947_s6 + $0x860] sm:$0xff] }
 0x3a5   : > { %6300 = vmatprep.subr.bf16.mxu0 %v13410_v41  ;;  %6464 = vmatprep.subr.bf16.mxu1 %v13412_v47  ;;  %v3386_v41 = vld [vmem:[%s15947_s6 + $0x848] sm:$0xff] }
 0x3a6   : > { %v3390_v47 = vld [vmem:[%s15947_s6 + $0x868] sm:$0xff] }
 0x3a7   : > { %v13451_v22 = vcombine.low %v3386_v41, %v3390_v47 }
 0x3a8   : > { %6301 = vmatpush1.bf16.msra.mxu0 %v13409_v46  ;;  %6465 = vmatpush1.bf16.msra.mxu1 %v13411_v50  ;;  %v13452_v50 = vcombine.high %v3386_v41, %v3390_v47  ;;  %v3438_v41 = vld [vmem:[%s15947_s6 + $0x9e8] sm:$0xff] }
 0x3a9   : > { %6302 = vmatprep.subr.bf16.mxu0 %v13418_v11  ;;  %6466 = vmatprep.subr.bf16.mxu1 %v13420_v57  ;;  %v3393_v11 = vld [vmem:[%s15947_s6 + $0x880] sm:$0xff] }
 0x3aa   : > { %v3397_v57 = vld [vmem:[%s15947_s6 + $0x8a0] sm:$0xff] }
 0x3ac   : > { %6303 = vmatpush1.bf16.msra.mxu0 %v13417_v62  ;;  %6467 = vmatpush1.bf16.msra.mxu1 %v13419_v54  ;;  %v3007_v25 = vpop.f32.mrb[12].mxu0  ;;  %v13458_v62 = vcombine.high %v3393_v11, %v3397_v57  ;;  %v13460_v54 = vcombine.high %v3394_v17, %v3398_v18 }
 0x3ad   : > { %v16566_v27 = vadd.f32 %v3007_v25, %v16455_v32  ;;  %v3048_v28 = vpop.f32.mrb[12].mxu1  ;;  %v3009_v30 = vpop.f32.mrb[13].mxu0  ;;  %6304 = vmatprep.subr.bf16.mxu0 %v13426_v56  ;;  %6468 = vmatprep.subr.bf16.mxu1 %v13428_v20  ;;  %v3405_v56 = vld [vmem:[%s15947_s6 + $0x8e0] sm:$0xff]  ;;  %v3402_v20 = vld [vmem:[%s15947_s6 + $0x8c8] sm:$0xff] }
 0x3ae   : > { %v16570_v3 = vadd.f32 %v3048_v28, %v16457_v37  ;;  %v3010_v4 = vadd.f32 %v3009_v30, %v16459_v38  ;;  %v3050_v5 = vpop.f32.mrb[13].mxu1  ;;  %v3011_v9 = vpop.f32.mrb[14].mxu0  ;;  %v13433_v37 = vcombine.low %v3369_v59, %v3373_v49  ;;  %v13435_v38 = vcombine.low %v3370_v23, %v3374_v2  ;;  %v3406_v59 = vld [vmem:[%s15947_s6 + $0x8e8] sm:$0xff]  ;;  %v3409_v25 = vld [vmem:[%s15947_s6 + $0x900] sm:$0xff] }
 0x3af   : > { %v16577_v32 = vadd.f32 %v3050_v5, %v16461_v39  ;;  %v3052_v24 = vpop.f32.mrb[14].mxu1  ;;  %v3012_v43 = vpop.f32.mrb[15].mxu0  ;;  %v3385_v39 = vld [vmem:[%s15947_s6 + $0x840] sm:$0xff]  ;;  %v13457_v49 = vcombine.low %v3393_v11, %v3397_v57  ;;  %v13459_v23 = vcombine.low %v3394_v17, %v3398_v18  ;;  %v13466_v2 = vcombine.high %v3401_v0, %v3405_v56  ;;  %v3418_v5 = vld [vmem:[%s15947_s6 + $0x948] sm:$0xff] }
 0x3b0   : > { %v3102_v44 = vadd.f32 %v3080_v26, %v3010_v4  ;;  %v3053_v45 = vpop.f32.mrb[15].mxu1  ;;  %6305 = vmatpush1.bf16.msra.mxu0 %v13425_v34  ;;  %6469 = vmatpush1.bf16.msra.mxu1 %v13427_v35  ;;  %v13450_v46 = vcombine.high %v3385_v39, %v3389_v33  ;;  %v13449_v61 = vcombine.low %v3385_v39, %v3389_v33  ;;  %v3413_v26 = vld [vmem:[%s15947_s6 + $0x920] sm:$0xff]  ;;  %v3410_v35 = vld [vmem:[%s15947_s6 + $0x908] sm:$0xff] }
 0x3b1   : > { %6306 = vmatprep.subr.bf16.mxu0 %v13434_v31  ;;  %6470 = vmatprep.subr.bf16.mxu1 %v13436_v29  ;;  %v13468_v34 = vcombine.high %v3402_v20, %v3406_v59  ;;  %v3414_v31 = vld [vmem:[%s15947_s6 + $0x928] sm:$0xff]  ;;  %v13465_v55 = vcombine.low %v3401_v0, %v3405_v56  ;;  %v13467_v28 = vcombine.low %v3402_v20, %v3406_v59  ;;  %v3421_v4 = vld [vmem:[%s15947_s6 + $0x960] sm:$0xff] }
 0x3b2   : > { %v3110_v63 = vmax.f32 %v3102_v44, 0.0  ;;  %v13474_v30 = vcombine.high %v3409_v25, %v3413_v26  ;;  %v13476_v29 = vcombine.high %v3410_v35, %v3414_v31  ;;  %v3422_v9 = vld [vmem:[%s15947_s6 + $0x968] sm:$0xff]  ;;  %v13473_v40 = vcombine.low %v3409_v25, %v3413_v26  ;;  %v3425_v43 = vld [vmem:[%s15947_s6 + $0x980] sm:$0xff] }
 0x3b3   : > { %v13475_v42 = vcombine.low %v3410_v35, %v3414_v31  ;;  %v13482_v36 = vcombine.high %v3417_v58, %v3421_v4  ;;  %v13484_v24 = vcombine.high %v3418_v5, %v3422_v9  ;;  %v3429_v44 = vld [vmem:[%s15947_s6 + $0x9a0] sm:$0xff]  ;;  %v3426_v45 = vld [vmem:[%s15947_s6 + $0x988] sm:$0xff]  ;;  %v13483_v51 = vcombine.low %v3418_v5, %v3422_v9 }
 0x3b4   : > { %v16583_v60 = vpack.c.bf16 %v3110_v63, %v3110_v63  ;;  %6307 = vmatpush1.bf16.msra.mxu0 %v13433_v37  ;;  %6471 = vmatpush1.bf16.msra.mxu1 %v13435_v38  ;;  %v3430_v37 = vld [vmem:[%s15947_s6 + $0x9a8] sm:$0xff]  ;;  %v13481_v38 = vcombine.low %v3417_v58, %v3421_v4  ;;  %v3433_v63 = vld [vmem:[%s15947_s6 + $0x9c0] sm:$0xff]  ;;  %v13489_v47 = vcombine.low %v3425_v43, %v3429_v44 }
 0x3b5   : > { %6317 = vmatprep.subr.bf16.mxu0 %v13442_v48  ;;  %6481 = vmatprep.subr.bf16.mxu1 %v13444_v52  ;;  %v13490_v48 = vcombine.high %v3425_v43, %v3429_v44  ;;  %v13492_v52 = vcombine.high %v3426_v45, %v3430_v37  ;;  %v3437_v39 = vld [vmem:[%s15947_s6 + $0x9e0] sm:$0xff]  ;;  %v3434_v33 = vld [vmem:[%s15947_s6 + $0x9c8] sm:$0xff] }
 0x3b6   : > { %v3445_v11 = vld [vmem:[%s15947_s6 + $0xa20] sm:$0xff]  ;;  %v3442_v57 = vld [vmem:[%s15947_s6 + $0xa08] sm:$0xff]  ;;  %v13497_v18 = vcombine.low %v3433_v63, %v3437_v39 }
 0x3b7   : > { %6309 = vmatmul.mubr.bf16.vlgmr.msra.gmra.mrb[16].mxu0 %v16585_v7  ;;  %6473 = vmatmul.mubr.bf16.vlgmr.msra.gmra.mrb[16].mxu1 %v16585_v7  ;;  %v3446_v17 = vld [vmem:[%s15947_s6 + $0xa28] sm:$0xff]  ;;  %v3453_v0 = vld [vmem:[%s15947_s6 + $0xa60] sm:$0xff] }
 0x3b8   : > { %6318 = vmatpush1.bf16.msra.mxu0 %v13441_v1  ;;  %6349 = vmatprep.mubr.bf16.mxu0 %v16583_v60  ;;  %v13491_v1 = vcombine.low %v3426_v45, %v3430_v37  ;;  %v3450_v56 = vld [vmem:[%s15947_s6 + $0xa48] sm:$0xff]  ;;  %v3461_v25 = vld [vmem:[%s15947_s6 + $0xaa0] sm:$0xff] }
 0x3b9   : > { %6482 = vmatpush1.bf16.msra.mxu1 %v13443_v10  ;;  %6513 = vmatprep.mubr.bf16.mxu1 %v16583_v60  ;;  %v13498_v10 = vcombine.high %v3433_v63, %v3437_v39  ;;  %v3454_v20 = vld [vmem:[%s15947_s6 + $0xa68] sm:$0xff]  ;;  %v3469_v58 = vld [vmem:[%s15947_s6 + $0xae0] sm:$0xff] }
 0x3ba   : > { %6319 = vmatprep.subr.bf16.mxu0 %v13450_v46  ;;  %6483 = vmatprep.subr.bf16.mxu1 %v13452_v50  ;;  %v13500_v46 = vcombine.high %v3434_v33, %v3438_v41  ;;  %v3441_v50 = vld [vmem:[%s15947_s6 + $0xa00] sm:$0xff]  ;;  %v3458_v26 = vld [vmem:[%s15947_s6 + $0xa88] sm:$0xff] }
 0x3bb   : > { %v13505_v59 = vcombine.low %v3441_v50, %v3445_v11  ;;  %v3462_v35 = vld [vmem:[%s15947_s6 + $0xaa8] sm:$0xff]  ;;  %v3477_v43 = vld [vmem:[%s15947_s6 + $0xb20] sm:$0xff] }
 0x3bc   : > { %6320 = vmatpush1.bf16.msra.mxu0 %v13449_v61  ;;  %v13499_v61 = vcombine.low %v3434_v33, %v3438_v41  ;;  %v3466_v4 = vld [vmem:[%s15947_s6 + $0xac8] sm:$0xff]  ;;  %v3485_v63 = vld [vmem:[%s15947_s6 + $0xb60] sm:$0xff] }
 0x3bd   : > { %6484 = vmatpush1.bf16.msra.mxu1 %v13451_v22  ;;  %6321 = vmatprep.subr.bf16.mxu0 %v13458_v62  ;;  %v13506_v22 = vcombine.high %v3441_v50, %v3445_v11  ;;  %v13508_v62 = vcombine.high %v3442_v57, %v3446_v17  ;;  %v3470_v5 = vld [vmem:[%s15947_s6 + $0xae8] sm:$0xff]  ;;  %v3489_v50 = vld [vmem:[%s15947_s6 + $0xb80] sm:$0xff] }
 0x3be   : > { %6485 = vmatprep.subr.bf16.mxu1 %v13460_v54  ;;  %v3449_v54 = vld [vmem:[%s15947_s6 + $0xa40] sm:$0xff]  ;;  %v3474_v44 = vld [vmem:[%s15947_s6 + $0xb08] sm:$0xff] }
 0x3bf   : > { %v13513_v31 = vcombine.low %v3449_v54, %v3453_v0  ;;  %v3478_v45 = vld [vmem:[%s15947_s6 + $0xb28] sm:$0xff]  ;;  %v3493_v11 = vld [vmem:[%s15947_s6 + $0xba0] sm:$0xff] }
 0x3c0   : > { %6322 = vmatpush1.bf16.msra.mxu0 %v13457_v49  ;;  %v13507_v49 = vcombine.low %v3442_v57, %v3446_v17  ;;  %v3482_v39 = vld [vmem:[%s15947_s6 + $0xb48] sm:$0xff]  ;;  %v16645_v57 = vsub.s32 7, %v16054_v12 }
 0x3c1   : > { %6486 = vmatpush1.bf16.msra.mxu1 %v13459_v23  ;;  %6323 = vmatprep.subr.bf16.mxu0 %v13466_v2  ;;  %v13514_v23 = vcombine.high %v3449_v54, %v3453_v0  ;;  %v13516_v2 = vcombine.high %v3450_v56, %v3454_v20  ;;  %v3486_v33 = vld [vmem:[%s15947_s6 + $0xb68] sm:$0xff]  ;;  %v13554_v54 = vcombine.high %v3489_v50, %v3493_v11 }
 0x3c2   : > { %6487 = vmatprep.subr.bf16.mxu1 %v13468_v34  ;;  %v3457_v34 = vld [vmem:[%s15947_s6 + $0xa80] sm:$0xff]  ;;  %v3490_v17 = vld [vmem:[%s15947_s6 + $0xb88] sm:$0xff] }
 0x3c3   : > { %v13521_v9 = vcombine.low %v3457_v34, %v3461_v25 }
 0x3c4   : > { %6324 = vmatpush1.bf16.msra.mxu0 %v13465_v55  ;;  %v13515_v55 = vcombine.low %v3450_v56, %v3454_v20  ;;  %v3497_v56 = vld [vmem:[%s15947_s6 + $0xbc0] sm:$0xff] }
 0x3c5   : > { %6488 = vmatpush1.bf16.msra.mxu1 %v13467_v28  ;;  %6325 = vmatprep.subr.bf16.mxu0 %v13474_v30  ;;  %v13522_v28 = vcombine.high %v3457_v34, %v3461_v25  ;;  %v13524_v30 = vcombine.high %v3458_v26, %v3462_v35  ;;  %v3501_v20 = vld [vmem:[%s15947_s6 + $0xbe0] sm:$0xff] }
 0x3c6   : > { %6489 = vmatprep.subr.bf16.mxu1 %v13476_v29  ;;  %v3465_v29 = vld [vmem:[%s15947_s6 + $0xac0] sm:$0xff] }
 0x3c7   : > { %v13529_v37 = vcombine.low %v3465_v29, %v3469_v58 }
 0x3c8   : > { %6326 = vmatpush1.bf16.msra.mxu0 %v13473_v40  ;;  %v13523_v40 = vcombine.low %v3458_v26, %v3462_v35  ;;  %v13562_v26 = vcombine.high %v3497_v56, %v3501_v20 }
 0x3c9   : > { %6490 = vmatpush1.bf16.msra.mxu1 %v13475_v42  ;;  %6327 = vmatprep.subr.bf16.mxu0 %v13482_v36  ;;  %v13530_v42 = vcombine.high %v3465_v29, %v3469_v58  ;;  %v13532_v36 = vcombine.high %v3466_v4, %v3470_v5  ;;  %v13561_v29 = vcombine.low %v3497_v56, %v3501_v20  ;;  %v3542_v56 = vld [vmem:[%s15947_s6 + $0xd28] sm:$0xff] }
 0x3ca   : > { %6491 = vmatprep.subr.bf16.mxu1 %v13484_v24  ;;  %v3473_v24 = vld [vmem:[%s15947_s6 + $0xb00] sm:$0xff] }
 0x3cb   : > { %v13537_v41 = vcombine.low %v3473_v24, %v3477_v43 }
 0x3cc   : > { %6328 = vmatpush1.bf16.msra.mxu0 %v13481_v38  ;;  %v13531_v38 = vcombine.low %v3466_v4, %v3470_v5 }
 0x3cd   : > { %6492 = vmatpush1.bf16.msra.mxu1 %v13483_v51  ;;  %6329 = vmatprep.subr.bf16.mxu0 %v13490_v48  ;;  %v13538_v51 = vcombine.high %v3473_v24, %v3477_v43  ;;  %v13540_v48 = vcombine.high %v3474_v44, %v3478_v45  ;;  %v3518_v24 = vld [vmem:[%s15947_s6 + $0xc68] sm:$0xff] }
 0x3ce   : > { %6493 = vmatprep.subr.bf16.mxu1 %v13492_v52  ;;  %v3481_v52 = vld [vmem:[%s15947_s6 + $0xb40] sm:$0xff] }
 0x3d0   : > { %6330 = vmatpush1.bf16.msra.mxu0 %v13489_v47  ;;  %v16640_v47 = vsub.s32 4, %v16054_v12 }
 0x3d1   : > { %6494 = vmatpush1.bf16.msra.mxu1 %v13491_v1  ;;  %6331 = vmatprep.subr.bf16.mxu0 %v13498_v10  ;;  %v13539_v1 = vcombine.low %v3474_v44, %v3478_v45  ;;  %v13546_v10 = vcombine.high %v3481_v52, %v3485_v63 }
 0x3d2   : > { %6495 = vmatprep.subr.bf16.mxu1 %v13500_v46  ;;  %v13548_v46 = vcombine.high %v3482_v39, %v3486_v33 }
 0x3d4   : > { %6332 = vmatpush1.bf16.msra.mxu0 %v13497_v18  ;;  %v3494_v18 = vld [vmem:[%s15947_s6 + $0xba8] sm:$0xff] }
 0x3d5   : > { %6496 = vmatpush1.bf16.msra.mxu1 %v13499_v61  ;;  %6333 = vmatprep.subr.bf16.mxu0 %v13506_v22  ;;  %v13545_v61 = vcombine.low %v3481_v52, %v3485_v63  ;;  %v3076_v22 = vrot.slane %v16465_v6, %v16640_v47  ;;  %v13556_v0 = vcombine.high %v3490_v17, %v3494_v18  ;;  %v3522_v52 = vld [vmem:[%s15947_s6 + $0xc88] sm:$0xff] }
 0x3d6   : > { %6497 = vmatprep.subr.bf16.mxu1 %v13508_v62  ;;  %v13547_v62 = vcombine.low %v3482_v39, %v3486_v33  ;;  %v13555_v25 = vcombine.low %v3490_v17, %v3494_v18  ;;  %v3526_v63 = vld [vmem:[%s15947_s6 + $0xca8] sm:$0xff] }
 0x3d7   : > { %v3101_v34 = vadd.f32 %v3076_v22, %v16566_v27  ;;  %v13587_v18 = vcombine.low %v3522_v52, %v3526_v63 }
 0x3d8   : > { %6334 = vmatpush1.bf16.msra.mxu0 %v13505_v59  ;;  %v3088_v59 = vrot.slane %v16465_v6, %v16645_v57  ;;  %v3506_v6 = vld [vmem:[%s15947_s6 + $0xc08] sm:$0xff] }
 0x3d9   : > { %6498 = vmatpush1.bf16.msra.mxu1 %v13507_v49  ;;  %6335 = vmatprep.subr.bf16.mxu0 %v13514_v23  ;;  %v3498_v49 = vld [vmem:[%s15947_s6 + $0xbc8] sm:$0xff]  ;;  %v3109_v58 = vmax.f32 %v3101_v34, 0.0  ;;  %v3549_v34 = vld [vmem:[%s15947_s6 + $0xd60] sm:$0xff] }
 0x3da   : > { %6499 = vmatprep.subr.bf16.mxu1 %v13516_v2  ;;  %v3502_v23 = vld [vmem:[%s15947_s6 + $0xbe8] sm:$0xff]  ;;  %v13553_v2 = vcombine.low %v3489_v50, %v3493_v11 }
 0x3db   : > { %v13564_v35 = vcombine.high %v3498_v49, %v3502_v23  ;;  %v13563_v27 = vcombine.low %v3498_v49, %v3502_v23  ;;  %v16667_v43 = vpack.c.bf16 %v3109_v58, %v3109_v58  ;;  %v3530_v50 = vld [vmem:[%s15947_s6 + $0xcc8] sm:$0xff] }
 0x3dc   : > { %6336 = vmatpush1.bf16.msra.mxu0 %v13513_v31  ;;  %v3505_v31 = vld [vmem:[%s15947_s6 + $0xc00] sm:$0xff]  ;;  %v3534_v11 = vld [vmem:[%s15947_s6 + $0xce8] sm:$0xff] }
 0x3dd   : > { %6500 = vmatpush1.bf16.msra.mxu1 %v13515_v55  ;;  %6337 = vmatprep.subr.bf16.mxu0 %v13522_v28  ;;  %v3509_v55 = vld [vmem:[%s15947_s6 + $0xc20] sm:$0xff]  ;;  %v3104_v28 = vadd.f32 %v3088_v59, %v16577_v32  ;;  %v13596_v22 = vcombine.high %v3530_v50, %v3534_v11  ;;  %v13595_v59 = vcombine.low %v3530_v50, %v3534_v11  ;;  %v3558_v58 = vld [vmem:[%s15947_s6 + $0xda8] sm:$0xff] }
 0x3de   : > { %6501 = vmatprep.subr.bf16.mxu1 %v13524_v30  ;;  %v3510_v30 = vld [vmem:[%s15947_s6 + $0xc28] sm:$0xff]  ;;  %v13570_v4 = vcombine.high %v3505_v31, %v3509_v55  ;;  %v13569_v32 = vcombine.low %v3505_v31, %v3509_v55 }
 0x3df   : > { %v13572_v5 = vcombine.high %v3506_v6, %v3510_v30  ;;  %v13571_v44 = vcombine.low %v3506_v6, %v3510_v30  ;;  %v3553_v6 = vld [vmem:[%s15947_s6 + $0xd80] sm:$0xff]  ;;  %v3578_v50 = vld [vmem:[%s15947_s6 + $0xe48] sm:$0xff] }
 0x3e0   : > { %6338 = vmatpush1.bf16.msra.mxu0 %v13521_v9  ;;  %v3112_v9 = vmax.f32 %v3104_v28, 0.0  ;;  %v3557_v30 = vld [vmem:[%s15947_s6 + $0xda0] sm:$0xff]  ;;  %v3582_v11 = vld [vmem:[%s15947_s6 + $0xe68] sm:$0xff] }
 0x3e1   : > { %6502 = vmatpush1.bf16.msra.mxu1 %v13523_v40  ;;  %6339 = vmatprep.subr.bf16.mxu0 %v13530_v42  ;;  %v3513_v40 = vld [vmem:[%s15947_s6 + $0xc40] sm:$0xff] }
 0x3e2   : > { %6503 = vmatprep.subr.bf16.mxu1 %v13532_v36  ;;  %v3517_v42 = vld [vmem:[%s15947_s6 + $0xc60] sm:$0xff]  ;;  %v3514_v36 = vld [vmem:[%s15947_s6 + $0xc48] sm:$0xff] }
 0x3e3   : > { %v13578_v45 = vcombine.high %v3513_v40, %v3517_v42  ;;  %v13577_v39 = vcombine.low %v3513_v40, %v3517_v42  ;;  %v13579_v33 = vcombine.low %v3514_v36, %v3518_v24  ;;  %v3561_v40 = vld [vmem:[%s15947_s6 + $0xdc0] sm:$0xff] }
 0x3e4   : > { %6340 = vmatpush1.bf16.msra.mxu0 %v13529_v37  ;;  %v3521_v37 = vld [vmem:[%s15947_s6 + $0xc80] sm:$0xff] }
 0x3e5   : > { %6504 = vmatpush1.bf16.msra.mxu1 %v13531_v38  ;;  %6341 = vmatprep.subr.bf16.mxu0 %v13538_v51  ;;  %v3525_v38 = vld [vmem:[%s15947_s6 + $0xca0] sm:$0xff]  ;;  %v16671_v51 = vpack.c.bf16 %v3112_v9, %v3112_v9 }
 0x3e6   : > { %6505 = vmatprep.subr.bf16.mxu1 %v13540_v48  ;;  %v13580_v48 = vcombine.high %v3514_v36, %v3518_v24  ;;  %v13585_v17 = vcombine.low %v3521_v37, %v3525_v38  ;;  %v3565_v42 = vld [vmem:[%s15947_s6 + $0xde0] sm:$0xff]  ;;  %v3566_v36 = vld [vmem:[%s15947_s6 + $0xde8] sm:$0xff]  ;;  %v13617_v24 = vcombine.low %v3553_v6, %v3557_v30 }
 0x3e8   : > { %6342 = vmatpush1.bf16.msra.mxu0 %v13537_v41  ;;  %v13586_v41 = vcombine.high %v3521_v37, %v3525_v38  ;;  %v3569_v38 = vld [vmem:[%s15947_s6 + $0xe00] sm:$0xff] }
 0x3e9   : > { %6506 = vmatpush1.bf16.msra.mxu1 %v13539_v1  ;;  %6343 = vmatprep.subr.bf16.mxu0 %v13546_v10  ;;  %v13588_v1 = vcombine.high %v3522_v52, %v3526_v63  ;;  %v3529_v10 = vld [vmem:[%s15947_s6 + $0xcc0] sm:$0xff]  ;;  %v3570_v52 = vld [vmem:[%s15947_s6 + $0xe08] sm:$0xff] }
 0x3ea   : > { %6507 = vmatprep.subr.bf16.mxu1 %v13548_v46  ;;  %v3533_v46 = vld [vmem:[%s15947_s6 + $0xce0] sm:$0xff]  ;;  %v3574_v63 = vld [vmem:[%s15947_s6 + $0xe28] sm:$0xff] }
 0x3eb   : > { %v13593_v20 = vcombine.low %v3529_v10, %v3533_v46 }
 0x3ec   : > { %6344 = vmatpush1.bf16.msra.mxu0 %v13545_v61  ;;  %v13594_v61 = vcombine.high %v3529_v10, %v3533_v46  ;;  %v3577_v10 = vld [vmem:[%s15947_s6 + $0xe40] sm:$0xff] }
 0x3ed   : > { %6508 = vmatpush1.bf16.msra.mxu1 %v13547_v62  ;;  %6345 = vmatprep.subr.bf16.mxu0 %v13554_v54  ;;  %v3537_v62 = vld [vmem:[%s15947_s6 + $0xd00] sm:$0xff] }
 0x3ee   : > { %6509 = vmatprep.subr.bf16.mxu1 %v13556_v0  ;;  %v3541_v54 = vld [vmem:[%s15947_s6 + $0xd20] sm:$0xff]  ;;  %v3538_v0 = vld [vmem:[%s15947_s6 + $0xd08] sm:$0xff] }
 0x3ef   : > { %v13602_v49 = vcombine.high %v3537_v62, %v3541_v54  ;;  %v13604_v23 = vcombine.high %v3538_v0, %v3542_v56  ;;  %v13603_v31 = vcombine.low %v3538_v0, %v3542_v56  ;;  %v3581_v46 = vld [vmem:[%s15947_s6 + $0xe60] sm:$0xff]  ;;  %v3586_v0 = vld [vmem:[%s15947_s6 + $0xe88] sm:$0xff] }
 0x3f0   : > { %6346 = vmatpush1.bf16.msra.mxu0 %v13553_v2  ;;  %v3545_v2 = vld [vmem:[%s15947_s6 + $0xd40] sm:$0xff]  ;;  %v3590_v56 = vld [vmem:[%s15947_s6 + $0xea8] sm:$0xff] }
 0x3f1   : > { %6510 = vmatpush1.bf16.msra.mxu1 %v13555_v25  ;;  %6347 = vmatprep.subr.bf16.mxu0 %v13562_v26  ;;  %v3546_v25 = vld [vmem:[%s15947_s6 + $0xd48] sm:$0xff]  ;;  %v13610_v55 = vcombine.high %v3545_v2, %v3549_v34 }
 0x3f2   : > { %6511 = vmatprep.subr.bf16.mxu1 %v13564_v35  ;;  %v3550_v26 = vld [vmem:[%s15947_s6 + $0xd68] sm:$0xff]  ;;  %v13601_v35 = vcombine.low %v3537_v62, %v3541_v54  ;;  %v3585_v62 = vld [vmem:[%s15947_s6 + $0xe80] sm:$0xff] }
 0x3f3   : > { %v13612_v28 = vcombine.high %v3546_v25, %v3550_v26  ;;  %v3589_v54 = vld [vmem:[%s15947_s6 + $0xea0] sm:$0xff] }
 0x3f4   : > { %6348 = vmatpush1.bf16.msra.mxu0 %v13561_v29  ;;  %v3554_v29 = vld [vmem:[%s15947_s6 + $0xd88] sm:$0xff] }
 0x3f5   : > { %6512 = vmatpush1.bf16.msra.mxu1 %v13563_v27  ;;  %6358 = vmatprep.subr.bf16.mxu0 %v13570_v4  ;;  %v13609_v27 = vcombine.low %v3545_v2, %v3549_v34  ;;  %v13611_v4 = vcombine.low %v3546_v25, %v3550_v26  ;;  %v13620_v9 = vcombine.high %v3554_v29, %v3558_v58  ;;  %v3593_v2 = vld [vmem:[%s15947_s6 + $0xec0] sm:$0xff]  ;;  %v3594_v25 = vld [vmem:[%s15947_s6 + $0xec8] sm:$0xff] }
 0x3f6   : > { %6522 = vmatprep.subr.bf16.mxu1 %v13572_v5  ;;  %v13618_v5 = vcombine.high %v3553_v6, %v3557_v30  ;;  %v3597_v34 = vld [vmem:[%s15947_s6 + $0xee0] sm:$0xff]  ;;  %v3598_v26 = vld [vmem:[%s15947_s6 + $0xee8] sm:$0xff] }
 0x3f7   : > { %6350 = vmatmul.mubr.bf16.vlgmr.msra.gmra.mrb[16].mxu0 %v16667_v43  ;;  %v3601_v6 = vld [vmem:[%s15947_s6 + $0xf00] sm:$0xff] }
 0x3f8   : > { %6514 = vmatmul.mubr.bf16.vlgmr.msra.gmra.mrb[16].mxu1 %v16667_v43  ;;  %6359 = vmatpush1.bf16.msra.mxu0 %v13569_v32  ;;  %v3562_v32 = vld [vmem:[%s15947_s6 + $0xdc8] sm:$0xff]  ;;  %v3605_v30 = vld [vmem:[%s15947_s6 + $0xf20] sm:$0xff] }
 0x3f9   : > { %6390 = vmatprep.mubr.bf16.mxu0 %v16671_v51  ;;  %6523 = vmatpush1.bf16.msra.mxu1 %v13571_v44  ;;  %v13619_v44 = vcombine.low %v3554_v29, %v3558_v58  ;;  %v13628_v37 = vcombine.high %v3562_v32, %v3566_v36  ;;  %v3602_v29 = vld [vmem:[%s15947_s6 + $0xf08] sm:$0xff] }
 0x3fa   : > { %6554 = vmatprep.mubr.bf16.mxu1 %v16671_v51  ;;  %6360 = vmatprep.subr.bf16.mxu0 %v13578_v45  ;;  %v13626_v45 = vcombine.high %v3561_v40, %v3565_v42  ;;  %v3606_v58 = vld [vmem:[%s15947_s6 + $0xf28] sm:$0xff] }
 0x3fb   : > { %6524 = vmatprep.subr.bf16.mxu1 %v13580_v48  ;;  %v3573_v48 = vld [vmem:[%s15947_s6 + $0xe20] sm:$0xff] }
 0x3fc   : > { %6361 = vmatpush1.bf16.msra.mxu0 %v13577_v39  ;;  %v13625_v39 = vcombine.low %v3561_v40, %v3565_v42  ;;  %v3609_v40 = vld [vmem:[%s15947_s6 + $0xf40] sm:$0xff] }
 0x3fd   : > { %6525 = vmatpush1.bf16.msra.mxu1 %v13579_v33  ;;  %6362 = vmatprep.subr.bf16.mxu0 %v13586_v41  ;;  %v13627_v33 = vcombine.low %v3562_v32, %v3566_v36  ;;  %v13634_v41 = vcombine.high %v3569_v38, %v3573_v48  ;;  %v3613_v42 = vld [vmem:[%s15947_s6 + $0xf60] sm:$0xff]  ;;  %v3610_v32 = vld [vmem:[%s15947_s6 + $0xf48] sm:$0xff] }
 0x3fe   : > { %6526 = vmatprep.subr.bf16.mxu1 %v13588_v1  ;;  %v13636_v1 = vcombine.high %v3570_v52, %v3574_v63  ;;  %v3614_v36 = vld [vmem:[%s15947_s6 + $0xf68] sm:$0xff] }
 0x400   : > { %6363 = vmatpush1.bf16.msra.mxu0 %v13585_v17  ;;  %v13633_v17 = vcombine.low %v3569_v38, %v3573_v48  ;;  %v13676_v38 = vcombine.high %v3610_v32, %v3614_v36  ;;  %v3617_v48 = vld [vmem:[%s15947_s6 + $0xf80] sm:$0xff] }
 0x401   : > { %6527 = vmatpush1.bf16.msra.mxu1 %v13587_v18  ;;  %6364 = vmatprep.subr.bf16.mxu0 %v13594_v61  ;;  %v13635_v18 = vcombine.low %v3570_v52, %v3574_v63  ;;  %v13642_v61 = vcombine.high %v3577_v10, %v3581_v46  ;;  %v3621_v52 = vld [vmem:[%s15947_s6 + $0xfa0] sm:$0xff]  ;;  %v3618_v63 = vld [vmem:[%s15947_s6 + $0xf88] sm:$0xff] }
 0x402   : > { %6528 = vmatprep.subr.bf16.mxu1 %v13596_v22  ;;  %v13644_v22 = vcombine.high %v3578_v50, %v3582_v11 }
 0x404   : > { %6365 = vmatpush1.bf16.msra.mxu0 %v13593_v20  ;;  %v13641_v20 = vcombine.low %v3577_v10, %v3581_v46  ;;  %v13682_v10 = vcombine.high %v3617_v48, %v3621_v52 }
 0x405   : > { %6529 = vmatpush1.bf16.msra.mxu1 %v13595_v59  ;;  %6366 = vmatprep.subr.bf16.mxu0 %v13602_v49  ;;  %v13643_v59 = vcombine.low %v3578_v50, %v3582_v11  ;;  %v13650_v49 = vcombine.high %v3585_v62, %v3589_v54  ;;  %v3625_v50 = vld [vmem:[%s15947_s6 + $0xfc0] sm:$0xff] }
 0x406   : > { %6530 = vmatprep.subr.bf16.mxu1 %v13604_v23  ;;  %v13652_v23 = vcombine.high %v3586_v0, %v3590_v56  ;;  %v3629_v11 = vld [vmem:[%s15947_s6 + $0xfe0] sm:$0xff] }
 0x408   : > { %6367 = vmatpush1.bf16.msra.mxu0 %v13601_v35  ;;  %v13649_v35 = vcombine.low %v3585_v62, %v3589_v54  ;;  %v13690_v54 = vcombine.high %v3625_v50, %v3629_v11 }
 0x409   : > { %6531 = vmatpush1.bf16.msra.mxu1 %v13603_v31  ;;  %6368 = vmatprep.subr.bf16.mxu0 %v13610_v55  ;;  %v13651_v31 = vcombine.low %v3586_v0, %v3590_v56  ;;  %v13658_v55 = vcombine.high %v3593_v2, %v3597_v34  ;;  %v3123_v56 = vld [vmem:[%s15947_s6 + $0x10] sm:$0xff] }
 0x40a   : > { %6532 = vmatprep.subr.bf16.mxu1 %v13612_v28  ;;  %v13660_v28 = vcombine.high %v3594_v25, %v3598_v26 }
 0x40c   : > { %6369 = vmatpush1.bf16.msra.mxu0 %v13609_v27  ;;  %v13657_v27 = vcombine.low %v3593_v2, %v3597_v34 }
 0x40d   : > { %6533 = vmatpush1.bf16.msra.mxu1 %v13611_v4  ;;  %6370 = vmatprep.subr.bf16.mxu0 %v13618_v5  ;;  %v13659_v4 = vcombine.low %v3594_v25, %v3598_v26  ;;  %v13666_v5 = vcombine.high %v3601_v6, %v3605_v30  ;;  %v3131_v26 = vld [vmem:[%s15947_s6 + $0x50] sm:$0xff] }
 0x40e   : > { %6534 = vmatprep.subr.bf16.mxu1 %v13620_v9  ;;  %v13668_v9 = vcombine.high %v3602_v29, %v3606_v58 }
 0x410   : > { %6371 = vmatpush1.bf16.msra.mxu0 %v13617_v24  ;;  %v13665_v24 = vcombine.low %v3601_v6, %v3605_v30 }
 0x411   : > { %6535 = vmatpush1.bf16.msra.mxu1 %v13619_v44  ;;  %6372 = vmatprep.subr.bf16.mxu0 %v13626_v45  ;;  %v16724_v44 = vsub.s32 6, %v16054_v12  ;;  %v13667_v45 = vcombine.low %v3602_v29, %v3606_v58  ;;  %v3139_v58 = vld [vmem:[%s15947_s6 + $0x90] sm:$0xff] }
 0x412   : > { %6536 = vmatprep.subr.bf16.mxu1 %v13628_v37  ;;  %v13674_v37 = vcombine.high %v3609_v40, %v3613_v42 }
 0x414   : > { %6373 = vmatpush1.bf16.msra.mxu0 %v13625_v39  ;;  %v3622_v39 = vld [vmem:[%s15947_s6 + $0xfa8] sm:$0xff] }
 0x415   : > { %6537 = vmatpush1.bf16.msra.mxu1 %v13627_v33  ;;  %6374 = vmatprep.subr.bf16.mxu0 %v13634_v41  ;;  %v13673_v33 = vcombine.low %v3609_v40, %v3613_v42  ;;  %v15126_v41 = vld [vmem:[%s565_s1] sm:$0xff]  ;;  %v13684_v46 = vcombine.high %v3618_v63, %v3622_v39  ;;  %v13683_v62 = vcombine.low %v3618_v63, %v3622_v39 }
 0x416   : > { %6538 = vmatprep.subr.bf16.mxu1 %v13636_v1  ;;  %v3084_v12 = vrot.slane %v15126_v41, %v16724_v44  ;;  %v13675_v1 = vcombine.low %v3610_v32, %v3614_v36  ;;  %v3155_v39 = vld [vmem:[%s15947_s6 + $0x110] sm:$0xff]  ;;  %v3156_v41 = vld [vmem:[%s15947_s6 + $0x118] sm:$0xff] }
 0x418   : > { %6375 = vmatpush1.bf16.msra.mxu0 %v13633_v17  ;;  %v3626_v17 = vld [vmem:[%s15947_s6 + $0xfc8] sm:$0xff] }
 0x419   : > { %6539 = vmatpush1.bf16.msra.mxu1 %v13635_v18  ;;  %6376 = vmatprep.subr.bf16.mxu0 %v13642_v61  ;;  %v3630_v18 = vld [vmem:[%s15947_s6 + $0xfe8] sm:$0xff]  ;;  %v13681_v61 = vcombine.low %v3617_v48, %v3621_v52 }
 0x41a   : > { %6540 = vmatprep.subr.bf16.mxu1 %v13644_v22  ;;  %v3103_v22 = vadd.f32 %v3084_v12, %v16570_v3  ;;  %v13692_v0 = vcombine.high %v3626_v17, %v3630_v18  ;;  %v13691_v3 = vcombine.low %v3626_v17, %v3630_v18  ;;  %v3160_v12 = vld [vmem:[%s15947_s6 + $0x138] sm:$0xff]  ;;  %v3167_v17 = vld [vmem:[%s15947_s6 + $0x170] sm:$0xff] }
 0x41b   : > { %v3164_v18 = vld [vmem:[%s15947_s6 + $0x158] sm:$0xff] }
 0x41c   : > { %6377 = vmatpush1.bf16.msra.mxu0 %v13641_v20  ;;  %v3127_v20 = vld [vmem:[%s15947_s6 + $0x30] sm:$0xff]  ;;  %v3111_v2 = vmax.f32 %v3103_v22, 0.0 }
 0x41d   : > { %6541 = vmatpush1.bf16.msra.mxu1 %v13643_v59  ;;  %6378 = vmatprep.subr.bf16.mxu0 %v13650_v49  ;;  %v3124_v59 = vld [vmem:[%s15947_s6 + $0x18] sm:$0xff]  ;;  %v13190_v34 = vcombine.high %v3123_v56, %v3127_v20 }
 0x41e   : > { %6542 = vmatprep.subr.bf16.mxu1 %v13652_v23  ;;  %v3128_v49 = vld [vmem:[%s15947_s6 + $0x38] sm:$0xff]  ;;  %v13689_v23 = vcombine.low %v3625_v50, %v3629_v11  ;;  %v16746_v6 = vpack.c.bf16 %v3111_v2, %v3111_v2  ;;  %v13224_v50 = vcombine.high %v3156_v41, %v3160_v12  ;;  %v3163_v11 = vld [vmem:[%s15947_s6 + $0x150] sm:$0xff] }
 0x41f   : > { %v13192_v25 = vcombine.high %v3124_v59, %v3128_v49  ;;  %v13191_v30 = vcombine.low %v3124_v59, %v3128_v49  ;;  %v3172_v59 = vld [vmem:[%s15947_s6 + $0x198] sm:$0xff] }
 0x420   : > { %6379 = vmatpush1.bf16.msra.mxu0 %v13649_v35  ;;  %v3135_v35 = vld [vmem:[%s15947_s6 + $0x70] sm:$0xff]  ;;  %v3176_v49 = vld [vmem:[%s15947_s6 + $0x1b8] sm:$0xff] }
 0x421   : > { %6543 = vmatpush1.bf16.msra.mxu1 %v13651_v31  ;;  %6380 = vmatprep.subr.bf16.mxu0 %v13658_v55  ;;  %v13189_v31 = vcombine.low %v3123_v56, %v3127_v20  ;;  %v3132_v55 = vld [vmem:[%s15947_s6 + $0x58] sm:$0xff]  ;;  %v13198_v29 = vcombine.high %v3131_v26, %v3135_v35  ;;  %v13197_v40 = vcombine.low %v3131_v26, %v3135_v35  ;;  %v3171_v56 = vld [vmem:[%s15947_s6 + $0x190] sm:$0xff] }
 0x422   : > { %6544 = vmatprep.subr.bf16.mxu1 %v13660_v28  ;;  %v3136_v28 = vld [vmem:[%s15947_s6 + $0x78] sm:$0xff]  ;;  %v3175_v20 = vld [vmem:[%s15947_s6 + $0x1b0] sm:$0xff] }
 0x423   : > { %v13199_v42 = vcombine.low %v3132_v55, %v3136_v28  ;;  %v3183_v26 = vld [vmem:[%s15947_s6 + $0x1f0] sm:$0xff]  ;;  %v3180_v35 = vld [vmem:[%s15947_s6 + $0x1d8] sm:$0xff] }
 0x424   : > { %6381 = vmatpush1.bf16.msra.mxu0 %v13657_v27  ;;  %v3143_v27 = vld [vmem:[%s15947_s6 + $0xb0] sm:$0xff] }
 0x425   : > { %6545 = vmatpush1.bf16.msra.mxu1 %v13659_v4  ;;  %6382 = vmatprep.subr.bf16.mxu0 %v13666_v5  ;;  %v13200_v4 = vcombine.high %v3132_v55, %v3136_v28  ;;  %v3140_v5 = vld [vmem:[%s15947_s6 + $0x98] sm:$0xff]  ;;  %v13206_v32 = vcombine.high %v3139_v58, %v3143_v27  ;;  %v13205_v48 = vcombine.low %v3139_v58, %v3143_v27  ;;  %v3187_v58 = vld [vmem:[%s15947_s6 + $0x210] sm:$0xff] }
 0x426   : > { %6546 = vmatprep.subr.bf16.mxu1 %v13668_v9  ;;  %v3144_v9 = vld [vmem:[%s15947_s6 + $0xb8] sm:$0xff]  ;;  %v13237_v55 = vcombine.low %v3171_v56, %v3175_v20  ;;  %v13239_v28 = vcombine.low %v3172_v59, %v3176_v49  ;;  %v3191_v27 = vld [vmem:[%s15947_s6 + $0x230] sm:$0xff] }
 0x427   : > { %v13208_v36 = vcombine.high %v3140_v5, %v3144_v9  ;;  %v13207_v52 = vcombine.low %v3140_v5, %v3144_v9  ;;  %v3192_v5 = vld [vmem:[%s15947_s6 + $0x238] sm:$0xff] }
 0x428   : > { %6383 = vmatpush1.bf16.msra.mxu0 %v13665_v24  ;;  %v3147_v24 = vld [vmem:[%s15947_s6 + $0xd0] sm:$0xff] }
 0x429   : > { %6547 = vmatpush1.bf16.msra.mxu1 %v13667_v45  ;;  %6384 = vmatprep.subr.bf16.mxu0 %v13674_v37  ;;  %v3151_v45 = vld [vmem:[%s15947_s6 + $0xf0] sm:$0xff]  ;;  %v3148_v37 = vld [vmem:[%s15947_s6 + $0xd8] sm:$0xff] }
 0x42a   : > { %6548 = vmatprep.subr.bf16.mxu1 %v13676_v38  ;;  %v3152_v38 = vld [vmem:[%s15947_s6 + $0xf8] sm:$0xff]  ;;  %v13214_v63 = vcombine.high %v3147_v24, %v3151_v45 }
 0x42c   : > { %6385 = vmatpush1.bf16.msra.mxu0 %v13673_v33  ;;  %v3159_v33 = vld [vmem:[%s15947_s6 + $0x130] sm:$0xff] }
 0x42d   : > { %6549 = vmatpush1.bf16.msra.mxu1 %v13675_v1  ;;  %6386 = vmatprep.subr.bf16.mxu0 %v13682_v10  ;;  %v13213_v1 = vcombine.low %v3147_v24, %v3151_v45  ;;  %v13215_v10 = vcombine.low %v3148_v37, %v3152_v38  ;;  %v13221_v22 = vcombine.low %v3155_v39, %v3159_v33  ;;  %v3199_v24 = vld [vmem:[%s15947_s6 + $0x270] sm:$0xff]  ;;  %v3196_v45 = vld [vmem:[%s15947_s6 + $0x258] sm:$0xff] }
 0x42e   : > { %6550 = vmatprep.subr.bf16.mxu1 %v13684_v46  ;;  %v13222_v46 = vcombine.high %v3155_v39, %v3159_v33  ;;  %v3207_v39 = vld [vmem:[%s15947_s6 + $0x2b0] sm:$0xff]  ;;  %v3204_v33 = vld [vmem:[%s15947_s6 + $0x298] sm:$0xff] }
 0x430   : > { %6387 = vmatpush1.bf16.msra.mxu0 %v13681_v61  ;;  %v3168_v61 = vld [vmem:[%s15947_s6 + $0x178] sm:$0xff] }
 0x431   : > { %6551 = vmatpush1.bf16.msra.mxu1 %v13683_v62  ;;  %6388 = vmatprep.subr.bf16.mxu0 %v13690_v54  ;;  %v13223_v62 = vcombine.low %v3156_v41, %v3160_v12  ;;  %v13230_v54 = vcombine.high %v3163_v11, %v3167_v17  ;;  %v13231_v2 = vcombine.low %v3164_v18, %v3168_v61  ;;  %v3208_v41 = vld [vmem:[%s15947_s6 + $0x2b8] sm:$0xff] }
 0x432   : > { %6552 = vmatprep.subr.bf16.mxu1 %v13692_v0  ;;  %v13232_v0 = vcombine.high %v3164_v18, %v3168_v61  ;;  %v3216_v18 = vld [vmem:[%s15947_s6 + $0x2f8] sm:$0xff] }
 0x434   : > { %6389 = vmatpush1.bf16.msra.mxu0 %v13689_v23  ;;  %v13229_v23 = vcombine.low %v3163_v11, %v3167_v17  ;;  %v3215_v11 = vld [vmem:[%s15947_s6 + $0x2f0] sm:$0xff]  ;;  %v3212_v17 = vld [vmem:[%s15947_s6 + $0x2d8] sm:$0xff] }
 0x435   : > { %6553 = vmatpush1.bf16.msra.mxu1 %v13691_v3  ;;  %6563 = vmatprep.subr.bf16.mxu0 %v13190_v34  ;;  %v13238_v3 = vcombine.high %v3171_v56, %v3175_v20  ;;  %v13240_v34 = vcombine.high %v3172_v59, %v3176_v49  ;;  %v3223_v56 = vld [vmem:[%s15947_s6 + $0x330] sm:$0xff]  ;;  %v3220_v20 = vld [vmem:[%s15947_s6 + $0x318] sm:$0xff] }
 0x436   : > { %6727 = vmatprep.subr.bf16.mxu1 %v13192_v25  ;;  %v3179_v25 = vld [vmem:[%s15947_s6 + $0x1d0] sm:$0xff]  ;;  %v3224_v59 = vld [vmem:[%s15947_s6 + $0x338] sm:$0xff] }
 0x437   : > { %6391 = vmatmul.mubr.bf16.vlgmr.msra.gmra.mrb[16].mxu0 %v16746_v6  ;;  %v13245_v9 = vcombine.low %v3179_v25, %v3183_v26 }
 0x438   : > { %6555 = vmatmul.mubr.bf16.vlgmr.msra.gmra.mrb[16].mxu1 %v16746_v6  ;;  %6564 = vmatpush1.bf16.msra.mxu0 %v13189_v31  ;;  %v3184_v31 = vld [vmem:[%s15947_s6 + $0x1f8] sm:$0xff] }
 0x439   : > { %6595 = vmatprep.mubr.bf16.mxu0 %v16483_v19  ;;  %6728 = vmatpush1.bf16.msra.mxu1 %v13191_v30  ;;  %v13246_v30 = vcombine.high %v3179_v25, %v3183_v26  ;;  %v3231_v25 = vld [vmem:[%s15947_s6 + $0x370] sm:$0xff]  ;;  %v3228_v26 = vld [vmem:[%s15947_s6 + $0x358] sm:$0xff] }
 0x43a   : > { %6759 = vmatprep.mubr.bf16.mxu1 %v16483_v19  ;;  %6565 = vmatprep.subr.bf16.mxu0 %v13198_v29  ;;  %v13216_v19 = vcombine.high %v3148_v37, %v3152_v38  ;;  %v13248_v29 = vcombine.high %v3180_v35, %v3184_v31  ;;  %v3200_v37 = vld [vmem:[%s15947_s6 + $0x278] sm:$0xff]  ;;  %v13253_v38 = vcombine.low %v3187_v58, %v3191_v27 }
 0x43b   : > { %6729 = vmatprep.subr.bf16.mxu1 %v13200_v4  ;;  %v3188_v4 = vld [vmem:[%s15947_s6 + $0x218] sm:$0xff] }
 0x43c   : > { %6566 = vmatpush1.bf16.msra.mxu0 %v13197_v40  ;;  %v13247_v40 = vcombine.low %v3180_v35, %v3184_v31  ;;  %v3232_v35 = vld [vmem:[%s15947_s6 + $0x378] sm:$0xff] }
 0x43d   : > { %6730 = vmatpush1.bf16.msra.mxu1 %v13199_v42  ;;  %6567 = vmatprep.subr.bf16.mxu0 %v13206_v32  ;;  %v13254_v42 = vcombine.high %v3187_v58, %v3191_v27  ;;  %v13256_v32 = vcombine.high %v3188_v4, %v3192_v5  ;;  %v3239_v58 = vld [vmem:[%s15947_s6 + $0x3b0] sm:$0xff]  ;;  %v3236_v27 = vld [vmem:[%s15947_s6 + $0x398] sm:$0xff] }
 0x43e   : > { %6731 = vmatprep.subr.bf16.mxu1 %v13208_v36  ;;  %v3195_v36 = vld [vmem:[%s15947_s6 + $0x250] sm:$0xff] }
 0x43f   : > { %v13261_v12 = vcombine.low %v3195_v36, %v3199_v24 }
 0x440   : > { %6568 = vmatpush1.bf16.msra.mxu0 %v13205_v48  ;;  %v13255_v48 = vcombine.low %v3188_v4, %v3192_v5  ;;  %v3240_v4 = vld [vmem:[%s15947_s6 + $0x3b8] sm:$0xff] }
 0x441   : > { %6732 = vmatpush1.bf16.msra.mxu1 %v13207_v52  ;;  %6569 = vmatprep.subr.bf16.mxu0 %v13214_v63  ;;  %v13262_v52 = vcombine.high %v3195_v36, %v3199_v24  ;;  %v13264_v63 = vcombine.high %v3196_v45, %v3200_v37  ;;  %v3247_v36 = vld [vmem:[%s15947_s6 + $0x3f0] sm:$0xff]  ;;  %v3244_v24 = vld [vmem:[%s15947_s6 + $0x3d8] sm:$0xff] }
 0x442   : > { %6733 = vmatprep.subr.bf16.mxu1 %v13216_v19  ;;  %v3203_v19 = vld [vmem:[%s15947_s6 + $0x290] sm:$0xff] }
 0x443   : > { %v13269_v61 = vcombine.low %v3203_v19, %v3207_v39 }
 0x444   : > { %6570 = vmatpush1.bf16.msra.mxu0 %v13213_v1  ;;  %v13263_v1 = vcombine.low %v3196_v45, %v3200_v37  ;;  %v3248_v45 = vld [vmem:[%s15947_s6 + $0x3f8] sm:$0xff] }
 0x445   : > { %6734 = vmatpush1.bf16.msra.mxu1 %v13215_v10  ;;  %6571 = vmatprep.subr.bf16.mxu0 %v13222_v46  ;;  %v13270_v10 = vcombine.high %v3203_v19, %v3207_v39  ;;  %v13272_v46 = vcombine.high %v3204_v33, %v3208_v41  ;;  %v3255_v19 = vld [vmem:[%s15947_s6 + $0x430] sm:$0xff]  ;;  %v3252_v39 = vld [vmem:[%s15947_s6 + $0x418] sm:$0xff] }
 0x446   : > { %6735 = vmatprep.subr.bf16.mxu1 %v13224_v50  ;;  %v3211_v50 = vld [vmem:[%s15947_s6 + $0x2d0] sm:$0xff] }
 0x447   : > { %v13277_v49 = vcombine.low %v3211_v50, %v3215_v11 }
 0x448   : > { %6572 = vmatpush1.bf16.msra.mxu0 %v13221_v22  ;;  %v13271_v22 = vcombine.low %v3204_v33, %v3208_v41  ;;  %v3256_v33 = vld [vmem:[%s15947_s6 + $0x438] sm:$0xff] }
 0x449   : > { %6736 = vmatpush1.bf16.msra.mxu1 %v13223_v62  ;;  %6573 = vmatprep.subr.bf16.mxu0 %v13230_v54  ;;  %v13278_v62 = vcombine.high %v3211_v50, %v3215_v11  ;;  %v13280_v54 = vcombine.high %v3212_v17, %v3216_v18  ;;  %v3263_v50 = vld [vmem:[%s15947_s6 + $0x470] sm:$0xff] }
 0x44a   : > { %6737 = vmatprep.subr.bf16.mxu1 %v13232_v0  ;;  %v3219_v0 = vld [vmem:[%s15947_s6 + $0x310] sm:$0xff] }
 0x44b   : > { %v13285_v31 = vcombine.low %v3219_v0, %v3223_v56 }
 0x44c   : > { %6574 = vmatpush1.bf16.msra.mxu0 %v13229_v23  ;;  %v13279_v23 = vcombine.low %v3212_v17, %v3216_v18  ;;  %v3260_v17 = vld [vmem:[%s15947_s6 + $0x458] sm:$0xff] }
 0x44d   : > { %6738 = vmatpush1.bf16.msra.mxu1 %v13231_v2  ;;  %6575 = vmatprep.subr.bf16.mxu0 %v13238_v3  ;;  %v13286_v2 = vcombine.high %v3219_v0, %v3223_v56  ;;  %v13288_v3 = vcombine.high %v3220_v20, %v3224_v59  ;;  %v3264_v18 = vld [vmem:[%s15947_s6 + $0x478] sm:$0xff] }
 0x44e   : > { %6739 = vmatprep.subr.bf16.mxu1 %v13240_v34  ;;  %v3227_v34 = vld [vmem:[%s15947_s6 + $0x350] sm:$0xff]  ;;  %v13328_v0 = vcombine.high %v3260_v17, %v3264_v18  ;;  %v3268_v56 = vld [vmem:[%s15947_s6 + $0x498] sm:$0xff] }
 0x44f   : > { %v13293_v5 = vcombine.low %v3227_v34, %v3231_v25 }
 0x450   : > { %6576 = vmatpush1.bf16.msra.mxu0 %v13237_v55  ;;  %v13287_v55 = vcombine.low %v3220_v20, %v3224_v59  ;;  %v3272_v20 = vld [vmem:[%s15947_s6 + $0x4b8] sm:$0xff] }
 0x451   : > { %6740 = vmatpush1.bf16.msra.mxu1 %v13239_v28  ;;  %6577 = vmatprep.subr.bf16.mxu0 %v13246_v30  ;;  %v13294_v28 = vcombine.high %v3227_v34, %v3231_v25  ;;  %v13296_v30 = vcombine.high %v3228_v26, %v3232_v35  ;;  %v3279_v34 = vld [vmem:[%s15947_s6 + $0x4f0] sm:$0xff]  ;;  %v3276_v25 = vld [vmem:[%s15947_s6 + $0x4d8] sm:$0xff] }
 0x452   : > { %6741 = vmatprep.subr.bf16.mxu1 %v13248_v29  ;;  %v3235_v29 = vld [vmem:[%s15947_s6 + $0x390] sm:$0xff] }
 0x453   : > { %v13301_v37 = vcombine.low %v3235_v29, %v3239_v58 }
 0x454   : > { %6578 = vmatpush1.bf16.msra.mxu0 %v13245_v9  ;;  %v13295_v9 = vcombine.low %v3228_v26, %v3232_v35  ;;  %v13335_v35 = vcombine.low %v3268_v56, %v3272_v20 }
 0x455   : > { %6742 = vmatpush1.bf16.msra.mxu1 %v13247_v40  ;;  %6579 = vmatprep.subr.bf16.mxu0 %v13254_v42  ;;  %v13302_v40 = vcombine.high %v3235_v29, %v3239_v58  ;;  %v13304_v42 = vcombine.high %v3236_v27, %v3240_v4  ;;  %v3288_v29 = vld [vmem:[%s15947_s6 + $0x538] sm:$0xff] }
 0x456   : > { %6743 = vmatprep.subr.bf16.mxu1 %v13256_v32  ;;  %v3243_v32 = vld [vmem:[%s15947_s6 + $0x3d0] sm:$0xff] }
 0x457   : > { %v13309_v41 = vcombine.low %v3243_v32, %v3247_v36 }
 0x458   : > { %6580 = vmatpush1.bf16.msra.mxu0 %v13253_v38  ;;  %v13303_v38 = vcombine.low %v3236_v27, %v3240_v4 }
 0x459   : > { %6744 = vmatpush1.bf16.msra.mxu1 %v13255_v48  ;;  %6581 = vmatprep.subr.bf16.mxu0 %v13262_v52  ;;  %v13310_v48 = vcombine.high %v3243_v32, %v3247_v36  ;;  %v13312_v52 = vcombine.high %v3244_v24, %v3248_v45  ;;  %v3296_v32 = vld [vmem:[%s15947_s6 + $0x578] sm:$0xff] }
 0x45a   : > { %6745 = vmatprep.subr.bf16.mxu1 %v13264_v63  ;;  %v3251_v63 = vld [vmem:[%s15947_s6 + $0x410] sm:$0xff] }
 0x45b   : > { %v13317_v11 = vcombine.low %v3251_v63, %v3255_v19 }
 0x45c   : > { %6582 = vmatpush1.bf16.msra.mxu0 %v13261_v12  ;;  %v13311_v12 = vcombine.low %v3244_v24, %v3248_v45 }
 0x45d   : > { %6746 = vmatpush1.bf16.msra.mxu1 %v13263_v1  ;;  %6583 = vmatprep.subr.bf16.mxu0 %v13270_v10  ;;  %v13318_v1 = vcombine.high %v3251_v63, %v3255_v19  ;;  %v13320_v10 = vcombine.high %v3252_v39, %v3256_v33  ;;  %v3304_v63 = vld [vmem:[%s15947_s6 + $0x5b8] sm:$0xff] }
 0x45e   : > { %6747 = vmatprep.subr.bf16.mxu1 %v13272_v46  ;;  %v3259_v46 = vld [vmem:[%s15947_s6 + $0x450] sm:$0xff] }
 0x45f   : > { %v13325_v59 = vcombine.low %v3259_v46, %v3263_v50 }
 0x460   : > { %6584 = vmatpush1.bf16.msra.mxu0 %v13269_v61  ;;  %v13319_v61 = vcombine.low %v3252_v39, %v3256_v33 }
 0x461   : > { %6748 = vmatpush1.bf16.msra.mxu1 %v13271_v22  ;;  %6585 = vmatprep.subr.bf16.mxu0 %v13278_v62  ;;  %v13326_v22 = vcombine.high %v3259_v46, %v3263_v50  ;;  %v3267_v62 = vld [vmem:[%s15947_s6 + $0x490] sm:$0xff]  ;;  %v3312_v46 = vld [vmem:[%s15947_s6 + $0x5f8] sm:$0xff] }
 0x462   : > { %6749 = vmatprep.subr.bf16.mxu1 %v13280_v54  ;;  %v3271_v54 = vld [vmem:[%s15947_s6 + $0x4b0] sm:$0xff] }
 0x463   : > { %v13333_v26 = vcombine.low %v3267_v62, %v3271_v54 }
 0x464   : > { %6586 = vmatpush1.bf16.msra.mxu0 %v13277_v49  ;;  %v13327_v49 = vcombine.low %v3260_v17, %v3264_v18 }
 0x465   : > { %6750 = vmatpush1.bf16.msra.mxu1 %v13279_v23  ;;  %6587 = vmatprep.subr.bf16.mxu0 %v13286_v2  ;;  %v13334_v23 = vcombine.high %v3267_v62, %v3271_v54  ;;  %v13336_v2 = vcombine.high %v3268_v56, %v3272_v20  ;;  %v3316_v62 = vld [vmem:[%s15947_s6 + $0x618] sm:$0xff] }
 0x466   : > { %6751 = vmatprep.subr.bf16.mxu1 %v13288_v3  ;;  %v3275_v3 = vld [vmem:[%s15947_s6 + $0x4d0] sm:$0xff]  ;;  %v3320_v54 = vld [vmem:[%s15947_s6 + $0x638] sm:$0xff] }
 0x467   : > { %v13341_v58 = vcombine.low %v3275_v3, %v3279_v34 }
 0x468   : > { %6588 = vmatpush1.bf16.msra.mxu0 %v13285_v31  ;;  %v13342_v31 = vcombine.high %v3275_v3, %v3279_v34  ;;  %v3328_v3 = vld [vmem:[%s15947_s6 + $0x678] sm:$0xff] }
 0x469   : > { %6752 = vmatpush1.bf16.msra.mxu1 %v13287_v55  ;;  %6589 = vmatprep.subr.bf16.mxu0 %v13294_v28  ;;  %v3283_v55 = vld [vmem:[%s15947_s6 + $0x510] sm:$0xff] }
 0x46a   : > { %6753 = vmatprep.subr.bf16.mxu1 %v13296_v30  ;;  %v3287_v28 = vld [vmem:[%s15947_s6 + $0x530] sm:$0xff]  ;;  %v3284_v30 = vld [vmem:[%s15947_s6 + $0x518] sm:$0xff] }
 0x46b   : > { %v13350_v4 = vcombine.high %v3283_v55, %v3287_v28  ;;  %v13349_v36 = vcombine.low %v3283_v55, %v3287_v28  ;;  %v13351_v24 = vcombine.low %v3284_v30, %v3288_v29  ;;  %v3336_v55 = vld [vmem:[%s15947_s6 + $0x6b8] sm:$0xff] }
 0x46c   : > { %6590 = vmatpush1.bf16.msra.mxu0 %v13293_v5  ;;  %v13352_v5 = vcombine.high %v3284_v30, %v3288_v29 }
 0x46d   : > { %6754 = vmatpush1.bf16.msra.mxu1 %v13295_v9  ;;  %6591 = vmatprep.subr.bf16.mxu0 %v13302_v40  ;;  %v3291_v9 = vld [vmem:[%s15947_s6 + $0x550] sm:$0xff] }
 0x46e   : > { %6755 = vmatprep.subr.bf16.mxu1 %v13304_v42  ;;  %v3295_v40 = vld [vmem:[%s15947_s6 + $0x570] sm:$0xff]  ;;  %v3292_v42 = vld [vmem:[%s15947_s6 + $0x558] sm:$0xff] }
 0x46f   : > { %v13358_v45 = vcombine.high %v3291_v9, %v3295_v40  ;;  %v13357_v19 = vcombine.low %v3291_v9, %v3295_v40  ;;  %v13359_v39 = vcombine.low %v3292_v42, %v3296_v32  ;;  %v3344_v9 = vld [vmem:[%s15947_s6 + $0x6f8] sm:$0xff] }
 0x470   : > { %6592 = vmatpush1.bf16.msra.mxu0 %v13301_v37  ;;  %v13360_v37 = vcombine.high %v3292_v42, %v3296_v32 }
 0x471   : > { %6756 = vmatpush1.bf16.msra.mxu1 %v13303_v38  ;;  %6593 = vmatprep.subr.bf16.mxu0 %v13310_v48  ;;  %v3299_v38 = vld [vmem:[%s15947_s6 + $0x590] sm:$0xff] }
 0x472   : > { %6757 = vmatprep.subr.bf16.mxu1 %v13312_v52  ;;  %v3303_v48 = vld [vmem:[%s15947_s6 + $0x5b0] sm:$0xff]  ;;  %v3300_v52 = vld [vmem:[%s15947_s6 + $0x598] sm:$0xff] }
 0x473   : > { %v13366_v33 = vcombine.high %v3299_v38, %v3303_v48  ;;  %v13365_v50 = vcombine.low %v3299_v38, %v3303_v48  ;;  %v3352_v38 = vld [vmem:[%s15947_s6 + $0x738] sm:$0xff] }
 0x474   : > { %6594 = vmatpush1.bf16.msra.mxu0 %v13309_v41  ;;  %v13368_v41 = vcombine.high %v3300_v52, %v3304_v63 }
 0x475   : > { %6758 = vmatpush1.bf16.msra.mxu1 %v13311_v12  ;;  %6604 = vmatprep.subr.bf16.mxu0 %v13318_v1  ;;  %v3307_v12 = vld [vmem:[%s15947_s6 + $0x5d0] sm:$0xff] }
 0x476   : > { %6768 = vmatprep.subr.bf16.mxu1 %v13320_v10  ;;  %v3311_v1 = vld [vmem:[%s15947_s6 + $0x5f0] sm:$0xff]  ;;  %v3308_v10 = vld [vmem:[%s15947_s6 + $0x5d8] sm:$0xff] }
 0x477   : > { %6596 = vmatmul.mubr.bf16.vlgmr.msra.gmra.mrb[20].mxu0 %v16485_v21  ;;  %v13374_v17 = vcombine.high %v3307_v12, %v3311_v1  ;;  %v13376_v18 = vcombine.high %v3308_v10, %v3312_v46  ;;  %v13375_v56 = vcombine.low %v3308_v10, %v3312_v46 }
 0x478   : > { %6760 = vmatmul.mubr.bf16.vlgmr.msra.gmra.mrb[20].mxu1 %v16485_v21  ;;  %6605 = vmatpush1.bf16.msra.mxu0 %v13317_v11  ;;  %v3280_v21 = vld [vmem:[%s15947_s6 + $0x4f8] sm:$0xff]  ;;  %v13367_v11 = vcombine.low %v3300_v52, %v3304_v63 }
 0x479   : > { %6636 = vmatprep.mubr.bf16.mxu0 %v16493_v53  ;;  %6769 = vmatpush1.bf16.msra.mxu1 %v13319_v61  ;;  %v13343_v27 = vcombine.low %v3276_v25, %v3280_v21  ;;  %v3315_v61 = vld [vmem:[%s15947_s6 + $0x610] sm:$0xff] }
 0x47a   : > { %6800 = vmatprep.mubr.bf16.mxu1 %v16493_v53  ;;  %6606 = vmatprep.subr.bf16.mxu0 %v13326_v22  ;;  %v13344_v53 = vcombine.high %v3276_v25, %v3280_v21  ;;  %v3319_v22 = vld [vmem:[%s15947_s6 + $0x630] sm:$0xff]  ;;  %v13383_v25 = vcombine.low %v3316_v62, %v3320_v54 }
 0x47b   : > { %6770 = vmatprep.subr.bf16.mxu1 %v13328_v0  ;;  %v13373_v0 = vcombine.low %v3307_v12, %v3311_v1  ;;  %v13382_v20 = vcombine.high %v3315_v61, %v3319_v22  ;;  %v13381_v34 = vcombine.low %v3315_v61, %v3319_v22  ;;  %v3360_v12 = vld [vmem:[%s15947_s6 + $0x778] sm:$0xff] }
 0x47c   : > { %6607 = vmatpush1.bf16.msra.mxu0 %v13325_v59  ;;  %v13384_v59 = vcombine.high %v3316_v62, %v3320_v54  ;;  %v3368_v61 = vld [vmem:[%s15947_s6 + $0x7b8] sm:$0xff] }
 0x47d   : > { %6771 = vmatpush1.bf16.msra.mxu1 %v13327_v49  ;;  %6608 = vmatprep.subr.bf16.mxu0 %v13334_v23  ;;  %v3323_v49 = vld [vmem:[%s15947_s6 + $0x650] sm:$0xff] }
 0x47e   : > { %6772 = vmatprep.subr.bf16.mxu1 %v13336_v2  ;;  %v3327_v23 = vld [vmem:[%s15947_s6 + $0x670] sm:$0xff]  ;;  %v3324_v2 = vld [vmem:[%s15947_s6 + $0x658] sm:$0xff] }
 0x47f   : > { %v13390_v21 = vcombine.high %v3323_v49, %v3327_v23  ;;  %v13389_v28 = vcombine.low %v3323_v49, %v3327_v23  ;;  %v13391_v30 = vcombine.low %v3324_v2, %v3328_v3  ;;  %v3376_v49 = vld [vmem:[%s15947_s6 + $0x7f8] sm:$0xff] }
 0x480   : > { %6609 = vmatpush1.bf16.msra.mxu0 %v13333_v26  ;;  %v13392_v26 = vcombine.high %v3324_v2, %v3328_v3 }
 0x481   : > { %6773 = vmatpush1.bf16.msra.mxu1 %v13335_v35  ;;  %6610 = vmatprep.subr.bf16.mxu0 %v13342_v31  ;;  %v3331_v35 = vld [vmem:[%s15947_s6 + $0x690] sm:$0xff] }
 0x482   : > { %6774 = vmatprep.subr.bf16.mxu1 %v13344_v53  ;;  %v3335_v31 = vld [vmem:[%s15947_s6 + $0x6b0] sm:$0xff]  ;;  %v3332_v53 = vld [vmem:[%s15947_s6 + $0x698] sm:$0xff] }
 0x483   : > { %v13398_v29 = vcombine.high %v3331_v35, %v3335_v31  ;;  %v13397_v40 = vcombine.low %v3331_v35, %v3335_v31  ;;  %v13399_v42 = vcombine.low %v3332_v53, %v3336_v55  ;;  %v3384_v35 = vld [vmem:[%s15947_s6 + $0x838] sm:$0xff] }
 0x484   : > { %6611 = vmatpush1.bf16.msra.mxu0 %v13341_v58  ;;  %v13400_v58 = vcombine.high %v3332_v53, %v3336_v55 }
 0x485   : > { %6775 = vmatpush1.bf16.msra.mxu1 %v13343_v27  ;;  %6612 = vmatprep.subr.bf16.mxu0 %v13350_v4  ;;  %v3339_v27 = vld [vmem:[%s15947_s6 + $0x6d0] sm:$0xff] }
 0x486   : > { %6776 = vmatprep.subr.bf16.mxu1 %v13352_v5  ;;  %v3343_v4 = vld [vmem:[%s15947_s6 + $0x6f0] sm:$0xff]  ;;  %v3340_v5 = vld [vmem:[%s15947_s6 + $0x6d8] sm:$0xff] }
 0x487   : > { %v13406_v32 = vcombine.high %v3339_v27, %v3343_v4  ;;  %v13405_v48 = vcombine.low %v3339_v27, %v3343_v4  ;;  %v13407_v52 = vcombine.low %v3340_v5, %v3344_v9  ;;  %v3388_v27 = vld [vmem:[%s15947_s6 + $0x858] sm:$0xff] }
 0x488   : > { %6613 = vmatpush1.bf16.msra.mxu0 %v13349_v36  ;;  %v13408_v36 = vcombine.high %v3340_v5, %v3344_v9  ;;  %v3392_v4 = vld [vmem:[%s15947_s6 + $0x878] sm:$0xff] }
 0x489   : > { %6777 = vmatpush1.bf16.msra.mxu1 %v13351_v24  ;;  %6614 = vmatprep.subr.bf16.mxu0 %v13358_v45  ;;  %v3347_v24 = vld [vmem:[%s15947_s6 + $0x710] sm:$0xff] }
 0x48a   : > { %6778 = vmatprep.subr.bf16.mxu1 %v13360_v37  ;;  %v3351_v45 = vld [vmem:[%s15947_s6 + $0x730] sm:$0xff]  ;;  %v3348_v37 = vld [vmem:[%s15947_s6 + $0x718] sm:$0xff] }
 0x48b   : > { %v13414_v63 = vcombine.high %v3347_v24, %v3351_v45  ;;  %v13413_v1 = vcombine.low %v3347_v24, %v3351_v45  ;;  %v13415_v10 = vcombine.low %v3348_v37, %v3352_v38  ;;  %v3400_v24 = vld [vmem:[%s15947_s6 + $0x8b8] sm:$0xff] }
 0x48c   : > { %6615 = vmatpush1.bf16.msra.mxu0 %v13357_v19  ;;  %v13416_v19 = vcombine.high %v3348_v37, %v3352_v38  ;;  %v13455_v37 = vcombine.low %v3388_v27, %v3392_v4 }
 0x48d   : > { %6779 = vmatpush1.bf16.msra.mxu1 %v13359_v39  ;;  %6616 = vmatprep.subr.bf16.mxu0 %v13366_v33  ;;  %v3355_v39 = vld [vmem:[%s15947_s6 + $0x750] sm:$0xff] }
 0x48e   : > { %6780 = vmatprep.subr.bf16.mxu1 %v13368_v41  ;;  %v3359_v33 = vld [vmem:[%s15947_s6 + $0x770] sm:$0xff]  ;;  %v3356_v41 = vld [vmem:[%s15947_s6 + $0x758] sm:$0xff] }
 0x48f   : > { %v13422_v46 = vcombine.high %v3355_v39, %v3359_v33  ;;  %v13421_v22 = vcombine.low %v3355_v39, %v3359_v33  ;;  %v13423_v62 = vcombine.low %v3356_v41, %v3360_v12 }
 0x490   : > { %6617 = vmatpush1.bf16.msra.mxu0 %v13365_v50  ;;  %v13424_v50 = vcombine.high %v3356_v41, %v3360_v12  ;;  %v3411_v12 = vld [vmem:[%s15947_s6 + $0x910] sm:$0xff] }
 0x491   : > { %6781 = vmatpush1.bf16.msra.mxu1 %v13367_v11  ;;  %6618 = vmatprep.subr.bf16.mxu0 %v13374_v17  ;;  %v3363_v11 = vld [vmem:[%s15947_s6 + $0x790] sm:$0xff] }
 0x492   : > { %6782 = vmatprep.subr.bf16.mxu1 %v13376_v18  ;;  %v3367_v17 = vld [vmem:[%s15947_s6 + $0x7b0] sm:$0xff]  ;;  %v3364_v18 = vld [vmem:[%s15947_s6 + $0x798] sm:$0xff] }
 0x493   : > { %v13430_v54 = vcombine.high %v3363_v11, %v3367_v17  ;;  %v13429_v23 = vcombine.low %v3363_v11, %v3367_v17  ;;  %v13431_v2 = vcombine.low %v3364_v18, %v3368_v61 }
 0x494   : > { %6619 = vmatpush1.bf16.msra.mxu0 %v13373_v0  ;;  %v13432_v0 = vcombine.high %v3364_v18, %v3368_v61  ;;  %v3419_v61 = vld [vmem:[%s15947_s6 + $0x950] sm:$0xff] }
 0x495   : > { %6783 = vmatpush1.bf16.msra.mxu1 %v13375_v56  ;;  %6620 = vmatprep.subr.bf16.mxu0 %v13382_v20  ;;  %v3371_v56 = vld [vmem:[%s15947_s6 + $0x7d0] sm:$0xff] }
 0x496   : > { %6784 = vmatprep.subr.bf16.mxu1 %v13384_v59  ;;  %v3375_v20 = vld [vmem:[%s15947_s6 + $0x7f0] sm:$0xff]  ;;  %v3372_v59 = vld [vmem:[%s15947_s6 + $0x7d8] sm:$0xff] }
 0x497   : > { %v13438_v3 = vcombine.high %v3371_v56, %v3375_v20  ;;  %v13437_v31 = vcombine.low %v3371_v56, %v3375_v20  ;;  %v13439_v53 = vcombine.low %v3372_v59, %v3376_v49 }
 0x498   : > { %6621 = vmatpush1.bf16.msra.mxu0 %v13381_v34  ;;  %v13440_v34 = vcombine.high %v3372_v59, %v3376_v49  ;;  %v3427_v49 = vld [vmem:[%s15947_s6 + $0x990] sm:$0xff] }
 0x499   : > { %6785 = vmatpush1.bf16.msra.mxu1 %v13383_v25  ;;  %6622 = vmatprep.subr.bf16.mxu0 %v13390_v21  ;;  %v3379_v25 = vld [vmem:[%s15947_s6 + $0x810] sm:$0xff] }
 0x49a   : > { %6786 = vmatprep.subr.bf16.mxu1 %v13392_v26  ;;  %v3383_v21 = vld [vmem:[%s15947_s6 + $0x830] sm:$0xff]  ;;  %v3380_v26 = vld [vmem:[%s15947_s6 + $0x818] sm:$0xff] }
 0x49b   : > { %v13446_v55 = vcombine.high %v3379_v25, %v3383_v21  ;;  %v13447_v5 = vcombine.low %v3380_v26, %v3384_v35 }
 0x49c   : > { %6623 = vmatpush1.bf16.msra.mxu0 %v13389_v28  ;;  %v13448_v28 = vcombine.high %v3380_v26, %v3384_v35  ;;  %v3435_v35 = vld [vmem:[%s15947_s6 + $0x9d0] sm:$0xff] }
 0x49d   : > { %6787 = vmatpush1.bf16.msra.mxu1 %v13391_v30  ;;  %6624 = vmatprep.subr.bf16.mxu0 %v13398_v29  ;;  %v3387_v30 = vld [vmem:[%s15947_s6 + $0x850] sm:$0xff] }
 0x49e   : > { %6788 = vmatprep.subr.bf16.mxu1 %v13400_v58  ;;  %v3391_v29 = vld [vmem:[%s15947_s6 + $0x870] sm:$0xff]  ;;  %v13445_v58 = vcombine.low %v3379_v25, %v3383_v21 }
 0x49f   : > { %v13454_v9 = vcombine.high %v3387_v30, %v3391_v29  ;;  %v13453_v45 = vcombine.low %v3387_v30, %v3391_v29 }
 0x4a0   : > { %6625 = vmatpush1.bf16.msra.mxu0 %v13397_v40  ;;  %v3395_v40 = vld [vmem:[%s15947_s6 + $0x890] sm:$0xff] }
 0x4a1   : > { %6789 = vmatpush1.bf16.msra.mxu1 %v13399_v42  ;;  %6626 = vmatprep.subr.bf16.mxu0 %v13406_v32  ;;  %v3399_v42 = vld [vmem:[%s15947_s6 + $0x8b0] sm:$0xff]  ;;  %v13456_v32 = vcombine.high %v3388_v27, %v3392_v4 }
 0x4a2   : > { %6790 = vmatprep.subr.bf16.mxu1 %v13408_v36  ;;  %v3396_v36 = vld [vmem:[%s15947_s6 + $0x898] sm:$0xff]  ;;  %v13462_v38 = vcombine.high %v3395_v40, %v3399_v42  ;;  %v13461_v39 = vcombine.low %v3395_v40, %v3399_v42  ;;  %v3443_v27 = vld [vmem:[%s15947_s6 + $0xa10] sm:$0xff] }
 0x4a3   : > { %v13463_v33 = vcombine.low %v3396_v36, %v3400_v24  ;;  %v3447_v4 = vld [vmem:[%s15947_s6 + $0xa30] sm:$0xff] }
 0x4a4   : > { %6627 = vmatpush1.bf16.msra.mxu0 %v13405_v48  ;;  %v13464_v48 = vcombine.high %v3396_v36, %v3400_v24  ;;  %v3451_v24 = vld [vmem:[%s15947_s6 + $0xa50] sm:$0xff] }
 0x4a5   : > { %6791 = vmatpush1.bf16.msra.mxu1 %v13407_v52  ;;  %6628 = vmatprep.subr.bf16.mxu0 %v13414_v63  ;;  %v3403_v52 = vld [vmem:[%s15947_s6 + $0x8d0] sm:$0xff] }
 0x4a6   : > { %6792 = vmatprep.subr.bf16.mxu1 %v13416_v19  ;;  %v3407_v63 = vld [vmem:[%s15947_s6 + $0x8f0] sm:$0xff]  ;;  %v3404_v19 = vld [vmem:[%s15947_s6 + $0x8d8] sm:$0xff] }
 0x4a7   : > { %v13470_v41 = vcombine.high %v3403_v52, %v3407_v63 }
 0x4a8   : > { %6629 = vmatpush1.bf16.msra.mxu0 %v13413_v1  ;;  %v3415_v1 = vld [vmem:[%s15947_s6 + $0x930] sm:$0xff] }
 0x4a9   : > { %6793 = vmatpush1.bf16.msra.mxu1 %v13415_v10  ;;  %6630 = vmatprep.subr.bf16.mxu0 %v13422_v46  ;;  %v3412_v10 = vld [vmem:[%s15947_s6 + $0x918] sm:$0xff]  ;;  %v13478_v17 = vcombine.high %v3411_v12, %v3415_v1 }
 0x4aa   : > { %6794 = vmatprep.subr.bf16.mxu1 %v13424_v50  ;;  %v3416_v46 = vld [vmem:[%s15947_s6 + $0x938] sm:$0xff]  ;;  %v13469_v50 = vcombine.low %v3403_v52, %v3407_v63 }
 0x4ab   : > { %v13480_v18 = vcombine.high %v3412_v10, %v3416_v46  ;;  %v13479_v56 = vcombine.low %v3412_v10, %v3416_v46  ;;  %v3467_v46 = vld [vmem:[%s15947_s6 + $0xad0] sm:$0xff] }
 0x4ac   : > { %6631 = vmatpush1.bf16.msra.mxu0 %v13421_v22  ;;  %v3423_v22 = vld [vmem:[%s15947_s6 + $0x970] sm:$0xff] }
 0x4ad   : > { %6795 = vmatpush1.bf16.msra.mxu1 %v13423_v62  ;;  %6632 = vmatprep.subr.bf16.mxu0 %v13430_v54  ;;  %v3420_v62 = vld [vmem:[%s15947_s6 + $0x958] sm:$0xff]  ;;  %v13486_v20 = vcombine.high %v3419_v61, %v3423_v22 }
 0x4ae   : > { %6796 = vmatprep.subr.bf16.mxu1 %v13432_v0  ;;  %v3424_v54 = vld [vmem:[%s15947_s6 + $0x978] sm:$0xff]  ;;  %v13477_v0 = vcombine.low %v3411_v12, %v3415_v1 }
 0x4af   : > { %v13488_v59 = vcombine.high %v3420_v62, %v3424_v54  ;;  %v13487_v25 = vcombine.low %v3420_v62, %v3424_v54  ;;  %v3475_v54 = vld [vmem:[%s15947_s6 + $0xb10] sm:$0xff] }
 0x4b0   : > { %6633 = vmatpush1.bf16.msra.mxu0 %v13429_v23  ;;  %v3431_v23 = vld [vmem:[%s15947_s6 + $0x9b0] sm:$0xff] }
 0x4b1   : > { %6797 = vmatpush1.bf16.msra.mxu1 %v13431_v2  ;;  %6634 = vmatprep.subr.bf16.mxu0 %v13438_v3  ;;  %v3428_v2 = vld [vmem:[%s15947_s6 + $0x998] sm:$0xff]  ;;  %v13494_v21 = vcombine.high %v3427_v49, %v3431_v23 }
 0x4b2   : > { %6798 = vmatprep.subr.bf16.mxu1 %v13440_v34  ;;  %v3432_v3 = vld [vmem:[%s15947_s6 + $0x9b8] sm:$0xff]  ;;  %v13485_v34 = vcombine.low %v3419_v61, %v3423_v22 }
 0x4b3   : > { %v13496_v26 = vcombine.high %v3428_v2, %v3432_v3  ;;  %v13495_v30 = vcombine.low %v3428_v2, %v3432_v3  ;;  %v3483_v3 = vld [vmem:[%s15947_s6 + $0xb50] sm:$0xff] }
 0x4b4   : > { %6635 = vmatpush1.bf16.msra.mxu0 %v13437_v31  ;;  %v3439_v31 = vld [vmem:[%s15947_s6 + $0x9f0] sm:$0xff] }
 0x4b5   : > { %6799 = vmatpush1.bf16.msra.mxu1 %v13439_v53  ;;  %6645 = vmatprep.subr.bf16.mxu0 %v13446_v55  ;;  %v3436_v53 = vld [vmem:[%s15947_s6 + $0x9d8] sm:$0xff]  ;;  %v13502_v29 = vcombine.high %v3435_v35, %v3439_v31  ;;  %v13501_v40 = vcombine.low %v3435_v35, %v3439_v31 }
 0x4b6   : > { %6809 = vmatprep.subr.bf16.mxu1 %v13448_v28  ;;  %v3440_v55 = vld [vmem:[%s15947_s6 + $0x9f8] sm:$0xff]  ;;  %v13493_v28 = vcombine.low %v3427_v49, %v3431_v23 }
 0x4b7   : > { %6637 = vmatmul.mubr.bf16.vlgmr.msra.gmra.mrb[20].mxu0 %v16585_v7  ;;  %v13503_v42 = vcombine.low %v3436_v53, %v3440_v55 }
 0x4b8   : > { %6801 = vmatmul.mubr.bf16.vlgmr.msra.gmra.mrb[20].mxu1 %v16585_v7  ;;  %6646 = vmatpush1.bf16.msra.mxu0 %v13445_v58  ;;  %v3408_v7 = vld [vmem:[%s15947_s6 + $0x8f8] sm:$0xff]  ;;  %v13504_v58 = vcombine.high %v3436_v53, %v3440_v55  ;;  %v3491_v55 = vld [vmem:[%s15947_s6 + $0xb90] sm:$0xff] }
 0x4b9   : > { %6677 = vmatprep.mubr.bf16.mxu0 %v16583_v60  ;;  %6810 = vmatpush1.bf16.msra.mxu1 %v13447_v5  ;;  %v13471_v11 = vcombine.low %v3404_v19, %v3408_v7  ;;  %v3444_v5 = vld [vmem:[%s15947_s6 + $0xa18] sm:$0xff] }
 0x4ba   : > { %6841 = vmatprep.mubr.bf16.mxu1 %v16583_v60  ;;  %6647 = vmatprep.subr.bf16.mxu0 %v13454_v9  ;;  %v13472_v60 = vcombine.high %v3404_v19, %v3408_v7  ;;  %v3448_v9 = vld [vmem:[%s15947_s6 + $0xa38] sm:$0xff]  ;;  %v3459_v7 = vld [vmem:[%s15947_s6 + $0xa90] sm:$0xff] }
 0x4bb   : > { %6811 = vmatprep.subr.bf16.mxu1 %v13456_v32  ;;  %v13510_v32 = vcombine.high %v3443_v27, %v3447_v4  ;;  %v13512_v36 = vcombine.high %v3444_v5, %v3448_v9  ;;  %v13511_v52 = vcombine.low %v3444_v5, %v3448_v9  ;;  %v3499_v9 = vld [vmem:[%s15947_s6 + $0xbd0] sm:$0xff] }
 0x4bc   : > { %6648 = vmatpush1.bf16.msra.mxu0 %v13453_v45  ;;  %v3455_v45 = vld [vmem:[%s15947_s6 + $0xa70] sm:$0xff] }
 0x4bd   : > { %6812 = vmatpush1.bf16.msra.mxu1 %v13455_v37  ;;  %6649 = vmatprep.subr.bf16.mxu0 %v13462_v38  ;;  %v3452_v37 = vld [vmem:[%s15947_s6 + $0xa58] sm:$0xff]  ;;  %v13518_v63 = vcombine.high %v3451_v24, %v3455_v45 }
 0x4be   : > { %6813 = vmatprep.subr.bf16.mxu1 %v13464_v48  ;;  %v3456_v38 = vld [vmem:[%s15947_s6 + $0xa78] sm:$0xff]  ;;  %v13509_v48 = vcombine.low %v3443_v27, %v3447_v4 }
 0x4bf   : > { %v13520_v19 = vcombine.high %v3452_v37, %v3456_v38  ;;  %v13519_v12 = vcombine.low %v3452_v37, %v3456_v38  ;;  %v3507_v38 = vld [vmem:[%s15947_s6 + $0xc10] sm:$0xff] }
 0x4c0   : > { %6650 = vmatpush1.bf16.msra.mxu0 %v13461_v39  ;;  %v3463_v39 = vld [vmem:[%s15947_s6 + $0xab0] sm:$0xff] }
 0x4c1   : > { %6814 = vmatpush1.bf16.msra.mxu1 %v13463_v33  ;;  %6651 = vmatprep.subr.bf16.mxu0 %v13470_v41  ;;  %v3460_v33 = vld [vmem:[%s15947_s6 + $0xa98] sm:$0xff]  ;;  %v13526_v1 = vcombine.high %v3459_v7, %v3463_v39 }
 0x4c2   : > { %6815 = vmatprep.subr.bf16.mxu1 %v13472_v60  ;;  %v3464_v41 = vld [vmem:[%s15947_s6 + $0xab8] sm:$0xff]  ;;  %v13517_v60 = vcombine.low %v3451_v24, %v3455_v45 }
 0x4c3   : > { %v13528_v10 = vcombine.high %v3460_v33, %v3464_v41  ;;  %v13527_v61 = vcombine.low %v3460_v33, %v3464_v41  ;;  %v3515_v41 = vld [vmem:[%s15947_s6 + $0xc50] sm:$0xff] }
 0x4c4   : > { %6652 = vmatpush1.bf16.msra.mxu0 %v13469_v50  ;;  %v3471_v50 = vld [vmem:[%s15947_s6 + $0xaf0] sm:$0xff] }
 0x4c5   : > { %6816 = vmatpush1.bf16.msra.mxu1 %v13471_v11  ;;  %6653 = vmatprep.subr.bf16.mxu0 %v13478_v17  ;;  %v3468_v11 = vld [vmem:[%s15947_s6 + $0xad8] sm:$0xff]  ;;  %v13534_v22 = vcombine.high %v3467_v46, %v3471_v50 }
 0x4c6   : > { %6817 = vmatprep.subr.bf16.mxu1 %v13480_v18  ;;  %v3472_v17 = vld [vmem:[%s15947_s6 + $0xaf8] sm:$0xff]  ;;  %v13525_v18 = vcombine.low %v3459_v7, %v3463_v39 }
 0x4c7   : > { %v13536_v62 = vcombine.high %v3468_v11, %v3472_v17  ;;  %v13535_v49 = vcombine.low %v3468_v11, %v3472_v17  ;;  %v3523_v11 = vld [vmem:[%s15947_s6 + $0xc90] sm:$0xff] }
 0x4c8   : > { %6654 = vmatpush1.bf16.msra.mxu0 %v13477_v0  ;;  %v3479_v0 = vld [vmem:[%s15947_s6 + $0xb30] sm:$0xff] }
 0x4c9   : > { %6818 = vmatpush1.bf16.msra.mxu1 %v13479_v56  ;;  %6655 = vmatprep.subr.bf16.mxu0 %v13486_v20  ;;  %v3476_v56 = vld [vmem:[%s15947_s6 + $0xb18] sm:$0xff]  ;;  %v13542_v23 = vcombine.high %v3475_v54, %v3479_v0  ;;  %v3527_v17 = vld [vmem:[%s15947_s6 + $0xcb0] sm:$0xff] }
 0x4ca   : > { %6819 = vmatprep.subr.bf16.mxu1 %v13488_v59  ;;  %v3480_v20 = vld [vmem:[%s15947_s6 + $0xb38] sm:$0xff]  ;;  %v13533_v59 = vcombine.low %v3467_v46, %v3471_v50 }
 0x4cb   : > { %v13544_v2 = vcombine.high %v3476_v56, %v3480_v20  ;;  %v13543_v35 = vcombine.low %v3476_v56, %v3480_v20  ;;  %v3531_v20 = vld [vmem:[%s15947_s6 + $0xcd0] sm:$0xff] }
 0x4cc   : > { %6656 = vmatpush1.bf16.msra.mxu0 %v13485_v34  ;;  %v3487_v34 = vld [vmem:[%s15947_s6 + $0xb70] sm:$0xff] }
 0x4cd   : > { %6820 = vmatpush1.bf16.msra.mxu1 %v13487_v25  ;;  %6657 = vmatprep.subr.bf16.mxu0 %v13494_v21  ;;  %v3484_v25 = vld [vmem:[%s15947_s6 + $0xb58] sm:$0xff]  ;;  %v13550_v31 = vcombine.high %v3483_v3, %v3487_v34 }
 0x4ce   : > { %6821 = vmatprep.subr.bf16.mxu1 %v13496_v26  ;;  %v3488_v21 = vld [vmem:[%s15947_s6 + $0xb78] sm:$0xff]  ;;  %v13541_v26 = vcombine.low %v3475_v54, %v3479_v0  ;;  %v13590_v0 = vcombine.high %v3523_v11, %v3527_v17 }
 0x4cf   : > { %v13552_v53 = vcombine.high %v3484_v25, %v3488_v21  ;;  %v13551_v27 = vcombine.low %v3484_v25, %v3488_v21  ;;  %v3543_v25 = vld [vmem:[%s15947_s6 + $0xd30] sm:$0xff]  ;;  %v3540_v21 = vld [vmem:[%s15947_s6 + $0xd18] sm:$0xff] }
 0x4d0   : > { %6658 = vmatpush1.bf16.msra.mxu0 %v13493_v28  ;;  %v3495_v28 = vld [vmem:[%s15947_s6 + $0xbb0] sm:$0xff] }
 0x4d1   : > { %6822 = vmatpush1.bf16.msra.mxu1 %v13495_v30  ;;  %6659 = vmatprep.subr.bf16.mxu0 %v13502_v29  ;;  %v3492_v30 = vld [vmem:[%s15947_s6 + $0xb98] sm:$0xff]  ;;  %v13558_v4 = vcombine.high %v3491_v55, %v3495_v28 }
 0x4d2   : > { %6823 = vmatprep.subr.bf16.mxu1 %v13504_v58  ;;  %v3496_v29 = vld [vmem:[%s15947_s6 + $0xbb8] sm:$0xff]  ;;  %v13549_v58 = vcombine.low %v3483_v3, %v3487_v34  ;;  %v3539_v34 = vld [vmem:[%s15947_s6 + $0xd10] sm:$0xff] }
 0x4d3   : > { %v13560_v5 = vcombine.high %v3492_v30, %v3496_v29  ;;  %v13559_v24 = vcombine.low %v3492_v30, %v3496_v29  ;;  %v3551_v30 = vld [vmem:[%s15947_s6 + $0xd70] sm:$0xff]  ;;  %v3548_v29 = vld [vmem:[%s15947_s6 + $0xd58] sm:$0xff] }
 0x4d4   : > { %6660 = vmatpush1.bf16.msra.mxu0 %v13501_v40  ;;  %v3503_v40 = vld [vmem:[%s15947_s6 + $0xbf0] sm:$0xff] }
 0x4d5   : > { %6824 = vmatpush1.bf16.msra.mxu1 %v13503_v42  ;;  %6661 = vmatprep.subr.bf16.mxu0 %v13510_v32  ;;  %v3500_v42 = vld [vmem:[%s15947_s6 + $0xbd8] sm:$0xff]  ;;  %v13566_v45 = vcombine.high %v3499_v9, %v3503_v40 }
 0x4d6   : > { %6825 = vmatprep.subr.bf16.mxu1 %v13512_v36  ;;  %v3504_v32 = vld [vmem:[%s15947_s6 + $0xbf8] sm:$0xff]  ;;  %v13557_v36 = vcombine.low %v3491_v55, %v3495_v28  ;;  %v3547_v28 = vld [vmem:[%s15947_s6 + $0xd50] sm:$0xff] }
 0x4d7   : > { %v13568_v37 = vcombine.high %v3500_v42, %v3504_v32  ;;  %v13567_v7 = vcombine.low %v3500_v42, %v3504_v32  ;;  %v3559_v42 = vld [vmem:[%s15947_s6 + $0xdb0] sm:$0xff]  ;;  %v3556_v32 = vld [vmem:[%s15947_s6 + $0xd98] sm:$0xff] }
 0x4d8   : > { %6662 = vmatpush1.bf16.msra.mxu0 %v13509_v48  ;;  %v3511_v48 = vld [vmem:[%s15947_s6 + $0xc30] sm:$0xff] }
 0x4d9   : > { %6826 = vmatpush1.bf16.msra.mxu1 %v13511_v52  ;;  %6663 = vmatprep.subr.bf16.mxu0 %v13518_v63  ;;  %v3508_v52 = vld [vmem:[%s15947_s6 + $0xc18] sm:$0xff]  ;;  %v13574_v39 = vcombine.high %v3507_v38, %v3511_v48 }
 0x4da   : > { %6827 = vmatprep.subr.bf16.mxu1 %v13520_v19  ;;  %v3512_v63 = vld [vmem:[%s15947_s6 + $0xc38] sm:$0xff]  ;;  %v13565_v19 = vcombine.low %v3499_v9, %v3503_v40  ;;  %v3555_v40 = vld [vmem:[%s15947_s6 + $0xd90] sm:$0xff] }
 0x4db   : > { %v13576_v33 = vcombine.high %v3508_v52, %v3512_v63  ;;  %v13575_v46 = vcombine.low %v3508_v52, %v3512_v63  ;;  %v3563_v52 = vld [vmem:[%s15947_s6 + $0xdd0] sm:$0xff] }
 0x4dc   : > { %6664 = vmatpush1.bf16.msra.mxu0 %v13517_v60  ;;  %v3519_v60 = vld [vmem:[%s15947_s6 + $0xc70] sm:$0xff] }
 0x4dd   : > { %6828 = vmatpush1.bf16.msra.mxu1 %v13519_v12  ;;  %6665 = vmatprep.subr.bf16.mxu0 %v13526_v1  ;;  %v13573_v12 = vcombine.low %v3507_v38, %v3511_v48  ;;  %v3516_v1 = vld [vmem:[%s15947_s6 + $0xc58] sm:$0xff]  ;;  %v13582_v50 = vcombine.high %v3515_v41, %v3519_v60  ;;  %v3567_v63 = vld [vmem:[%s15947_s6 + $0xdf0] sm:$0xff] }
 0x4de   : > { %6829 = vmatprep.subr.bf16.mxu1 %v13528_v10  ;;  %v3520_v10 = vld [vmem:[%s15947_s6 + $0xc78] sm:$0xff] }
 0x4df   : > { %v13583_v54 = vcombine.low %v3516_v1, %v3520_v10 }
 0x4e0   : > { %6666 = vmatpush1.bf16.msra.mxu0 %v13525_v18  ;;  %v13584_v18 = vcombine.high %v3516_v1, %v3520_v10 }
 0x4e1   : > { %6830 = vmatpush1.bf16.msra.mxu1 %v13527_v61  ;;  %6667 = vmatprep.subr.bf16.mxu0 %v13534_v22  ;;  %v3524_v61 = vld [vmem:[%s15947_s6 + $0xc98] sm:$0xff] }
 0x4e2   : > { %6831 = vmatprep.subr.bf16.mxu1 %v13536_v62  ;;  %v3528_v22 = vld [vmem:[%s15947_s6 + $0xcb8] sm:$0xff]  ;;  %v13581_v62 = vcombine.low %v3515_v41, %v3519_v60 }
 0x4e3   : > { %v13592_v56 = vcombine.high %v3524_v61, %v3528_v22 }
 0x4e4   : > { %6668 = vmatpush1.bf16.msra.mxu0 %v13533_v59  ;;  %v3535_v59 = vld [vmem:[%s15947_s6 + $0xcf0] sm:$0xff] }
 0x4e5   : > { %6832 = vmatpush1.bf16.msra.mxu1 %v13535_v49  ;;  %6669 = vmatprep.subr.bf16.mxu0 %v13542_v23  ;;  %v3532_v49 = vld [vmem:[%s15947_s6 + $0xcd8] sm:$0xff]  ;;  %v13589_v23 = vcombine.low %v3523_v11, %v3527_v17  ;;  %v13598_v3 = vcombine.high %v3531_v20, %v3535_v59 }
 0x4e6   : > { %6833 = vmatprep.subr.bf16.mxu1 %v13544_v2  ;;  %v13591_v2 = vcombine.low %v3524_v61, %v3528_v22  ;;  %v3575_v61 = vld [vmem:[%s15947_s6 + $0xe30] sm:$0xff]  ;;  %v3572_v22 = vld [vmem:[%s15947_s6 + $0xe18] sm:$0xff] }
 0x4e8   : > { %6670 = vmatpush1.bf16.msra.mxu0 %v13541_v26  ;;  %v3544_v26 = vld [vmem:[%s15947_s6 + $0xd38] sm:$0xff] }
 0x4e9   : > { %6834 = vmatpush1.bf16.msra.mxu1 %v13543_v35  ;;  %6671 = vmatprep.subr.bf16.mxu0 %v13550_v31  ;;  %v13597_v35 = vcombine.low %v3531_v20, %v3535_v59  ;;  %v13608_v55 = vcombine.high %v3540_v21, %v3544_v26  ;;  %v3579_v59 = vld [vmem:[%s15947_s6 + $0xe50] sm:$0xff] }
 0x4ea   : > { %6835 = vmatprep.subr.bf16.mxu1 %v13552_v53  ;;  %v13606_v53 = vcombine.high %v3539_v34, %v3543_v25 }
 0x4ec   : > { %6672 = vmatpush1.bf16.msra.mxu0 %v13549_v58  ;;  %v3552_v58 = vld [vmem:[%s15947_s6 + $0xd78] sm:$0xff] }
 0x4ed   : > { %6836 = vmatpush1.bf16.msra.mxu1 %v13551_v27  ;;  %6673 = vmatprep.subr.bf16.mxu0 %v13558_v4  ;;  %v13605_v27 = vcombine.low %v3539_v34, %v3543_v25  ;;  %v13607_v4 = vcombine.low %v3540_v21, %v3544_v26  ;;  %v13616_v9 = vcombine.high %v3548_v29, %v3552_v58  ;;  %v3587_v25 = vld [vmem:[%s15947_s6 + $0xe90] sm:$0xff]  ;;  %v3588_v26 = vld [vmem:[%s15947_s6 + $0xe98] sm:$0xff] }
 0x4ee   : > { %6837 = vmatprep.subr.bf16.mxu1 %v13560_v5  ;;  %v13614_v5 = vcombine.high %v3547_v28, %v3551_v30  ;;  %v3591_v21 = vld [vmem:[%s15947_s6 + $0xeb0] sm:$0xff] }
 0x4f0   : > { %6674 = vmatpush1.bf16.msra.mxu0 %v13557_v36  ;;  %v3560_v36 = vld [vmem:[%s15947_s6 + $0xdb8] sm:$0xff] }
 0x4f1   : > { %6838 = vmatpush1.bf16.msra.mxu1 %v13559_v24  ;;  %6675 = vmatprep.subr.bf16.mxu0 %v13566_v45  ;;  %v13613_v24 = vcombine.low %v3547_v28, %v3551_v30  ;;  %v13615_v45 = vcombine.low %v3548_v29, %v3552_v58  ;;  %v13624_v48 = vcombine.high %v3556_v32, %v3560_v36  ;;  %v3595_v30 = vld [vmem:[%s15947_s6 + $0xed0] sm:$0xff]  ;;  %v3596_v58 = vld [vmem:[%s15947_s6 + $0xed8] sm:$0xff] }
 0x4f2   : > { %6839 = vmatprep.subr.bf16.mxu1 %v13568_v37  ;;  %v13622_v37 = vcombine.high %v3555_v40, %v3559_v42  ;;  %v3599_v29 = vld [vmem:[%s15947_s6 + $0xef0] sm:$0xff] }
 0x4f4   : > { %6676 = vmatpush1.bf16.msra.mxu0 %v13565_v19 }
 0x4f5   : > { %6840 = vmatpush1.bf16.msra.mxu1 %v13567_v7  ;;  %6686 = vmatprep.subr.bf16.mxu0 %v13574_v39  ;;  %v3564_v39 = vld [vmem:[%s15947_s6 + $0xdd8] sm:$0xff] }
 0x4f6   : > { %6850 = vmatprep.subr.bf16.mxu1 %v13576_v33  ;;  %v3568_v33 = vld [vmem:[%s15947_s6 + $0xdf8] sm:$0xff] }
 0x4f7   : > { %6678 = vmatmul.mubr.bf16.vlgmr.msra.gmra.mrb[20].mxu0 %v16667_v43  ;;  %v13632_v17 = vcombine.high %v3564_v39, %v3568_v33 }
 0x4f8   : > { %6842 = vmatmul.mubr.bf16.vlgmr.msra.gmra.mrb[20].mxu1 %v16667_v43  ;;  %6687 = vmatpush1.bf16.msra.mxu0 %v13573_v12  ;;  %v3536_v43 = vld [vmem:[%s15947_s6 + $0xcf8] sm:$0xff]  ;;  %v13621_v12 = vcombine.low %v3555_v40, %v3559_v42  ;;  %v3603_v42 = vld [vmem:[%s15947_s6 + $0xf10] sm:$0xff] }
 0x4f9   : > { %6718 = vmatprep.mubr.bf16.mxu0 %v16671_v51  ;;  %6851 = vmatpush1.bf16.msra.mxu1 %v13575_v46  ;;  %v13599_v31 = vcombine.low %v3532_v49, %v3536_v43  ;;  %v13623_v46 = vcombine.low %v3556_v32, %v3560_v36  ;;  %v3607_v32 = vld [vmem:[%s15947_s6 + $0xf30] sm:$0xff]  ;;  %v3604_v36 = vld [vmem:[%s15947_s6 + $0xf18] sm:$0xff] }
 0x4fa   : > { %6882 = vmatprep.mubr.bf16.mxu1 %v16671_v51  ;;  %6688 = vmatprep.subr.bf16.mxu0 %v13582_v50  ;;  %v13600_v51 = vcombine.high %v3532_v49, %v3536_v43  ;;  %v13630_v50 = vcombine.high %v3563_v52, %v3567_v63  ;;  %v3583_v49 = vld [vmem:[%s15947_s6 + $0xe70] sm:$0xff]  ;;  %v3580_v43 = vld [vmem:[%s15947_s6 + $0xe58] sm:$0xff] }
 0x4fb   : > { %6852 = vmatprep.subr.bf16.mxu1 %v13584_v18  ;;  %v3571_v18 = vld [vmem:[%s15947_s6 + $0xe10] sm:$0xff] }
 0x4fc   : > { %6689 = vmatpush1.bf16.msra.mxu0 %v13581_v62  ;;  %v3576_v62 = vld [vmem:[%s15947_s6 + $0xe38] sm:$0xff] }
 0x4fd   : > { %6853 = vmatpush1.bf16.msra.mxu1 %v13583_v54  ;;  %6690 = vmatprep.subr.bf16.mxu0 %v13590_v0  ;;  %v13629_v54 = vcombine.low %v3563_v52, %v3567_v63  ;;  %v13631_v0 = vcombine.low %v3564_v39, %v3568_v33  ;;  %v13640_v20 = vcombine.high %v3572_v22, %v3576_v62  ;;  %v3611_v63 = vld [vmem:[%s15947_s6 + $0xf50] sm:$0xff]  ;;  %v3612_v33 = vld [vmem:[%s15947_s6 + $0xf58] sm:$0xff] }
 0x4fe   : > { %6854 = vmatprep.subr.bf16.mxu1 %v13592_v56  ;;  %v13638_v56 = vcombine.high %v3571_v18, %v3575_v61  ;;  %v3615_v39 = vld [vmem:[%s15947_s6 + $0xf70] sm:$0xff] }
 0x500   : > { %6691 = vmatpush1.bf16.msra.mxu0 %v13589_v23  ;;  %v3584_v23 = vld [vmem:[%s15947_s6 + $0xe78] sm:$0xff] }
 0x501   : > { %6855 = vmatpush1.bf16.msra.mxu1 %v13591_v2  ;;  %6692 = vmatprep.subr.bf16.mxu0 %v13598_v3  ;;  %v13637_v2 = vcombine.low %v3571_v18, %v3575_v61  ;;  %v13639_v3 = vcombine.low %v3572_v22, %v3576_v62  ;;  %v13648_v34 = vcombine.high %v3580_v43, %v3584_v23  ;;  %v3624_v18 = vld [vmem:[%s15947_s6 + $0xfb8] sm:$0xff]  ;;  %v17018_v61 = vld [vmem:[%s583_s2] sm:$0xff] }
 0x502   : > { %6856 = vmatprep.subr.bf16.mxu1 %v13600_v51  ;;  %v13646_v51 = vcombine.high %v3579_v59, %v3583_v49  ;;  %v13677_v22 = vcombine.low %v3611_v63, %v3615_v39 }
 0x504   : > { %6693 = vmatpush1.bf16.msra.mxu0 %v13597_v35  ;;  %v3592_v35 = vld [vmem:[%s15947_s6 + $0xeb8] sm:$0xff] }
 0x505   : > { %6857 = vmatpush1.bf16.msra.mxu1 %v13599_v31  ;;  %6694 = vmatprep.subr.bf16.mxu0 %v13606_v53  ;;  %v13645_v31 = vcombine.low %v3579_v59, %v3583_v49  ;;  %v13647_v53 = vcombine.low %v3580_v43, %v3584_v23  ;;  %v13656_v28 = vcombine.high %v3588_v26, %v3592_v35  ;;  %v3628_v49 = vld [vmem:[%s15947_s6 + $0xfd8] sm:$0xff] }
 0x506   : > { %6858 = vmatprep.subr.bf16.mxu1 %v13608_v55  ;;  %v13654_v55 = vcombine.high %v3587_v25, %v3591_v21  ;;  %v3642_v59 = vrot.slane %v17018_v61, %v16063_v15  ;;  %v3632_v43 = vld [vmem:[%s15947_s6 + $0xff8] sm:$0xff] }
 0x508   : > { %6695 = vmatpush1.bf16.msra.mxu0 %v13605_v27  ;;  %v3600_v27 = vld [vmem:[%s15947_s6 + $0xef8] sm:$0xff] }
 0x509   : > { %6859 = vmatpush1.bf16.msra.mxu1 %v13607_v4  ;;  %6696 = vmatprep.subr.bf16.mxu0 %v13614_v5  ;;  %v13653_v4 = vcombine.low %v3587_v25, %v3591_v21  ;;  %v13655_v5 = vcombine.low %v3588_v26, %v3592_v35  ;;  %v13664_v40 = vcombine.high %v3596_v58, %v3600_v27  ;;  %v6911_v25 = vld [vmem:[%s15954_s29 + $0x20] sm:$0xff]  ;;  %v6908_v26 = vld [vmem:[%s15954_s29 + $0x8] sm:$0xff] }
 0x50a   : > { %v16976_v38 = vpop.f32.mrb[16].mxu0  ;;  %6860 = vmatprep.subr.bf16.mxu1 %v13616_v9  ;;  %v13662_v9 = vcombine.high %v3595_v30, %v3599_v29  ;;  %v6912_v35 = vld [vmem:[%s15954_s29 + $0x28] sm:$0xff] }
 0x50b   : > { %v16980_v19 = vpop.f32.mrb[16].mxu1  ;;  %v16982_v7 = vpop.f32.mrb[17].mxu0 }
 0x50c   : > { %v16986_v41 = vpop.f32.mrb[17].mxu1  ;;  %v6396_v60 = vpop.f32.mrb[18].mxu0  ;;  %6697 = vmatpush1.bf16.msra.mxu0 %v13613_v24  ;;  %v3608_v24 = vld [vmem:[%s15947_s6 + $0xf38] sm:$0xff]  ;;  %v14478_v21 = vadd.f32 %v16982_v7, %v3642_v59 }
 0x50d   : > { %v6560_v1 = vpop.f32.mrb[18].mxu1  ;;  %6861 = vmatpush1.bf16.msra.mxu1 %v13615_v45  ;;  %v6397_v10 = vpop.f32.mrb[19].mxu0  ;;  %6698 = vmatprep.subr.bf16.mxu0 %v13622_v37  ;;  %v13661_v45 = vcombine.low %v3595_v30, %v3599_v29  ;;  %v13663_v37 = vcombine.low %v3596_v58, %v3600_v27  ;;  %v13672_v52 = vcombine.high %v3604_v36, %v3608_v24  ;;  %v3616_v60 = vld [vmem:[%s15947_s6 + $0xf78] sm:$0xff]  ;;  %v6915_v29 = vld [vmem:[%s15954_s29 + $0x40] sm:$0xff] }
 0x50e   : > { %v6561_v11 = vpop.f32.mrb[19].mxu1  ;;  %6862 = vmatprep.subr.bf16.mxu1 %v13624_v48  ;;  %v13670_v48 = vcombine.high %v3603_v42, %v3607_v32  ;;  %v13671_v1 = vcombine.low %v3604_v36, %v3608_v24  ;;  %v13678_v10 = vcombine.high %v3611_v63, %v3615_v39  ;;  %v13679_v62 = vcombine.low %v3612_v33, %v3616_v60  ;;  %v6919_v58 = vld [vmem:[%s15954_s29 + $0x60] sm:$0xff]  ;;  %v6916_v27 = vld [vmem:[%s15954_s29 + $0x48] sm:$0xff] }
 0x50f   : > { %v3623_v11 = vld [vmem:[%s15947_s6 + $0xfb0] sm:$0xff]  ;;  %v6892_v30 = vmax.f32 %v14478_v21, 0.0  ;;  %v6924_v24 = vld [vmem:[%s15954_s29 + $0x88] sm:$0xff] }
 0x510   : > { %6699 = vmatpush1.bf16.msra.mxu0 %v13621_v12  ;;  %v13669_v12 = vcombine.low %v3603_v42, %v3607_v32  ;;  %v6927_v42 = vld [vmem:[%s15954_s29 + $0xa0] sm:$0xff]  ;;  %v6948_v59 = vld [vmem:[%s15954_s29 + $0x148] sm:$0xff] }
 0x511   : > { %6863 = vmatpush1.bf16.msra.mxu1 %v13623_v46  ;;  %6700 = vmatprep.subr.bf16.mxu0 %v13630_v50  ;;  %v13680_v46 = vcombine.high %v3612_v33, %v3616_v60  ;;  %v3619_v50 = vld [vmem:[%s15947_s6 + $0xf90] sm:$0xff]  ;;  %v17037_v32 = vpack.c.bf16 %v6892_v30, %v6892_v30  ;;  %v6932_v60 = vld [vmem:[%s15954_s29 + $0xc8] sm:$0xff] }
 0x512   : > { %6864 = vmatprep.subr.bf16.mxu1 %v13632_v17  ;;  %v3620_v17 = vld [vmem:[%s15947_s6 + $0xf98] sm:$0xff]  ;;  %v13685_v23 = vcombine.low %v3619_v50, %v3623_v11  ;;  %v6931_v39 = vld [vmem:[%s15954_s29 + $0xc0] sm:$0xff] }
 0x513   : > { %v6935_v33 = vld [vmem:[%s15954_s29 + $0xe0] sm:$0xff]  ;;  %v6960_v21 = vld [vmem:[%s15954_s29 + $0x1a8] sm:$0xff] }
 0x514   : > { %6701 = vmatpush1.bf16.msra.mxu0 %v13629_v54  ;;  %v13686_v54 = vcombine.high %v3619_v50, %v3623_v11  ;;  %v6939_v50 = vld [vmem:[%s15954_s29 + $0x100] sm:$0xff]  ;;  %v6964_v30 = vld [vmem:[%s15954_s29 + $0x1c8] sm:$0xff] }
 0x515   : > { %6865 = vmatpush1.bf16.msra.mxu1 %v13631_v0  ;;  %6702 = vmatprep.subr.bf16.mxu0 %v13638_v56  ;;  %v13688_v0 = vcombine.high %v3620_v17, %v3624_v18  ;;  %v3627_v56 = vld [vmem:[%s15947_s6 + $0xfd0] sm:$0xff] }
 0x516   : > { %6866 = vmatprep.subr.bf16.mxu1 %v13640_v20  ;;  %v3631_v20 = vld [vmem:[%s15947_s6 + $0xff0] sm:$0xff] }
 0x517   : > { %v6943_v11 = vld [vmem:[%s15954_s29 + $0x120] sm:$0xff] }
 0x518   : > { %6703 = vmatpush1.bf16.msra.mxu0 %v13637_v2  ;;  %v13687_v2 = vcombine.low %v3620_v17, %v3624_v18  ;;  %v6940_v17 = vld [vmem:[%s15954_s29 + $0x108] sm:$0xff] }
 0x519   : > { %6867 = vmatpush1.bf16.msra.mxu1 %v13639_v3  ;;  %6704 = vmatprep.subr.bf16.mxu0 %v13646_v51  ;;  %v13694_v3 = vcombine.high %v3627_v56, %v3631_v20  ;;  %v13696_v51 = vcombine.high %v3628_v49, %v3632_v43  ;;  %v6944_v18 = vld [vmem:[%s15954_s29 + $0x128] sm:$0xff] }
 0x51a   : > { %6868 = vmatprep.subr.bf16.mxu1 %v13648_v34  ;;  %v6907_v34 = vld [vmem:[%s15954_s29] sm:$0xff] }
 0x51b   : > { %v13697_v7 = vcombine.low %v6907_v34, %v6911_v25 }
 0x51c   : > { %6705 = vmatpush1.bf16.msra.mxu0 %v13645_v31  ;;  %v13693_v31 = vcombine.low %v3627_v56, %v3631_v20  ;;  %v6947_v56 = vld [vmem:[%s15954_s29 + $0x140] sm:$0xff] }
 0x51d   : > { %6869 = vmatpush1.bf16.msra.mxu1 %v13647_v53  ;;  %6706 = vmatprep.subr.bf16.mxu0 %v13654_v55  ;;  %v13695_v53 = vcombine.low %v3628_v49, %v3632_v43  ;;  %v13698_v55 = vcombine.high %v6907_v34, %v6911_v25  ;;  %v6951_v20 = vld [vmem:[%s15954_s29 + $0x160] sm:$0xff]  ;;  %v6952_v49 = vld [vmem:[%s15954_s29 + $0x168] sm:$0xff]  ;;  %v13729_v43 = vcombine.low %v6939_v50, %v6943_v11 }
 0x51e   : > { %6870 = vmatprep.subr.bf16.mxu1 %v13656_v28  ;;  %v13700_v28 = vcombine.high %v6908_v26, %v6912_v35  ;;  %v6959_v34 = vld [vmem:[%s15954_s29 + $0x1a0] sm:$0xff]  ;;  %v6956_v25 = vld [vmem:[%s15954_s29 + $0x188] sm:$0xff] }
 0x520   : > { %6707 = vmatpush1.bf16.msra.mxu0 %v13653_v4  ;;  %v6920_v4 = vld [vmem:[%s15954_s29 + $0x68] sm:$0xff] }
 0x521   : > { %6871 = vmatpush1.bf16.msra.mxu1 %v13655_v5  ;;  %6708 = vmatprep.subr.bf16.mxu0 %v13662_v9  ;;  %v13699_v5 = vcombine.low %v6908_v26, %v6912_v35  ;;  %v13706_v9 = vcombine.high %v6915_v29, %v6919_v58  ;;  %v13708_v36 = vcombine.high %v6916_v27, %v6920_v4 }
 0x522   : > { %6872 = vmatprep.subr.bf16.mxu1 %v13664_v40  ;;  %v6923_v40 = vld [vmem:[%s15954_s29 + $0x80] sm:$0xff]  ;;  %v13737_v26 = vcombine.low %v6947_v56, %v6951_v20  ;;  %v13739_v35 = vcombine.low %v6948_v59, %v6952_v49 }
 0x524   : > { %6709 = vmatpush1.bf16.msra.mxu0 %v13661_v45  ;;  %v6928_v45 = vld [vmem:[%s15954_s29 + $0xa8] sm:$0xff] }
 0x525   : > { %6873 = vmatpush1.bf16.msra.mxu1 %v13663_v37  ;;  %6710 = vmatprep.subr.bf16.mxu0 %v13670_v48  ;;  %v13705_v37 = vcombine.low %v6915_v29, %v6919_v58  ;;  %v13707_v48 = vcombine.low %v6916_v27, %v6920_v4  ;;  %v13716_v63 = vcombine.high %v6924_v24, %v6928_v45  ;;  %v6968_v29 = vld [vmem:[%s15954_s29 + $0x1e8] sm:$0xff] }
 0x526   : > { %6874 = vmatprep.subr.bf16.mxu1 %v13672_v52  ;;  %v13714_v52 = vcombine.high %v6923_v40, %v6927_v42  ;;  %v13756_v4 = vcombine.high %v6964_v30, %v6968_v29 }
 0x528   : > { %6711 = vmatpush1.bf16.msra.mxu0 %v13669_v12  ;;  %v13713_v12 = vcombine.low %v6923_v40, %v6927_v42  ;;  %v6972_v40 = vld [vmem:[%s15954_s29 + $0x208] sm:$0xff] }
 0x529   : > { %6875 = vmatpush1.bf16.msra.mxu1 %v13671_v1  ;;  %6712 = vmatprep.subr.bf16.mxu0 %v13678_v10  ;;  %v13715_v1 = vcombine.low %v6924_v24, %v6928_v45  ;;  %v13722_v10 = vcombine.high %v6931_v39, %v6935_v33  ;;  %v6976_v42 = vld [vmem:[%s15954_s29 + $0x228] sm:$0xff]  ;;  %v13755_v24 = vcombine.low %v6964_v30, %v6968_v29 }
 0x52a   : > { %6876 = vmatprep.subr.bf16.mxu1 %v13680_v46 }
 0x52c   : > { %6713 = vmatpush1.bf16.msra.mxu0 %v13677_v22  ;;  %v13721_v22 = vcombine.low %v6931_v39, %v6935_v33  ;;  %v6984_v39 = vld [vmem:[%s15954_s29 + $0x268] sm:$0xff] }
 0x52d   : > { %6877 = vmatpush1.bf16.msra.mxu1 %v13679_v62  ;;  %6714 = vmatprep.subr.bf16.mxu0 %v13686_v54  ;;  %v13730_v54 = vcombine.high %v6939_v50, %v6943_v11  ;;  %v6992_v50 = vld [vmem:[%s15954_s29 + $0x2a8] sm:$0xff] }
 0x52e   : > { %6878 = vmatprep.subr.bf16.mxu1 %v13688_v0  ;;  %v13732_v0 = vcombine.high %v6940_v17, %v6944_v18 }
 0x530   : > { %6715 = vmatpush1.bf16.msra.mxu0 %v13685_v23  ;;  %v13731_v23 = vcombine.low %v6940_v17, %v6944_v18 }
 0x531   : > { %6879 = vmatpush1.bf16.msra.mxu1 %v13687_v2  ;;  %6716 = vmatprep.subr.bf16.mxu0 %v13694_v3  ;;  %v13738_v2 = vcombine.high %v6947_v56, %v6951_v20  ;;  %v13740_v3 = vcombine.high %v6948_v59, %v6952_v49  ;;  %v7000_v56 = vld [vmem:[%s15954_s29 + $0x2e8] sm:$0xff] }
 0x532   : > { %6880 = vmatprep.subr.bf16.mxu1 %v13696_v51  ;;  %v6955_v51 = vld [vmem:[%s15954_s29 + $0x180] sm:$0xff] }
 0x533   : > { %v13745_v58 = vcombine.low %v6955_v51, %v6959_v34 }
 0x534   : > { %6717 = vmatpush1.bf16.msra.mxu0 %v13693_v31  ;;  %v13746_v31 = vcombine.high %v6955_v51, %v6959_v34  ;;  %v7008_v51 = vld [vmem:[%s15954_s29 + $0x328] sm:$0xff] }
 0x535   : > { %6881 = vmatpush1.bf16.msra.mxu1 %v13695_v53  ;;  %10021 = vmatprep.subr.bf16.mxu0 %v13698_v55  ;;  %v13748_v53 = vcombine.high %v6956_v25, %v6960_v21  ;;  %v6963_v55 = vld [vmem:[%s15954_s29 + $0x1c0] sm:$0xff] }
 0x536   : > { %10185 = vmatprep.subr.bf16.mxu1 %v13700_v28  ;;  %v6967_v28 = vld [vmem:[%s15954_s29 + $0x1e0] sm:$0xff] }
 0x537   : > { %6719 = vmatmul.mubr.bf16.vlgmr.msra.gmra.mrb[20].mxu0 %v16746_v6  ;;  %v13754_v27 = vcombine.high %v6963_v55, %v6967_v28 }
 0x538   : > { %6883 = vmatmul.mubr.bf16.vlgmr.msra.gmra.mrb[20].mxu1 %v16746_v6  ;;  %10022 = vmatpush1.bf16.msra.mxu0 %v13697_v7  ;;  %v6936_v6 = vld [vmem:[%s15954_s29 + $0xe8] sm:$0xff]  ;;  %v13747_v7 = vcombine.low %v6956_v25, %v6960_v21 }
 0x539   : > { %10053 = vmatprep.mubr.bf16.mxu0 %v17037_v32  ;;  %10186 = vmatpush1.bf16.msra.mxu1 %v13699_v5  ;;  %v13724_v46 = vcombine.high %v6932_v60, %v6936_v6  ;;  %v13723_v62 = vcombine.low %v6932_v60, %v6936_v6  ;;  %v6971_v5 = vld [vmem:[%s15954_s29 + $0x200] sm:$0xff]  ;;  %v13763_v60 = vcombine.low %v6972_v40, %v6976_v42 }
 0x53a   : > { %10217 = vmatprep.mubr.bf16.mxu1 %v17037_v32  ;;  %10023 = vmatprep.subr.bf16.mxu0 %v13706_v9  ;;  %v6975_v9 = vld [vmem:[%s15954_s29 + $0x220] sm:$0xff] }
 0x53b   : > { %10187 = vmatprep.subr.bf16.mxu1 %v13708_v36  ;;  %v13753_v36 = vcombine.low %v6963_v55, %v6967_v28  ;;  %v13762_v45 = vcombine.high %v6971_v5, %v6975_v9  ;;  %v13761_v33 = vcombine.low %v6971_v5, %v6975_v9  ;;  %v7016_v55 = vld [vmem:[%s15954_s29 + $0x368] sm:$0xff] }
 0x53c   : > { %10024 = vmatpush1.bf16.msra.mxu0 %v13705_v37  ;;  %v13764_v37 = vcombine.high %v6972_v40, %v6976_v42  ;;  %v7024_v5 = vld [vmem:[%s15954_s29 + $0x3a8] sm:$0xff]  ;;  %v3638_v40 = vrot.slane %v17018_v61, %v16057_v13 }
 0x53d   : > { %10188 = vmatpush1.bf16.msra.mxu1 %v13707_v48  ;;  %10025 = vmatprep.subr.bf16.mxu0 %v13714_v52  ;;  %v6979_v48 = vld [vmem:[%s15954_s29 + $0x240] sm:$0xff] }
 0x53e   : > { %10189 = vmatprep.subr.bf16.mxu1 %v13716_v63  ;;  %v6983_v52 = vld [vmem:[%s15954_s29 + $0x260] sm:$0xff]  ;;  %v6980_v63 = vld [vmem:[%s15954_s29 + $0x248] sm:$0xff] }
 0x53f   : > { %v13770_v6 = vcombine.high %v6979_v48, %v6983_v52  ;;  %v13769_v11 = vcombine.low %v6979_v48, %v6983_v52  ;;  %v13771_v17 = vcombine.low %v6980_v63, %v6984_v39  ;;  %v3650_v48 = vrot.slane %v17018_v61, %v16066_v16  ;;  %v7028_v52 = vld [vmem:[%s15954_s29 + $0x3c8] sm:$0xff] }
 0x540   : > { %10026 = vmatpush1.bf16.msra.mxu0 %v13713_v12  ;;  %v13772_v12 = vcombine.high %v6980_v63, %v6984_v39  ;;  %v7032_v63 = vld [vmem:[%s15954_s29 + $0x3e8] sm:$0xff] }
 0x541   : > { %10190 = vmatpush1.bf16.msra.mxu1 %v13715_v1  ;;  %10027 = vmatprep.subr.bf16.mxu0 %v13722_v10  ;;  %v6987_v1 = vld [vmem:[%s15954_s29 + $0x280] sm:$0xff] }
 0x542   : > { %10191 = vmatprep.subr.bf16.mxu1 %v13724_v46  ;;  %v6991_v10 = vld [vmem:[%s15954_s29 + $0x2a0] sm:$0xff]  ;;  %v6988_v46 = vld [vmem:[%s15954_s29 + $0x288] sm:$0xff] }
 0x543   : > { %v13778_v18 = vcombine.high %v6987_v1, %v6991_v10  ;;  %v13777_v20 = vcombine.low %v6987_v1, %v6991_v10  ;;  %v13779_v59 = vcombine.low %v6988_v46, %v6992_v50  ;;  %v7035_v1 = vld [vmem:[%s15954_s29 + $0x400] sm:$0xff] }
 0x544   : > { %10028 = vmatpush1.bf16.msra.mxu0 %v13721_v22  ;;  %v13780_v22 = vcombine.high %v6988_v46, %v6992_v50  ;;  %v7039_v10 = vld [vmem:[%s15954_s29 + $0x420] sm:$0xff]  ;;  %v14480_v46 = vadd.f32 %v16986_v41, %v3650_v48  ;;  %v7036_v50 = vld [vmem:[%s15954_s29 + $0x408] sm:$0xff] }
 0x545   : > { %10192 = vmatpush1.bf16.msra.mxu1 %v13723_v62  ;;  %10029 = vmatprep.subr.bf16.mxu0 %v13730_v54  ;;  %v6995_v62 = vld [vmem:[%s15954_s29 + $0x2c0] sm:$0xff]  ;;  %v13825_v41 = vcombine.low %v7035_v1, %v7039_v10 }
 0x546   : > { %10193 = vmatprep.subr.bf16.mxu1 %v13732_v0  ;;  %v6999_v54 = vld [vmem:[%s15954_s29 + $0x2e0] sm:$0xff]  ;;  %v6996_v0 = vld [vmem:[%s15954_s29 + $0x2c8] sm:$0xff] }
 0x547   : > { %v13786_v49 = vcombine.high %v6995_v62, %v6999_v54  ;;  %v13785_v34 = vcombine.low %v6995_v62, %v6999_v54  ;;  %v13787_v25 = vcombine.low %v6996_v0, %v7000_v56  ;;  %v6894_v54 = vmax.f32 %v14480_v46, 0.0  ;;  %v7075_v48 = vld [vmem:[%s15954_s29 + $0x540] sm:$0xff]  ;;  %v7084_v46 = vld [vmem:[%s15954_s29 + $0x588] sm:$0xff] }
 0x548   : > { %10030 = vmatpush1.bf16.msra.mxu0 %v13729_v43  ;;  %v13788_v43 = vcombine.high %v6996_v0, %v7000_v56  ;;  %v7043_v0 = vld [vmem:[%s15954_s29 + $0x440] sm:$0xff] }
 0x549   : > { %10194 = vmatpush1.bf16.msra.mxu1 %v13731_v23  ;;  %10031 = vmatprep.subr.bf16.mxu0 %v13738_v2  ;;  %v7003_v23 = vld [vmem:[%s15954_s29 + $0x300] sm:$0xff] }
 0x54a   : > { %10195 = vmatprep.subr.bf16.mxu1 %v13740_v3  ;;  %v7007_v2 = vld [vmem:[%s15954_s29 + $0x320] sm:$0xff]  ;;  %v7004_v3 = vld [vmem:[%s15954_s29 + $0x308] sm:$0xff] }
 0x54b   : > { %v13794_v21 = vcombine.high %v7003_v23, %v7007_v2  ;;  %v13793_v28 = vcombine.low %v7003_v23, %v7007_v2  ;;  %v13795_v30 = vcombine.low %v7004_v3, %v7008_v51  ;;  %v7047_v56 = vld [vmem:[%s15954_s29 + $0x460] sm:$0xff] }
 0x54c   : > { %10032 = vmatpush1.bf16.msra.mxu0 %v13737_v26  ;;  %v13796_v26 = vcombine.high %v7004_v3, %v7008_v51  ;;  %v13834_v23 = vcombine.high %v7043_v0, %v7047_v56  ;;  %v7051_v2 = vld [vmem:[%s15954_s29 + $0x480] sm:$0xff]  ;;  %v17115_v51 = vpack.c.bf16 %v6894_v54, %v6894_v54  ;;  %v7092_v54 = vld [vmem:[%s15954_s29 + $0x5c8] sm:$0xff] }
 0x54d   : > { %10196 = vmatpush1.bf16.msra.mxu1 %v13739_v35  ;;  %10033 = vmatprep.subr.bf16.mxu0 %v13746_v31  ;;  %v7011_v35 = vld [vmem:[%s15954_s29 + $0x340] sm:$0xff] }
 0x54e   : > { %10197 = vmatprep.subr.bf16.mxu1 %v13748_v53  ;;  %v7015_v31 = vld [vmem:[%s15954_s29 + $0x360] sm:$0xff]  ;;  %v7012_v53 = vld [vmem:[%s15954_s29 + $0x348] sm:$0xff] }
 0x54f   : > { %v13802_v29 = vcombine.high %v7011_v35, %v7015_v31  ;;  %v13801_v9 = vcombine.low %v7011_v35, %v7015_v31  ;;  %v13803_v42 = vcombine.low %v7012_v53, %v7016_v55  ;;  %v7055_v3 = vld [vmem:[%s15954_s29 + $0x4a0] sm:$0xff] }
 0x550   : > { %10034 = vmatpush1.bf16.msra.mxu0 %v13745_v58  ;;  %v13804_v58 = vcombine.high %v7012_v53, %v7016_v55  ;;  %v13842_v31 = vcombine.high %v7051_v2, %v7055_v3  ;;  %v7059_v55 = vld [vmem:[%s15954_s29 + $0x4c0] sm:$0xff] }
 0x551   : > { %10198 = vmatpush1.bf16.msra.mxu1 %v13747_v7  ;;  %10035 = vmatprep.subr.bf16.mxu0 %v13754_v27  ;;  %v7019_v7 = vld [vmem:[%s15954_s29 + $0x380] sm:$0xff] }
 0x552   : > { %10199 = vmatprep.subr.bf16.mxu1 %v13756_v4  ;;  %v7023_v27 = vld [vmem:[%s15954_s29 + $0x3a0] sm:$0xff]  ;;  %v7020_v4 = vld [vmem:[%s15954_s29 + $0x388] sm:$0xff] }
 0x553   : > { %v13809_v39 = vcombine.low %v7019_v7, %v7023_v27 }
 0x554   : > { %10036 = vmatpush1.bf16.msra.mxu0 %v13753_v36  ;;  %v13810_v36 = vcombine.high %v7019_v7, %v7023_v27 }
 0x555   : > { %10200 = vmatpush1.bf16.msra.mxu1 %v13755_v24  ;;  %10037 = vmatprep.subr.bf16.mxu0 %v13762_v45  ;;  %v13812_v24 = vcombine.high %v7020_v4, %v7024_v5  ;;  %v7027_v45 = vld [vmem:[%s15954_s29 + $0x3c0] sm:$0xff] }
 0x556   : > { %10201 = vmatprep.subr.bf16.mxu1 %v13764_v37  ;;  %v7031_v37 = vld [vmem:[%s15954_s29 + $0x3e0] sm:$0xff] }
 0x558   : > { %10038 = vmatpush1.bf16.msra.mxu0 %v13761_v33  ;;  %v14477_v33 = vadd.f32 %v16976_v38, %v3638_v40  ;;  %v13819_v38 = vcombine.low %v7028_v52, %v7032_v63  ;;  %v7068_v40 = vld [vmem:[%s15954_s29 + $0x508] sm:$0xff] }
 0x559   : > { %10202 = vmatpush1.bf16.msra.mxu1 %v13763_v60  ;;  %10039 = vmatprep.subr.bf16.mxu0 %v13770_v6  ;;  %v13811_v60 = vcombine.low %v7020_v4, %v7024_v5  ;;  %v13818_v6 = vcombine.high %v7027_v45, %v7031_v37  ;;  %v7067_v5 = vld [vmem:[%s15954_s29 + $0x500] sm:$0xff] }
 0x55a   : > { %10203 = vmatprep.subr.bf16.mxu1 %v13772_v12  ;;  %v13820_v12 = vcombine.high %v7028_v52, %v7032_v63  ;;  %v7079_v52 = vld [vmem:[%s15954_s29 + $0x560] sm:$0xff]  ;;  %v7076_v63 = vld [vmem:[%s15954_s29 + $0x548] sm:$0xff] }
 0x55c   : > { %10040 = vmatpush1.bf16.msra.mxu0 %v13769_v11  ;;  %v7040_v11 = vld [vmem:[%s15954_s29 + $0x428] sm:$0xff] }
 0x55d   : > { %10204 = vmatpush1.bf16.msra.mxu1 %v13771_v17  ;;  %10041 = vmatprep.subr.bf16.mxu0 %v13778_v18  ;;  %v13817_v17 = vcombine.low %v7027_v45, %v7031_v37  ;;  %v6891_v18 = vmax.f32 %v14477_v33, 0.0  ;;  %v13828_v62 = vcombine.high %v7036_v50, %v7040_v11 }
 0x55e   : > { %10205 = vmatprep.subr.bf16.mxu1 %v13780_v22  ;;  %v13826_v22 = vcombine.high %v7035_v1, %v7039_v10  ;;  %v7083_v1 = vld [vmem:[%s15954_s29 + $0x580] sm:$0xff] }
 0x55f   : > { %v7087_v10 = vld [vmem:[%s15954_s29 + $0x5a0] sm:$0xff] }
 0x560   : > { %10042 = vmatpush1.bf16.msra.mxu0 %v13777_v20  ;;  %v7044_v20 = vld [vmem:[%s15954_s29 + $0x448] sm:$0xff] }
 0x561   : > { %10206 = vmatpush1.bf16.msra.mxu1 %v13779_v59  ;;  %10043 = vmatprep.subr.bf16.mxu0 %v13786_v49  ;;  %v7048_v59 = vld [vmem:[%s15954_s29 + $0x468] sm:$0xff]  ;;  %v17111_v49 = vpack.c.bf16 %v6891_v18, %v6891_v18  ;;  %v13874_v18 = vcombine.high %v7083_v1, %v7087_v10 }
 0x562   : > { %10207 = vmatprep.subr.bf16.mxu1 %v13788_v43  ;;  %v13827_v43 = vcombine.low %v7036_v50, %v7040_v11  ;;  %v13835_v35 = vcombine.low %v7044_v20, %v7048_v59  ;;  %v7088_v50 = vld [vmem:[%s15954_s29 + $0x5a8] sm:$0xff]  ;;  %v13865_v11 = vcombine.low %v7075_v48, %v7079_v52 }
 0x564   : > { %10044 = vmatpush1.bf16.msra.mxu0 %v13785_v34  ;;  %v13836_v34 = vcombine.high %v7044_v20, %v7048_v59 }
 0x565   : > { %10208 = vmatpush1.bf16.msra.mxu1 %v13787_v25  ;;  %10045 = vmatprep.subr.bf16.mxu0 %v13794_v21  ;;  %v7052_v25 = vld [vmem:[%s15954_s29 + $0x488] sm:$0xff] }
 0x566   : > { %10209 = vmatprep.subr.bf16.mxu1 %v13796_v26  ;;  %v7056_v21 = vld [vmem:[%s15954_s29 + $0x4a8] sm:$0xff]  ;;  %v13833_v26 = vcombine.low %v7043_v0, %v7047_v56  ;;  %v13873_v56 = vcombine.low %v7083_v1, %v7087_v10 }
 0x567   : > { %v13844_v53 = vcombine.high %v7052_v25, %v7056_v21  ;;  %v13843_v7 = vcombine.low %v7052_v25, %v7056_v21  ;;  %v7096_v0 = vld [vmem:[%s15954_s29 + $0x5e8] sm:$0xff] }
 0x568   : > { %10046 = vmatpush1.bf16.msra.mxu0 %v13793_v28  ;;  %v7063_v28 = vld [vmem:[%s15954_s29 + $0x4e0] sm:$0xff]  ;;  %v13884_v59 = vcombine.high %v7092_v54, %v7096_v0  ;;  %v13883_v25 = vcombine.low %v7092_v54, %v7096_v0  ;;  %v7136_v1 = vld [vmem:[%s15954_s29 + $0x728] sm:$0xff] }
 0x569   : > { %10210 = vmatpush1.bf16.msra.mxu1 %v13795_v30  ;;  %10047 = vmatprep.subr.bf16.mxu0 %v13802_v29  ;;  %v7060_v30 = vld [vmem:[%s15954_s29 + $0x4c8] sm:$0xff]  ;;  %v13850_v27 = vcombine.high %v7059_v55, %v7063_v28 }
 0x56a   : > { %10211 = vmatprep.subr.bf16.mxu1 %v13804_v58  ;;  %v7064_v29 = vld [vmem:[%s15954_s29 + $0x4e8] sm:$0xff]  ;;  %v13841_v58 = vcombine.low %v7051_v2, %v7055_v3 }
 0x56b   : > { %v13852_v4 = vcombine.high %v7060_v30, %v7064_v29  ;;  %v7100_v2 = vld [vmem:[%s15954_s29 + $0x608] sm:$0xff] }
 0x56c   : > { %10048 = vmatpush1.bf16.msra.mxu0 %v13801_v9  ;;  %v7071_v9 = vld [vmem:[%s15954_s29 + $0x520] sm:$0xff]  ;;  %v7104_v3 = vld [vmem:[%s15954_s29 + $0x628] sm:$0xff] }
 0x56d   : > { %10212 = vmatpush1.bf16.msra.mxu1 %v13803_v42  ;;  %10049 = vmatprep.subr.bf16.mxu0 %v13810_v36  ;;  %v7072_v42 = vld [vmem:[%s15954_s29 + $0x528] sm:$0xff]  ;;  %v13849_v36 = vcombine.low %v7059_v55, %v7063_v28  ;;  %v13858_v45 = vcombine.high %v7067_v5, %v7071_v9  ;;  %v13857_v33 = vcombine.low %v7067_v5, %v7071_v9 }
 0x56e   : > { %10213 = vmatprep.subr.bf16.mxu1 %v13812_v24  ;;  %v13851_v24 = vcombine.low %v7060_v30, %v7064_v29  ;;  %v13860_v37 = vcombine.high %v7068_v40, %v7072_v42  ;;  %v7112_v55 = vld [vmem:[%s15954_s29 + $0x668] sm:$0xff]  ;;  %v13891_v30 = vcombine.low %v7100_v2, %v7104_v3 }
 0x56f   : > { %v7120_v5 = vld [vmem:[%s15954_s29 + $0x6a8] sm:$0xff] }
 0x570   : > { %10050 = vmatpush1.bf16.msra.mxu0 %v13809_v39  ;;  %v7080_v39 = vld [vmem:[%s15954_s29 + $0x568] sm:$0xff] }
 0x571   : > { %10214 = vmatpush1.bf16.msra.mxu1 %v13811_v60  ;;  %10051 = vmatprep.subr.bf16.mxu0 %v13818_v6  ;;  %v13859_v60 = vcombine.low %v7068_v40, %v7072_v42  ;;  %v13866_v6 = vcombine.high %v7075_v48, %v7079_v52  ;;  %v7128_v48 = vld [vmem:[%s15954_s29 + $0x6e8] sm:$0xff] }
 0x572   : > { %10215 = vmatprep.subr.bf16.mxu1 %v13820_v12  ;;  %v13868_v12 = vcombine.high %v7076_v63, %v7080_v39 }
 0x574   : > { %10052 = vmatpush1.bf16.msra.mxu0 %v13817_v17  ;;  %v13867_v17 = vcombine.low %v7076_v63, %v7080_v39 }
 0x575   : > { %10216 = vmatpush1.bf16.msra.mxu1 %v13819_v38  ;;  %10062 = vmatprep.subr.bf16.mxu0 %v13826_v22  ;;  %v13876_v38 = vcombine.high %v7084_v46, %v7088_v50  ;;  %v7091_v22 = vld [vmem:[%s15954_s29 + $0x5c0] sm:$0xff] }
 0x576   : > { %10226 = vmatprep.subr.bf16.mxu1 %v13828_v62  ;;  %v7095_v62 = vld [vmem:[%s15954_s29 + $0x5e0] sm:$0xff] }
 0x577   : > { %10054 = vmatmul.mubr.bf16.vlgmr.msra.gmra.mrb[24].mxu0 %v17111_v49  ;;  %v13882_v20 = vcombine.high %v7091_v22, %v7095_v62 }
 0x578   : > { %10218 = vmatmul.mubr.bf16.vlgmr.msra.gmra.mrb[24].mxu1 %v17111_v49  ;;  %10063 = vmatpush1.bf16.msra.mxu0 %v13825_v41  ;;  %v13875_v41 = vcombine.low %v7084_v46, %v7088_v50 }
 0x579   : > { %10094 = vmatprep.mubr.bf16.mxu0 %v17115_v51  ;;  %10227 = vmatpush1.bf16.msra.mxu1 %v13827_v43  ;;  %v7099_v43 = vld [vmem:[%s15954_s29 + $0x600] sm:$0xff] }
 0x57a   : > { %10258 = vmatprep.mubr.bf16.mxu1 %v17115_v51  ;;  %10064 = vmatprep.subr.bf16.mxu0 %v13834_v23  ;;  %v7103_v23 = vld [vmem:[%s15954_s29 + $0x620] sm:$0xff] }
 0x57b   : > { %10228 = vmatprep.subr.bf16.mxu1 %v13836_v34  ;;  %v13881_v34 = vcombine.low %v7091_v22, %v7095_v62  ;;  %v13890_v21 = vcombine.high %v7099_v43, %v7103_v23  ;;  %v13889_v28 = vcombine.low %v7099_v43, %v7103_v23  ;;  %v7144_v22 = vld [vmem:[%s15954_s29 + $0x768] sm:$0xff] }
 0x57c   : > { %10065 = vmatpush1.bf16.msra.mxu0 %v13833_v26  ;;  %v13892_v26 = vcombine.high %v7100_v2, %v7104_v3  ;;  %v7152_v43 = vld [vmem:[%s15954_s29 + $0x7a8] sm:$0xff]  ;;  %v3646_v2 = vrot.slane %v17018_v61, %v16060_v14 }
 0x57d   : > { %10229 = vmatpush1.bf16.msra.mxu1 %v13835_v35  ;;  %10066 = vmatprep.subr.bf16.mxu0 %v13842_v31  ;;  %v7107_v35 = vld [vmem:[%s15954_s29 + $0x640] sm:$0xff] }
 0x57e   : > { %10230 = vmatprep.subr.bf16.mxu1 %v13844_v53  ;;  %v7111_v31 = vld [vmem:[%s15954_s29 + $0x660] sm:$0xff]  ;;  %v7108_v53 = vld [vmem:[%s15954_s29 + $0x648] sm:$0xff] }
 0x57f   : > { %v13898_v29 = vcombine.high %v7107_v35, %v7111_v31  ;;  %v13897_v9 = vcombine.low %v7107_v35, %v7111_v31  ;;  %v13899_v40 = vcombine.low %v7108_v53, %v7112_v55  ;;  %v7156_v35 = vld [vmem:[%s15954_s29 + $0x7c8] sm:$0xff] }
 0x580   : > { %10067 = vmatpush1.bf16.msra.mxu0 %v13841_v58  ;;  %v13900_v58 = vcombine.high %v7108_v53, %v7112_v55  ;;  %v7160_v31 = vld [vmem:[%s15954_s29 + $0x7e8] sm:$0xff]  ;;  %v14479_v55 = vadd.f32 %v16980_v19, %v3646_v2 }
 0x581   : > { %10231 = vmatpush1.bf16.msra.mxu1 %v13843_v7  ;;  %10068 = vmatprep.subr.bf16.mxu0 %v13850_v27  ;;  %v7115_v7 = vld [vmem:[%s15954_s29 + $0x680] sm:$0xff]  ;;  %v13947_v19 = vcombine.low %v7156_v35, %v7160_v31 }
 0x582   : > { %10232 = vmatprep.subr.bf16.mxu1 %v13852_v4  ;;  %v7119_v27 = vld [vmem:[%s15954_s29 + $0x6a0] sm:$0xff]  ;;  %v7116_v4 = vld [vmem:[%s15954_s29 + $0x688] sm:$0xff] }
 0x583   : > { %v13906_v42 = vcombine.high %v7115_v7, %v7119_v27  ;;  %v13905_v52 = vcombine.low %v7115_v7, %v7119_v27  ;;  %v13907_v63 = vcombine.low %v7116_v4, %v7120_v5  ;;  %v7164_v7 = vld [vmem:[%s15954_s29 + $0x808] sm:$0xff] }
 0x584   : > { %10069 = vmatpush1.bf16.msra.mxu0 %v13849_v36  ;;  %v13908_v36 = vcombine.high %v7116_v4, %v7120_v5  ;;  %v7168_v27 = vld [vmem:[%s15954_s29 + $0x828] sm:$0xff]  ;;  %v6893_v5 = vmax.f32 %v14479_v55, 0.0 }
 0x585   : > { %10233 = vmatpush1.bf16.msra.mxu1 %v13851_v24  ;;  %10070 = vmatprep.subr.bf16.mxu0 %v13858_v45  ;;  %v7123_v24 = vld [vmem:[%s15954_s29 + $0x6c0] sm:$0xff] }
 0x586   : > { %10234 = vmatprep.subr.bf16.mxu1 %v13860_v37  ;;  %v7127_v45 = vld [vmem:[%s15954_s29 + $0x6e0] sm:$0xff]  ;;  %v7124_v37 = vld [vmem:[%s15954_s29 + $0x6c8] sm:$0xff] }
 0x587   : > { %v13914_v39 = vcombine.high %v7123_v24, %v7127_v45  ;;  %v13913_v10 = vcombine.low %v7123_v24, %v7127_v45  ;;  %v13915_v46 = vcombine.low %v7124_v37, %v7128_v48  ;;  %v7172_v24 = vld [vmem:[%s15954_s29 + $0x848] sm:$0xff] }
 0x588   : > { %10071 = vmatpush1.bf16.msra.mxu0 %v13857_v33  ;;  %v13916_v33 = vcombine.high %v7124_v37, %v7128_v48  ;;  %v7176_v45 = vld [vmem:[%s15954_s29 + $0x868] sm:$0xff]  ;;  %v17186_v48 = vpack.c.bf16 %v6893_v5, %v6893_v5  ;;  %v7219_v5 = vld [vmem:[%s15954_s29 + $0x9c0] sm:$0xff] }
 0x589   : > { %10235 = vmatpush1.bf16.msra.mxu1 %v13859_v60  ;;  %10072 = vmatprep.subr.bf16.mxu0 %v13866_v6  ;;  %v7131_v60 = vld [vmem:[%s15954_s29 + $0x700] sm:$0xff] }
 0x58a   : > { %10236 = vmatprep.subr.bf16.mxu1 %v13868_v12  ;;  %v7135_v6 = vld [vmem:[%s15954_s29 + $0x720] sm:$0xff]  ;;  %v7132_v12 = vld [vmem:[%s15954_s29 + $0x708] sm:$0xff] }
 0x58b   : > { %v13922_v50 = vcombine.high %v7131_v60, %v7135_v6  ;;  %v13921_v62 = vcombine.low %v7131_v60, %v7135_v6  ;;  %v13923_v54 = vcombine.low %v7132_v12, %v7136_v1  ;;  %v7183_v60 = vld [vmem:[%s15954_s29 + $0x8a0] sm:$0xff]  ;;  %v7180_v6 = vld [vmem:[%s15954_s29 + $0x888] sm:$0xff] }
 0x58c   : > { %10073 = vmatpush1.bf16.msra.mxu0 %v13865_v11  ;;  %v13924_v11 = vcombine.high %v7132_v12, %v7136_v1  ;;  %v7184_v12 = vld [vmem:[%s15954_s29 + $0x8a8] sm:$0xff] }
 0x58d   : > { %10237 = vmatpush1.bf16.msra.mxu1 %v13867_v17  ;;  %10074 = vmatprep.subr.bf16.mxu0 %v13874_v18  ;;  %v7139_v17 = vld [vmem:[%s15954_s29 + $0x740] sm:$0xff] }
 0x58e   : > { %10238 = vmatprep.subr.bf16.mxu1 %v13876_v38  ;;  %v7143_v18 = vld [vmem:[%s15954_s29 + $0x760] sm:$0xff]  ;;  %v7140_v38 = vld [vmem:[%s15954_s29 + $0x748] sm:$0xff] }
 0x58f   : > { %v13930_v0 = vcombine.high %v7139_v17, %v7143_v18  ;;  %v13929_v23 = vcombine.low %v7139_v17, %v7143_v18  ;;  %v13931_v3 = vcombine.low %v7140_v38, %v7144_v22  ;;  %v7191_v17 = vld [vmem:[%s15954_s29 + $0x8e0] sm:$0xff]  ;;  %v7188_v18 = vld [vmem:[%s15954_s29 + $0x8c8] sm:$0xff] }
 0x590   : > { %10075 = vmatpush1.bf16.msra.mxu0 %v13873_v56  ;;  %v13932_v56 = vcombine.high %v7140_v38, %v7144_v22  ;;  %v7192_v38 = vld [vmem:[%s15954_s29 + $0x8e8] sm:$0xff] }
 0x591   : > { %10239 = vmatpush1.bf16.msra.mxu1 %v13875_v41  ;;  %10076 = vmatprep.subr.bf16.mxu0 %v13882_v20  ;;  %v7147_v41 = vld [vmem:[%s15954_s29 + $0x780] sm:$0xff] }
 0x592   : > { %10240 = vmatprep.subr.bf16.mxu1 %v13884_v59  ;;  %v7151_v20 = vld [vmem:[%s15954_s29 + $0x7a0] sm:$0xff]  ;;  %v7148_v59 = vld [vmem:[%s15954_s29 + $0x788] sm:$0xff] }
 0x593   : > { %v13937_v53 = vcombine.low %v7147_v41, %v7151_v20  ;;  %v13939_v61 = vcombine.low %v7148_v59, %v7152_v43 }
 0x594   : > { %10077 = vmatpush1.bf16.msra.mxu0 %v13881_v34  ;;  %v13938_v34 = vcombine.high %v7147_v41, %v7151_v20  ;;  %v7199_v41 = vld [vmem:[%s15954_s29 + $0x920] sm:$0xff]  ;;  %v7196_v20 = vld [vmem:[%s15954_s29 + $0x908] sm:$0xff] }
 0x595   : > { %10241 = vmatpush1.bf16.msra.mxu1 %v13883_v25  ;;  %10078 = vmatprep.subr.bf16.mxu0 %v13890_v21  ;;  %v13940_v25 = vcombine.high %v7148_v59, %v7152_v43  ;;  %v7155_v21 = vld [vmem:[%s15954_s29 + $0x7c0] sm:$0xff]  ;;  %v7200_v59 = vld [vmem:[%s15954_s29 + $0x928] sm:$0xff] }
 0x596   : > { %10242 = vmatprep.subr.bf16.mxu1 %v13892_v26  ;;  %v7159_v26 = vld [vmem:[%s15954_s29 + $0x7e0] sm:$0xff] }
 0x597   : > { %v13945_v4 = vcombine.low %v7155_v21, %v7159_v26 }
 0x598   : > { %10079 = vmatpush1.bf16.msra.mxu0 %v13889_v28  ;;  %v13946_v28 = vcombine.high %v7155_v21, %v7159_v26  ;;  %v7204_v21 = vld [vmem:[%s15954_s29 + $0x948] sm:$0xff] }
 0x599   : > { %10243 = vmatpush1.bf16.msra.mxu1 %v13891_v30  ;;  %10080 = vmatprep.subr.bf16.mxu0 %v13898_v29  ;;  %v13948_v30 = vcombine.high %v7156_v35, %v7160_v31  ;;  %v7163_v29 = vld [vmem:[%s15954_s29 + $0x800] sm:$0xff]  ;;  %v7208_v26 = vld [vmem:[%s15954_s29 + $0x968] sm:$0xff]  ;;  %v13987_v31 = vcombine.low %v7196_v20, %v7200_v59 }
 0x59a   : > { %10244 = vmatprep.subr.bf16.mxu1 %v13900_v58  ;;  %v7167_v58 = vld [vmem:[%s15954_s29 + $0x820] sm:$0xff]  ;;  %v13996_v55 = vcombine.high %v7204_v21, %v7208_v26 }
 0x59b   : > { %v13953_v37 = vcombine.low %v7163_v29, %v7167_v58 }
 0x59c   : > { %10081 = vmatpush1.bf16.msra.mxu0 %v13897_v9  ;;  %v13954_v9 = vcombine.high %v7163_v29, %v7167_v58  ;;  %v7216_v29 = vld [vmem:[%s15954_s29 + $0x9a8] sm:$0xff] }
 0x59d   : > { %10245 = vmatpush1.bf16.msra.mxu1 %v13899_v40  ;;  %10082 = vmatprep.subr.bf16.mxu0 %v13906_v42  ;;  %v13956_v40 = vcombine.high %v7164_v7, %v7168_v27  ;;  %v7171_v42 = vld [vmem:[%s15954_s29 + $0x840] sm:$0xff] }
 0x59e   : > { %10246 = vmatprep.subr.bf16.mxu1 %v13908_v36  ;;  %v7175_v36 = vld [vmem:[%s15954_s29 + $0x860] sm:$0xff] }
 0x59f   : > { %v13961_v1 = vcombine.low %v7171_v42, %v7175_v36 }
 0x5a0   : > { %10083 = vmatpush1.bf16.msra.mxu0 %v13905_v52  ;;  %v13955_v52 = vcombine.low %v7164_v7, %v7168_v27  ;;  %v13995_v7 = vcombine.low %v7204_v21, %v7208_v26 }
 0x5a1   : > { %10247 = vmatpush1.bf16.msra.mxu1 %v13907_v63  ;;  %10084 = vmatprep.subr.bf16.mxu0 %v13914_v39  ;;  %v13962_v63 = vcombine.high %v7171_v42, %v7175_v36  ;;  %v13964_v39 = vcombine.high %v7172_v24, %v7176_v45 }
 0x5a2   : > { %10248 = vmatprep.subr.bf16.mxu1 %v13916_v33  ;;  %v7179_v33 = vld [vmem:[%s15954_s29 + $0x880] sm:$0xff] }
 0x5a3   : > { %v13969_v22 = vcombine.low %v7179_v33, %v7183_v60 }
 0x5a4   : > { %10085 = vmatpush1.bf16.msra.mxu0 %v13913_v10  ;;  %v13963_v10 = vcombine.low %v7172_v24, %v7176_v45 }
 0x5a5   : > { %10249 = vmatpush1.bf16.msra.mxu1 %v13915_v46  ;;  %10086 = vmatprep.subr.bf16.mxu0 %v13922_v50  ;;  %v13970_v46 = vcombine.high %v7179_v33, %v7183_v60  ;;  %v13972_v50 = vcombine.high %v7180_v6, %v7184_v12 }
 0x5a6   : > { %10250 = vmatprep.subr.bf16.mxu1 %v13924_v11  ;;  %v7187_v11 = vld [vmem:[%s15954_s29 + $0x8c0] sm:$0xff] }
 0x5a7   : > { %v13977_v43 = vcombine.low %v7187_v11, %v7191_v17 }
 0x5a8   : > { %10087 = vmatpush1.bf16.msra.mxu0 %v13921_v62  ;;  %v13971_v62 = vcombine.low %v7180_v6, %v7184_v12 }
 0x5a9   : > { %10251 = vmatpush1.bf16.msra.mxu1 %v13923_v54  ;;  %10088 = vmatprep.subr.bf16.mxu0 %v13930_v0  ;;  %v13978_v54 = vcombine.high %v7187_v11, %v7191_v17  ;;  %v13980_v0 = vcombine.high %v7188_v18, %v7192_v38 }
 0x5aa   : > { %10252 = vmatprep.subr.bf16.mxu1 %v13932_v56  ;;  %v7195_v56 = vld [vmem:[%s15954_s29 + $0x900] sm:$0xff] }
 0x5ab   : > { %v13986_v2 = vcombine.high %v7195_v56, %v7199_v41  ;;  %v13985_v35 = vcombine.low %v7195_v56, %v7199_v41 }
 0x5ac   : > { %10089 = vmatpush1.bf16.msra.mxu0 %v13929_v23  ;;  %v13979_v23 = vcombine.low %v7188_v18, %v7192_v38 }
 0x5ad   : > { %10253 = vmatpush1.bf16.msra.mxu1 %v13931_v3  ;;  %10090 = vmatprep.subr.bf16.mxu0 %v13938_v34  ;;  %v13988_v3 = vcombine.high %v7196_v20, %v7200_v59  ;;  %v7203_v34 = vld [vmem:[%s15954_s29 + $0x940] sm:$0xff] }
 0x5ae   : > { %10254 = vmatprep.subr.bf16.mxu1 %v13940_v25  ;;  %v7207_v25 = vld [vmem:[%s15954_s29 + $0x960] sm:$0xff] }
 0x5af   : > { %v13993_v58 = vcombine.low %v7203_v34, %v7207_v25 }
 0x5b0   : > { %10091 = vmatpush1.bf16.msra.mxu0 %v13937_v53  ;;  %v13994_v53 = vcombine.high %v7203_v34, %v7207_v25 }
 0x5b1   : > { %10255 = vmatpush1.bf16.msra.mxu1 %v13939_v61  ;;  %10092 = vmatprep.subr.bf16.mxu0 %v13946_v28  ;;  %v7211_v61 = vld [vmem:[%s15954_s29 + $0x980] sm:$0xff] }
 0x5b2   : > { %10256 = vmatprep.subr.bf16.mxu1 %v13948_v30  ;;  %v7215_v28 = vld [vmem:[%s15954_s29 + $0x9a0] sm:$0xff]  ;;  %v7212_v30 = vld [vmem:[%s15954_s29 + $0x988] sm:$0xff] }
 0x5b3   : > { %v14002_v27 = vcombine.high %v7211_v61, %v7215_v28  ;;  %v14001_v42 = vcombine.low %v7211_v61, %v7215_v28  ;;  %v14003_v36 = vcombine.low %v7212_v30, %v7216_v29 }
 0x5b4   : > { %10093 = vmatpush1.bf16.msra.mxu0 %v13945_v4  ;;  %v14004_v4 = vcombine.high %v7212_v30, %v7216_v29 }
 0x5b5   : > { %10257 = vmatpush1.bf16.msra.mxu1 %v13947_v19  ;;  %10103 = vmatprep.subr.bf16.mxu0 %v13954_v9  ;;  %v7223_v19 = vld [vmem:[%s15954_s29 + $0x9e0] sm:$0xff]  ;;  %v7220_v9 = vld [vmem:[%s15954_s29 + $0x9c8] sm:$0xff] }
 0x5b6   : > { %10267 = vmatprep.subr.bf16.mxu1 %v13956_v40  ;;  %v7224_v40 = vld [vmem:[%s15954_s29 + $0x9e8] sm:$0xff]  ;;  %v14010_v24 = vcombine.high %v7219_v5, %v7223_v19  ;;  %v14009_v33 = vcombine.low %v7219_v5, %v7223_v19 }
 0x5b7   : > { %10095 = vmatmul.mubr.bf16.vlgmr.msra.gmra.mrb[24].mxu0 %v17186_v48  ;;  %v14012_v45 = vcombine.high %v7220_v9, %v7224_v40  ;;  %v14011_v60 = vcombine.low %v7220_v9, %v7224_v40 }
 0x5b8   : > { %10259 = vmatmul.mubr.bf16.vlgmr.msra.gmra.mrb[24].mxu1 %v17186_v48  ;;  %10104 = vmatpush1.bf16.msra.mxu0 %v13953_v37  ;;  %v7227_v37 = vld [vmem:[%s15954_s29 + $0xa00] sm:$0xff] }
 0x5b9   : > { %10268 = vmatpush1.bf16.msra.mxu1 %v13955_v52  ;;  %10105 = vmatprep.subr.bf16.mxu0 %v13962_v63  ;;  %v7231_v52 = vld [vmem:[%s15954_s29 + $0xa20] sm:$0xff]  ;;  %v7228_v63 = vld [vmem:[%s15954_s29 + $0xa08] sm:$0xff] }
 0x5ba   : > { %10269 = vmatprep.subr.bf16.mxu1 %v13964_v39  ;;  %v7232_v39 = vld [vmem:[%s15954_s29 + $0xa28] sm:$0xff]  ;;  %v14018_v6 = vcombine.high %v7227_v37, %v7231_v52  ;;  %v14017_v11 = vcombine.low %v7227_v37, %v7231_v52 }
 0x5bb   : > { %v14020_v12 = vcombine.high %v7228_v63, %v7232_v39  ;;  %v14019_v17 = vcombine.low %v7228_v63, %v7232_v39 }
 0x5bc   : > { %10106 = vmatpush1.bf16.msra.mxu0 %v13961_v1  ;;  %v7235_v1 = vld [vmem:[%s15954_s29 + $0xa40] sm:$0xff] }
 0x5bd   : > { %10270 = vmatpush1.bf16.msra.mxu1 %v13963_v10  ;;  %10107 = vmatprep.subr.bf16.mxu0 %v13970_v46  ;;  %v7239_v10 = vld [vmem:[%s15954_s29 + $0xa60] sm:$0xff]  ;;  %v7236_v46 = vld [vmem:[%s15954_s29 + $0xa48] sm:$0xff] }
 0x5be   : > { %10271 = vmatprep.subr.bf16.mxu1 %v13972_v50  ;;  %v7240_v50 = vld [vmem:[%s15954_s29 + $0xa68] sm:$0xff]  ;;  %v14026_v18 = vcombine.high %v7235_v1, %v7239_v10  ;;  %v14025_v56 = vcombine.low %v7235_v1, %v7239_v10 }
 0x5bf   : > { %v14028_v38 = vcombine.high %v7236_v46, %v7240_v50  ;;  %v14027_v41 = vcombine.low %v7236_v46, %v7240_v50 }
 0x5c0   : > { %10108 = vmatpush1.bf16.msra.mxu0 %v13969_v22  ;;  %v7243_v22 = vld [vmem:[%s15954_s29 + $0xa80] sm:$0xff] }
 0x5c1   : > { %10272 = vmatpush1.bf16.msra.mxu1 %v13971_v62  ;;  %10109 = vmatprep.subr.bf16.mxu0 %v13978_v54  ;;  %v7247_v62 = vld [vmem:[%s15954_s29 + $0xaa0] sm:$0xff]  ;;  %v7244_v54 = vld [vmem:[%s15954_s29 + $0xa88] sm:$0xff] }
 0x5c2   : > { %10273 = vmatprep.subr.bf16.mxu1 %v13980_v0  ;;  %v7248_v0 = vld [vmem:[%s15954_s29 + $0xaa8] sm:$0xff]  ;;  %v14034_v20 = vcombine.high %v7243_v22, %v7247_v62  ;;  %v14033_v34 = vcombine.low %v7243_v22, %v7247_v62 }
 0x5c3   : > { %v14036_v59 = vcombine.high %v7244_v54, %v7248_v0  ;;  %v14035_v25 = vcombine.low %v7244_v54, %v7248_v0 }
 0x5c4   : > { %10110 = vmatpush1.bf16.msra.mxu0 %v13977_v43  ;;  %v7251_v43 = vld [vmem:[%s15954_s29 + $0xac0] sm:$0xff] }
 0x5c5   : > { %10274 = vmatpush1.bf16.msra.mxu1 %v13979_v23  ;;  %10111 = vmatprep.subr.bf16.mxu0 %v13986_v2  ;;  %v7255_v23 = vld [vmem:[%s15954_s29 + $0xae0] sm:$0xff]  ;;  %v7252_v2 = vld [vmem:[%s15954_s29 + $0xac8] sm:$0xff] }
 0x5c6   : > { %10275 = vmatprep.subr.bf16.mxu1 %v13988_v3  ;;  %v7256_v3 = vld [vmem:[%s15954_s29 + $0xae8] sm:$0xff]  ;;  %v14042_v21 = vcombine.high %v7251_v43, %v7255_v23  ;;  %v14041_v61 = vcombine.low %v7251_v43, %v7255_v23 }
 0x5c7   : > { %v14044_v26 = vcombine.high %v7252_v2, %v7256_v3  ;;  %v14043_v28 = vcombine.low %v7252_v2, %v7256_v3 }
 0x5c8   : > { %10112 = vmatpush1.bf16.msra.mxu0 %v13985_v35  ;;  %v7259_v35 = vld [vmem:[%s15954_s29 + $0xb00] sm:$0xff] }
 0x5c9   : > { %10276 = vmatpush1.bf16.msra.mxu1 %v13987_v31  ;;  %10113 = vmatprep.subr.bf16.mxu0 %v13994_v53  ;;  %v7263_v31 = vld [vmem:[%s15954_s29 + $0xb20] sm:$0xff]  ;;  %v7260_v53 = vld [vmem:[%s15954_s29 + $0xb08] sm:$0xff] }
 0x5ca   : > { %10277 = vmatprep.subr.bf16.mxu1 %v13996_v55  ;;  %v7264_v55 = vld [vmem:[%s15954_s29 + $0xb28] sm:$0xff]  ;;  %v14050_v30 = vcombine.high %v7259_v35, %v7263_v31  ;;  %v14049_v5 = vcombine.low %v7259_v35, %v7263_v31 }
 0x5cb   : > { %v14052_v29 = vcombine.high %v7260_v53, %v7264_v55  ;;  %v14051_v19 = vcombine.low %v7260_v53, %v7264_v55 }
 0x5cc   : > { %10114 = vmatpush1.bf16.msra.mxu0 %v13993_v58  ;;  %v7267_v58 = vld [vmem:[%s15954_s29 + $0xb40] sm:$0xff] }
 0x5cd   : > { %10278 = vmatpush1.bf16.msra.mxu1 %v13995_v7  ;;  %10115 = vmatprep.subr.bf16.mxu0 %v14002_v27  ;;  %v7271_v7 = vld [vmem:[%s15954_s29 + $0xb60] sm:$0xff]  ;;  %v7268_v27 = vld [vmem:[%s15954_s29 + $0xb48] sm:$0xff] }
 0x5ce   : > { %10279 = vmatprep.subr.bf16.mxu1 %v14004_v4  ;;  %v7272_v4 = vld [vmem:[%s15954_s29 + $0xb68] sm:$0xff]  ;;  %v14058_v9 = vcombine.high %v7267_v58, %v7271_v7  ;;  %v14057_v37 = vcombine.low %v7267_v58, %v7271_v7 }
 0x5cf   : > { %v14060_v40 = vcombine.high %v7268_v27, %v7272_v4  ;;  %v14059_v52 = vcombine.low %v7268_v27, %v7272_v4  ;;  %v7300_v58 = vld [vmem:[%s15954_s29 + $0xc48] sm:$0xff] }
 0x5d0   : > { %10116 = vmatpush1.bf16.msra.mxu0 %v14001_v42  ;;  %v7275_v42 = vld [vmem:[%s15954_s29 + $0xb80] sm:$0xff]  ;;  %v7304_v7 = vld [vmem:[%s15954_s29 + $0xc68] sm:$0xff] }
 0x5d1   : > { %10280 = vmatpush1.bf16.msra.mxu1 %v14003_v36  ;;  %10117 = vmatprep.subr.bf16.mxu0 %v14010_v24  ;;  %v7279_v36 = vld [vmem:[%s15954_s29 + $0xba0] sm:$0xff]  ;;  %v7276_v24 = vld [vmem:[%s15954_s29 + $0xb88] sm:$0xff] }
 0x5d2   : > { %10281 = vmatprep.subr.bf16.mxu1 %v14012_v45  ;;  %v7280_v45 = vld [vmem:[%s15954_s29 + $0xba8] sm:$0xff]  ;;  %v14066_v63 = vcombine.high %v7275_v42, %v7279_v36  ;;  %v14065_v1 = vcombine.low %v7275_v42, %v7279_v36  ;;  %v14092_v42 = vcombine.high %v7300_v58, %v7304_v7  ;;  %v7311_v36 = vld [vmem:[%s15954_s29 + $0xca0] sm:$0xff] }
 0x5d3   : > { %v14068_v39 = vcombine.high %v7276_v24, %v7280_v45  ;;  %v14067_v10 = vcombine.low %v7276_v24, %v7280_v45  ;;  %v7308_v24 = vld [vmem:[%s15954_s29 + $0xc88] sm:$0xff] }
 0x5d4   : > { %10118 = vmatpush1.bf16.msra.mxu0 %v14009_v33  ;;  %v7283_v33 = vld [vmem:[%s15954_s29 + $0xbc0] sm:$0xff]  ;;  %v7312_v45 = vld [vmem:[%s15954_s29 + $0xca8] sm:$0xff] }
 0x5d5   : > { %10282 = vmatpush1.bf16.msra.mxu1 %v14011_v60  ;;  %10119 = vmatprep.subr.bf16.mxu0 %v14018_v6  ;;  %v7287_v60 = vld [vmem:[%s15954_s29 + $0xbe0] sm:$0xff]  ;;  %v7284_v6 = vld [vmem:[%s15954_s29 + $0xbc8] sm:$0xff] }
 0x5d6   : > { %10283 = vmatprep.subr.bf16.mxu1 %v14020_v12  ;;  %v7288_v12 = vld [vmem:[%s15954_s29 + $0xbe8] sm:$0xff]  ;;  %v14074_v46 = vcombine.high %v7283_v33, %v7287_v60  ;;  %v14073_v22 = vcombine.low %v7283_v33, %v7287_v60  ;;  %v14100_v33 = vcombine.high %v7308_v24, %v7312_v45  ;;  %v7315_v60 = vld [vmem:[%s15954_s29 + $0xcc0] sm:$0xff] }
 0x5d7   : > { %v14076_v50 = vcombine.high %v7284_v6, %v7288_v12  ;;  %v14075_v62 = vcombine.low %v7284_v6, %v7288_v12  ;;  %v7319_v6 = vld [vmem:[%s15954_s29 + $0xce0] sm:$0xff]  ;;  %v7316_v12 = vld [vmem:[%s15954_s29 + $0xcc8] sm:$0xff] }
 0x5d8   : > { %10120 = vmatpush1.bf16.msra.mxu0 %v14017_v11  ;;  %v7291_v11 = vld [vmem:[%s15954_s29 + $0xc00] sm:$0xff] }
 0x5d9   : > { %10284 = vmatpush1.bf16.msra.mxu1 %v14019_v17  ;;  %10121 = vmatprep.subr.bf16.mxu0 %v14026_v18  ;;  %v7295_v17 = vld [vmem:[%s15954_s29 + $0xc20] sm:$0xff]  ;;  %v7292_v18 = vld [vmem:[%s15954_s29 + $0xc08] sm:$0xff] }
 0x5da   : > { %10285 = vmatprep.subr.bf16.mxu1 %v14028_v38  ;;  %v7296_v38 = vld [vmem:[%s15954_s29 + $0xc28] sm:$0xff]  ;;  %v14082_v54 = vcombine.high %v7291_v11, %v7295_v17  ;;  %v14081_v4 = vcombine.low %v7291_v11, %v7295_v17  ;;  %v7323_v17 = vld [vmem:[%s15954_s29 + $0xd00] sm:$0xff] }
 0x5db   : > { %v14084_v0 = vcombine.high %v7292_v18, %v7296_v38 }
 0x5dc   : > { %10122 = vmatpush1.bf16.msra.mxu0 %v14025_v56  ;;  %v17252_v56 = vld [vmem:[%s583_s2] sm:$0xff] }
 0x5dd   : > { %10286 = vmatpush1.bf16.msra.mxu1 %v14027_v41  ;;  %10123 = vmatprep.subr.bf16.mxu0 %v14034_v20  ;;  %v3654_v41 = vrot.slane %v17252_v56, %v16640_v47  ;;  %v3658_v20 = vrot.slane %v17252_v56, %v16554_v8 }
 0x5de   : > { %10287 = vmatprep.subr.bf16.mxu1 %v14036_v59  ;;  %v3666_v59 = vrot.slane %v17252_v56, %v16645_v57 }
 0x5e0   : > { %10124 = vmatpush1.bf16.msra.mxu0 %v14033_v34 }
 0x5e1   : > { %10288 = vmatpush1.bf16.msra.mxu1 %v14035_v25  ;;  %10125 = vmatprep.subr.bf16.mxu0 %v14042_v21 }
 0x5e2   : > { %10289 = vmatprep.subr.bf16.mxu1 %v14044_v26 }
 0x5e4   : > { %10126 = vmatpush1.bf16.msra.mxu0 %v14041_v61 }
 0x5e5   : > { %10290 = vmatpush1.bf16.msra.mxu1 %v14043_v28  ;;  %10127 = vmatprep.subr.bf16.mxu0 %v14050_v30  ;;  %v7299_v28 = vld [vmem:[%s15954_s29 + $0xc40] sm:$0xff] }
 0x5e6   : > { %10291 = vmatprep.subr.bf16.mxu1 %v14052_v29  ;;  %v7303_v29 = vld [vmem:[%s15954_s29 + $0xc60] sm:$0xff] }
 0x5e8   : > { %10128 = vmatpush1.bf16.msra.mxu0 %v14049_v5  ;;  %v14083_v5 = vcombine.low %v7292_v18, %v7296_v38  ;;  %v7327_v18 = vld [vmem:[%s15954_s29 + $0xd20] sm:$0xff]  ;;  %v7324_v38 = vld [vmem:[%s15954_s29 + $0xd08] sm:$0xff] }
 0x5e9   : > { %10292 = vmatpush1.bf16.msra.mxu1 %v14051_v19  ;;  %10129 = vmatprep.subr.bf16.mxu0 %v14058_v9  ;;  %v7307_v9 = vld [vmem:[%s15954_s29 + $0xc80] sm:$0xff] }
 0x5ea   : > { %10293 = vmatprep.subr.bf16.mxu1 %v14060_v40  ;;  %v14090_v40 = vcombine.high %v7299_v28, %v7303_v29 }
 0x5ec   : > { %10130 = vmatpush1.bf16.msra.mxu0 %v14057_v37 }
 0x5ed   : > { %10294 = vmatpush1.bf16.msra.mxu1 %v14059_v52  ;;  %10131 = vmatprep.subr.bf16.mxu0 %v14066_v63  ;;  %v14089_v52 = vcombine.low %v7299_v28, %v7303_v29  ;;  %v14091_v63 = vcombine.low %v7300_v58, %v7304_v7  ;;  %v7347_v29 = vld [vmem:[%s15954_s29 + $0xdc0] sm:$0xff]  ;;  %v7348_v7 = vld [vmem:[%s15954_s29 + $0xdc8] sm:$0xff] }
 0x5ee   : > { %10295 = vmatprep.subr.bf16.mxu1 %v14068_v39  ;;  %v14098_v39 = vcombine.high %v7307_v9, %v7311_v36  ;;  %v7351_v58 = vld [vmem:[%s15954_s29 + $0xde0] sm:$0xff] }
 0x5f0   : > { %10132 = vmatpush1.bf16.msra.mxu0 %v14065_v1  ;;  %v7320_v1 = vld [vmem:[%s15954_s29 + $0xce8] sm:$0xff] }
 0x5f1   : > { %10296 = vmatpush1.bf16.msra.mxu1 %v14067_v10  ;;  %10133 = vmatprep.subr.bf16.mxu0 %v14074_v46  ;;  %v14097_v10 = vcombine.low %v7307_v9, %v7311_v36  ;;  %v14099_v46 = vcombine.low %v7308_v24, %v7312_v45  ;;  %v14108_v11 = vcombine.high %v7316_v12, %v7320_v1  ;;  %v7355_v36 = vld [vmem:[%s15954_s29 + $0xe00] sm:$0xff]  ;;  %v7356_v45 = vld [vmem:[%s15954_s29 + $0xe08] sm:$0xff] }
 0x5f2   : > { %10297 = vmatprep.subr.bf16.mxu1 %v14076_v50  ;;  %v14106_v50 = vcombine.high %v7315_v60, %v7319_v6  ;;  %v7359_v24 = vld [vmem:[%s15954_s29 + $0xe20] sm:$0xff] }
 0x5f4   : > { %10134 = vmatpush1.bf16.msra.mxu0 %v14073_v22  ;;  %v7328_v22 = vld [vmem:[%s15954_s29 + $0xd28] sm:$0xff] }
 0x5f5   : > { %10298 = vmatpush1.bf16.msra.mxu1 %v14075_v62  ;;  %10144 = vmatprep.subr.bf16.mxu0 %v14082_v54  ;;  %v14105_v62 = vcombine.low %v7315_v60, %v7319_v6  ;;  %v14107_v54 = vcombine.low %v7316_v12, %v7320_v1  ;;  %v7363_v6 = vld [vmem:[%s15954_s29 + $0xe40] sm:$0xff]  ;;  %v7364_v1 = vld [vmem:[%s15954_s29 + $0xe48] sm:$0xff] }
 0x5f6   : > { %10308 = vmatprep.subr.bf16.mxu1 %v14084_v0  ;;  %v14114_v0 = vcombine.high %v7323_v17, %v7327_v18  ;;  %v7367_v12 = vld [vmem:[%s15954_s29 + $0xe60] sm:$0xff] }
 0x60a   : > { %v6720_v43 = vpop.f32.mrb[20].mxu0 }
 0x60b   : > { %v14481_v23 = vadd.f32 %v6720_v43, %v3654_v41  ;;  %v17260_v2 = vpop.f32.mrb[20].mxu1  ;;  %v6722_v3 = vpop.f32.mrb[21].mxu0  ;;  %v14116_v41 = vcombine.high %v7324_v38, %v7328_v22  ;;  %v7332_v43 = vld [vmem:[%s15954_s29 + $0xd48] sm:$0xff] }
 0x60c   : > { %v14482_v34 = vadd.f32 %v6722_v3, %v3658_v20  ;;  %v6886_v25 = vpop.f32.mrb[21].mxu1  ;;  %v6724_v21 = vpop.f32.mrb[22].mxu0  ;;  %v7331_v20 = vld [vmem:[%s15954_s29 + $0xd40] sm:$0xff]  ;;  %v14113_v3 = vcombine.low %v7323_v17, %v7327_v18 }
 0x60d   : > { %v6895_v26 = vmax.f32 %v14481_v23, 0.0  ;;  %v14484_v35 = vadd.f32 %v6886_v25, %v3666_v59  ;;  %v6888_v31 = vpop.f32.mrb[22].mxu1  ;;  %v6725_v53 = vpop.f32.mrb[23].mxu0  ;;  %v7335_v59 = vld [vmem:[%s15954_s29 + $0xd60] sm:$0xff]  ;;  %v7336_v23 = vld [vmem:[%s15954_s29 + $0xd68] sm:$0xff] }
 0x60e   : > { %v6896_v55 = vmax.f32 %v14482_v34, 0.0  ;;  %v6889_v61 = vpop.f32.mrb[23].mxu1  ;;  %v14115_v34 = vcombine.low %v7324_v38, %v7328_v22  ;;  %v14122_v25 = vcombine.high %v7331_v20, %v7335_v59  ;;  %v14124_v21 = vcombine.high %v7332_v43, %v7336_v23  ;;  %v7340_v31 = vld [vmem:[%s15954_s29 + $0xd88] sm:$0xff]  ;;  %v7371_v18 = vld [vmem:[%s15954_s29 + $0xe80] sm:$0xff] }
 0x60f   : > { %v6898_v30 = vmax.f32 %v14484_v35, 0.0  ;;  %v17268_v19 = vpack.c.bf16 %v6895_v26, %v6895_v26  ;;  %v7339_v26 = vld [vmem:[%s15954_s29 + $0xd80] sm:$0xff]  ;;  %v7344_v53 = vld [vmem:[%s15954_s29 + $0xda8] sm:$0xff]  ;;  %v14123_v61 = vcombine.low %v7332_v43, %v7336_v23 }
 0x610   : > { %v17266_v27 = vpack.c.bf16 %v6896_v55, %v6896_v55  ;;  %v7343_v35 = vld [vmem:[%s15954_s29 + $0xda0] sm:$0xff]  ;;  %v14121_v55 = vcombine.low %v7331_v20, %v7335_v59  ;;  %v14131_v9 = vcombine.low %v7340_v31, %v7344_v53  ;;  %v7372_v22 = vld [vmem:[%s15954_s29 + $0xe88] sm:$0xff] }
 0x611   : > { %v17276_v37 = vpack.c.bf16 %v6898_v30, %v6898_v30  ;;  %v14130_v28 = vcombine.high %v7339_v26, %v7343_v35  ;;  %v14132_v30 = vcombine.high %v7340_v31, %v7344_v53  ;;  %v7375_v38 = vld [vmem:[%s15954_s29 + $0xea0] sm:$0xff]  ;;  %v7380_v23 = vld [vmem:[%s15954_s29 + $0xec8] sm:$0xff] }
 0x612   : > { %10135 = vmatprep.mubr.bf16.mxu0 %v17266_v27  ;;  %10299 = vmatprep.mubr.bf16.mxu1 %v17266_v27  ;;  %v7379_v59 = vld [vmem:[%s15954_s29 + $0xec0] sm:$0xff]  ;;  %v7388_v53 = vld [vmem:[%s15954_s29 + $0xf08] sm:$0xff] }
 0x613   : > { %10136 = vmatmul.mubr.bf16.vlgmr.msra.gmra.mrb[24].mxu0 %v17268_v19  ;;  %10300 = vmatmul.mubr.bf16.vlgmr.msra.gmra.mrb[24].mxu1 %v17268_v19  ;;  %v7383_v43 = vld [vmem:[%s15954_s29 + $0xee0] sm:$0xff] }
 0x614   : > { %10145 = vmatpush1.bf16.msra.mxu0 %v14081_v4  ;;  %10309 = vmatpush1.bf16.msra.mxu1 %v14083_v5  ;;  %v7352_v4 = vld [vmem:[%s15954_s29 + $0xde8] sm:$0xff]  ;;  %v14129_v5 = vcombine.low %v7339_v26, %v7343_v35  ;;  %v7387_v35 = vld [vmem:[%s15954_s29 + $0xf00] sm:$0xff] }
 0x615   : > { %10176 = vmatprep.mubr.bf16.mxu0 %v17276_v37  ;;  %10340 = vmatprep.mubr.bf16.mxu1 %v17276_v37  ;;  %v7391_v31 = vld [vmem:[%s15954_s29 + $0xf20] sm:$0xff] }
 0x616   : > { %10146 = vmatprep.subr.bf16.mxu0 %v14090_v40  ;;  %10310 = vmatprep.subr.bf16.mxu1 %v14092_v42  ;;  %v14138_v40 = vcombine.high %v7347_v29, %v7351_v58  ;;  %v14140_v42 = vcombine.high %v7348_v7, %v7352_v4 }
 0x618   : > { %10147 = vmatpush1.bf16.msra.mxu0 %v14089_v52  ;;  %10311 = vmatpush1.bf16.msra.mxu1 %v14091_v63  ;;  %v7360_v52 = vld [vmem:[%s15954_s29 + $0xe28] sm:$0xff]  ;;  %v14137_v63 = vcombine.low %v7347_v29, %v7351_v58  ;;  %v7395_v58 = vld [vmem:[%s15954_s29 + $0xf40] sm:$0xff] }
 0x619   : > { %10148 = vmatprep.subr.bf16.mxu0 %v14098_v39  ;;  %10312 = vmatprep.subr.bf16.mxu1 %v14100_v33  ;;  %v14139_v39 = vcombine.low %v7348_v7, %v7352_v4  ;;  %v14146_v33 = vcombine.high %v7355_v36, %v7359_v24  ;;  %v14148_v60 = vcombine.high %v7356_v45, %v7360_v52  ;;  %v7399_v7 = vld [vmem:[%s15954_s29 + $0xf60] sm:$0xff]  ;;  %v7396_v4 = vld [vmem:[%s15954_s29 + $0xf48] sm:$0xff] }
 0x61c   : > { %10149 = vmatpush1.bf16.msra.mxu0 %v14097_v10  ;;  %10313 = vmatpush1.bf16.msra.mxu1 %v14099_v46  ;;  %v7368_v10 = vld [vmem:[%s15954_s29 + $0xe68] sm:$0xff]  ;;  %v14145_v46 = vcombine.low %v7355_v36, %v7359_v24  ;;  %v7403_v24 = vld [vmem:[%s15954_s29 + $0xf80] sm:$0xff] }
 0x61d   : > { %10150 = vmatprep.subr.bf16.mxu0 %v14106_v50  ;;  %10314 = vmatprep.subr.bf16.mxu1 %v14108_v11  ;;  %v14147_v50 = vcombine.low %v7356_v45, %v7360_v52  ;;  %v14154_v11 = vcombine.high %v7363_v6, %v7367_v12  ;;  %v14156_v17 = vcombine.high %v7364_v1, %v7368_v10  ;;  %v7407_v45 = vld [vmem:[%s15954_s29 + $0xfa0] sm:$0xff]  ;;  %v7404_v52 = vld [vmem:[%s15954_s29 + $0xf88] sm:$0xff] }
 0x620   : > { %10151 = vmatpush1.bf16.msra.mxu0 %v14105_v62  ;;  %10315 = vmatpush1.bf16.msra.mxu1 %v14107_v54  ;;  %v7376_v62 = vld [vmem:[%s15954_s29 + $0xea8] sm:$0xff]  ;;  %v14153_v54 = vcombine.low %v7363_v6, %v7367_v12  ;;  %v14194_v6 = vcombine.high %v7403_v24, %v7407_v45 }
 0x621   : > { %10152 = vmatprep.subr.bf16.mxu0 %v14114_v0  ;;  %10316 = vmatprep.subr.bf16.mxu1 %v14116_v41  ;;  %v14155_v0 = vcombine.low %v7364_v1, %v7368_v10  ;;  %v14162_v41 = vcombine.high %v7371_v18, %v7375_v38  ;;  %v14164_v20 = vcombine.high %v7372_v22, %v7376_v62  ;;  %v7411_v1 = vld [vmem:[%s15954_s29 + $0xfc0] sm:$0xff] }
 0x622   : > { %v7415_v10 = vld [vmem:[%s15954_s29 + $0xfe0] sm:$0xff] }
 0x624   : > { %10153 = vmatpush1.bf16.msra.mxu0 %v14113_v3  ;;  %10317 = vmatpush1.bf16.msra.mxu1 %v14115_v34  ;;  %v7384_v3 = vld [vmem:[%s15954_s29 + $0xee8] sm:$0xff]  ;;  %v14161_v34 = vcombine.low %v7371_v18, %v7375_v38 }
 0x625   : > { %10154 = vmatprep.subr.bf16.mxu0 %v14122_v25  ;;  %10318 = vmatprep.subr.bf16.mxu1 %v14124_v21  ;;  %v14163_v25 = vcombine.low %v7372_v22, %v7376_v62  ;;  %v14170_v21 = vcombine.high %v7379_v59, %v7383_v43  ;;  %v14172_v26 = vcombine.high %v7380_v23, %v7384_v3  ;;  %v6909_v22 = vld [vmem:[%s15954_s29 + $0x10] sm:$0xff] }
 0x626   : > { %v6913_v62 = vld [vmem:[%s15954_s29 + $0x30] sm:$0xff] }
 0x628   : > { %10155 = vmatpush1.bf16.msra.mxu0 %v14121_v55  ;;  %10319 = vmatpush1.bf16.msra.mxu1 %v14123_v61  ;;  %v7392_v55 = vld [vmem:[%s15954_s29 + $0xf28] sm:$0xff]  ;;  %v14169_v61 = vcombine.low %v7379_v59, %v7383_v43 }
 0x629   : > { %10156 = vmatprep.subr.bf16.mxu0 %v14130_v28  ;;  %10320 = vmatprep.subr.bf16.mxu1 %v14132_v30  ;;  %v14171_v28 = vcombine.low %v7380_v23, %v7384_v3  ;;  %v14178_v30 = vcombine.high %v7387_v35, %v7391_v31  ;;  %v14180_v29 = vcombine.high %v7388_v53, %v7392_v55  ;;  %v6917_v23 = vld [vmem:[%s15954_s29 + $0x50] sm:$0xff] }
 0x62a   : > { %v6921_v3 = vld [vmem:[%s15954_s29 + $0x70] sm:$0xff] }
 0x62c   : > { %10157 = vmatpush1.bf16.msra.mxu0 %v14129_v5  ;;  %10321 = vmatpush1.bf16.msra.mxu1 %v14131_v9  ;;  %v7400_v5 = vld [vmem:[%s15954_s29 + $0xf68] sm:$0xff]  ;;  %v14177_v9 = vcombine.low %v7387_v35, %v7391_v31  ;;  %v13710_v31 = vcombine.high %v6917_v23, %v6921_v3 }
 0x62d   : > { %10158 = vmatprep.subr.bf16.mxu0 %v14138_v40  ;;  %10322 = vmatprep.subr.bf16.mxu1 %v14140_v42  ;;  %v14179_v40 = vcombine.low %v7388_v53, %v7392_v55  ;;  %v14186_v42 = vcombine.high %v7395_v58, %v7399_v7  ;;  %v14188_v36 = vcombine.high %v7396_v4, %v7400_v5  ;;  %v6925_v55 = vld [vmem:[%s15954_s29 + $0x90] sm:$0xff] }
 0x630   : > { %10159 = vmatpush1.bf16.msra.mxu0 %v14137_v63  ;;  %10323 = vmatpush1.bf16.msra.mxu1 %v14139_v39  ;;  %v7408_v63 = vld [vmem:[%s15954_s29 + $0xfa8] sm:$0xff]  ;;  %v14185_v39 = vcombine.low %v7395_v58, %v7399_v7 }
 0x631   : > { %10160 = vmatprep.subr.bf16.mxu0 %v14146_v33  ;;  %10324 = vmatprep.subr.bf16.mxu1 %v14148_v60  ;;  %v14187_v33 = vcombine.low %v7396_v4, %v7400_v5  ;;  %v3662_v60 = vrot.slane %v17252_v56, %v16724_v44  ;;  %v14196_v12 = vcombine.high %v7404_v52, %v7408_v63  ;;  %v6933_v5 = vld [vmem:[%s15954_s29 + $0xd0] sm:$0xff] }
 0x632   : > { %v14202_v56 = vcombine.high %v7411_v1, %v7415_v10 }
 0x633   : > { %v14483_v18 = vadd.f32 %v17260_v2, %v3662_v60  ;;  %v13702_v2 = vcombine.high %v6909_v22, %v6913_v62 }
 0x634   : > { %10161 = vmatpush1.bf16.msra.mxu0 %v14145_v46  ;;  %10325 = vmatpush1.bf16.msra.mxu1 %v14147_v50  ;;  %v7412_v46 = vld [vmem:[%s15954_s29 + $0xfc8] sm:$0xff] }
 0x635   : > { %10162 = vmatprep.subr.bf16.mxu0 %v14154_v11  ;;  %10326 = vmatprep.subr.bf16.mxu1 %v14156_v17  ;;  %v7416_v50 = vld [vmem:[%s15954_s29 + $0xfe8] sm:$0xff]  ;;  %v14193_v11 = vcombine.low %v7403_v24, %v7407_v45  ;;  %v14195_v17 = vcombine.low %v7404_v52, %v7408_v63  ;;  %v6897_v59 = vmax.f32 %v14483_v18, 0.0  ;;  %v6941_v52 = vld [vmem:[%s15954_s29 + $0x110] sm:$0xff] }
 0x636   : > { %v14204_v38 = vcombine.high %v7412_v46, %v7416_v50  ;;  %v6945_v63 = vld [vmem:[%s15954_s29 + $0x130] sm:$0xff] }
 0x638   : > { %10163 = vmatpush1.bf16.msra.mxu0 %v14153_v54  ;;  %10327 = vmatpush1.bf16.msra.mxu1 %v14155_v0  ;;  %v6910_v54 = vld [vmem:[%s15954_s29 + $0x18] sm:$0xff] }
 0x639   : > { %10164 = vmatprep.subr.bf16.mxu0 %v14162_v41  ;;  %10328 = vmatprep.subr.bf16.mxu1 %v14164_v20  ;;  %v6914_v0 = vld [vmem:[%s15954_s29 + $0x38] sm:$0xff]  ;;  %v14201_v41 = vcombine.low %v7411_v1, %v7415_v10  ;;  %v14203_v20 = vcombine.low %v7412_v46, %v7416_v50  ;;  %v6949_v10 = vld [vmem:[%s15954_s29 + $0x150] sm:$0xff] }
 0x63a   : > { %v13704_v43 = vcombine.high %v6910_v54, %v6914_v0  ;;  %v13703_v35 = vcombine.low %v6910_v54, %v6914_v0  ;;  %v6953_v46 = vld [vmem:[%s15954_s29 + $0x170] sm:$0xff]  ;;  %v6950_v50 = vld [vmem:[%s15954_s29 + $0x158] sm:$0xff] }
 0x63b   : > { %v6958_v54 = vld [vmem:[%s15954_s29 + $0x198] sm:$0xff] }
 0x63c   : > { %10165 = vmatpush1.bf16.msra.mxu0 %v14161_v34  ;;  %10329 = vmatpush1.bf16.msra.mxu1 %v14163_v25  ;;  %v6918_v34 = vld [vmem:[%s15954_s29 + $0x58] sm:$0xff] }
 0x63d   : > { %10166 = vmatprep.subr.bf16.mxu0 %v14170_v21  ;;  %10330 = vmatprep.subr.bf16.mxu1 %v14172_v26  ;;  %v6922_v25 = vld [vmem:[%s15954_s29 + $0x78] sm:$0xff]  ;;  %v13701_v21 = vcombine.low %v6909_v22, %v6913_v62  ;;  %v17345_v26 = vpack.c.bf16 %v6897_v59, %v6897_v59  ;;  %v6957_v22 = vld [vmem:[%s15954_s29 + $0x190] sm:$0xff] }
 0x63e   : > { %v13712_v53 = vcombine.high %v6918_v34, %v6922_v25  ;;  %v13711_v58 = vcombine.low %v6918_v34, %v6922_v25  ;;  %v6961_v62 = vld [vmem:[%s15954_s29 + $0x1b0] sm:$0xff]  ;;  %v6962_v0 = vld [vmem:[%s15954_s29 + $0x1b8] sm:$0xff] }
 0x63f   : > { %v13750_v59 = vcombine.high %v6957_v22, %v6961_v62  ;;  %v6970_v34 = vld [vmem:[%s15954_s29 + $0x1f8] sm:$0xff]  ;;  %v13749_v25 = vcombine.low %v6957_v22, %v6961_v62  ;;  %v7009_v22 = vld [vmem:[%s15954_s29 + $0x330] sm:$0xff] }
 0x640   : > { %10167 = vmatpush1.bf16.msra.mxu0 %v14169_v61  ;;  %10331 = vmatpush1.bf16.msra.mxu1 %v14171_v28  ;;  %v6929_v61 = vld [vmem:[%s15954_s29 + $0xb0] sm:$0xff]  ;;  %v6926_v28 = vld [vmem:[%s15954_s29 + $0x98] sm:$0xff] }
 0x641   : > { %10168 = vmatprep.subr.bf16.mxu0 %v14178_v30  ;;  %10332 = vmatprep.subr.bf16.mxu1 %v14180_v29  ;;  %v6930_v30 = vld [vmem:[%s15954_s29 + $0xb8] sm:$0xff]  ;;  %v13709_v29 = vcombine.low %v6917_v23, %v6921_v3  ;;  %v13718_v7 = vcombine.high %v6925_v55, %v6929_v61  ;;  %v6969_v23 = vld [vmem:[%s15954_s29 + $0x1f0] sm:$0xff] }
 0x642   : > { %v13720_v4 = vcombine.high %v6926_v28, %v6930_v30  ;;  %v13719_v24 = vcombine.low %v6926_v28, %v6930_v30  ;;  %v6966_v3 = vld [vmem:[%s15954_s29 + $0x1d8] sm:$0xff] }
 0x643   : > { %v6978_v28 = vld [vmem:[%s15954_s29 + $0x238] sm:$0xff] }
 0x644   : > { %10169 = vmatpush1.bf16.msra.mxu0 %v14177_v9  ;;  %10333 = vmatpush1.bf16.msra.mxu1 %v14179_v40  ;;  %v6937_v9 = vld [vmem:[%s15954_s29 + $0xf0] sm:$0xff]  ;;  %v6934_v40 = vld [vmem:[%s15954_s29 + $0xd8] sm:$0xff] }
 0x645   : > { %10170 = vmatprep.subr.bf16.mxu0 %v14186_v42  ;;  %10334 = vmatprep.subr.bf16.mxu1 %v14188_v36  ;;  %v6938_v42 = vld [vmem:[%s15954_s29 + $0xf8] sm:$0xff]  ;;  %v13717_v36 = vcombine.low %v6925_v55, %v6929_v61  ;;  %v13725_v60 = vcombine.low %v6933_v5, %v6937_v9  ;;  %v6977_v55 = vld [vmem:[%s15954_s29 + $0x230] sm:$0xff] }
 0x646   : > { %v13728_v45 = vcombine.high %v6934_v40, %v6938_v42  ;;  %v6974_v61 = vld [vmem:[%s15954_s29 + $0x218] sm:$0xff] }
 0x647   : > { %v7006_v62 = vld [vmem:[%s15954_s29 + $0x318] sm:$0xff] }
 0x648   : > { %10171 = vmatpush1.bf16.msra.mxu0 %v14185_v39  ;;  %10335 = vmatpush1.bf16.msra.mxu1 %v14187_v33  ;;  %v6942_v39 = vld [vmem:[%s15954_s29 + $0x118] sm:$0xff] }
 0x649   : > { %10172 = vmatprep.subr.bf16.mxu0 %v14194_v6  ;;  %10336 = vmatprep.subr.bf16.mxu1 %v14196_v12  ;;  %v6946_v33 = vld [vmem:[%s15954_s29 + $0x138] sm:$0xff]  ;;  %v13727_v6 = vcombine.low %v6934_v40, %v6938_v42  ;;  %v13734_v12 = vcombine.high %v6941_v52, %v6945_v63 }
 0x64a   : > { %v13736_v1 = vcombine.high %v6942_v39, %v6946_v33  ;;  %v13735_v18 = vcombine.low %v6942_v39, %v6946_v33  ;;  %v6986_v40 = vld [vmem:[%s15954_s29 + $0x278] sm:$0xff] }
 0x64b   : > { %v6994_v39 = vld [vmem:[%s15954_s29 + $0x2b8] sm:$0xff] }
 0x64c   : > { %10173 = vmatpush1.bf16.msra.mxu0 %v14193_v11  ;;  %10337 = vmatpush1.bf16.msra.mxu1 %v14195_v17  ;;  %v6954_v11 = vld [vmem:[%s15954_s29 + $0x178] sm:$0xff]  ;;  %v13733_v17 = vcombine.low %v6941_v52, %v6945_v63  ;;  %v6993_v52 = vld [vmem:[%s15954_s29 + $0x2b0] sm:$0xff] }
 0x64d   : > { %10174 = vmatprep.subr.bf16.mxu0 %v14202_v56  ;;  %10338 = vmatprep.subr.bf16.mxu1 %v14204_v38  ;;  %v13742_v56 = vcombine.high %v6949_v10, %v6953_v46  ;;  %v13744_v38 = vcombine.high %v6950_v50, %v6954_v11  ;;  %v6990_v63 = vld [vmem:[%s15954_s29 + $0x298] sm:$0xff] }
 0x650   : > { %10175 = vmatpush1.bf16.msra.mxu0 %v14201_v41  ;;  %10339 = vmatpush1.bf16.msra.mxu1 %v14203_v20  ;;  %v13741_v41 = vcombine.low %v6949_v10, %v6953_v46  ;;  %v13743_v20 = vcombine.low %v6950_v50, %v6954_v11  ;;  %v7001_v10 = vld [vmem:[%s15954_s29 + $0x2f0] sm:$0xff]  ;;  %v6998_v46 = vld [vmem:[%s15954_s29 + $0x2d8] sm:$0xff] }
 0x651   : > { %10349 = vmatprep.subr.bf16.mxu0 %v13702_v2  ;;  %10513 = vmatprep.subr.bf16.mxu1 %v13704_v43  ;;  %v13752_v2 = vcombine.high %v6958_v54, %v6962_v0  ;;  %v6965_v43 = vld [vmem:[%s15954_s29 + $0x1d0] sm:$0xff]  ;;  %v7002_v50 = vld [vmem:[%s15954_s29 + $0x2f8] sm:$0xff] }
 0x652   : > { %v13757_v30 = vcombine.low %v6965_v43, %v6969_v23 }
 0x653   : > { %10177 = vmatmul.mubr.bf16.vlgmr.msra.gmra.mrb[24].mxu0 %v17345_v26  ;;  %10341 = vmatmul.mubr.bf16.vlgmr.msra.gmra.mrb[24].mxu1 %v17345_v26 }
 0x654   : > { %10350 = vmatpush1.bf16.msra.mxu0 %v13701_v21  ;;  %10381 = vmatprep.mubr.bf16.mxu0 %v17037_v32  ;;  %v13751_v21 = vcombine.low %v6958_v54, %v6962_v0  ;;  %v7010_v54 = vld [vmem:[%s15954_s29 + $0x338] sm:$0xff] }
 0x655   : > { %10514 = vmatpush1.bf16.msra.mxu1 %v13703_v35  ;;  %10545 = vmatprep.mubr.bf16.mxu1 %v17037_v32  ;;  %v13726_v32 = vcombine.high %v6933_v5, %v6937_v9  ;;  %v13758_v35 = vcombine.high %v6965_v43, %v6969_v23  ;;  %v6985_v5 = vld [vmem:[%s15954_s29 + $0x270] sm:$0xff]  ;;  %v6982_v9 = vld [vmem:[%s15954_s29 + $0x258] sm:$0xff] }
 0x656   : > { %10351 = vmatprep.subr.bf16.mxu0 %v13710_v31  ;;  %10515 = vmatprep.subr.bf16.mxu1 %v13712_v53  ;;  %v13760_v31 = vcombine.high %v6966_v3, %v6970_v34  ;;  %v6973_v53 = vld [vmem:[%s15954_s29 + $0x210] sm:$0xff]  ;;  %v7014_v23 = vld [vmem:[%s15954_s29 + $0x358] sm:$0xff] }
 0x657   : > { %v13765_v42 = vcombine.low %v6973_v53, %v6977_v55  ;;  %v7017_v43 = vld [vmem:[%s15954_s29 + $0x370] sm:$0xff] }
 0x658   : > { %10352 = vmatpush1.bf16.msra.mxu0 %v13709_v29  ;;  %v13759_v29 = vcombine.low %v6966_v3, %v6970_v34  ;;  %v7018_v3 = vld [vmem:[%s15954_s29 + $0x378] sm:$0xff] }
 0x659   : > { %10516 = vmatpush1.bf16.msra.mxu1 %v13711_v58  ;;  %10353 = vmatprep.subr.bf16.mxu0 %v13718_v7  ;;  %v13766_v58 = vcombine.high %v6973_v53, %v6977_v55  ;;  %v13768_v7 = vcombine.high %v6974_v61, %v6978_v28  ;;  %v7025_v53 = vld [vmem:[%s15954_s29 + $0x3b0] sm:$0xff]  ;;  %v7022_v55 = vld [vmem:[%s15954_s29 + $0x398] sm:$0xff] }
 0x65a   : > { %10517 = vmatprep.subr.bf16.mxu1 %v13720_v4  ;;  %v6981_v4 = vld [vmem:[%s15954_s29 + $0x250] sm:$0xff] }
 0x65b   : > { %v13773_v33 = vcombine.low %v6981_v4, %v6985_v5 }
 0x65c   : > { %10354 = vmatpush1.bf16.msra.mxu0 %v13717_v36  ;;  %v13767_v36 = vcombine.low %v6974_v61, %v6978_v28  ;;  %v7026_v61 = vld [vmem:[%s15954_s29 + $0x3b8] sm:$0xff] }
 0x65d   : > { %10518 = vmatpush1.bf16.msra.mxu1 %v13719_v24  ;;  %10355 = vmatprep.subr.bf16.mxu0 %v13726_v32  ;;  %v13774_v24 = vcombine.high %v6981_v4, %v6985_v5  ;;  %v13776_v32 = vcombine.high %v6982_v9, %v6986_v40  ;;  %v7033_v4 = vld [vmem:[%s15954_s29 + $0x3f0] sm:$0xff]  ;;  %v7030_v5 = vld [vmem:[%s15954_s29 + $0x3d8] sm:$0xff] }
 0x65e   : > { %10519 = vmatprep.subr.bf16.mxu1 %v13728_v45  ;;  %v6989_v45 = vld [vmem:[%s15954_s29 + $0x290] sm:$0xff] }
 0x65f   : > { %v13781_v11 = vcombine.low %v6989_v45, %v6993_v52 }
 0x660   : > { %10356 = vmatpush1.bf16.msra.mxu0 %v13725_v60  ;;  %v13775_v60 = vcombine.low %v6982_v9, %v6986_v40  ;;  %v7034_v9 = vld [vmem:[%s15954_s29 + $0x3f8] sm:$0xff] }
 0x661   : > { %10520 = vmatpush1.bf16.msra.mxu1 %v13727_v6  ;;  %10357 = vmatprep.subr.bf16.mxu0 %v13734_v12  ;;  %v13782_v6 = vcombine.high %v6989_v45, %v6993_v52  ;;  %v13784_v12 = vcombine.high %v6990_v63, %v6994_v39  ;;  %v7041_v45 = vld [vmem:[%s15954_s29 + $0x430] sm:$0xff]  ;;  %v7038_v52 = vld [vmem:[%s15954_s29 + $0x418] sm:$0xff] }
 0x662   : > { %10521 = vmatprep.subr.bf16.mxu1 %v13736_v1  ;;  %v6997_v1 = vld [vmem:[%s15954_s29 + $0x2d0] sm:$0xff] }
 0x663   : > { %v13789_v0 = vcombine.low %v6997_v1, %v7001_v10 }
 0x664   : > { %10358 = vmatpush1.bf16.msra.mxu0 %v13733_v17  ;;  %v13783_v17 = vcombine.low %v6990_v63, %v6994_v39  ;;  %v7042_v63 = vld [vmem:[%s15954_s29 + $0x438] sm:$0xff] }
 0x665   : > { %10522 = vmatpush1.bf16.msra.mxu1 %v13735_v18  ;;  %10359 = vmatprep.subr.bf16.mxu0 %v13742_v56  ;;  %v13790_v18 = vcombine.high %v6997_v1, %v7001_v10  ;;  %v13792_v56 = vcombine.high %v6998_v46, %v7002_v50  ;;  %v7049_v1 = vld [vmem:[%s15954_s29 + $0x470] sm:$0xff] }
 0x666   : > { %10523 = vmatprep.subr.bf16.mxu1 %v13744_v38  ;;  %v7005_v38 = vld [vmem:[%s15954_s29 + $0x310] sm:$0xff] }
 0x667   : > { %v13797_v34 = vcombine.low %v7005_v38, %v7009_v22 }
 0x668   : > { %10360 = vmatpush1.bf16.msra.mxu0 %v13741_v41  ;;  %v13791_v41 = vcombine.low %v6998_v46, %v7002_v50  ;;  %v7046_v46 = vld [vmem:[%s15954_s29 + $0x458] sm:$0xff] }
 0x669   : > { %10524 = vmatpush1.bf16.msra.mxu1 %v13743_v20  ;;  %10361 = vmatprep.subr.bf16.mxu0 %v13750_v59  ;;  %v13798_v20 = vcombine.high %v7005_v38, %v7009_v22  ;;  %v13800_v59 = vcombine.high %v7006_v62, %v7010_v54  ;;  %v7050_v50 = vld [vmem:[%s15954_s29 + $0x478] sm:$0xff] }
 0x66a   : > { %10525 = vmatprep.subr.bf16.mxu1 %v13752_v2  ;;  %v7013_v2 = vld [vmem:[%s15954_s29 + $0x350] sm:$0xff]  ;;  %v13840_v38 = vcombine.high %v7046_v46, %v7050_v50  ;;  %v7054_v22 = vld [vmem:[%s15954_s29 + $0x498] sm:$0xff] }
 0x66b   : > { %v13805_v28 = vcombine.low %v7013_v2, %v7017_v43 }
 0x66c   : > { %10362 = vmatpush1.bf16.msra.mxu0 %v13749_v25  ;;  %v13799_v25 = vcombine.low %v7006_v62, %v7010_v54  ;;  %v7058_v62 = vld [vmem:[%s15954_s29 + $0x4b8] sm:$0xff] }
 0x66d   : > { %10526 = vmatpush1.bf16.msra.mxu1 %v13751_v21  ;;  %10363 = vmatprep.subr.bf16.mxu0 %v13758_v35  ;;  %v13806_v21 = vcombine.high %v7013_v2, %v7017_v43  ;;  %v13808_v35 = vcombine.high %v7014_v23, %v7018_v3  ;;  %v7065_v2 = vld [vmem:[%s15954_s29 + $0x4f0] sm:$0xff]  ;;  %v7062_v43 = vld [vmem:[%s15954_s29 + $0x4d8] sm:$0xff] }
 0x66e   : > { %10527 = vmatprep.subr.bf16.mxu1 %v13760_v31  ;;  %v7021_v31 = vld [vmem:[%s15954_s29 + $0x390] sm:$0xff] }
 0x66f   : > { %v13813_v40 = vcombine.low %v7021_v31, %v7025_v53 }
 0x670   : > { %10364 = vmatpush1.bf16.msra.mxu0 %v13757_v30  ;;  %v13807_v30 = vcombine.low %v7014_v23, %v7018_v3  ;;  %v13847_v3 = vcombine.low %v7054_v22, %v7058_v62 }
 0x671   : > { %10528 = vmatpush1.bf16.msra.mxu1 %v13759_v29  ;;  %10365 = vmatprep.subr.bf16.mxu0 %v13766_v58  ;;  %v13814_v29 = vcombine.high %v7021_v31, %v7025_v53  ;;  %v13816_v58 = vcombine.high %v7022_v55, %v7026_v61  ;;  %v7074_v31 = vld [vmem:[%s15954_s29 + $0x538] sm:$0xff] }
 0x672   : > { %10529 = vmatprep.subr.bf16.mxu1 %v13768_v7  ;;  %v7029_v7 = vld [vmem:[%s15954_s29 + $0x3d0] sm:$0xff] }
 0x673   : > { %v13821_v39 = vcombine.low %v7029_v7, %v7033_v4 }
 0x674   : > { %10366 = vmatpush1.bf16.msra.mxu0 %v13765_v42  ;;  %v13815_v42 = vcombine.low %v7022_v55, %v7026_v61 }
 0x675   : > { %10530 = vmatpush1.bf16.msra.mxu1 %v13767_v36  ;;  %10367 = vmatprep.subr.bf16.mxu0 %v13774_v24  ;;  %v13822_v36 = vcombine.high %v7029_v7, %v7033_v4  ;;  %v13824_v24 = vcombine.high %v7030_v5, %v7034_v9  ;;  %v7082_v7 = vld [vmem:[%s15954_s29 + $0x578] sm:$0xff] }
 0x676   : > { %10531 = vmatprep.subr.bf16.mxu1 %v13776_v32  ;;  %v7037_v32 = vld [vmem:[%s15954_s29 + $0x410] sm:$0xff] }
 0x677   : > { %v13829_v10 = vcombine.low %v7037_v32, %v7041_v45 }
 0x678   : > { %10368 = vmatpush1.bf16.msra.mxu0 %v13773_v33  ;;  %v13823_v33 = vcombine.low %v7030_v5, %v7034_v9 }
 0x679   : > { %10532 = vmatpush1.bf16.msra.mxu1 %v13775_v60  ;;  %10369 = vmatprep.subr.bf16.mxu0 %v13782_v6  ;;  %v13830_v60 = vcombine.high %v7037_v32, %v7041_v45  ;;  %v13832_v6 = vcombine.high %v7038_v52, %v7042_v63  ;;  %v7090_v32 = vld [vmem:[%s15954_s29 + $0x5b8] sm:$0xff] }
 0x67a   : > { %10533 = vmatprep.subr.bf16.mxu1 %v13784_v12  ;;  %v7045_v12 = vld [vmem:[%s15954_s29 + $0x450] sm:$0xff] }
 0x67b   : > { %v13837_v54 = vcombine.low %v7045_v12, %v7049_v1 }
 0x67c   : > { %10370 = vmatpush1.bf16.msra.mxu0 %v13781_v11  ;;  %v13831_v11 = vcombine.low %v7038_v52, %v7042_v63 }
 0x67d   : > { %10534 = vmatpush1.bf16.msra.mxu1 %v13783_v17  ;;  %10371 = vmatprep.subr.bf16.mxu0 %v13790_v18  ;;  %v13838_v17 = vcombine.high %v7045_v12, %v7049_v1  ;;  %v7053_v18 = vld [vmem:[%s15954_s29 + $0x490] sm:$0xff]  ;;  %v7098_v12 = vld [vmem:[%s15954_s29 + $0x5f8] sm:$0xff] }
 0x67e   : > { %10535 = vmatprep.subr.bf16.mxu1 %v13792_v56  ;;  %v7057_v56 = vld [vmem:[%s15954_s29 + $0x4b0] sm:$0xff] }
 0x67f   : > { %v13845_v23 = vcombine.low %v7053_v18, %v7057_v56 }
 0x680   : > { %10372 = vmatpush1.bf16.msra.mxu0 %v13789_v0  ;;  %v13839_v0 = vcombine.low %v7046_v46, %v7050_v50 }
 0x681   : > { %10536 = vmatpush1.bf16.msra.mxu1 %v13791_v41  ;;  %10373 = vmatprep.subr.bf16.mxu0 %v13798_v20  ;;  %v13846_v41 = vcombine.high %v7053_v18, %v7057_v56  ;;  %v13848_v20 = vcombine.high %v7054_v22, %v7058_v62  ;;  %v7102_v18 = vld [vmem:[%s15954_s29 + $0x618] sm:$0xff] }
 0x682   : > { %10537 = vmatprep.subr.bf16.mxu1 %v13800_v59  ;;  %v7061_v59 = vld [vmem:[%s15954_s29 + $0x4d0] sm:$0xff]  ;;  %v7106_v56 = vld [vmem:[%s15954_s29 + $0x638] sm:$0xff] }
 0x683   : > { %v13853_v53 = vcombine.low %v7061_v59, %v7065_v2 }
 0x684   : > { %10374 = vmatpush1.bf16.msra.mxu0 %v13797_v34  ;;  %v13854_v34 = vcombine.high %v7061_v59, %v7065_v2  ;;  %v7114_v59 = vld [vmem:[%s15954_s29 + $0x678] sm:$0xff] }
 0x685   : > { %10538 = vmatpush1.bf16.msra.mxu1 %v13799_v25  ;;  %10375 = vmatprep.subr.bf16.mxu0 %v13806_v21  ;;  %v7069_v25 = vld [vmem:[%s15954_s29 + $0x510] sm:$0xff] }
 0x686   : > { %10539 = vmatprep.subr.bf16.mxu1 %v13808_v35  ;;  %v7073_v21 = vld [vmem:[%s15954_s29 + $0x530] sm:$0xff]  ;;  %v7070_v35 = vld [vmem:[%s15954_s29 + $0x518] sm:$0xff] }
 0x687   : > { %v13862_v61 = vcombine.high %v7069_v25, %v7073_v21  ;;  %v13861_v4 = vcombine.low %v7069_v25, %v7073_v21  ;;  %v13863_v5 = vcombine.low %v7070_v35, %v7074_v31  ;;  %v7122_v25 = vld [vmem:[%s15954_s29 + $0x6b8] sm:$0xff] }
 0x688   : > { %10376 = vmatpush1.bf16.msra.mxu0 %v13805_v28  ;;  %v13864_v28 = vcombine.high %v7070_v35, %v7074_v31 }
 0x689   : > { %10540 = vmatpush1.bf16.msra.mxu1 %v13807_v30  ;;  %10377 = vmatprep.subr.bf16.mxu0 %v13814_v29  ;;  %v7077_v30 = vld [vmem:[%s15954_s29 + $0x550] sm:$0xff] }
 0x68a   : > { %10541 = vmatprep.subr.bf16.mxu1 %v13816_v58  ;;  %v7081_v29 = vld [vmem:[%s15954_s29 + $0x570] sm:$0xff]  ;;  %v7078_v58 = vld [vmem:[%s15954_s29 + $0x558] sm:$0xff] }
 0x68b   : > { %v13870_v9 = vcombine.high %v7077_v30, %v7081_v29  ;;  %v13869_v45 = vcombine.low %v7077_v30, %v7081_v29  ;;  %v13871_v52 = vcombine.low %v7078_v58, %v7082_v7  ;;  %v7130_v30 = vld [vmem:[%s15954_s29 + $0x6f8] sm:$0xff] }
 0x68c   : > { %10378 = vmatpush1.bf16.msra.mxu0 %v13813_v40  ;;  %v13872_v40 = vcombine.high %v7078_v58, %v7082_v7 }
 0x68d   : > { %10542 = vmatpush1.bf16.msra.mxu1 %v13815_v42  ;;  %10379 = vmatprep.subr.bf16.mxu0 %v13822_v36  ;;  %v7085_v42 = vld [vmem:[%s15954_s29 + $0x590] sm:$0xff] }
 0x68e   : > { %10543 = vmatprep.subr.bf16.mxu1 %v13824_v24  ;;  %v7089_v36 = vld [vmem:[%s15954_s29 + $0x5b0] sm:$0xff]  ;;  %v7086_v24 = vld [vmem:[%s15954_s29 + $0x598] sm:$0xff] }
 0x68f   : > { %v13878_v63 = vcombine.high %v7085_v42, %v7089_v36  ;;  %v13877_v1 = vcombine.low %v7085_v42, %v7089_v36  ;;  %v7138_v42 = vld [vmem:[%s15954_s29 + $0x738] sm:$0xff] }
 0x690   : > { %10380 = vmatpush1.bf16.msra.mxu0 %v13821_v39  ;;  %v13880_v39 = vcombine.high %v7086_v24, %v7090_v32 }
 0x691   : > { %10544 = vmatpush1.bf16.msra.mxu1 %v13823_v33  ;;  %10390 = vmatprep.subr.bf16.mxu0 %v13830_v60  ;;  %v7093_v33 = vld [vmem:[%s15954_s29 + $0x5d0] sm:$0xff] }
 0x692   : > { %10554 = vmatprep.subr.bf16.mxu1 %v13832_v6  ;;  %v7097_v60 = vld [vmem:[%s15954_s29 + $0x5f0] sm:$0xff]  ;;  %v7094_v6 = vld [vmem:[%s15954_s29 + $0x5d8] sm:$0xff] }
 0x693   : > { %10382 = vmatmul.mubr.bf16.vlgmr.msra.gmra.mrb[28].mxu0 %v17111_v49  ;;  %v13886_v46 = vcombine.high %v7093_v33, %v7097_v60  ;;  %v13888_v50 = vcombine.high %v7094_v6, %v7098_v12  ;;  %v13887_v22 = vcombine.low %v7094_v6, %v7098_v12 }
 0x694   : > { %10546 = vmatmul.mubr.bf16.vlgmr.msra.gmra.mrb[28].mxu1 %v17111_v49  ;;  %10391 = vmatpush1.bf16.msra.mxu0 %v13829_v10  ;;  %v7066_v49 = vld [vmem:[%s15954_s29 + $0x4f8] sm:$0xff]  ;;  %v13879_v10 = vcombine.low %v7086_v24, %v7090_v32 }
 0x695   : > { %10422 = vmatprep.mubr.bf16.mxu0 %v17115_v51  ;;  %10555 = vmatpush1.bf16.msra.mxu1 %v13831_v11  ;;  %v13855_v55 = vcombine.low %v7062_v43, %v7066_v49  ;;  %v7101_v11 = vld [vmem:[%s15954_s29 + $0x610] sm:$0xff] }
 0x696   : > { %10586 = vmatprep.mubr.bf16.mxu1 %v17115_v51  ;;  %10392 = vmatprep.subr.bf16.mxu0 %v13838_v17  ;;  %v13856_v51 = vcombine.high %v7062_v43, %v7066_v49  ;;  %v7105_v17 = vld [vmem:[%s15954_s29 + $0x630] sm:$0xff]  ;;  %v13895_v43 = vcombine.low %v7102_v18, %v7106_v56 }
 0x697   : > { %10556 = vmatprep.subr.bf16.mxu1 %v13840_v38  ;;  %v13885_v38 = vcombine.low %v7093_v33, %v7097_v60  ;;  %v13894_v62 = vcombine.high %v7101_v11, %v7105_v17  ;;  %v13893_v2 = vcombine.low %v7101_v11, %v7105_v17  ;;  %v7146_v33 = vld [vmem:[%s15954_s29 + $0x778] sm:$0xff] }
 0x698   : > { %10393 = vmatpush1.bf16.msra.mxu0 %v13837_v54  ;;  %v13896_v54 = vcombine.high %v7102_v18, %v7106_v56  ;;  %v7154_v11 = vld [vmem:[%s15954_s29 + $0x7b8] sm:$0xff] }
 0x699   : > { %10557 = vmatpush1.bf16.msra.mxu1 %v13839_v0  ;;  %10394 = vmatprep.subr.bf16.mxu0 %v13846_v41  ;;  %v7109_v0 = vld [vmem:[%s15954_s29 + $0x650] sm:$0xff] }
 0x69a   : > { %10558 = vmatprep.subr.bf16.mxu1 %v13848_v20  ;;  %v7113_v41 = vld [vmem:[%s15954_s29 + $0x670] sm:$0xff]  ;;  %v7110_v20 = vld [vmem:[%s15954_s29 + $0x658] sm:$0xff] }
 0x69b   : > { %v13902_v49 = vcombine.high %v7109_v0, %v7113_v41  ;;  %v13901_v21 = vcombine.low %v7109_v0, %v7113_v41  ;;  %v13903_v35 = vcombine.low %v7110_v20, %v7114_v59  ;;  %v7162_v0 = vld [vmem:[%s15954_s29 + $0x7f8] sm:$0xff] }
 0x69c   : > { %10395 = vmatpush1.bf16.msra.mxu0 %v13845_v23  ;;  %v13904_v23 = vcombine.high %v7110_v20, %v7114_v59 }
 0x69d   : > { %10559 = vmatpush1.bf16.msra.mxu1 %v13847_v3  ;;  %10396 = vmatprep.subr.bf16.mxu0 %v13854_v34  ;;  %v7117_v3 = vld [vmem:[%s15954_s29 + $0x690] sm:$0xff] }
 0x69e   : > { %10560 = vmatprep.subr.bf16.mxu1 %v13856_v51  ;;  %v7121_v34 = vld [vmem:[%s15954_s29 + $0x6b0] sm:$0xff]  ;;  %v7118_v51 = vld [vmem:[%s15954_s29 + $0x698] sm:$0xff] }
 0x69f   : > { %v13910_v31 = vcombine.high %v7117_v3, %v7121_v34  ;;  %v13909_v29 = vcombine.low %v7117_v3, %v7121_v34  ;;  %v13911_v58 = vcombine.low %v7118_v51, %v7122_v25  ;;  %v7170_v3 = vld [vmem:[%s15954_s29 + $0x838] sm:$0xff] }
 0x6a0   : > { %10397 = vmatpush1.bf16.msra.mxu0 %v13853_v53  ;;  %v13912_v53 = vcombine.high %v7118_v51, %v7122_v25 }
 0x6a1   : > { %10561 = vmatpush1.bf16.msra.mxu1 %v13855_v55  ;;  %10398 = vmatprep.subr.bf16.mxu0 %v13862_v61  ;;  %v7125_v55 = vld [vmem:[%s15954_s29 + $0x6d0] sm:$0xff] }
 0x6a2   : > { %10562 = vmatprep.subr.bf16.mxu1 %v13864_v28  ;;  %v7129_v61 = vld [vmem:[%s15954_s29 + $0x6f0] sm:$0xff]  ;;  %v7126_v28 = vld [vmem:[%s15954_s29 + $0x6d8] sm:$0xff] }
 0x6a3   : > { %v13918_v7 = vcombine.high %v7125_v55, %v7129_v61  ;;  %v13917_v36 = vcombine.low %v7125_v55, %v7129_v61  ;;  %v13919_v24 = vcombine.low %v7126_v28, %v7130_v30  ;;  %v7174_v55 = vld [vmem:[%s15954_s29 + $0x858] sm:$0xff] }
 0x6a4   : > { %10399 = vmatpush1.bf16.msra.mxu0 %v13861_v4  ;;  %v13920_v4 = vcombine.high %v7126_v28, %v7130_v30  ;;  %v7178_v61 = vld [vmem:[%s15954_s29 + $0x878] sm:$0xff] }
 0x6a5   : > { %10563 = vmatpush1.bf16.msra.mxu1 %v13863_v5  ;;  %10400 = vmatprep.subr.bf16.mxu0 %v13870_v9  ;;  %v7133_v5 = vld [vmem:[%s15954_s29 + $0x710] sm:$0xff] }
 0x6a6   : > { %10564 = vmatprep.subr.bf16.mxu1 %v13872_v40  ;;  %v7137_v9 = vld [vmem:[%s15954_s29 + $0x730] sm:$0xff]  ;;  %v7134_v40 = vld [vmem:[%s15954_s29 + $0x718] sm:$0xff] }
 0x6a7   : > { %v13926_v32 = vcombine.high %v7133_v5, %v7137_v9  ;;  %v13925_v60 = vcombine.low %v7133_v5, %v7137_v9  ;;  %v13927_v6 = vcombine.low %v7134_v40, %v7138_v42  ;;  %v7186_v5 = vld [vmem:[%s15954_s29 + $0x8b8] sm:$0xff] }
 0x6a8   : > { %10401 = vmatpush1.bf16.msra.mxu0 %v13869_v45  ;;  %v13928_v45 = vcombine.high %v7134_v40, %v7138_v42  ;;  %v13967_v40 = vcombine.low %v7174_v55, %v7178_v61 }
 0x6a9   : > { %10565 = vmatpush1.bf16.msra.mxu1 %v13871_v52  ;;  %10402 = vmatprep.subr.bf16.mxu0 %v13878_v63  ;;  %v7141_v52 = vld [vmem:[%s15954_s29 + $0x750] sm:$0xff] }
 0x6aa   : > { %10566 = vmatprep.subr.bf16.mxu1 %v13880_v39  ;;  %v7145_v63 = vld [vmem:[%s15954_s29 + $0x770] sm:$0xff]  ;;  %v7142_v39 = vld [vmem:[%s15954_s29 + $0x758] sm:$0xff] }
 0x6ab   : > { %v13934_v12 = vcombine.high %v7141_v52, %v7145_v63  ;;  %v13933_v17 = vcombine.low %v7141_v52, %v7145_v63  ;;  %v13935_v18 = vcombine.low %v7142_v39, %v7146_v33 }
 0x6ac   : > { %10403 = vmatpush1.bf16.msra.mxu0 %v13877_v1  ;;  %v13936_v1 = vcombine.high %v7142_v39, %v7146_v33  ;;  %v7197_v33 = vld [vmem:[%s15954_s29 + $0x910] sm:$0xff] }
 0x6ad   : > { %10567 = vmatpush1.bf16.msra.mxu1 %v13879_v10  ;;  %10404 = vmatprep.subr.bf16.mxu0 %v13886_v46  ;;  %v7149_v10 = vld [vmem:[%s15954_s29 + $0x790] sm:$0xff] }
 0x6ae   : > { %10568 = vmatprep.subr.bf16.mxu1 %v13888_v50  ;;  %v7153_v46 = vld [vmem:[%s15954_s29 + $0x7b0] sm:$0xff]  ;;  %v7150_v50 = vld [vmem:[%s15954_s29 + $0x798] sm:$0xff] }
 0x6af   : > { %v13942_v56 = vcombine.high %v7149_v10, %v7153_v46  ;;  %v13941_v41 = vcombine.low %v7149_v10, %v7153_v46  ;;  %v13943_v20 = vcombine.low %v7150_v50, %v7154_v11 }
 0x6b0   : > { %10405 = vmatpush1.bf16.msra.mxu0 %v13885_v38  ;;  %v13944_v38 = vcombine.high %v7150_v50, %v7154_v11  ;;  %v7205_v11 = vld [vmem:[%s15954_s29 + $0x950] sm:$0xff] }
 0x6b1   : > { %10569 = vmatpush1.bf16.msra.mxu1 %v13887_v22  ;;  %10406 = vmatprep.subr.bf16.mxu0 %v13894_v62  ;;  %v7157_v22 = vld [vmem:[%s15954_s29 + $0x7d0] sm:$0xff] }
 0x6b2   : > { %10570 = vmatprep.subr.bf16.mxu1 %v13896_v54  ;;  %v7161_v62 = vld [vmem:[%s15954_s29 + $0x7f0] sm:$0xff]  ;;  %v7158_v54 = vld [vmem:[%s15954_s29 + $0x7d8] sm:$0xff] }
 0x6b3   : > { %v13950_v59 = vcombine.high %v7157_v22, %v7161_v62  ;;  %v13949_v34 = vcombine.low %v7157_v22, %v7161_v62  ;;  %v13951_v51 = vcombine.low %v7158_v54, %v7162_v0 }
 0x6b4   : > { %10407 = vmatpush1.bf16.msra.mxu0 %v13893_v2  ;;  %v13952_v2 = vcombine.high %v7158_v54, %v7162_v0  ;;  %v7213_v0 = vld [vmem:[%s15954_s29 + $0x990] sm:$0xff] }
 0x6b5   : > { %10571 = vmatpush1.bf16.msra.mxu1 %v13895_v43  ;;  %10408 = vmatprep.subr.bf16.mxu0 %v13902_v49  ;;  %v7165_v43 = vld [vmem:[%s15954_s29 + $0x810] sm:$0xff] }
 0x6b6   : > { %10572 = vmatprep.subr.bf16.mxu1 %v13904_v23  ;;  %v7169_v49 = vld [vmem:[%s15954_s29 + $0x830] sm:$0xff]  ;;  %v7166_v23 = vld [vmem:[%s15954_s29 + $0x818] sm:$0xff] }
 0x6b7   : > { %v13958_v25 = vcombine.high %v7165_v43, %v7169_v49  ;;  %v13959_v28 = vcombine.low %v7166_v23, %v7170_v3 }
 0x6b8   : > { %10409 = vmatpush1.bf16.msra.mxu0 %v13901_v21  ;;  %v13960_v21 = vcombine.high %v7166_v23, %v7170_v3  ;;  %v7221_v3 = vld [vmem:[%s15954_s29 + $0x9d0] sm:$0xff] }
 0x6b9   : > { %10573 = vmatpush1.bf16.msra.mxu1 %v13903_v35  ;;  %10410 = vmatprep.subr.bf16.mxu0 %v13910_v31  ;;  %v7173_v35 = vld [vmem:[%s15954_s29 + $0x850] sm:$0xff] }
 0x6ba   : > { %10574 = vmatprep.subr.bf16.mxu1 %v13912_v53  ;;  %v7177_v31 = vld [vmem:[%s15954_s29 + $0x870] sm:$0xff]  ;;  %v13957_v53 = vcombine.low %v7165_v43, %v7169_v49 }
 0x6bb   : > { %v13966_v30 = vcombine.high %v7173_v35, %v7177_v31  ;;  %v13965_v9 = vcombine.low %v7173_v35, %v7177_v31 }
 0x6bc   : > { %10411 = vmatpush1.bf16.msra.mxu0 %v13909_v29  ;;  %v7181_v29 = vld [vmem:[%s15954_s29 + $0x890] sm:$0xff] }
 0x6bd   : > { %10575 = vmatpush1.bf16.msra.mxu1 %v13911_v58  ;;  %10412 = vmatprep.subr.bf16.mxu0 %v13918_v7  ;;  %v7185_v58 = vld [vmem:[%s15954_s29 + $0x8b0] sm:$0xff]  ;;  %v13968_v7 = vcombine.high %v7174_v55, %v7178_v61 }
 0x6be   : > { %10576 = vmatprep.subr.bf16.mxu1 %v13920_v4  ;;  %v7182_v4 = vld [vmem:[%s15954_s29 + $0x898] sm:$0xff]  ;;  %v13974_v42 = vcombine.high %v7181_v29, %v7185_v58  ;;  %v13973_v52 = vcombine.low %v7181_v29, %v7185_v58  ;;  %v7229_v55 = vld [vmem:[%s15954_s29 + $0xa10] sm:$0xff] }
 0x6bf   : > { %v13975_v63 = vcombine.low %v7182_v4, %v7186_v5  ;;  %v7233_v61 = vld [vmem:[%s15954_s29 + $0xa30] sm:$0xff] }
 0x6c0   : > { %10413 = vmatpush1.bf16.msra.mxu0 %v13917_v36  ;;  %v13976_v36 = vcombine.high %v7182_v4, %v7186_v5  ;;  %v7237_v5 = vld [vmem:[%s15954_s29 + $0xa50] sm:$0xff] }
 0x6c1   : > { %10577 = vmatpush1.bf16.msra.mxu1 %v13919_v24  ;;  %10414 = vmatprep.subr.bf16.mxu0 %v13926_v32  ;;  %v7189_v24 = vld [vmem:[%s15954_s29 + $0x8d0] sm:$0xff] }
 0x6c2   : > { %10578 = vmatprep.subr.bf16.mxu1 %v13928_v45  ;;  %v7193_v32 = vld [vmem:[%s15954_s29 + $0x8f0] sm:$0xff]  ;;  %v7190_v45 = vld [vmem:[%s15954_s29 + $0x8d8] sm:$0xff] }
 0x6c3   : > { %v13982_v39 = vcombine.high %v7189_v24, %v7193_v32 }
 0x6c4   : > { %10415 = vmatpush1.bf16.msra.mxu0 %v13925_v60  ;;  %v7201_v60 = vld [vmem:[%s15954_s29 + $0x930] sm:$0xff] }
 0x6c5   : > { %10579 = vmatpush1.bf16.msra.mxu1 %v13927_v6  ;;  %10416 = vmatprep.subr.bf16.mxu0 %v13934_v12  ;;  %v7198_v6 = vld [vmem:[%s15954_s29 + $0x918] sm:$0xff]  ;;  %v13990_v46 = vcombine.high %v7197_v33, %v7201_v60 }
 0x6c6   : > { %10580 = vmatprep.subr.bf16.mxu1 %v13936_v1  ;;  %v7202_v12 = vld [vmem:[%s15954_s29 + $0x938] sm:$0xff]  ;;  %v13981_v1 = vcombine.low %v7189_v24, %v7193_v32 }
 0x6c7   : > { %v13992_v50 = vcombine.high %v7198_v6, %v7202_v12  ;;  %v13991_v22 = vcombine.low %v7198_v6, %v7202_v12  ;;  %v7253_v12 = vld [vmem:[%s15954_s29 + $0xad0] sm:$0xff] }
 0x6c8   : > { %10417 = vmatpush1.bf16.msra.mxu0 %v13933_v17  ;;  %v7209_v17 = vld [vmem:[%s15954_s29 + $0x970] sm:$0xff] }
 0x6c9   : > { %10581 = vmatpush1.bf16.msra.mxu1 %v13935_v18  ;;  %10418 = vmatprep.subr.bf16.mxu0 %v13942_v56  ;;  %v7206_v18 = vld [vmem:[%s15954_s29 + $0x958] sm:$0xff]  ;;  %v13998_v62 = vcombine.high %v7205_v11, %v7209_v17 }
 0x6ca   : > { %10582 = vmatprep.subr.bf16.mxu1 %v13944_v38  ;;  %v7210_v56 = vld [vmem:[%s15954_s29 + $0x978] sm:$0xff]  ;;  %v13989_v38 = vcombine.low %v7197_v33, %v7201_v60 }
 0x6cb   : > { %v14000_v54 = vcombine.high %v7206_v18, %v7210_v56  ;;  %v13999_v43 = vcombine.low %v7206_v18, %v7210_v56  ;;  %v7261_v56 = vld [vmem:[%s15954_s29 + $0xb10] sm:$0xff] }
 0x6cc   : > { %10419 = vmatpush1.bf16.msra.mxu0 %v13941_v41  ;;  %v7217_v41 = vld [vmem:[%s15954_s29 + $0x9b0] sm:$0xff] }
 0x6cd   : > { %10583 = vmatpush1.bf16.msra.mxu1 %v13943_v20  ;;  %10420 = vmatprep.subr.bf16.mxu0 %v13950_v59  ;;  %v7214_v20 = vld [vmem:[%s15954_s29 + $0x998] sm:$0xff]  ;;  %v14006_v49 = vcombine.high %v7213_v0, %v7217_v41 }
 0x6ce   : > { %10584 = vmatprep.subr.bf16.mxu1 %v13952_v2  ;;  %v7218_v59 = vld [vmem:[%s15954_s29 + $0x9b8] sm:$0xff]  ;;  %v13997_v2 = vcombine.low %v7205_v11, %v7209_v17 }
 0x6cf   : > { %v14008_v23 = vcombine.high %v7214_v20, %v7218_v59  ;;  %v14007_v35 = vcombine.low %v7214_v20, %v7218_v59  ;;  %v7269_v59 = vld [vmem:[%s15954_s29 + $0xb50] sm:$0xff] }
 0x6d0   : > { %10421 = vmatpush1.bf16.msra.mxu0 %v13949_v34  ;;  %v7225_v34 = vld [vmem:[%s15954_s29 + $0x9f0] sm:$0xff] }
 0x6d1   : > { %10585 = vmatpush1.bf16.msra.mxu1 %v13951_v51  ;;  %10431 = vmatprep.subr.bf16.mxu0 %v13958_v25  ;;  %v7222_v51 = vld [vmem:[%s15954_s29 + $0x9d8] sm:$0xff]  ;;  %v14014_v31 = vcombine.high %v7221_v3, %v7225_v34  ;;  %v14013_v29 = vcombine.low %v7221_v3, %v7225_v34 }
 0x6d2   : > { %10595 = vmatprep.subr.bf16.mxu1 %v13960_v21  ;;  %v7226_v25 = vld [vmem:[%s15954_s29 + $0x9f8] sm:$0xff]  ;;  %v14005_v21 = vcombine.low %v7213_v0, %v7217_v41 }
 0x6d3   : > { %10423 = vmatmul.mubr.bf16.vlgmr.msra.gmra.mrb[28].mxu0 %v17186_v48  ;;  %v14015_v58 = vcombine.low %v7222_v51, %v7226_v25 }
 0x6d4   : > { %10587 = vmatmul.mubr.bf16.vlgmr.msra.gmra.mrb[28].mxu1 %v17186_v48  ;;  %10432 = vmatpush1.bf16.msra.mxu0 %v13957_v53  ;;  %v7194_v48 = vld [vmem:[%s15954_s29 + $0x8f8] sm:$0xff]  ;;  %v14016_v53 = vcombine.high %v7222_v51, %v7226_v25  ;;  %v7277_v25 = vld [vmem:[%s15954_s29 + $0xb90] sm:$0xff] }
 0x6d5   : > { %10463 = vmatprep.mubr.bf16.mxu0 %v17266_v27  ;;  %10596 = vmatpush1.bf16.msra.mxu1 %v13959_v28  ;;  %v13983_v10 = vcombine.low %v7190_v45, %v7194_v48  ;;  %v7230_v28 = vld [vmem:[%s15954_s29 + $0xa18] sm:$0xff] }
 0x6d6   : > { %10627 = vmatprep.mubr.bf16.mxu1 %v17266_v27  ;;  %10433 = vmatprep.subr.bf16.mxu0 %v13966_v30  ;;  %v13984_v27 = vcombine.high %v7190_v45, %v7194_v48  ;;  %v7234_v30 = vld [vmem:[%s15954_s29 + $0xa38] sm:$0xff]  ;;  %v7245_v48 = vld [vmem:[%s15954_s29 + $0xa90] sm:$0xff] }
 0x6d7   : > { %10597 = vmatprep.subr.bf16.mxu1 %v13968_v7  ;;  %v14022_v7 = vcombine.high %v7229_v55, %v7233_v61  ;;  %v14024_v4 = vcombine.high %v7230_v28, %v7234_v30  ;;  %v14023_v24 = vcombine.low %v7230_v28, %v7234_v30  ;;  %v7285_v30 = vld [vmem:[%s15954_s29 + $0xbd0] sm:$0xff] }
 0x6d8   : > { %10434 = vmatpush1.bf16.msra.mxu0 %v13965_v9  ;;  %v7241_v9 = vld [vmem:[%s15954_s29 + $0xa70] sm:$0xff] }
 0x6d9   : > { %10598 = vmatpush1.bf16.msra.mxu1 %v13967_v40  ;;  %10435 = vmatprep.subr.bf16.mxu0 %v13974_v42  ;;  %v7238_v40 = vld [vmem:[%s15954_s29 + $0xa58] sm:$0xff]  ;;  %v14030_v32 = vcombine.high %v7237_v5, %v7241_v9 }
 0x6da   : > { %10599 = vmatprep.subr.bf16.mxu1 %v13976_v36  ;;  %v7242_v42 = vld [vmem:[%s15954_s29 + $0xa78] sm:$0xff]  ;;  %v14021_v36 = vcombine.low %v7229_v55, %v7233_v61 }
 0x6db   : > { %v14032_v45 = vcombine.high %v7238_v40, %v7242_v42  ;;  %v14031_v33 = vcombine.low %v7238_v40, %v7242_v42  ;;  %v7293_v42 = vld [vmem:[%s15954_s29 + $0xc10] sm:$0xff] }
 0x6dc   : > { %10436 = vmatpush1.bf16.msra.mxu0 %v13973_v52  ;;  %v7249_v52 = vld [vmem:[%s15954_s29 + $0xab0] sm:$0xff] }
 0x6dd   : > { %10600 = vmatpush1.bf16.msra.mxu1 %v13975_v63  ;;  %10437 = vmatprep.subr.bf16.mxu0 %v13982_v39  ;;  %v7246_v63 = vld [vmem:[%s15954_s29 + $0xa98] sm:$0xff]  ;;  %v14038_v60 = vcombine.high %v7245_v48, %v7249_v52 }
 0x6de   : > { %10601 = vmatprep.subr.bf16.mxu1 %v13984_v27  ;;  %v7250_v39 = vld [vmem:[%s15954_s29 + $0xab8] sm:$0xff]  ;;  %v14029_v27 = vcombine.low %v7237_v5, %v7241_v9 }
 0x6df   : > { %v14040_v6 = vcombine.high %v7246_v63, %v7250_v39  ;;  %v14039_v11 = vcombine.low %v7246_v63, %v7250_v39  ;;  %v7301_v39 = vld [vmem:[%s15954_s29 + $0xc50] sm:$0xff] }
 0x6e0   : > { %10438 = vmatpush1.bf16.msra.mxu0 %v13981_v1  ;;  %v7257_v1 = vld [vmem:[%s15954_s29 + $0xaf0] sm:$0xff] }
 0x6e1   : > { %10602 = vmatpush1.bf16.msra.mxu1 %v13983_v10  ;;  %10439 = vmatprep.subr.bf16.mxu0 %v13990_v46  ;;  %v7254_v10 = vld [vmem:[%s15954_s29 + $0xad8] sm:$0xff]  ;;  %v14046_v17 = vcombine.high %v7253_v12, %v7257_v1 }
 0x6e2   : > { %10603 = vmatprep.subr.bf16.mxu1 %v13992_v50  ;;  %v7258_v46 = vld [vmem:[%s15954_s29 + $0xaf8] sm:$0xff]  ;;  %v14037_v50 = vcombine.low %v7245_v48, %v7249_v52 }
 0x6e3   : > { %v14048_v18 = vcombine.high %v7254_v10, %v7258_v46  ;;  %v14047_v0 = vcombine.low %v7254_v10, %v7258_v46  ;;  %v7309_v10 = vld [vmem:[%s15954_s29 + $0xc90] sm:$0xff] }
 0x6e4   : > { %10440 = vmatpush1.bf16.msra.mxu0 %v13989_v38  ;;  %v7265_v38 = vld [vmem:[%s15954_s29 + $0xb30] sm:$0xff] }
 0x6e5   : > { %10604 = vmatpush1.bf16.msra.mxu1 %v13991_v22  ;;  %10441 = vmatprep.subr.bf16.mxu0 %v13998_v62  ;;  %v7262_v22 = vld [vmem:[%s15954_s29 + $0xb18] sm:$0xff]  ;;  %v14054_v41 = vcombine.high %v7261_v56, %v7265_v38  ;;  %v7313_v46 = vld [vmem:[%s15954_s29 + $0xcb0] sm:$0xff] }
 0x6e6   : > { %10605 = vmatprep.subr.bf16.mxu1 %v14000_v54  ;;  %v7266_v62 = vld [vmem:[%s15954_s29 + $0xb38] sm:$0xff]  ;;  %v14045_v54 = vcombine.low %v7253_v12, %v7257_v1 }
 0x6e7   : > { %v14056_v20 = vcombine.high %v7262_v22, %v7266_v62  ;;  %v14055_v3 = vcombine.low %v7262_v22, %v7266_v62  ;;  %v7317_v62 = vld [vmem:[%s15954_s29 + $0xcd0] sm:$0xff] }
 0x6e8   : > { %10442 = vmatpush1.bf16.msra.mxu0 %v13997_v2  ;;  %v7273_v2 = vld [vmem:[%s15954_s29 + $0xb70] sm:$0xff] }
 0x6e9   : > { %10606 = vmatpush1.bf16.msra.mxu1 %v13999_v43  ;;  %10443 = vmatprep.subr.bf16.mxu0 %v14006_v49  ;;  %v7270_v43 = vld [vmem:[%s15954_s29 + $0xb58] sm:$0xff]  ;;  %v14062_v34 = vcombine.high %v7269_v59, %v7273_v2 }
 0x6ea   : > { %10607 = vmatprep.subr.bf16.mxu1 %v14008_v23  ;;  %v7274_v49 = vld [vmem:[%s15954_s29 + $0xb78] sm:$0xff]  ;;  %v14053_v23 = vcombine.low %v7261_v56, %v7265_v38  ;;  %v14102_v38 = vcombine.high %v7309_v10, %v7313_v46 }
 0x6eb   : > { %v14064_v51 = vcombine.high %v7270_v43, %v7274_v49  ;;  %v14063_v55 = vcombine.low %v7270_v43, %v7274_v49  ;;  %v7329_v43 = vld [vmem:[%s15954_s29 + $0xd30] sm:$0xff]  ;;  %v7326_v49 = vld [vmem:[%s15954_s29 + $0xd18] sm:$0xff] }
 0x6ec   : > { %10444 = vmatpush1.bf16.msra.mxu0 %v14005_v21  ;;  %v7281_v21 = vld [vmem:[%s15954_s29 + $0xbb0] sm:$0xff] }
 0x6ed   : > { %10608 = vmatpush1.bf16.msra.mxu1 %v14007_v35  ;;  %10445 = vmatprep.subr.bf16.mxu0 %v14014_v31  ;;  %v7278_v35 = vld [vmem:[%s15954_s29 + $0xb98] sm:$0xff]  ;;  %v14070_v61 = vcombine.high %v7277_v25, %v7281_v21 }
 0x6ee   : > { %10609 = vmatprep.subr.bf16.mxu1 %v14016_v53  ;;  %v7282_v31 = vld [vmem:[%s15954_s29 + $0xbb8] sm:$0xff]  ;;  %v14061_v53 = vcombine.low %v7269_v59, %v7273_v2  ;;  %v7325_v2 = vld [vmem:[%s15954_s29 + $0xd10] sm:$0xff] }
 0x6ef   : > { %v14072_v28 = vcombine.high %v7278_v35, %v7282_v31  ;;  %v14071_v5 = vcombine.low %v7278_v35, %v7282_v31  ;;  %v7337_v35 = vld [vmem:[%s15954_s29 + $0xd70] sm:$0xff]  ;;  %v7334_v31 = vld [vmem:[%s15954_s29 + $0xd58] sm:$0xff] }
 0x6f0   : > { %10446 = vmatpush1.bf16.msra.mxu0 %v14013_v29  ;;  %v7289_v29 = vld [vmem:[%s15954_s29 + $0xbf0] sm:$0xff] }
 0x6f1   : > { %10610 = vmatpush1.bf16.msra.mxu1 %v14015_v58  ;;  %10447 = vmatprep.subr.bf16.mxu0 %v14022_v7  ;;  %v7286_v58 = vld [vmem:[%s15954_s29 + $0xbd8] sm:$0xff]  ;;  %v14078_v9 = vcombine.high %v7285_v30, %v7289_v29 }
 0x6f2   : > { %10611 = vmatprep.subr.bf16.mxu1 %v14024_v4  ;;  %v7290_v7 = vld [vmem:[%s15954_s29 + $0xbf8] sm:$0xff]  ;;  %v14069_v4 = vcombine.low %v7277_v25, %v7281_v21  ;;  %v7333_v21 = vld [vmem:[%s15954_s29 + $0xd50] sm:$0xff] }
 0x6f3   : > { %v14080_v40 = vcombine.high %v7286_v58, %v7290_v7  ;;  %v14079_v48 = vcombine.low %v7286_v58, %v7290_v7  ;;  %v7345_v58 = vld [vmem:[%s15954_s29 + $0xdb0] sm:$0xff]  ;;  %v7342_v7 = vld [vmem:[%s15954_s29 + $0xd98] sm:$0xff] }
 0x6f4   : > { %10448 = vmatpush1.bf16.msra.mxu0 %v14021_v36  ;;  %v7297_v36 = vld [vmem:[%s15954_s29 + $0xc30] sm:$0xff] }
 0x6f5   : > { %10612 = vmatpush1.bf16.msra.mxu1 %v14023_v24  ;;  %10449 = vmatprep.subr.bf16.mxu0 %v14030_v32  ;;  %v7294_v24 = vld [vmem:[%s15954_s29 + $0xc18] sm:$0xff]  ;;  %v14086_v52 = vcombine.high %v7293_v42, %v7297_v36 }
 0x6f6   : > { %10613 = vmatprep.subr.bf16.mxu1 %v14032_v45  ;;  %v7298_v32 = vld [vmem:[%s15954_s29 + $0xc38] sm:$0xff]  ;;  %v14077_v45 = vcombine.low %v7285_v30, %v7289_v29  ;;  %v7341_v29 = vld [vmem:[%s15954_s29 + $0xd90] sm:$0xff] }
 0x6f7   : > { %v14088_v63 = vcombine.high %v7294_v24, %v7298_v32  ;;  %v14087_v12 = vcombine.low %v7294_v24, %v7298_v32  ;;  %v7349_v32 = vld [vmem:[%s15954_s29 + $0xdd0] sm:$0xff] }
 0x6f8   : > { %10450 = vmatpush1.bf16.msra.mxu0 %v14029_v27  ;;  %v7305_v27 = vld [vmem:[%s15954_s29 + $0xc70] sm:$0xff] }
 0x6f9   : > { %10614 = vmatpush1.bf16.msra.mxu1 %v14031_v33  ;;  %10451 = vmatprep.subr.bf16.mxu0 %v14038_v60  ;;  %v14085_v33 = vcombine.low %v7293_v42, %v7297_v36  ;;  %v7302_v60 = vld [vmem:[%s15954_s29 + $0xc58] sm:$0xff]  ;;  %v14094_v1 = vcombine.high %v7301_v39, %v7305_v27 }
 0x6fa   : > { %10615 = vmatprep.subr.bf16.mxu1 %v14040_v6  ;;  %v7306_v6 = vld [vmem:[%s15954_s29 + $0xc78] sm:$0xff] }
 0x6fb   : > { %v14095_v56 = vcombine.low %v7302_v60, %v7306_v6 }
 0x6fc   : > { %10452 = vmatpush1.bf16.msra.mxu0 %v14037_v50  ;;  %v14096_v50 = vcombine.high %v7302_v60, %v7306_v6  ;;  %v14133_v60 = vcombine.low %v7341_v29, %v7345_v58 }
 0x6fd   : > { %10616 = vmatpush1.bf16.msra.mxu1 %v14039_v11  ;;  %10453 = vmatprep.subr.bf16.mxu0 %v14046_v17  ;;  %v7310_v11 = vld [vmem:[%s15954_s29 + $0xc98] sm:$0xff] }
 0x6fe   : > { %10617 = vmatprep.subr.bf16.mxu1 %v14048_v18  ;;  %v7314_v17 = vld [vmem:[%s15954_s29 + $0xcb8] sm:$0xff]  ;;  %v14093_v18 = vcombine.low %v7301_v39, %v7305_v27 }
 0x6ff   : > { %v14104_v22 = vcombine.high %v7310_v11, %v7314_v17  ;;  %v7354_v39 = vld [vmem:[%s15954_s29 + $0xdf8] sm:$0xff] }
 0x700   : > { %10454 = vmatpush1.bf16.msra.mxu0 %v14045_v54  ;;  %v7321_v54 = vld [vmem:[%s15954_s29 + $0xcf0] sm:$0xff] }
 0x701   : > { %10618 = vmatpush1.bf16.msra.mxu1 %v14047_v0  ;;  %10455 = vmatprep.subr.bf16.mxu0 %v14054_v41  ;;  %v7318_v0 = vld [vmem:[%s15954_s29 + $0xcd8] sm:$0xff]  ;;  %v14101_v41 = vcombine.low %v7309_v10, %v7313_v46  ;;  %v14110_v59 = vcombine.high %v7317_v62, %v7321_v54 }
 0x702   : > { %10619 = vmatprep.subr.bf16.mxu1 %v14056_v20  ;;  %v14103_v20 = vcombine.low %v7310_v11, %v7314_v17  ;;  %v7361_v11 = vld [vmem:[%s15954_s29 + $0xe30] sm:$0xff]  ;;  %v7358_v17 = vld [vmem:[%s15954_s29 + $0xe18] sm:$0xff] }
 0x704   : > { %10456 = vmatpush1.bf16.msra.mxu0 %v14053_v23  ;;  %v7330_v23 = vld [vmem:[%s15954_s29 + $0xd38] sm:$0xff] }
 0x705   : > { %10620 = vmatpush1.bf16.msra.mxu1 %v14055_v3  ;;  %10457 = vmatprep.subr.bf16.mxu0 %v14062_v34  ;;  %v14109_v3 = vcombine.low %v7317_v62, %v7321_v54  ;;  %v14120_v25 = vcombine.high %v7326_v49, %v7330_v23  ;;  %v7365_v54 = vld [vmem:[%s15954_s29 + $0xe50] sm:$0xff] }
 0x706   : > { %10621 = vmatprep.subr.bf16.mxu1 %v14064_v51  ;;  %v14118_v51 = vcombine.high %v7325_v2, %v7329_v43 }
 0x708   : > { %10458 = vmatpush1.bf16.msra.mxu0 %v14061_v53  ;;  %v7338_v53 = vld [vmem:[%s15954_s29 + $0xd78] sm:$0xff] }
 0x709   : > { %10622 = vmatpush1.bf16.msra.mxu1 %v14063_v55  ;;  %10459 = vmatprep.subr.bf16.mxu0 %v14070_v61  ;;  %v14117_v55 = vcombine.low %v7325_v2, %v7329_v43  ;;  %v14119_v61 = vcombine.low %v7326_v49, %v7330_v23  ;;  %v14128_v30 = vcombine.high %v7334_v31, %v7338_v53  ;;  %v7373_v43 = vld [vmem:[%s15954_s29 + $0xe90] sm:$0xff]  ;;  %v7374_v23 = vld [vmem:[%s15954_s29 + $0xe98] sm:$0xff] }
 0x70a   : > { %10623 = vmatprep.subr.bf16.mxu1 %v14072_v28  ;;  %v14126_v28 = vcombine.high %v7333_v21, %v7337_v35  ;;  %v7377_v49 = vld [vmem:[%s15954_s29 + $0xeb0] sm:$0xff] }
 0x70c   : > { %10460 = vmatpush1.bf16.msra.mxu0 %v14069_v4  ;;  %v7346_v4 = vld [vmem:[%s15954_s29 + $0xdb8] sm:$0xff] }
 0x70d   : > { %10624 = vmatpush1.bf16.msra.mxu1 %v14071_v5  ;;  %10461 = vmatprep.subr.bf16.mxu0 %v14078_v9  ;;  %v14125_v5 = vcombine.low %v7333_v21, %v7337_v35  ;;  %v14127_v9 = vcombine.low %v7334_v31, %v7338_v53  ;;  %v14136_v24 = vcombine.high %v7342_v7, %v7346_v4  ;;  %v7381_v35 = vld [vmem:[%s15954_s29 + $0xed0] sm:$0xff]  ;;  %v7382_v53 = vld [vmem:[%s15954_s29 + $0xed8] sm:$0xff] }
 0x70e   : > { %10625 = vmatprep.subr.bf16.mxu1 %v14080_v40  ;;  %v14134_v40 = vcombine.high %v7341_v29, %v7345_v58  ;;  %v7385_v31 = vld [vmem:[%s15954_s29 + $0xef0] sm:$0xff] }
 0x70f   : > { %v7389_v58 = vld [vmem:[%s15954_s29 + $0xf10] sm:$0xff] }
 0x710   : > { %10462 = vmatpush1.bf16.msra.mxu0 %v14077_v45  ;;  %v7353_v45 = vld [vmem:[%s15954_s29 + $0xdf0] sm:$0xff] }
 0x711   : > { %10626 = vmatpush1.bf16.msra.mxu1 %v14079_v48  ;;  %10472 = vmatprep.subr.bf16.mxu0 %v14086_v52  ;;  %v14142_v10 = vcombine.high %v7349_v32, %v7353_v45 }
 0x712   : > { %10636 = vmatprep.subr.bf16.mxu1 %v14088_v63  ;;  %v7350_v63 = vld [vmem:[%s15954_s29 + $0xdd8] sm:$0xff] }
 0x713   : > { %10464 = vmatmul.mubr.bf16.vlgmr.msra.gmra.mrb[28].mxu0 %v17268_v19  ;;  %v14144_v46 = vcombine.high %v7350_v63, %v7354_v39 }
 0x714   : > { %10628 = vmatmul.mubr.bf16.vlgmr.msra.gmra.mrb[28].mxu1 %v17268_v19  ;;  %10473 = vmatpush1.bf16.msra.mxu0 %v14085_v33  ;;  %v7322_v19 = vld [vmem:[%s15954_s29 + $0xcf8] sm:$0xff] }
 0x715   : > { %10504 = vmatprep.mubr.bf16.mxu0 %v17276_v37  ;;  %10637 = vmatpush1.bf16.msra.mxu1 %v14087_v12  ;;  %v14111_v34 = vcombine.low %v7318_v0, %v7322_v19 }
 0x716   : > { %10668 = vmatprep.mubr.bf16.mxu1 %v17276_v37  ;;  %10474 = vmatprep.subr.bf16.mxu0 %v14094_v1  ;;  %v14112_v37 = vcombine.high %v7318_v0, %v7322_v19  ;;  %v14135_v1 = vcombine.low %v7342_v7, %v7346_v4  ;;  %v7369_v0 = vld [vmem:[%s15954_s29 + $0xe70] sm:$0xff]  ;;  %v7366_v19 = vld [vmem:[%s15954_s29 + $0xe58] sm:$0xff] }
 0x717   : > { %10638 = vmatprep.subr.bf16.mxu1 %v14096_v50  ;;  %v7357_v50 = vld [vmem:[%s15954_s29 + $0xe10] sm:$0xff]  ;;  %v7390_v4 = vld [vmem:[%s15954_s29 + $0xf18] sm:$0xff] }
 0x718   : > { %10475 = vmatpush1.bf16.msra.mxu0 %v14093_v18  ;;  %v7362_v18 = vld [vmem:[%s15954_s29 + $0xe38] sm:$0xff]  ;;  %v7393_v7 = vld [vmem:[%s15954_s29 + $0xf30] sm:$0xff] }
 0x719   : > { %10639 = vmatpush1.bf16.msra.mxu1 %v14095_v56  ;;  %10476 = vmatprep.subr.bf16.mxu0 %v14102_v38  ;;  %v14141_v56 = vcombine.low %v7349_v32, %v7353_v45  ;;  %v14143_v38 = vcombine.low %v7350_v63, %v7354_v39  ;;  %v14152_v62 = vcombine.high %v7358_v17, %v7362_v18  ;;  %v7397_v45 = vld [vmem:[%s15954_s29 + $0xf50] sm:$0xff]  ;;  %v7398_v39 = vld [vmem:[%s15954_s29 + $0xf58] sm:$0xff] }
 0x71a   : > { %10640 = vmatprep.subr.bf16.mxu1 %v14104_v22  ;;  %v14150_v22 = vcombine.high %v7357_v50, %v7361_v11  ;;  %v7401_v63 = vld [vmem:[%s15954_s29 + $0xf70] sm:$0xff] }
 0x71c   : > { %10477 = vmatpush1.bf16.msra.mxu0 %v14101_v41  ;;  %v7370_v41 = vld [vmem:[%s15954_s29 + $0xe78] sm:$0xff] }
 0x71d   : > { %10641 = vmatpush1.bf16.msra.mxu1 %v14103_v20  ;;  %10478 = vmatprep.subr.bf16.mxu0 %v14110_v59  ;;  %v14149_v20 = vcombine.low %v7357_v50, %v7361_v11  ;;  %v14151_v59 = vcombine.low %v7358_v17, %v7362_v18  ;;  %v14160_v2 = vcombine.high %v7366_v19, %v7370_v41  ;;  %v7410_v50 = vld [vmem:[%s15954_s29 + $0xfb8] sm:$0xff]  ;;  %v17617_v11 = vld [vmem:[%s601_s13] sm:$0xff] }
 0x71e   : > { %10642 = vmatprep.subr.bf16.mxu1 %v14112_v37  ;;  %v14158_v37 = vcombine.high %v7365_v54, %v7369_v0  ;;  %v14189_v17 = vcombine.low %v7397_v45, %v7401_v63 }
 0x720   : > { %10479 = vmatpush1.bf16.msra.mxu0 %v14109_v3  ;;  %v7378_v3 = vld [vmem:[%s15954_s29 + $0xeb8] sm:$0xff] }
 0x721   : > { %10643 = vmatpush1.bf16.msra.mxu1 %v14111_v34  ;;  %10480 = vmatprep.subr.bf16.mxu0 %v14118_v51  ;;  %v14157_v34 = vcombine.low %v7365_v54, %v7369_v0  ;;  %v14159_v51 = vcombine.low %v7366_v19, %v7370_v41  ;;  %v14168_v21 = vcombine.high %v7374_v23, %v7378_v3  ;;  %v7414_v0 = vld [vmem:[%s15954_s29 + $0xfd8] sm:$0xff] }
 0x722   : > { %10644 = vmatprep.subr.bf16.mxu1 %v14120_v25  ;;  %v14166_v25 = vcombine.high %v7373_v43, %v7377_v49  ;;  %v7428_v54 = vrot.slane %v17617_v11, %v16063_v15  ;;  %v7418_v19 = vld [vmem:[%s15954_s29 + $0xff8] sm:$0xff] }
 0x724   : > { %10481 = vmatpush1.bf16.msra.mxu0 %v14117_v55  ;;  %v7386_v55 = vld [vmem:[%s15954_s29 + $0xef8] sm:$0xff] }
 0x725   : > { %10645 = vmatpush1.bf16.msra.mxu1 %v14119_v61  ;;  %10482 = vmatprep.subr.bf16.mxu0 %v14126_v28  ;;  %v14165_v61 = vcombine.low %v7373_v43, %v7377_v49  ;;  %v14167_v28 = vcombine.low %v7374_v23, %v7378_v3  ;;  %v14176_v29 = vcombine.high %v7382_v53, %v7386_v55  ;;  %v14736_v23 = vld [vmem:[%s15961_s8 + $0x4] ss:$16 sps:$4 sm:$0xff]   ;;  %v14739_v3 = vld [vmem:[%s15961_s8 + $0xc] ss:$16 sps:$4 sm:$0xff]  }
 0x726   : > { %v17575_v42 = vpop.f32.mrb[24].mxu0  ;;  %v17577_v36 = vpop.f32.mrb[24].mxu1  ;;  %10646 = vmatprep.subr.bf16.mxu1 %v14128_v30  ;;  %v14174_v30 = vcombine.high %v7381_v35, %v7385_v31  ;;  %v14207_v49 = vcombine.low %v7414_v0, %v7418_v19 }
 0x727   : > { %v17581_v48 = vpop.f32.mrb[25].mxu0  ;;  %v17583_v52 = vpop.f32.mrb[25].mxu1 }
 0x728   : > { %v10182_v27 = vpop.f32.mrb[26].mxu0  ;;  %v10346_v33 = vpop.f32.mrb[26].mxu1  ;;  %10483 = vmatpush1.bf16.msra.mxu0 %v14125_v5  ;;  %v7394_v5 = vld [vmem:[%s15954_s29 + $0xf38] sm:$0xff] }
 0x729   : > { %10647 = vmatpush1.bf16.msra.mxu1 %v14127_v9  ;;  %v10183_v6 = vpop.f32.mrb[27].mxu0  ;;  %v10347_v12 = vpop.f32.mrb[27].mxu1  ;;  %10484 = vmatprep.subr.bf16.mxu0 %v14134_v40  ;;  %v14173_v9 = vcombine.low %v7381_v35, %v7385_v31  ;;  %v14175_v40 = vcombine.low %v7382_v53, %v7386_v55  ;;  %v14184_v32 = vcombine.high %v7390_v4, %v7394_v5  ;;  %v7402_v27 = vld [vmem:[%s15954_s29 + $0xf78] sm:$0xff]  ;;  %v14740_v31 = vld [vmem:[%s15961_s8 + $0x20] ss:$16 sps:$4 sm:$0xff]  }
 0x72a   : > { %10648 = vmatprep.subr.bf16.mxu1 %v14136_v24  ;;  %v14182_v24 = vcombine.high %v7389_v58, %v7393_v7  ;;  %v14181_v33 = vcombine.low %v7389_v58, %v7393_v7  ;;  %v14190_v6 = vcombine.high %v7397_v45, %v7401_v63  ;;  %v14192_v12 = vcombine.high %v7398_v39, %v7402_v27  ;;  %v14745_v35 = vld [vmem:[%s15961_s8 + $0x2c] ss:$16 sps:$4 sm:$0xff]   ;;  %v14743_v53 = vld [vmem:[%s15961_s8 + $0x28] ss:$16 sps:$4 sm:$0xff]   ;;  %v14748_v55 = vld [vmem:[%s15961_s8 + $0x44] ss:$16 sps:$4 sm:$0xff]  }
 0x72b   : > { %v14191_v18 = vcombine.low %v7398_v39, %v7402_v27  ;;  %v14752_v58 = vld [vmem:[%s15961_s8 + $0x60] ss:$16 sps:$4 sm:$0xff]   ;;  %v14755_v7 = vld [vmem:[%s15961_s8 + $0x68] ss:$16 sps:$4 sm:$0xff]   ;;  %v14772_v39 = vld [vmem:[%s15961_s8 + $0xc4] ss:$16 sps:$4 sm:$0xff]  }
 0x72c   : > { %10485 = vmatpush1.bf16.msra.mxu0 %v14133_v60  ;;  %v14183_v60 = vcombine.low %v7390_v4, %v7394_v5  ;;  %v14760_v4 = vld [vmem:[%s15961_s8 + $0x84] ss:$16 sps:$4 sm:$0xff]   ;;  %v14763_v5 = vld [vmem:[%s15961_s8 + $0x8c] ss:$16 sps:$4 sm:$0xff]   ;;  %v14764_v45 = vld [vmem:[%s15961_s8 + $0xa0] ss:$16 sps:$4 sm:$0xff]  }
 0x72d   : > { %10649 = vmatpush1.bf16.msra.mxu1 %v14135_v1  ;;  %10486 = vmatprep.subr.bf16.mxu0 %v14142_v10  ;;  %v7405_v1 = vld [vmem:[%s15954_s29 + $0xf90] sm:$0xff]  ;;  %v14767_v63 = vld [vmem:[%s15961_s8 + $0xa8] ss:$16 sps:$4 sm:$0xff]   ;;  %v14775_v27 = vld [vmem:[%s15961_s8 + $0xcc] ss:$16 sps:$4 sm:$0xff]  }
 0x72e   : > { %10650 = vmatprep.subr.bf16.mxu1 %v14144_v46  ;;  %v7409_v10 = vld [vmem:[%s15954_s29 + $0xfb0] sm:$0xff]  ;;  %v7406_v46 = vld [vmem:[%s15954_s29 + $0xf98] sm:$0xff] }
 0x72f   : > { %v14197_v41 = vcombine.low %v7405_v1, %v7409_v10 }
 0x730   : > { %10487 = vmatpush1.bf16.msra.mxu0 %v14141_v56  ;;  %v14198_v56 = vcombine.high %v7405_v1, %v7409_v10  ;;  %v14776_v1 = vld [vmem:[%s15961_s8 + $0xe0] ss:$16 sps:$4 sm:$0xff]   ;;  %v14779_v10 = vld [vmem:[%s15961_s8 + $0xe8] ss:$16 sps:$4 sm:$0xff]  }
 0x731   : > { %10651 = vmatpush1.bf16.msra.mxu1 %v14143_v38  ;;  %10488 = vmatprep.subr.bf16.mxu0 %v14150_v22  ;;  %v14200_v38 = vcombine.high %v7406_v46, %v7410_v50  ;;  %v7413_v22 = vld [vmem:[%s15954_s29 + $0xfd0] sm:$0xff] }
 0x732   : > { %10652 = vmatprep.subr.bf16.mxu1 %v14152_v62  ;;  %v7417_v62 = vld [vmem:[%s15954_s29 + $0xff0] sm:$0xff] }
 0x733   : > { %v14205_v43 = vcombine.low %v7413_v22, %v7417_v62 }
 0x734   : > { %10489 = vmatpush1.bf16.msra.mxu0 %v14149_v20  ;;  %v14199_v20 = vcombine.low %v7406_v46, %v7410_v50  ;;  %v14784_v46 = vld [vmem:[%s15961_s8 + $0x104] ss:$16 sps:$4 sm:$0xff]   ;;  %v14787_v50 = vld [vmem:[%s15961_s8 + $0x10c] ss:$16 sps:$4 sm:$0xff]  }
 0x735   : > { %10653 = vmatpush1.bf16.msra.mxu1 %v14151_v59  ;;  %10490 = vmatprep.subr.bf16.mxu0 %v14158_v37  ;;  %v14206_v59 = vcombine.high %v7413_v22, %v7417_v62  ;;  %v14208_v37 = vcombine.high %v7414_v0, %v7418_v19  ;;  %v14788_v22 = vld [vmem:[%s15961_s8 + $0x120] ss:$16 sps:$4 sm:$0xff]   ;;  %v14791_v62 = vld [vmem:[%s15961_s8 + $0x128] ss:$16 sps:$4 sm:$0xff]   ;;  %v14799_v0 = vld [vmem:[%s15961_s8 + $0x14c] ss:$16 sps:$4 sm:$0xff]  }
 0x736   : > { %10654 = vmatprep.subr.bf16.mxu1 %v14160_v2  ;;  %v14486_v2 = vadd.f32 %v17581_v48, %v7428_v54  ;;  %v14737_v48 = vld [vmem:[%s15961_s8 + $0x8] ss:$16 sps:$4 sm:$0xff]   ;;  %v14796_v54 = vld [vmem:[%s15961_s8 + $0x144] ss:$16 sps:$4 sm:$0xff]   ;;  %v14794_v19 = vld [vmem:[%s15961_s8 + $0x140] ss:$16 sps:$4 sm:$0xff]  }
 0x738   : > { %10491 = vmatpush1.bf16.msra.mxu0 %v14157_v34  ;;  %v10678_v34 = vmax.f32 %v14486_v2, 0.0  ;;  %v14803_v2 = vld [vmem:[%s15961_s8 + $0x168] ss:$16 sps:$4 sm:$0xff]  }
 0x739   : > { %10655 = vmatpush1.bf16.msra.mxu1 %v14159_v51  ;;  %10492 = vmatprep.subr.bf16.mxu0 %v14166_v25  ;;  %v14734_v51 = vld [vmem:[%s15961_s8] ss:$16 sps:$4 sm:$0xff]   ;;  %v14742_v25 = vld [vmem:[%s15961_s8 + $0x24] ss:$16 sps:$4 sm:$0xff]  }
 0x73a   : > { %10656 = vmatprep.subr.bf16.mxu1 %v14168_v21  ;;  %v10686_v21 = vpack.c.bf16 %v10678_v34, %v10678_v34  ;;  %v14814_v34 = vld [vmem:[%s15961_s8 + $0x1a4] ss:$16 sps:$4 sm:$0xff]  }
 0x73c   : > { %10493 = vmatpush1.bf16.msra.mxu0 %v14165_v61  ;;  %v14751_v61 = vld [vmem:[%s15961_s8 + $0x4c] ss:$16 sps:$4 sm:$0xff]  }
 0x73d   : > { %10657 = vmatpush1.bf16.msra.mxu1 %v14167_v28  ;;  %10494 = vmatprep.subr.bf16.mxu0 %v14174_v30  ;;  %v14746_v28 = vld [vmem:[%s15961_s8 + $0x40] ss:$16 sps:$4 sm:$0xff]   ;;  %v14754_v30 = vld [vmem:[%s15961_s8 + $0x64] ss:$16 sps:$4 sm:$0xff]  }
 0x73e   : > { %10658 = vmatprep.subr.bf16.mxu1 %v14176_v29  ;;  %v14757_v29 = vld [vmem:[%s15961_s8 + $0x6c] ss:$16 sps:$4 sm:$0xff]  }
 0x740   : > { %10495 = vmatpush1.bf16.msra.mxu0 %v14173_v9  ;;  %v14758_v9 = vld [vmem:[%s15961_s8 + $0x80] ss:$16 sps:$4 sm:$0xff]  }
 0x741   : > { %10659 = vmatpush1.bf16.msra.mxu1 %v14175_v40  ;;  %10496 = vmatprep.subr.bf16.mxu0 %v14182_v24  ;;  %v14761_v40 = vld [vmem:[%s15961_s8 + $0x88] ss:$16 sps:$4 sm:$0xff]   ;;  %v14766_v24 = vld [vmem:[%s15961_s8 + $0xa4] ss:$16 sps:$4 sm:$0xff]  }
 0x742   : > { %10660 = vmatprep.subr.bf16.mxu1 %v14184_v32  ;;  %v14769_v32 = vld [vmem:[%s15961_s8 + $0xac] ss:$16 sps:$4 sm:$0xff]  }
 0x744   : > { %10497 = vmatpush1.bf16.msra.mxu0 %v14181_v33  ;;  %v14770_v33 = vld [vmem:[%s15961_s8 + $0xc0] ss:$16 sps:$4 sm:$0xff]  }
 0x745   : > { %10661 = vmatpush1.bf16.msra.mxu1 %v14183_v60  ;;  %10498 = vmatprep.subr.bf16.mxu0 %v14190_v6  ;;  %v14773_v60 = vld [vmem:[%s15961_s8 + $0xc8] ss:$16 sps:$4 sm:$0xff]   ;;  %v14778_v6 = vld [vmem:[%s15961_s8 + $0xe4] ss:$16 sps:$4 sm:$0xff]  }
 0x746   : > { %10662 = vmatprep.subr.bf16.mxu1 %v14192_v12  ;;  %v14781_v12 = vld [vmem:[%s15961_s8 + $0xec] ss:$16 sps:$4 sm:$0xff]  }
 0x748   : > { %10499 = vmatpush1.bf16.msra.mxu0 %v14189_v17  ;;  %v14782_v17 = vld [vmem:[%s15961_s8 + $0x100] ss:$16 sps:$4 sm:$0xff]  }
 0x749   : > { %10663 = vmatpush1.bf16.msra.mxu1 %v14191_v18  ;;  %10500 = vmatprep.subr.bf16.mxu0 %v14198_v56  ;;  %v14785_v18 = vld [vmem:[%s15961_s8 + $0x108] ss:$16 sps:$4 sm:$0xff]   ;;  %v14790_v56 = vld [vmem:[%s15961_s8 + $0x124] ss:$16 sps:$4 sm:$0xff]  }
 0x74a   : > { %10664 = vmatprep.subr.bf16.mxu1 %v14200_v38  ;;  %v14793_v38 = vld [vmem:[%s15961_s8 + $0x12c] ss:$16 sps:$4 sm:$0xff]  }
 0x74c   : > { %10501 = vmatpush1.bf16.msra.mxu0 %v14197_v41  ;;  %v14797_v41 = vld [vmem:[%s15961_s8 + $0x148] ss:$16 sps:$4 sm:$0xff]  }
 0x74d   : > { %10665 = vmatpush1.bf16.msra.mxu1 %v14199_v20  ;;  %10502 = vmatprep.subr.bf16.mxu0 %v14206_v59  ;;  %v14802_v20 = vld [vmem:[%s15961_s8 + $0x164] ss:$16 sps:$4 sm:$0xff]   ;;  %v14805_v59 = vld [vmem:[%s15961_s8 + $0x16c] ss:$16 sps:$4 sm:$0xff]  }
 0x74e   : > { %10666 = vmatprep.subr.bf16.mxu1 %v14208_v37  ;;  %v14800_v37 = vld [vmem:[%s15961_s8 + $0x160] ss:$16 sps:$4 sm:$0xff]  }
 0x750   : > { %10503 = vmatpush1.bf16.msra.mxu0 %v14205_v43  ;;  %v14808_v43 = vld [vmem:[%s15961_s8 + $0x184] ss:$16 sps:$4 sm:$0xff]  }
 0x751   : > { %10667 = vmatpush1.bf16.msra.mxu1 %v14207_v49  ;;  %12251 = vmatprep.subr.bf16.mxu0 %v14736_v23  ;;  %v14811_v49 = vld [vmem:[%s15961_s8 + $0x18c] ss:$16 sps:$4 sm:$0xff]   ;;  %v14806_v23 = vld [vmem:[%s15961_s8 + $0x180] ss:$16 sps:$4 sm:$0xff]  }
 0x752   : > { %12415 = vmatprep.subr.bf16.mxu1 %v14739_v3  ;;  %v14809_v3 = vld [vmem:[%s15961_s8 + $0x188] ss:$16 sps:$4 sm:$0xff]  }
 0x753   : > { %10505 = vmatmul.mubr.bf16.vlgmr.msra.gmra.mrb[28].mxu0 %v17345_v26 }
 0x754   : > { %10669 = vmatmul.mubr.bf16.vlgmr.msra.gmra.mrb[28].mxu1 %v17345_v26  ;;  %12252 = vmatpush1.bf16.msra.mxu0 %v14734_v51  ;;  %v14749_v26 = vld [vmem:[%s15961_s8 + $0x48] ss:$16 sps:$4 sm:$0xff]   ;;  %v14817_v51 = vld [vmem:[%s15961_s8 + $0x1ac] ss:$16 sps:$4 sm:$0xff]  }
 0x755   : > { %12283 = vmatprep.mubr.bf16.mxu0 %v10686_v21  ;;  %12416 = vmatpush1.bf16.msra.mxu1 %v14737_v48  ;;  %v14812_v48 = vld [vmem:[%s15961_s8 + $0x1a0] ss:$16 sps:$4 sm:$0xff]  }
 0x756   : > { %12447 = vmatprep.mubr.bf16.mxu1 %v10686_v21  ;;  %12253 = vmatprep.subr.bf16.mxu0 %v14742_v25  ;;  %v7424_v25 = vrot.slane %v17617_v11, %v16057_v13  ;;  %v14815_v21 = vld [vmem:[%s15961_s8 + $0x1a8] ss:$16 sps:$4 sm:$0xff]  }
 0x757   : > { %12417 = vmatprep.subr.bf16.mxu1 %v14745_v35  ;;  %v14820_v35 = vld [vmem:[%s15961_s8 + $0x1c4] ss:$16 sps:$4 sm:$0xff]  }
 0x758   : > { %12254 = vmatpush1.bf16.msra.mxu0 %v14740_v31  ;;  %v14823_v31 = vld [vmem:[%s15961_s8 + $0x1cc] ss:$16 sps:$4 sm:$0xff]  }
 0x759   : > { %12418 = vmatpush1.bf16.msra.mxu1 %v14743_v53  ;;  %12255 = vmatprep.subr.bf16.mxu0 %v14748_v55  ;;  %v7436_v53 = vrot.slane %v17617_v11, %v16066_v16  ;;  %v14818_v55 = vld [vmem:[%s15961_s8 + $0x1c0] ss:$16 sps:$4 sm:$0xff]  }
 0x75a   : > { %12419 = vmatprep.subr.bf16.mxu1 %v14751_v61  ;;  %v14485_v61 = vadd.f32 %v17575_v42, %v7424_v25  ;;  %v14832_v42 = vld [vmem:[%s15961_s8 + $0x204] ss:$16 sps:$4 sm:$0xff]   ;;  %v14889_v25 = vld [vmem:[%s15961_s8 + $0x32c] ss:$16 sps:$4 sm:$0xff]  }
 0x75c   : > { %12256 = vmatpush1.bf16.msra.mxu0 %v14746_v28  ;;  %v14821_v28 = vld [vmem:[%s15961_s8 + $0x1c8] ss:$16 sps:$4 sm:$0xff]  }
 0x75d   : > { %12420 = vmatpush1.bf16.msra.mxu1 %v14749_v26  ;;  %12257 = vmatprep.subr.bf16.mxu0 %v14754_v30  ;;  %v14826_v26 = vld [vmem:[%s15961_s8 + $0x1e4] ss:$16 sps:$4 sm:$0xff]   ;;  %v14829_v30 = vld [vmem:[%s15961_s8 + $0x1ec] ss:$16 sps:$4 sm:$0xff]  }
 0x75e   : > { %12421 = vmatprep.subr.bf16.mxu1 %v14757_v29  ;;  %v14488_v29 = vadd.f32 %v17583_v52, %v7436_v53  ;;  %v14833_v52 = vld [vmem:[%s15961_s8 + $0x208] ss:$16 sps:$4 sm:$0xff]   ;;  %v14895_v53 = vld [vmem:[%s15961_s8 + $0x34c] ss:$16 sps:$4 sm:$0xff]  }
 0x760   : > { %12258 = vmatpush1.bf16.msra.mxu0 %v14752_v58  ;;  %v14824_v58 = vld [vmem:[%s15961_s8 + $0x1e0] ss:$16 sps:$4 sm:$0xff]  }
 0x761   : > { %12422 = vmatpush1.bf16.msra.mxu1 %v14755_v7  ;;  %12259 = vmatprep.subr.bf16.mxu0 %v14760_v4  ;;  %v10677_v7 = vmax.f32 %v14485_v61, 0.0  ;;  %v14827_v4 = vld [vmem:[%s15961_s8 + $0x1e8] ss:$16 sps:$4 sm:$0xff]  }
 0x762   : > { %12423 = vmatprep.subr.bf16.mxu1 %v14763_v5  ;;  %v14835_v5 = vld [vmem:[%s15961_s8 + $0x20c] ss:$16 sps:$4 sm:$0xff]   ;;  %v14893_v61 = vld [vmem:[%s15961_s8 + $0x348] ss:$16 sps:$4 sm:$0xff]  }
 0x764   : > { %12260 = vmatpush1.bf16.msra.mxu0 %v14758_v9  ;;  %v10680_v9 = vmax.f32 %v14488_v29, 0.0  ;;  %v14899_v29 = vld [vmem:[%s15961_s8 + $0x368] ss:$16 sps:$4 sm:$0xff]  }
 0x765   : > { %12424 = vmatpush1.bf16.msra.mxu1 %v14761_v40  ;;  %12261 = vmatprep.subr.bf16.mxu0 %v14766_v24  ;;  %v14830_v40 = vld [vmem:[%s15961_s8 + $0x200] ss:$16 sps:$4 sm:$0xff]   ;;  %v10685_v24 = vpack.c.bf16 %v10677_v7, %v10677_v7  ;;  %v14907_v7 = vld [vmem:[%s15961_s8 + $0x38c] ss:$16 sps:$4 sm:$0xff]  }
 0x766   : > { %12425 = vmatprep.subr.bf16.mxu1 %v14769_v32  ;;  %v14838_v32 = vld [vmem:[%s15961_s8 + $0x224] ss:$16 sps:$4 sm:$0xff]  }
 0x768   : > { %12262 = vmatpush1.bf16.msra.mxu0 %v14764_v45  ;;  %v10688_v45 = vpack.c.bf16 %v10680_v9, %v10680_v9  ;;  %v14913_v9 = vld [vmem:[%s15961_s8 + $0x3ac] ss:$16 sps:$4 sm:$0xff]  }
 0x769   : > { %12426 = vmatpush1.bf16.msra.mxu1 %v14767_v63  ;;  %12263 = vmatprep.subr.bf16.mxu0 %v14772_v39  ;;  %v14841_v63 = vld [vmem:[%s15961_s8 + $0x22c] ss:$16 sps:$4 sm:$0xff]   ;;  %v14836_v39 = vld [vmem:[%s15961_s8 + $0x220] ss:$16 sps:$4 sm:$0xff]  }
 0x76a   : > { %12427 = vmatprep.subr.bf16.mxu1 %v14775_v27  ;;  %v14839_v27 = vld [vmem:[%s15961_s8 + $0x228] ss:$16 sps:$4 sm:$0xff]  }
 0x76c   : > { %12264 = vmatpush1.bf16.msra.mxu0 %v14770_v33  ;;  %v14844_v33 = vld [vmem:[%s15961_s8 + $0x244] ss:$16 sps:$4 sm:$0xff]  }
 0x76d   : > { %12428 = vmatpush1.bf16.msra.mxu1 %v14773_v60  ;;  %12265 = vmatprep.subr.bf16.mxu0 %v14778_v6  ;;  %v14847_v60 = vld [vmem:[%s15961_s8 + $0x24c] ss:$16 sps:$4 sm:$0xff]   ;;  %v14842_v6 = vld [vmem:[%s15961_s8 + $0x240] ss:$16 sps:$4 sm:$0xff]  }
 0x76e   : > { %12429 = vmatprep.subr.bf16.mxu1 %v14781_v12  ;;  %v14845_v12 = vld [vmem:[%s15961_s8 + $0x248] ss:$16 sps:$4 sm:$0xff]  }
 0x770   : > { %12266 = vmatpush1.bf16.msra.mxu0 %v14776_v1  ;;  %v14850_v1 = vld [vmem:[%s15961_s8 + $0x264] ss:$16 sps:$4 sm:$0xff]  }
 0x771   : > { %12430 = vmatpush1.bf16.msra.mxu1 %v14779_v10  ;;  %12267 = vmatprep.subr.bf16.mxu0 %v14784_v46  ;;  %v14853_v10 = vld [vmem:[%s15961_s8 + $0x26c] ss:$16 sps:$4 sm:$0xff]   ;;  %v14848_v46 = vld [vmem:[%s15961_s8 + $0x260] ss:$16 sps:$4 sm:$0xff]  }
 0x772   : > { %12431 = vmatprep.subr.bf16.mxu1 %v14787_v50  ;;  %v14851_v50 = vld [vmem:[%s15961_s8 + $0x268] ss:$16 sps:$4 sm:$0xff]  }
 0x774   : > { %12268 = vmatpush1.bf16.msra.mxu0 %v14782_v17  ;;  %v14856_v17 = vld [vmem:[%s15961_s8 + $0x284] ss:$16 sps:$4 sm:$0xff]  }
 0x775   : > { %12432 = vmatpush1.bf16.msra.mxu1 %v14785_v18  ;;  %12269 = vmatprep.subr.bf16.mxu0 %v14790_v56  ;;  %v14859_v18 = vld [vmem:[%s15961_s8 + $0x28c] ss:$16 sps:$4 sm:$0xff]   ;;  %v14854_v56 = vld [vmem:[%s15961_s8 + $0x280] ss:$16 sps:$4 sm:$0xff]  }
 0x776   : > { %12433 = vmatprep.subr.bf16.mxu1 %v14793_v38  ;;  %v14857_v38 = vld [vmem:[%s15961_s8 + $0x288] ss:$16 sps:$4 sm:$0xff]  }
 0x778   : > { %12270 = vmatpush1.bf16.msra.mxu0 %v14788_v22  ;;  %v14862_v22 = vld [vmem:[%s15961_s8 + $0x2a4] ss:$16 sps:$4 sm:$0xff]  }
 0x779   : > { %12434 = vmatpush1.bf16.msra.mxu1 %v14791_v62  ;;  %12271 = vmatprep.subr.bf16.mxu0 %v14796_v54  ;;  %v14865_v62 = vld [vmem:[%s15961_s8 + $0x2ac] ss:$16 sps:$4 sm:$0xff]   ;;  %v14860_v54 = vld [vmem:[%s15961_s8 + $0x2a0] ss:$16 sps:$4 sm:$0xff]  }
 0x77a   : > { %12435 = vmatprep.subr.bf16.mxu1 %v14799_v0  ;;  %v14863_v0 = vld [vmem:[%s15961_s8 + $0x2a8] ss:$16 sps:$4 sm:$0xff]  }
 0x77c   : > { %12272 = vmatpush1.bf16.msra.mxu0 %v14794_v19  ;;  %v14868_v19 = vld [vmem:[%s15961_s8 + $0x2c4] ss:$16 sps:$4 sm:$0xff]  }
 0x77d   : > { %12436 = vmatpush1.bf16.msra.mxu1 %v14797_v41  ;;  %12273 = vmatprep.subr.bf16.mxu0 %v14802_v20  ;;  %v14871_v41 = vld [vmem:[%s15961_s8 + $0x2cc] ss:$16 sps:$4 sm:$0xff]   ;;  %v14866_v20 = vld [vmem:[%s15961_s8 + $0x2c0] ss:$16 sps:$4 sm:$0xff]  }
 0x77e   : > { %12437 = vmatprep.subr.bf16.mxu1 %v14805_v59  ;;  %v14869_v59 = vld [vmem:[%s15961_s8 + $0x2c8] ss:$16 sps:$4 sm:$0xff]  }
 0x780   : > { %12274 = vmatpush1.bf16.msra.mxu0 %v14800_v37  ;;  %v14874_v37 = vld [vmem:[%s15961_s8 + $0x2e4] ss:$16 sps:$4 sm:$0xff]  }
 0x781   : > { %12438 = vmatpush1.bf16.msra.mxu1 %v14803_v2  ;;  %12275 = vmatprep.subr.bf16.mxu0 %v14808_v43  ;;  %v14877_v2 = vld [vmem:[%s15961_s8 + $0x2ec] ss:$16 sps:$4 sm:$0xff]   ;;  %v14872_v43 = vld [vmem:[%s15961_s8 + $0x2e0] ss:$16 sps:$4 sm:$0xff]  }
 0x782   : > { %12439 = vmatprep.subr.bf16.mxu1 %v14811_v49  ;;  %v14875_v49 = vld [vmem:[%s15961_s8 + $0x2e8] ss:$16 sps:$4 sm:$0xff]  }
 0x784   : > { %12276 = vmatpush1.bf16.msra.mxu0 %v14806_v23  ;;  %v14880_v23 = vld [vmem:[%s15961_s8 + $0x304] ss:$16 sps:$4 sm:$0xff]  }
 0x785   : > { %12440 = vmatpush1.bf16.msra.mxu1 %v14809_v3  ;;  %12277 = vmatprep.subr.bf16.mxu0 %v14814_v34  ;;  %v14883_v3 = vld [vmem:[%s15961_s8 + $0x30c] ss:$16 sps:$4 sm:$0xff]   ;;  %v14878_v34 = vld [vmem:[%s15961_s8 + $0x300] ss:$16 sps:$4 sm:$0xff]  }
 0x786   : > { %12441 = vmatprep.subr.bf16.mxu1 %v14817_v51  ;;  %v14881_v51 = vld [vmem:[%s15961_s8 + $0x308] ss:$16 sps:$4 sm:$0xff]  }
 0x788   : > { %12278 = vmatpush1.bf16.msra.mxu0 %v14812_v48  ;;  %v14886_v48 = vld [vmem:[%s15961_s8 + $0x324] ss:$16 sps:$4 sm:$0xff]  }
 0x789   : > { %12442 = vmatpush1.bf16.msra.mxu1 %v14815_v21  ;;  %12279 = vmatprep.subr.bf16.mxu0 %v14820_v35  ;;  %v14884_v21 = vld [vmem:[%s15961_s8 + $0x320] ss:$16 sps:$4 sm:$0xff]   ;;  %v14887_v35 = vld [vmem:[%s15961_s8 + $0x328] ss:$16 sps:$4 sm:$0xff]  }
 0x78a   : > { %12443 = vmatprep.subr.bf16.mxu1 %v14823_v31  ;;  %v14892_v31 = vld [vmem:[%s15961_s8 + $0x344] ss:$16 sps:$4 sm:$0xff]  }
 0x78c   : > { %12280 = vmatpush1.bf16.msra.mxu0 %v14818_v55  ;;  %v14890_v55 = vld [vmem:[%s15961_s8 + $0x340] ss:$16 sps:$4 sm:$0xff]  }
 0x78d   : > { %12444 = vmatpush1.bf16.msra.mxu1 %v14821_v28  ;;  %12281 = vmatprep.subr.bf16.mxu0 %v14826_v26  ;;  %v14898_v28 = vld [vmem:[%s15961_s8 + $0x364] ss:$16 sps:$4 sm:$0xff]   ;;  %v14901_v26 = vld [vmem:[%s15961_s8 + $0x36c] ss:$16 sps:$4 sm:$0xff]  }
 0x78e   : > { %12445 = vmatprep.subr.bf16.mxu1 %v14829_v30  ;;  %v14896_v30 = vld [vmem:[%s15961_s8 + $0x360] ss:$16 sps:$4 sm:$0xff]  }
 0x790   : > { %12282 = vmatpush1.bf16.msra.mxu0 %v14824_v58  ;;  %v14904_v58 = vld [vmem:[%s15961_s8 + $0x384] ss:$16 sps:$4 sm:$0xff]  }
 0x791   : > { %12446 = vmatpush1.bf16.msra.mxu1 %v14827_v4  ;;  %12292 = vmatprep.subr.bf16.mxu0 %v14832_v42  ;;  %v14902_v4 = vld [vmem:[%s15961_s8 + $0x380] ss:$16 sps:$4 sm:$0xff]   ;;  %v14905_v42 = vld [vmem:[%s15961_s8 + $0x388] ss:$16 sps:$4 sm:$0xff]  }
 0x792   : > { %12456 = vmatprep.subr.bf16.mxu1 %v14835_v5  ;;  %v14910_v5 = vld [vmem:[%s15961_s8 + $0x3a4] ss:$16 sps:$4 sm:$0xff]  }
 0x793   : > { %12284 = vmatmul.mubr.bf16.vlgmr.msra.gmra.mrb[32].mxu0 %v10685_v24 }
 0x794   : > { %12448 = vmatmul.mubr.bf16.vlgmr.msra.gmra.mrb[32].mxu1 %v10685_v24  ;;  %12293 = vmatpush1.bf16.msra.mxu0 %v14830_v40  ;;  %v14908_v40 = vld [vmem:[%s15961_s8 + $0x3a0] ss:$16 sps:$4 sm:$0xff]   ;;  %v7432_v24 = vrot.slane %v17617_v11, %v16060_v14 }
 0x795   : > { %12324 = vmatprep.mubr.bf16.mxu0 %v10688_v45  ;;  %12457 = vmatpush1.bf16.msra.mxu1 %v14833_v52  ;;  %v14911_v52 = vld [vmem:[%s15961_s8 + $0x3a8] ss:$16 sps:$4 sm:$0xff]  }
 0x796   : > { %12488 = vmatprep.mubr.bf16.mxu1 %v10688_v45  ;;  %12294 = vmatprep.subr.bf16.mxu0 %v14838_v32  ;;  %v14916_v32 = vld [vmem:[%s15961_s8 + $0x3c4] ss:$16 sps:$4 sm:$0xff]   ;;  %v14919_v45 = vld [vmem:[%s15961_s8 + $0x3cc] ss:$16 sps:$4 sm:$0xff]  }
 0x797   : > { %12458 = vmatprep.subr.bf16.mxu1 %v14841_v63  ;;  %v14914_v63 = vld [vmem:[%s15961_s8 + $0x3c0] ss:$16 sps:$4 sm:$0xff]  }
 0x798   : > { %12295 = vmatpush1.bf16.msra.mxu0 %v14836_v39  ;;  %v14487_v39 = vadd.f32 %v17577_v36, %v7432_v24  ;;  %v14931_v36 = vld [vmem:[%s15961_s8 + $0x40c] ss:$16 sps:$4 sm:$0xff]   ;;  %v14986_v24 = vld [vmem:[%s15961_s8 + $0x540] ss:$16 sps:$4 sm:$0xff]  }
 0x799   : > { %12459 = vmatpush1.bf16.msra.mxu1 %v14839_v27  ;;  %12296 = vmatprep.subr.bf16.mxu0 %v14844_v33  ;;  %v14917_v27 = vld [vmem:[%s15961_s8 + $0x3c8] ss:$16 sps:$4 sm:$0xff]   ;;  %v14922_v33 = vld [vmem:[%s15961_s8 + $0x3e4] ss:$16 sps:$4 sm:$0xff]  }
 0x79a   : > { %12460 = vmatprep.subr.bf16.mxu1 %v14847_v60  ;;  %v14925_v60 = vld [vmem:[%s15961_s8 + $0x3ec] ss:$16 sps:$4 sm:$0xff]  }
 0x79c   : > { %12297 = vmatpush1.bf16.msra.mxu0 %v14842_v6  ;;  %v14920_v6 = vld [vmem:[%s15961_s8 + $0x3e0] ss:$16 sps:$4 sm:$0xff]  }
 0x79d   : > { %12461 = vmatpush1.bf16.msra.mxu1 %v14845_v12  ;;  %12298 = vmatprep.subr.bf16.mxu0 %v14850_v1  ;;  %v10679_v12 = vmax.f32 %v14487_v39, 0.0  ;;  %v14923_v1 = vld [vmem:[%s15961_s8 + $0x3e8] ss:$16 sps:$4 sm:$0xff]  }
 0x79e   : > { %12462 = vmatprep.subr.bf16.mxu1 %v14853_v10  ;;  %v14928_v10 = vld [vmem:[%s15961_s8 + $0x404] ss:$16 sps:$4 sm:$0xff]   ;;  %v14995_v39 = vld [vmem:[%s15961_s8 + $0x568] ss:$16 sps:$4 sm:$0xff]  }
 0x7a0   : > { %12299 = vmatpush1.bf16.msra.mxu0 %v14848_v46  ;;  %v14926_v46 = vld [vmem:[%s15961_s8 + $0x400] ss:$16 sps:$4 sm:$0xff]  }
 0x7a1   : > { %12463 = vmatpush1.bf16.msra.mxu1 %v14851_v50  ;;  %12300 = vmatprep.subr.bf16.mxu0 %v14856_v17  ;;  %v10687_v50 = vpack.c.bf16 %v10679_v12, %v10679_v12  ;;  %v14929_v17 = vld [vmem:[%s15961_s8 + $0x408] ss:$16 sps:$4 sm:$0xff]   ;;  %v15006_v12 = vld [vmem:[%s15961_s8 + $0x5a4] ss:$16 sps:$4 sm:$0xff]  }
 0x7a2   : > { %12464 = vmatprep.subr.bf16.mxu1 %v14859_v18  ;;  %v14934_v18 = vld [vmem:[%s15961_s8 + $0x424] ss:$16 sps:$4 sm:$0xff]  }
 0x7a4   : > { %12301 = vmatpush1.bf16.msra.mxu0 %v14854_v56  ;;  %v14937_v56 = vld [vmem:[%s15961_s8 + $0x42c] ss:$16 sps:$4 sm:$0xff]  }
 0x7a5   : > { %12465 = vmatpush1.bf16.msra.mxu1 %v14857_v38  ;;  %12302 = vmatprep.subr.bf16.mxu0 %v14862_v22  ;;  %v14932_v38 = vld [vmem:[%s15961_s8 + $0x420] ss:$16 sps:$4 sm:$0xff]   ;;  %v14935_v22 = vld [vmem:[%s15961_s8 + $0x428] ss:$16 sps:$4 sm:$0xff]  }
 0x7a6   : > { %12466 = vmatprep.subr.bf16.mxu1 %v14865_v62  ;;  %v14940_v62 = vld [vmem:[%s15961_s8 + $0x444] ss:$16 sps:$4 sm:$0xff]  }
 0x7a8   : > { %12303 = vmatpush1.bf16.msra.mxu0 %v14860_v54  ;;  %v14943_v54 = vld [vmem:[%s15961_s8 + $0x44c] ss:$16 sps:$4 sm:$0xff]  }
 0x7a9   : > { %12467 = vmatpush1.bf16.msra.mxu1 %v14863_v0  ;;  %12304 = vmatprep.subr.bf16.mxu0 %v14868_v19  ;;  %v14938_v0 = vld [vmem:[%s15961_s8 + $0x440] ss:$16 sps:$4 sm:$0xff]   ;;  %v14941_v19 = vld [vmem:[%s15961_s8 + $0x448] ss:$16 sps:$4 sm:$0xff]  }
 0x7aa   : > { %12468 = vmatprep.subr.bf16.mxu1 %v14871_v41  ;;  %v14946_v41 = vld [vmem:[%s15961_s8 + $0x464] ss:$16 sps:$4 sm:$0xff]  }
 0x7ac   : > { %12305 = vmatpush1.bf16.msra.mxu0 %v14866_v20  ;;  %v14949_v20 = vld [vmem:[%s15961_s8 + $0x46c] ss:$16 sps:$4 sm:$0xff]  }
 0x7ad   : > { %12469 = vmatpush1.bf16.msra.mxu1 %v14869_v59  ;;  %12306 = vmatprep.subr.bf16.mxu0 %v14874_v37  ;;  %v14944_v59 = vld [vmem:[%s15961_s8 + $0x460] ss:$16 sps:$4 sm:$0xff]   ;;  %v14947_v37 = vld [vmem:[%s15961_s8 + $0x468] ss:$16 sps:$4 sm:$0xff]  }
 0x7ae   : > { %12470 = vmatprep.subr.bf16.mxu1 %v14877_v2  ;;  %v14952_v2 = vld [vmem:[%s15961_s8 + $0x484] ss:$16 sps:$4 sm:$0xff]  }
 0x7b0   : > { %12307 = vmatpush1.bf16.msra.mxu0 %v14872_v43  ;;  %v14955_v43 = vld [vmem:[%s15961_s8 + $0x48c] ss:$16 sps:$4 sm:$0xff]  }
 0x7b1   : > { %12471 = vmatpush1.bf16.msra.mxu1 %v14875_v49  ;;  %12308 = vmatprep.subr.bf16.mxu0 %v14880_v23  ;;  %v14950_v49 = vld [vmem:[%s15961_s8 + $0x480] ss:$16 sps:$4 sm:$0xff]   ;;  %v14953_v23 = vld [vmem:[%s15961_s8 + $0x488] ss:$16 sps:$4 sm:$0xff]  }
 0x7b2   : > { %12472 = vmatprep.subr.bf16.mxu1 %v14883_v3  ;;  %v14958_v3 = vld [vmem:[%s15961_s8 + $0x4a4] ss:$16 sps:$4 sm:$0xff]  }
 0x7b4   : > { %12309 = vmatpush1.bf16.msra.mxu0 %v14878_v34  ;;  %v14961_v34 = vld [vmem:[%s15961_s8 + $0x4ac] ss:$16 sps:$4 sm:$0xff]  }
 0x7b5   : > { %12473 = vmatpush1.bf16.msra.mxu1 %v14881_v51  ;;  %12310 = vmatprep.subr.bf16.mxu0 %v14886_v48  ;;  %v14956_v51 = vld [vmem:[%s15961_s8 + $0x4a0] ss:$16 sps:$4 sm:$0xff]   ;;  %v14959_v48 = vld [vmem:[%s15961_s8 + $0x4a8] ss:$16 sps:$4 sm:$0xff]  }
 0x7b6   : > { %12474 = vmatprep.subr.bf16.mxu1 %v14889_v25  ;;  %v14964_v25 = vld [vmem:[%s15961_s8 + $0x4c4] ss:$16 sps:$4 sm:$0xff]  }
 0x7b8   : > { %12311 = vmatpush1.bf16.msra.mxu0 %v14884_v21  ;;  %v14967_v21 = vld [vmem:[%s15961_s8 + $0x4cc] ss:$16 sps:$4 sm:$0xff]  }
 0x7b9   : > { %12475 = vmatpush1.bf16.msra.mxu1 %v14887_v35  ;;  %12312 = vmatprep.subr.bf16.mxu0 %v14892_v31  ;;  %v14962_v35 = vld [vmem:[%s15961_s8 + $0x4c0] ss:$16 sps:$4 sm:$0xff]   ;;  %v14965_v31 = vld [vmem:[%s15961_s8 + $0x4c8] ss:$16 sps:$4 sm:$0xff]  }
 0x7ba   : > { %12476 = vmatprep.subr.bf16.mxu1 %v14895_v53  ;;  %v14970_v53 = vld [vmem:[%s15961_s8 + $0x4e4] ss:$16 sps:$4 sm:$0xff]  }
 0x7bc   : > { %12313 = vmatpush1.bf16.msra.mxu0 %v14890_v55  ;;  %v14973_v55 = vld [vmem:[%s15961_s8 + $0x4ec] ss:$16 sps:$4 sm:$0xff]  }
 0x7bd   : > { %12477 = vmatpush1.bf16.msra.mxu1 %v14893_v61  ;;  %12314 = vmatprep.subr.bf16.mxu0 %v14898_v28  ;;  %v14968_v61 = vld [vmem:[%s15961_s8 + $0x4e0] ss:$16 sps:$4 sm:$0xff]   ;;  %v14971_v28 = vld [vmem:[%s15961_s8 + $0x4e8] ss:$16 sps:$4 sm:$0xff]  }
 0x7be   : > { %12478 = vmatprep.subr.bf16.mxu1 %v14901_v26  ;;  %v14976_v26 = vld [vmem:[%s15961_s8 + $0x504] ss:$16 sps:$4 sm:$0xff]  }
 0x7c0   : > { %12315 = vmatpush1.bf16.msra.mxu0 %v14896_v30  ;;  %v14979_v30 = vld [vmem:[%s15961_s8 + $0x50c] ss:$16 sps:$4 sm:$0xff]  }
 0x7c1   : > { %12479 = vmatpush1.bf16.msra.mxu1 %v14899_v29  ;;  %12316 = vmatprep.subr.bf16.mxu0 %v14904_v58  ;;  %v14974_v29 = vld [vmem:[%s15961_s8 + $0x500] ss:$16 sps:$4 sm:$0xff]   ;;  %v14977_v58 = vld [vmem:[%s15961_s8 + $0x508] ss:$16 sps:$4 sm:$0xff]  }
 0x7c2   : > { %12480 = vmatprep.subr.bf16.mxu1 %v14907_v7  ;;  %v14982_v7 = vld [vmem:[%s15961_s8 + $0x524] ss:$16 sps:$4 sm:$0xff]  }
 0x7c4   : > { %12317 = vmatpush1.bf16.msra.mxu0 %v14902_v4  ;;  %v14985_v4 = vld [vmem:[%s15961_s8 + $0x52c] ss:$16 sps:$4 sm:$0xff]  }
 0x7c5   : > { %12481 = vmatpush1.bf16.msra.mxu1 %v14905_v42  ;;  %12318 = vmatprep.subr.bf16.mxu0 %v14910_v5  ;;  %v14980_v42 = vld [vmem:[%s15961_s8 + $0x520] ss:$16 sps:$4 sm:$0xff]   ;;  %v14983_v5 = vld [vmem:[%s15961_s8 + $0x528] ss:$16 sps:$4 sm:$0xff]  }
 0x7c6   : > { %12482 = vmatprep.subr.bf16.mxu1 %v14913_v9  ;;  %v14988_v9 = vld [vmem:[%s15961_s8 + $0x544] ss:$16 sps:$4 sm:$0xff]  }
 0x7c8   : > { %12319 = vmatpush1.bf16.msra.mxu0 %v14908_v40  ;;  %v14991_v40 = vld [vmem:[%s15961_s8 + $0x54c] ss:$16 sps:$4 sm:$0xff]  }
 0x7c9   : > { %12483 = vmatpush1.bf16.msra.mxu1 %v14911_v52  ;;  %12320 = vmatprep.subr.bf16.mxu0 %v14916_v32  ;;  %v14989_v52 = vld [vmem:[%s15961_s8 + $0x548] ss:$16 sps:$4 sm:$0xff]   ;;  %v14994_v32 = vld [vmem:[%s15961_s8 + $0x564] ss:$16 sps:$4 sm:$0xff]  }
 0x7ca   : > { %12484 = vmatprep.subr.bf16.mxu1 %v14919_v45  ;;  %v14997_v45 = vld [vmem:[%s15961_s8 + $0x56c] ss:$16 sps:$4 sm:$0xff]  }
 0x7cc   : > { %12321 = vmatpush1.bf16.msra.mxu0 %v14914_v63  ;;  %v14992_v63 = vld [vmem:[%s15961_s8 + $0x560] ss:$16 sps:$4 sm:$0xff]  }
 0x7cd   : > { %12485 = vmatpush1.bf16.msra.mxu1 %v14917_v27  ;;  %12322 = vmatprep.subr.bf16.mxu0 %v14922_v33  ;;  %v15000_v27 = vld [vmem:[%s15961_s8 + $0x584] ss:$16 sps:$4 sm:$0xff]   ;;  %v15003_v33 = vld [vmem:[%s15961_s8 + $0x58c] ss:$16 sps:$4 sm:$0xff]  }
 0x7ce   : > { %12486 = vmatprep.subr.bf16.mxu1 %v14925_v60  ;;  %v14998_v60 = vld [vmem:[%s15961_s8 + $0x580] ss:$16 sps:$4 sm:$0xff]  }
 0x7d0   : > { %12323 = vmatpush1.bf16.msra.mxu0 %v14920_v6  ;;  %v15001_v6 = vld [vmem:[%s15961_s8 + $0x588] ss:$16 sps:$4 sm:$0xff]  }
 0x7d1   : > { %12487 = vmatpush1.bf16.msra.mxu1 %v14923_v1  ;;  %12333 = vmatprep.subr.bf16.mxu0 %v14928_v10  ;;  %v15009_v1 = vld [vmem:[%s15961_s8 + $0x5ac] ss:$16 sps:$4 sm:$0xff]   ;;  %v15004_v10 = vld [vmem:[%s15961_s8 + $0x5a0] ss:$16 sps:$4 sm:$0xff]  }
 0x7d2   : > { %12497 = vmatprep.subr.bf16.mxu1 %v14931_v36  ;;  %v15007_v36 = vld [vmem:[%s15961_s8 + $0x5a8] ss:$16 sps:$4 sm:$0xff]  }
 0x7d3   : > { %12325 = vmatmul.mubr.bf16.vlgmr.msra.gmra.mrb[32].mxu0 %v10687_v50 }
 0x7d4   : > { %12489 = vmatmul.mubr.bf16.vlgmr.msra.gmra.mrb[32].mxu1 %v10687_v50  ;;  %12334 = vmatpush1.bf16.msra.mxu0 %v14926_v46  ;;  %v15012_v46 = vld [vmem:[%s15961_s8 + $0x5c4] ss:$16 sps:$4 sm:$0xff]   ;;  %v15015_v50 = vld [vmem:[%s15961_s8 + $0x5cc] ss:$16 sps:$4 sm:$0xff]  }
 0x7d5   : > { %12498 = vmatpush1.bf16.msra.mxu1 %v14929_v17  ;;  %12335 = vmatprep.subr.bf16.mxu0 %v14934_v18  ;;  %v15010_v17 = vld [vmem:[%s15961_s8 + $0x5c0] ss:$16 sps:$4 sm:$0xff]   ;;  %v15013_v18 = vld [vmem:[%s15961_s8 + $0x5c8] ss:$16 sps:$4 sm:$0xff]  }
 0x7d6   : > { %12499 = vmatprep.subr.bf16.mxu1 %v14937_v56  ;;  %v15018_v56 = vld [vmem:[%s15961_s8 + $0x5e4] ss:$16 sps:$4 sm:$0xff]  }
 0x7d8   : > { %12336 = vmatpush1.bf16.msra.mxu0 %v14932_v38  ;;  %v15021_v38 = vld [vmem:[%s15961_s8 + $0x5ec] ss:$16 sps:$4 sm:$0xff]  }
 0x7d9   : > { %12500 = vmatpush1.bf16.msra.mxu1 %v14935_v22  ;;  %12337 = vmatprep.subr.bf16.mxu0 %v14940_v62  ;;  %v15016_v22 = vld [vmem:[%s15961_s8 + $0x5e0] ss:$16 sps:$4 sm:$0xff]   ;;  %v15019_v62 = vld [vmem:[%s15961_s8 + $0x5e8] ss:$16 sps:$4 sm:$0xff]  }
 0x7da   : > { %12501 = vmatprep.subr.bf16.mxu1 %v14943_v54  ;;  %v15024_v54 = vld [vmem:[%s15961_s8 + $0x604] ss:$16 sps:$4 sm:$0xff]  }
 0x7dc   : > { %12338 = vmatpush1.bf16.msra.mxu0 %v14938_v0  ;;  %v15027_v0 = vld [vmem:[%s15961_s8 + $0x60c] ss:$16 sps:$4 sm:$0xff]  }
 0x7dd   : > { %12502 = vmatpush1.bf16.msra.mxu1 %v14941_v19  ;;  %12339 = vmatprep.subr.bf16.mxu0 %v14946_v41  ;;  %v7440_v19 = vrot.slane %v17617_v11, %v16640_v47  ;;  %v7444_v41 = vrot.slane %v17617_v11, %v16554_v8 }
 0x7de   : > { %12503 = vmatprep.subr.bf16.mxu1 %v14949_v20  ;;  %v7452_v20 = vrot.slane %v17617_v11, %v16645_v57 }
 0x7e0   : > { %12340 = vmatpush1.bf16.msra.mxu0 %v14944_v59 }
 0x7e1   : > { %12504 = vmatpush1.bf16.msra.mxu1 %v14947_v37  ;;  %12341 = vmatprep.subr.bf16.mxu0 %v14952_v2 }
 0x7e2   : > { %12505 = vmatprep.subr.bf16.mxu1 %v14955_v43 }
 0x7e4   : > { %12342 = vmatpush1.bf16.msra.mxu0 %v14950_v49 }
 0x7e5   : > { %12506 = vmatpush1.bf16.msra.mxu1 %v14953_v23  ;;  %12343 = vmatprep.subr.bf16.mxu0 %v14958_v3 }
 0x7e6   : > { %12507 = vmatprep.subr.bf16.mxu1 %v14961_v34 }
 0x7e8   : > { %12344 = vmatpush1.bf16.msra.mxu0 %v14956_v51 }
 0x7e9   : > { %12508 = vmatpush1.bf16.msra.mxu1 %v14959_v48  ;;  %12345 = vmatprep.subr.bf16.mxu0 %v14964_v25 }
 0x7ea   : > { %12509 = vmatprep.subr.bf16.mxu1 %v14967_v21  ;;  %v15022_v21 = vld [vmem:[%s15961_s8 + $0x600] ss:$16 sps:$4 sm:$0xff]  }
 0x7ec   : > { %12346 = vmatpush1.bf16.msra.mxu0 %v14962_v35  ;;  %v15025_v35 = vld [vmem:[%s15961_s8 + $0x608] ss:$16 sps:$4 sm:$0xff]  }
 0x7ed   : > { %12510 = vmatpush1.bf16.msra.mxu1 %v14965_v31  ;;  %12347 = vmatprep.subr.bf16.mxu0 %v14970_v53  ;;  %v15030_v53 = vld [vmem:[%s15961_s8 + $0x624] ss:$16 sps:$4 sm:$0xff]  }
 0x7ee   : > { %12511 = vmatprep.subr.bf16.mxu1 %v14973_v55  ;;  %v15033_v55 = vld [vmem:[%s15961_s8 + $0x62c] ss:$16 sps:$4 sm:$0xff]  }
 0x7f0   : > { %12348 = vmatpush1.bf16.msra.mxu0 %v14968_v61 }
 0x7f1   : > { %12512 = vmatpush1.bf16.msra.mxu1 %v14971_v28  ;;  %12349 = vmatprep.subr.bf16.mxu0 %v14976_v26  ;;  %v15028_v28 = vld [vmem:[%s15961_s8 + $0x620] ss:$16 sps:$4 sm:$0xff]   ;;  %v15031_v26 = vld [vmem:[%s15961_s8 + $0x628] ss:$16 sps:$4 sm:$0xff]  }
 0x7f2   : > { %12513 = vmatprep.subr.bf16.mxu1 %v14979_v30  ;;  %v15036_v30 = vld [vmem:[%s15961_s8 + $0x644] ss:$16 sps:$4 sm:$0xff]  }
 0x7f4   : > { %12350 = vmatpush1.bf16.msra.mxu0 %v14974_v29  ;;  %v15039_v29 = vld [vmem:[%s15961_s8 + $0x64c] ss:$16 sps:$4 sm:$0xff]  }
 0x7f5   : > { %12514 = vmatpush1.bf16.msra.mxu1 %v14977_v58  ;;  %12351 = vmatprep.subr.bf16.mxu0 %v14982_v7  ;;  %v15034_v58 = vld [vmem:[%s15961_s8 + $0x640] ss:$16 sps:$4 sm:$0xff]   ;;  %v15037_v7 = vld [vmem:[%s15961_s8 + $0x648] ss:$16 sps:$4 sm:$0xff]  }
 0x7f6   : > { %12515 = vmatprep.subr.bf16.mxu1 %v14985_v4  ;;  %v15042_v4 = vld [vmem:[%s15961_s8 + $0x664] ss:$16 sps:$4 sm:$0xff]  }
 0x7f8   : > { %12352 = vmatpush1.bf16.msra.mxu0 %v14980_v42  ;;  %v15045_v42 = vld [vmem:[%s15961_s8 + $0x66c] ss:$16 sps:$4 sm:$0xff]  }
 0x7f9   : > { %12516 = vmatpush1.bf16.msra.mxu1 %v14983_v5  ;;  %12353 = vmatprep.subr.bf16.mxu0 %v14988_v9  ;;  %v15040_v5 = vld [vmem:[%s15961_s8 + $0x660] ss:$16 sps:$4 sm:$0xff]   ;;  %v15043_v9 = vld [vmem:[%s15961_s8 + $0x668] ss:$16 sps:$4 sm:$0xff]  }
 0x7fa   : > { %12517 = vmatprep.subr.bf16.mxu1 %v14991_v40  ;;  %v15048_v40 = vld [vmem:[%s15961_s8 + $0x684] ss:$16 sps:$4 sm:$0xff]  }
 0x7fc   : > { %12354 = vmatpush1.bf16.msra.mxu0 %v14986_v24  ;;  %v15051_v24 = vld [vmem:[%s15961_s8 + $0x68c] ss:$16 sps:$4 sm:$0xff]  }
 0x7fd   : > { %12518 = vmatpush1.bf16.msra.mxu1 %v14989_v52  ;;  %12355 = vmatprep.subr.bf16.mxu0 %v14994_v32  ;;  %v15046_v52 = vld [vmem:[%s15961_s8 + $0x680] ss:$16 sps:$4 sm:$0xff]   ;;  %v15049_v32 = vld [vmem:[%s15961_s8 + $0x688] ss:$16 sps:$4 sm:$0xff]  }
 0x7fe   : > { %12519 = vmatprep.subr.bf16.mxu1 %v14997_v45  ;;  %v15054_v45 = vld [vmem:[%s15961_s8 + $0x6a4] ss:$16 sps:$4 sm:$0xff]  }
 0x800   : > { %12356 = vmatpush1.bf16.msra.mxu0 %v14992_v63  ;;  %v15057_v63 = vld [vmem:[%s15961_s8 + $0x6ac] ss:$16 sps:$4 sm:$0xff]  }
 0x801   : > { %12520 = vmatpush1.bf16.msra.mxu1 %v14995_v39  ;;  %12357 = vmatprep.subr.bf16.mxu0 %v15000_v27  ;;  %v15052_v39 = vld [vmem:[%s15961_s8 + $0x6a0] ss:$16 sps:$4 sm:$0xff]   ;;  %v15055_v27 = vld [vmem:[%s15961_s8 + $0x6a8] ss:$16 sps:$4 sm:$0xff]  }
 0x802   : > { %12521 = vmatprep.subr.bf16.mxu1 %v15003_v33  ;;  %v15060_v33 = vld [vmem:[%s15961_s8 + $0x6c4] ss:$16 sps:$4 sm:$0xff]  }
 0x804   : > { %12358 = vmatpush1.bf16.msra.mxu0 %v14998_v60  ;;  %v15063_v60 = vld [vmem:[%s15961_s8 + $0x6cc] ss:$16 sps:$4 sm:$0xff]  }
 0x805   : > { %12522 = vmatpush1.bf16.msra.mxu1 %v15001_v6  ;;  %12359 = vmatprep.subr.bf16.mxu0 %v15006_v12  ;;  %v15058_v6 = vld [vmem:[%s15961_s8 + $0x6c0] ss:$16 sps:$4 sm:$0xff]   ;;  %v15061_v12 = vld [vmem:[%s15961_s8 + $0x6c8] ss:$16 sps:$4 sm:$0xff]  }
 0x806   : > { %12523 = vmatprep.subr.bf16.mxu1 %v15009_v1  ;;  %v15066_v1 = vld [vmem:[%s15961_s8 + $0x6e4] ss:$16 sps:$4 sm:$0xff]  }
 0x808   : > { %12360 = vmatpush1.bf16.msra.mxu0 %v15004_v10  ;;  %v15069_v10 = vld [vmem:[%s15961_s8 + $0x6ec] ss:$16 sps:$4 sm:$0xff]  }
 0x809   : > { %12524 = vmatpush1.bf16.msra.mxu1 %v15007_v36  ;;  %12361 = vmatprep.subr.bf16.mxu0 %v15012_v46  ;;  %v15064_v36 = vld [vmem:[%s15961_s8 + $0x6e0] ss:$16 sps:$4 sm:$0xff]   ;;  %v15067_v46 = vld [vmem:[%s15961_s8 + $0x6e8] ss:$16 sps:$4 sm:$0xff]  }
 0x80a   : > { %12525 = vmatprep.subr.bf16.mxu1 %v15015_v50  ;;  %v15072_v50 = vld [vmem:[%s15961_s8 + $0x704] ss:$16 sps:$4 sm:$0xff]  }
 0x80c   : > { %12362 = vmatpush1.bf16.msra.mxu0 %v15010_v17  ;;  %v15075_v17 = vld [vmem:[%s15961_s8 + $0x70c] ss:$16 sps:$4 sm:$0xff]  }
 0x80d   : > { %12526 = vmatpush1.bf16.msra.mxu1 %v15013_v18  ;;  %12363 = vmatprep.subr.bf16.mxu0 %v15018_v56  ;;  %v15070_v18 = vld [vmem:[%s15961_s8 + $0x700] ss:$16 sps:$4 sm:$0xff]   ;;  %v15073_v56 = vld [vmem:[%s15961_s8 + $0x708] ss:$16 sps:$4 sm:$0xff]  }
 0x80e   : > { %12527 = vmatprep.subr.bf16.mxu1 %v15021_v38  ;;  %v15078_v38 = vld [vmem:[%s15961_s8 + $0x724] ss:$16 sps:$4 sm:$0xff]  }
 0x810   : > { %12364 = vmatpush1.bf16.msra.mxu0 %v15016_v22  ;;  %v15081_v22 = vld [vmem:[%s15961_s8 + $0x72c] ss:$16 sps:$4 sm:$0xff]  }
 0x811   : > { %12528 = vmatpush1.bf16.msra.mxu1 %v15019_v62  ;;  %12374 = vmatprep.subr.bf16.mxu0 %v15024_v54  ;;  %v15076_v62 = vld [vmem:[%s15961_s8 + $0x720] ss:$16 sps:$4 sm:$0xff]   ;;  %v15079_v54 = vld [vmem:[%s15961_s8 + $0x728] ss:$16 sps:$4 sm:$0xff]  }
 0x812   : > { %12538 = vmatprep.subr.bf16.mxu1 %v15027_v0  ;;  %v15084_v0 = vld [vmem:[%s15961_s8 + $0x744] ss:$16 sps:$4 sm:$0xff]  }
 0x826   : > { %v10506_v59 = vpop.f32.mrb[28].mxu0 }
 0x827   : > { %v14489_v37 = vadd.f32 %v10506_v59, %v7440_v19  ;;  %v17837_v2 = vpop.f32.mrb[28].mxu1  ;;  %v10508_v43 = vpop.f32.mrb[29].mxu0  ;;  %v15087_v19 = vld [vmem:[%s15961_s8 + $0x74c] ss:$16 sps:$4 sm:$0xff]   ;;  %v15090_v59 = vld [vmem:[%s15961_s8 + $0x764] ss:$16 sps:$4 sm:$0xff]  }
 0x828   : > { %v14490_v49 = vadd.f32 %v10508_v43, %v7444_v41  ;;  %v10672_v23 = vpop.f32.mrb[29].mxu1  ;;  %v10510_v3 = vpop.f32.mrb[30].mxu0  ;;  %v15082_v41 = vld [vmem:[%s15961_s8 + $0x740] ss:$16 sps:$4 sm:$0xff]  }
 0x829   : > { %v10681_v34 = vmax.f32 %v14489_v37, 0.0  ;;  %v14492_v47 = vadd.f32 %v10672_v23, %v7452_v20  ;;  %v10674_v51 = vpop.f32.mrb[30].mxu1  ;;  %v10511_v48 = vpop.f32.mrb[31].mxu0  ;;  %v15085_v20 = vld [vmem:[%s15961_s8 + $0x748] ss:$16 sps:$4 sm:$0xff]  }
 0x82a   : > { %v10682_v8 = vmax.f32 %v14490_v49, 0.0  ;;  %v10675_v25 = vpop.f32.mrb[31].mxu1  ;;  %v15093_v37 = vld [vmem:[%s15961_s8 + $0x76c] ss:$16 sps:$4 sm:$0xff]   ;;  %v15088_v43 = vld [vmem:[%s15961_s8 + $0x760] ss:$16 sps:$4 sm:$0xff]  }
 0x82b   : > { %v10684_v57 = vmax.f32 %v14492_v47, 0.0  ;;  %v10689_v31 = vpack.c.bf16 %v10681_v34, %v10681_v34  ;;  %v15091_v49 = vld [vmem:[%s15961_s8 + $0x768] ss:$16 sps:$4 sm:$0xff]   ;;  %v15096_v23 = vld [vmem:[%s15961_s8 + $0x784] ss:$16 sps:$4 sm:$0xff]  }
 0x82c   : > { %v10690_v11 = vpack.c.bf16 %v10682_v8, %v10682_v8  ;;  %v15099_v3 = vld [vmem:[%s15961_s8 + $0x78c] ss:$16 sps:$4 sm:$0xff]   ;;  %v15094_v34 = vld [vmem:[%s15961_s8 + $0x780] ss:$16 sps:$4 sm:$0xff]   ;;  %v15097_v47 = vld [vmem:[%s15961_s8 + $0x788] ss:$16 sps:$4 sm:$0xff]  }
 0x82d   : > { %v10692_v61 = vpack.c.bf16 %v10684_v57, %v10684_v57  ;;  %v15102_v51 = vld [vmem:[%s15961_s8 + $0x7a4] ss:$16 sps:$4 sm:$0xff]   ;;  %v15105_v48 = vld [vmem:[%s15961_s8 + $0x7ac] ss:$16 sps:$4 sm:$0xff]   ;;  %v15100_v8 = vld [vmem:[%s15961_s8 + $0x7a0] ss:$16 sps:$4 sm:$0xff]  }
 0x82e   : > { %12365 = vmatprep.mubr.bf16.mxu0 %v10690_v11  ;;  %12529 = vmatprep.mubr.bf16.mxu1 %v10690_v11  ;;  %v15103_v25 = vld [vmem:[%s15961_s8 + $0x7a8] ss:$16 sps:$4 sm:$0xff]  }
 0x82f   : > { %12366 = vmatmul.mubr.bf16.vlgmr.msra.gmra.mrb[32].mxu0 %v10689_v31  ;;  %12530 = vmatmul.mubr.bf16.vlgmr.msra.gmra.mrb[32].mxu1 %v10689_v31  ;;  %v15128_v57 = vld [vmem:[%s601_s13] sm:$0xff] }
 0x830   : > { %12375 = vmatpush1.bf16.msra.mxu0 %v15022_v21  ;;  %12539 = vmatpush1.bf16.msra.mxu1 %v15025_v35  ;;  %v7448_v11 = vrot.slane %v15128_v57, %v16724_v44  ;;  %v15108_v21 = vld [vmem:[%s15961_s8 + $0x7c4] ss:$16 sps:$4 sm:$0xff]   ;;  %v15111_v35 = vld [vmem:[%s15961_s8 + $0x7cc] ss:$16 sps:$4 sm:$0xff]   ;;  %v15106_v31 = vld [vmem:[%s15961_s8 + $0x7c0] ss:$16 sps:$4 sm:$0xff]  }
 0x831   : > { %12406 = vmatprep.mubr.bf16.mxu0 %v10692_v61  ;;  %12570 = vmatprep.mubr.bf16.mxu1 %v10692_v61  ;;  %v15114_v61 = vld [vmem:[%s15961_s8 + $0x7e4] ss:$16 sps:$4 sm:$0xff]   ;;  %v15112_v44 = vld [vmem:[%s15961_s8 + $0x7e0] ss:$16 sps:$4 sm:$0xff]  }
 0x832   : > { %12376 = vmatprep.subr.bf16.mxu0 %v15030_v53  ;;  %12540 = vmatprep.subr.bf16.mxu1 %v15033_v55  ;;  %v15109_v53 = vld [vmem:[%s15961_s8 + $0x7c8] ss:$16 sps:$4 sm:$0xff]   ;;  %v14491_v55 = vadd.f32 %v17837_v2, %v7448_v11  ;;  %v10949_v2 = vld [vmem:[%s619_s28] sm:$0xf] }
 0x834   : > { %12377 = vmatpush1.bf16.msra.mxu0 %v15028_v28  ;;  %12541 = vmatpush1.bf16.msra.mxu1 %v15031_v26  ;;  %v15117_v28 = vld [vmem:[%s15961_s8 + $0x7ec] ss:$16 sps:$4 sm:$0xff]   ;;  %v15115_v26 = vld [vmem:[%s15961_s8 + $0x7e8] ss:$16 sps:$4 sm:$0xff]  }
 0x835   : > { %12378 = vmatprep.subr.bf16.mxu0 %v15036_v30  ;;  %12542 = vmatprep.subr.bf16.mxu1 %v15039_v29  ;;  %v10683_v30 = vmax.f32 %v14491_v55, 0.0 }
 0x837   : > { %v10691_v29 = vpack.c.bf16 %v10683_v30, %v10683_v30 }
 0x838   : > { %12379 = vmatpush1.bf16.msra.mxu0 %v15034_v58  ;;  %12543 = vmatpush1.bf16.msra.mxu1 %v15037_v7  ;;  %v10954_v58 = vrot.slane %v10949_v2, %v16057_v13  ;;  %v10962_v7 = vrot.slane %v10949_v2, %v16060_v14 }
 0x839   : > { %12380 = vmatprep.subr.bf16.mxu0 %v15042_v4  ;;  %12544 = vmatprep.subr.bf16.mxu1 %v15045_v42  ;;  %v10958_v4 = vrot.slane %v10949_v2, %v16063_v15  ;;  %v10966_v42 = vrot.slane %v10949_v2, %v16066_v16 }
 0x83c   : > { %12381 = vmatpush1.bf16.msra.mxu0 %v15040_v5  ;;  %12545 = vmatpush1.bf16.msra.mxu1 %v15043_v9 }
 0x83d   : > { %12382 = vmatprep.subr.bf16.mxu0 %v15048_v40  ;;  %12546 = vmatprep.subr.bf16.mxu1 %v15051_v24 }
 0x840   : > { %12383 = vmatpush1.bf16.msra.mxu0 %v15046_v52  ;;  %12547 = vmatpush1.bf16.msra.mxu1 %v15049_v32 }
 0x841   : > { %12384 = vmatprep.subr.bf16.mxu0 %v15054_v45  ;;  %12548 = vmatprep.subr.bf16.mxu1 %v15057_v63 }
 0x844   : > { %12385 = vmatpush1.bf16.msra.mxu0 %v15052_v39  ;;  %12549 = vmatpush1.bf16.msra.mxu1 %v15055_v27 }
 0x845   : > { %12386 = vmatprep.subr.bf16.mxu0 %v15060_v33  ;;  %12550 = vmatprep.subr.bf16.mxu1 %v15063_v60 }
 0x848   : > { %12387 = vmatpush1.bf16.msra.mxu0 %v15058_v6  ;;  %12551 = vmatpush1.bf16.msra.mxu1 %v15061_v12 }
 0x849   : > { %12388 = vmatprep.subr.bf16.mxu0 %v15066_v1  ;;  %12552 = vmatprep.subr.bf16.mxu1 %v15069_v10 }
 0x84c   : > { %12389 = vmatpush1.bf16.msra.mxu0 %v15064_v36  ;;  %12553 = vmatpush1.bf16.msra.mxu1 %v15067_v46 }
 0x84d   : > { %12390 = vmatprep.subr.bf16.mxu0 %v15072_v50  ;;  %12554 = vmatprep.subr.bf16.mxu1 %v15075_v17 }
 0x850   : > { %12391 = vmatpush1.bf16.msra.mxu0 %v15070_v18  ;;  %12555 = vmatpush1.bf16.msra.mxu1 %v15073_v56 }
 0x851   : > { %12392 = vmatprep.subr.bf16.mxu0 %v15078_v38  ;;  %12556 = vmatprep.subr.bf16.mxu1 %v15081_v22 }
 0x854   : > { %12393 = vmatpush1.bf16.msra.mxu0 %v15076_v62  ;;  %12557 = vmatpush1.bf16.msra.mxu1 %v15079_v54 }
 0x855   : > { %12394 = vmatprep.subr.bf16.mxu0 %v15084_v0  ;;  %12558 = vmatprep.subr.bf16.mxu1 %v15087_v19 }
 0x858   : > { %12395 = vmatpush1.bf16.msra.mxu0 %v15082_v41  ;;  %12559 = vmatpush1.bf16.msra.mxu1 %v15085_v20 }
 0x859   : > { %12396 = vmatprep.subr.bf16.mxu0 %v15090_v59  ;;  %12560 = vmatprep.subr.bf16.mxu1 %v15093_v37 }
 0x85c   : > { %12397 = vmatpush1.bf16.msra.mxu0 %v15088_v43  ;;  %12561 = vmatpush1.bf16.msra.mxu1 %v15091_v49 }
 0x85d   : > { %12398 = vmatprep.subr.bf16.mxu0 %v15096_v23  ;;  %12562 = vmatprep.subr.bf16.mxu1 %v15099_v3 }
 0x860   : > { %12399 = vmatpush1.bf16.msra.mxu0 %v15094_v34  ;;  %12563 = vmatpush1.bf16.msra.mxu1 %v15097_v47 }
 0x861   : > { %12400 = vmatprep.subr.bf16.mxu0 %v15102_v51  ;;  %12564 = vmatprep.subr.bf16.mxu1 %v15105_v48 }
 0x864   : > { %12401 = vmatpush1.bf16.msra.mxu0 %v15100_v8  ;;  %12565 = vmatpush1.bf16.msra.mxu1 %v15103_v25 }
 0x865   : > { %12402 = vmatprep.subr.bf16.mxu0 %v15108_v21  ;;  %12566 = vmatprep.subr.bf16.mxu1 %v15111_v35 }
 0x868   : > { %12403 = vmatpush1.bf16.msra.mxu0 %v15106_v31  ;;  %12567 = vmatpush1.bf16.msra.mxu1 %v15109_v53 }
 0x869   : > { %12404 = vmatprep.subr.bf16.mxu0 %v15114_v61  ;;  %12568 = vmatprep.subr.bf16.mxu1 %v15117_v28 }
 0x86c   : > { %12405 = vmatpush1.bf16.msra.mxu0 %v15112_v44  ;;  %12569 = vmatpush1.bf16.msra.mxu1 %v15115_v26 }
 0x86f   : > { %12407 = vmatmul.mubr.bf16.vlgmr.msra.gmra.mrb[32].mxu0 %v10691_v29  ;;  %12571 = vmatmul.mubr.bf16.vlgmr.msra.gmra.mrb[32].mxu1 %v10691_v29 }
 0x942   : > { %v12408_v5 = vpop.f32.mrb[32].mxu0  ;;  %v12572_v9 = vpop.f32.mrb[32].mxu1 }
 0x943   : > { %v14493_v40 = vadd.f32 %v12408_v5, %v10954_v58  ;;  %v14495_v24 = vadd.f32 %v12572_v9, %v10962_v7  ;;  %v12410_v52 = vpop.f32.mrb[33].mxu0  ;;  %v12574_v32 = vpop.f32.mrb[33].mxu1 }
 0x944   : > { %v14494_v45 = vadd.f32 %v12410_v52, %v10958_v4  ;;  %v14496_v63 = vadd.f32 %v12574_v32, %v10966_v42  ;;  %v12412_v13 = vpop.f32.mrb[34].mxu0  ;;  %v12576_v39 = vpop.f32.mrb[34].mxu1 }
 0x945   : > { %v12579_v14 = vmax.f32 %v14493_v40, 0.0  ;;  %v12581_v27 = vmax.f32 %v14495_v24, 0.0  ;;  %v12413_v15 = vpop.f32.mrb[35].mxu0  ;;  %v12577_v33 = vpop.f32.mrb[35].mxu1 }
 0x946   : > { %v12580_v16 = vmax.f32 %v14494_v45, 0.0  ;;  %v12582_v60 = vmax.f32 %v14496_v63, 0.0 }
 0x947   : > { %12583 = vst [vmem:[%s716_s26] sm:$0xff] %v12579_v14  ;;  %12585 = vst [vmem:[%s716_s26 + $0x10] sm:$0xff] %v12581_v27 }
 0x948   : > { %12584 = vst [vmem:[%s716_s26 + $0x8] sm:$0xff] %v12580_v16  ;;  %12586 = vst [vmem:[%s716_s26 + $0x18] sm:$0xff] %v12582_v60 }
 0x949 PF: > { %s35_s18 = sadd.s32 1, %s15465_s18   ;;  %s18004_s27 = sld [smem:[#allocation21_spill]] }
 0x94a   : > { %p32_p1 = scmp.ge.s32.totalorder %s35_s18, 5   ;;  %s18005_s15 = sld [smem:[#allocation24_spill]] }
 0x94b   : > { %s18006_s11 = sld [smem:[#allocation23_spill]]  ;;  %s18007_s13 = smov %s15449_s14 }
 0x94c   : > { %s18009_s16 = smov %s15461_s17  ;;  %34 = sbr.rel (!%p32_p1) target bundleno = 20 (0x14), region = 199 }
 0x94f   : > { %s18008_s14 = smov %s18004_s27 }
 0x951   : > { %s18010_s17 = smov %s18006_s11 }
 0x953   :  { %12616 = vsyncpa [#allocation3], 1 }
 0x954   :  { %12618 = vsyncpa [#allocation3 + $0x1], 1 }
 0x955   :  { %12619 = vsyncpa [#allocation5], 1 }
 0x956   :  { %12621 = vsyncpa [#allocation5 + $0x1], 1 }
 0x957   :  { %12622 = vsyncpa [#allocation8], 1 }
 0x958   :  { %12624 = vsyncpa [#allocation8 + $0x1], 1 }
 0x959   :  { %12625 = vsyncpa [#allocation11], 1 }
 0x95a   :  { %12627 = vsyncpa [#allocation11 + $0x1], 1 }
 0x95b   :  { %12628 = vsyncpa [#allocation14], 1 }
 0x95c   :  { %12630 = vsyncpa [#allocation14 + $0x1], 1 }

</bundles_post_ra>
